<compile_context>
chip_gen: v7x
topology: tpu7x:2x2x1
jax: 0.10.0
libtpu: 0.0.40
codegen_flags: <defaults>
</compile_context>

<pallas_src>
import math
import functools

import jax
import jax.numpy as jnp
from jax.experimental import pallas as pl
from jax.experimental.pallas import tpu as pltpu


# ----------------------------- config -----------------------------
HIDDEN = 32          # hidden_channels
NUM_FILTERS = 32     # num_filters
NUM_INTERACTIONS = 2
NUM_GAUSSIANS = 16
CUTOFF = 4.0
NUM_CLASSES = 4
READOUT = "add"

B = 2                # graphs in batch
ATOMS_PER_GRAPH = 8
N = B * ATOMS_PER_GRAPH  # total atoms

# GaussianSmearing constants, computed in pure Python (no device->host sync).
_GAUSS_DELTA = CUTOFF / (NUM_GAUSSIANS - 1)
_GAUSS_COEFF = -0.5 / (_GAUSS_DELTA ** 2)


def _ssp(x):
    # ShiftedSoftplus: softplus(x) - log(2) (numerically stable form)
    return jnp.maximum(x, 0.0) + jnp.log1p(jnp.exp(-jnp.abs(x))) - math.log(2.0)


# ----------------------------- parameter slab layout -----------------------------
def _make_layout():
    """Static row layout of the single packed parameter slab (offsets 8-aligned)."""
    T, G, F, H, C = NUM_INTERACTIONS, NUM_GAUSSIANS, NUM_FILTERS, HIDDEN, NUM_CLASSES
    entries = [
        ("Wf1_cat", G, T * F), ("bf1_cat", 1, T * F),
        ("Wf2_blk", T * F, T * F), ("bf2_cat", 1, T * F),
    ]
    for t in range(T):
        entries += [
            (f"Wc1_{t}", H, F), (f"Wc2_{t}", F, H), (f"bc2_{t}", 1, H),
            (f"Wib_{t}", H, H), (f"bib_{t}", 1, H),
        ]
    entries += [
        ("Wl1", H, H // 2), ("bl1", 1, H // 2),
        ("Wl2", H // 2, 1), ("bl2", 1, 1),
        ("We1", 1, H), ("be1", 1, H),
        ("We2", H, C), ("be2", 1, C),
    ]
    layout = {}
    off = 0
    lanes = 0
    for name, r, c in entries:
        layout[name] = (off, r, c)
        off += ((r + 7) // 8) * 8   # keep every tensor's row offset 8-aligned
        lanes = max(lanes, c)
    return layout, off, lanes


_LAYOUT, _SLAB_ROWS, _SLAB_LANES = _make_layout()


def pack_params(params):
    """Pack all small weights/biases into one [rows, 64] f32 slab (done once)."""
    T = NUM_INTERACTIONS
    tensors = {
        "Wf1_cat": jnp.concatenate([params["Wf1"][t] for t in range(T)], axis=1),
        "bf1_cat": jnp.concatenate([params["bf1"][t] for t in range(T)], axis=1),
        "Wf2_blk": jax.scipy.linalg.block_diag(*[params["Wf2"][t] for t in range(T)]),
        "bf2_cat": jnp.concatenate([params["bf2"][t] for t in range(T)], axis=1),
    }
    for t in range(T):
        tensors[f"Wc1_{t}"] = params["Wc1"][t]
        tensors[f"Wc2_{t}"] = params["Wc2"][t]
        tensors[f"bc2_{t}"] = params["bc2"][t]
        tensors[f"Wib_{t}"] = params["Wib"][t]
        tensors[f"bib_{t}"] = params["bib"][t]
    for name in ("Wl1", "bl1", "Wl2", "bl2", "We1", "be1", "We2", "be2"):
        tensors[name] = params[name]

    slab = jnp.zeros((_SLAB_ROWS, _SLAB_LANES), jnp.float32)
    for name, (off, r, c) in _LAYOUT.items():
        t = jnp.asarray(tensors[name], jnp.float32)
        assert t.shape == (r, c), (name, t.shape, (r, c))
        slab = slab.at[off:off + r, 0:c].set(t)
    return slab


# ----------------------------- the kernel -----------------------------
def schnet_kernel(pos_ref, h0_ref, slab_ref, logits_ref, *, layout,
                  num_interactions, num_filters, num_gaussians,
                  atoms_per_graph, num_graphs, cutoff, gauss_coeff):
    f32 = jnp.float32
    n = pos_ref.shape[0]
    npairs = n * n
    inv_n = 1.0 / n
    inv_a = 1.0 / atoms_per_graph

    def param(name):
        off, r, c = layout[name]
        return slab_ref[pl.ds(off, r), pl.ds(0, c)]

    pos = pos_ref[...]                                   # [N, 3]
    h = h0_ref[...]                                      # [N, H]  (embedded atomic numbers)

    # ---- pair geometry in the flat pair layout (row index e = i*N + j) ----
    pos_j = jnp.concatenate([pos] * n, axis=0)           # [N*N, 3]  = pos[j]
    pos_i = jnp.concatenate(
        [jnp.broadcast_to(pos[i:i + 1, :], (n, 3)) for i in range(n)], axis=0)  # = pos[i]
    diff = pos_i - pos_j
    d2 = jnp.sum(diff * diff, axis=-1, keepdims=True)    # [N*N, 1]
    dist = jnp.sqrt(d2)

    # ---- edge mask from iota compares (pure VPU; no selection matrices) ----
    e_f = jax.lax.broadcasted_iota(jnp.int32, (npairs, 1), 0).astype(f32)
    i_f = jnp.floor(e_f * inv_n)                         # center atom i  (exact)
    j_f = e_f - i_f * n                                  # neighbor atom j (exact)
    same_graph = jnp.floor(i_f * inv_a) == jnp.floor(j_f * inv_a)
    # TODO(synk): assumes contiguous equal-size graphs (batch == repeat(arange(B), A));
    # an arbitrary PyG batch vector would need per-pair graph ids passed in.
    not_self = i_f != j_f
    within = dist <= cutoff
    # TODO(synk): radius_graph's max_num_neighbors cap is not applied (never hit here).
    mask = (same_graph & not_self & within).astype(f32)  # [N*N, 1]

    # ---- Gaussian smearing + cosine-cutoff envelope (loop invariant, hoisted) ----
    offs = jax.lax.broadcasted_iota(jnp.int32, (1, num_gaussians), 1).astype(f32) * (
        cutoff / (num_gaussians - 1))                    # [1, G]
    rbf = jnp.exp(gauss_coeff * (dist - offs) ** 2)      # [N*N, G]
    env = 0.5 * (jnp.cos(dist * (math.pi / cutoff)) + 1.0) * mask   # [N*N, 1]

    # ---- edge filters for ALL interactions at once ----
    # first layer concatenated along output lanes, second layer block-diagonal.
    w_all = _ssp(jnp.dot(rbf, param("Wf1_cat"), preferred_element_type=f32)
                 + param("bf1_cat"))
    w_all = (jnp.dot(w_all, param("Wf2_blk"), preferred_element_type=f32)
             + param("bf2_cat")) * env                   # [N*N, T*F]

    # ---- scatter-add over neighbors j as one MXU contraction (summat built in-kernel) ----
    row_i = jax.lax.broadcasted_iota(jnp.int32, (n, npairs), 0).astype(f32)
    col_e = jax.lax.broadcasted_iota(jnp.int32, (n, npairs), 1).astype(f32)
    summat = (jnp.floor(col_e * inv_n) == row_i).astype(f32)        # [N, N*N]

    for t in range(num_interactions):
        w_t = w_all[:, t * num_filters:(t + 1) * num_filters]       # [N*N, F]
        x1 = jnp.dot(h, param(f"Wc1_{t}"), preferred_element_type=f32)   # [N, F]
        xj = jnp.concatenate([x1] * n, axis=0)                      # [N*N, F] = x1[j]
        msg = jnp.dot(summat, w_t * xj, preferred_element_type=f32)      # [N, F]
        x2 = _ssp(jnp.dot(msg, param(f"Wc2_{t}"), preferred_element_type=f32)
                  + param(f"bc2_{t}"))
        h = h + jnp.dot(x2, param(f"Wib_{t}"), preferred_element_type=f32) + param(f"bib_{t}")

    # ---- SchNet per-atom output head ----
    h1 = _ssp(jnp.dot(h, param("Wl1"), preferred_element_type=f32) + param("bl1"))  # [N, H/2]
    h2 = jnp.dot(h1, param("Wl2"), preferred_element_type=f32) + param("bl2")       # [N, 1]

    # readout='add': graph one-hot from iota (same contiguity assumption as above)
    g_row = jax.lax.broadcasted_iota(jnp.int32, (num_graphs, n), 0).astype(f32)
    a_col = jax.lax.broadcasted_iota(jnp.int32, (num_graphs, n), 1).astype(f32)
    batch_oh = (jnp.floor(a_col * inv_a) == g_row).astype(f32)                      # [B, N]
    per_graph = jnp.dot(batch_oh, h2, preferred_element_type=f32)                   # [B, 1]

    # ---- classifier extender: Linear(1,H) -> ReLU -> Linear(H,C) ----
    e1 = jnp.maximum(per_graph * param("We1") + param("be1"), 0.0)                  # [B, H]
    logits_ref[...] = (jnp.dot(e1, param("We2"), preferred_element_type=f32)
                       + param("be2"))


# ----------------------------- jitted wrapper -----------------------------
@jax.jit
def schnet_classifier_forward(emb, slab, x, pos, batch):
    """emb: [V,H] embedding table; slab: packed params; x: [N,1] int atomic numbers;
    pos: [N,3] float; batch: [N] graph ids (assumed repeat(arange(B), ATOMS_PER_GRAPH))."""
    del batch  # graph membership is rebuilt in-kernel from the contiguity assumption
    z = x[:, 0].astype(jnp.int32)
    h0 = emb[z].astype(jnp.float32)        # embedding gather: fused XLA glue under jit

    kern = functools.partial(
        schnet_kernel, layout=_LAYOUT,
        num_interactions=NUM_INTERACTIONS, num_filters=NUM_FILTERS,
        num_gaussians=NUM_GAUSSIANS, atoms_per_graph=ATOMS_PER_GRAPH,
        num_graphs=B, cutoff=CUTOFF, gauss_coeff=_GAUSS_COEFF)

    vmem = pl.BlockSpec(memory_space=pltpu.MemorySpace.VMEM)
    return pl.pallas_call(
        kern,
        out_shape=jax.ShapeDtypeStruct((B, NUM_CLASSES), jnp.float32),
        in_specs=[vmem, vmem, vmem],
        out_specs=vmem,
    )(pos, h0, slab)


# ----------------------------- pure-JAX reference (for validation) -----------------------------
def schnet_reference(params, x, pos, batch):
    z = x[:, 0].astype(jnp.int32)
    h = params["emb"][z]
    nn = pos.shape[0]
    d = jnp.sqrt(jnp.sum((pos[:, None, :] - pos[None, :, :]) ** 2, axis=-1))     # [N,N]
    adj = (batch[:, None] == batch[None, :]) & (~jnp.eye(nn, dtype=bool)) & (d <= CUTOFF)
    offs = jnp.arange(NUM_GAUSSIANS, dtype=jnp.float32) * _GAUSS_DELTA
    rbf = jnp.exp(_GAUSS_COEFF * (d[..., None] - offs) ** 2)                     # [N,N,G]
    env = 0.5 * (jnp.cos(d * math.pi / CUTOFF) + 1.0) * adj.astype(jnp.float32)  # [N,N]
    for t in range(NUM_INTERACTIONS):
        w = _ssp(rbf @ params["Wf1"][t] + params["bf1"][t])
        w = (w @ params["Wf2"][t] + params["bf2"][t]) * env[..., None]
        x1 = h @ params["Wc1"][t]
        msg = jnp.einsum("ijf,jf->if", w, x1)
        x2 = _ssp(msg @ params["Wc2"][t] + params["bc2"][t])
        h = h + x2 @ params["Wib"][t] + params["bib"][t]
    h1 = _ssp(h @ params["Wl1"] + params["bl1"])
    h2 = h1 @ params["Wl2"] + params["bl2"]                                      # [N,1]
    batch_oh = (batch[None, :] == jnp.arange(B)[:, None]).astype(jnp.float32)    # [B,N]
    per_graph = batch_oh @ h2                                                    # [B,1]
    e1 = jnp.maximum(per_graph @ params["We1"] + params["be1"], 0.0)
    return e1 @ params["We2"] + params["be2"]


# ----------------------------- deterministic parameter init -----------------------------
def _linear(key, fan_in, fan_out, bias=True):
    k1, k2 = jax.random.split(key)
    bound = 1.0 / math.sqrt(fan_in)
    W = jax.random.uniform(k1, (fan_in, fan_out), jnp.float32, -bound, bound)
    if not bias:
        return W
    b = jax.random.uniform(k2, (1, fan_out), jnp.float32, -bound, bound)
    return W, b


def init_params(key):
    keys = jax.random.split(key, 8 + 6 * NUM_INTERACTIONS)
    p = {}
    p["emb"] = jax.random.normal(keys[0], (100, HIDDEN), jnp.float32) * 0.1

    Wf1, bf1, Wf2, bf2, Wc1, Wc2, bc2, Wib, bib = [], [], [], [], [], [], [], [], []
    for t in range(NUM_INTERACTIONS):
        k = jax.random.split(keys[1 + t], 5)
        w, b = _linear(k[0], NUM_GAUSSIANS, NUM_FILTERS); Wf1.append(w); bf1.append(b)
        w, b = _linear(k[1], NUM_FILTERS, NUM_FILTERS);   Wf2.append(w); bf2.append(b)
        Wc1.append(_linear(k[2], HIDDEN, NUM_FILTERS, bias=False))
        w, b = _linear(k[3], NUM_FILTERS, HIDDEN);        Wc2.append(w); bc2.append(b)
        w, b = _linear(k[4], HIDDEN, HIDDEN);             Wib.append(w); bib.append(b)
    p["Wf1"], p["bf1"] = jnp.stack(Wf1), jnp.stack(bf1)
    p["Wf2"], p["bf2"] = jnp.stack(Wf2), jnp.stack(bf2)
    p["Wc1"] = jnp.stack(Wc1)
    p["Wc2"], p["bc2"] = jnp.stack(Wc2), jnp.stack(bc2)
    p["Wib"], p["bib"] = jnp.stack(Wib), jnp.stack(bib)

    p["Wl1"], p["bl1"] = _linear(keys[-6], HIDDEN, HIDDEN // 2)
    p["Wl2"], p["bl2"] = _linear(keys[-5], HIDDEN // 2, 1)
    p["We1"], p["be1"] = _linear(keys[-4], 1, HIDDEN)
    p["We2"], p["be2"] = _linear(keys[-3], HIDDEN, NUM_CLASSES)
    return p


if __name__ == "__main__":
    key = jax.random.PRNGKey(0)
    k_p, k_z, k_pos = jax.random.split(key, 3)

    params = init_params(k_p)
    slab = pack_params(params)   # pack once; per-call path only sees 3 inputs

    # synthetic Data: x = atomic numbers [N, 1], pos [N, 3], batch [N]
    x = jax.random.randint(k_z, (N, 1), 1, 10).astype(jnp.int32)
    pos = jax.random.uniform(k_pos, (N, 3), jnp.float32, 0.0, 3.0)
    batch = jnp.repeat(jnp.arange(B, dtype=jnp.int32), ATOMS_PER_GRAPH)

    logits = schnet_classifier_forward(params["emb"], slab, x, pos, batch)
    jax.block_until_ready(logits)
    assert logits.shape == (B, NUM_CLASSES) and logits.dtype == jnp.float32

    # validate against a pure-JAX reference of the same forward pass
    ref = schnet_reference(params, x, pos, batch)
    max_err = float(jnp.max(jnp.abs(logits - ref)))
    assert max_err < 1e-1, f"kernel/reference mismatch: max abs err {max_err}"

    print("KERNEL_OK")
</pallas_src>

<mosaic_0001>
module attributes {stable_mosaic.version = 11 : i64} {
  func.func @schnet_kernel(%arg0: memref<16x3xf32, #tpu.memory_space<vmem>>, %arg1: memref<16x32xf32, #tpu.memory_space<vmem>>, %arg2: memref<440x64xf32, #tpu.memory_space<vmem>>, %arg3: memref<2x4xf32, #tpu.memory_space<vmem>>) attributes {dimension_semantics = [], scalar_prefetch = 0 : i64, scratch_operands = 0 : i64, tpu.core_type = #tpu.core_type<tc>} {
    %c0 = arith.constant 0 : index
    %c0_0 = arith.constant 0 : index
    %0 = vector.load %arg0[%c0, %c0_0] : memref<16x3xf32, #tpu.memory_space<vmem>>, vector<16x3xf32>
    %c0_1 = arith.constant 0 : index
    %c0_2 = arith.constant 0 : index
    %1 = vector.load %arg1[%c0_1, %c0_2] : memref<16x32xf32, #tpu.memory_space<vmem>>, vector<16x32xf32>
    %2 = tpu.concatenate %0, %0, %0, %0, %0, %0, %0, %0, %0, %0, %0, %0, %0, %0, %0, %0 in 0 : vector<16x3xf32>, vector<16x3xf32>, vector<16x3xf32>, vector<16x3xf32>, vector<16x3xf32>, vector<16x3xf32>, vector<16x3xf32>, vector<16x3xf32>, vector<16x3xf32>, vector<16x3xf32>, vector<16x3xf32>, vector<16x3xf32>, vector<16x3xf32>, vector<16x3xf32>, vector<16x3xf32>, vector<16x3xf32> -> vector<256x3xf32>
    %3 = vector.extract_strided_slice %0 {offsets = [0, 0], sizes = [1, 3], strides = [1, 1]} : vector<16x3xf32> to vector<1x3xf32>
    %4 = vector.shape_cast %3 : vector<1x3xf32> to vector<1x3xf32>
    %5 = vector.broadcast %4 : vector<1x3xf32> to vector<16x3xf32>
    %6 = vector.extract_strided_slice %0 {offsets = [1, 0], sizes = [1, 3], strides = [1, 1]} : vector<16x3xf32> to vector<1x3xf32>
    %7 = vector.shape_cast %6 : vector<1x3xf32> to vector<1x3xf32>
    %8 = vector.broadcast %7 : vector<1x3xf32> to vector<16x3xf32>
    %9 = vector.extract_strided_slice %0 {offsets = [2, 0], sizes = [1, 3], strides = [1, 1]} : vector<16x3xf32> to vector<1x3xf32>
    %10 = vector.shape_cast %9 : vector<1x3xf32> to vector<1x3xf32>
    %11 = vector.broadcast %10 : vector<1x3xf32> to vector<16x3xf32>
    %12 = vector.extract_strided_slice %0 {offsets = [3, 0], sizes = [1, 3], strides = [1, 1]} : vector<16x3xf32> to vector<1x3xf32>
    %13 = vector.shape_cast %12 : vector<1x3xf32> to vector<1x3xf32>
    %14 = vector.broadcast %13 : vector<1x3xf32> to vector<16x3xf32>
    %15 = vector.extract_strided_slice %0 {offsets = [4, 0], sizes = [1, 3], strides = [1, 1]} : vector<16x3xf32> to vector<1x3xf32>
    %16 = vector.shape_cast %15 : vector<1x3xf32> to vector<1x3xf32>
    %17 = vector.broadcast %16 : vector<1x3xf32> to vector<16x3xf32>
    %18 = vector.extract_strided_slice %0 {offsets = [5, 0], sizes = [1, 3], strides = [1, 1]} : vector<16x3xf32> to vector<1x3xf32>
    %19 = vector.shape_cast %18 : vector<1x3xf32> to vector<1x3xf32>
    %20 = vector.broadcast %19 : vector<1x3xf32> to vector<16x3xf32>
    %21 = vector.extract_strided_slice %0 {offsets = [6, 0], sizes = [1, 3], strides = [1, 1]} : vector<16x3xf32> to vector<1x3xf32>
    %22 = vector.shape_cast %21 : vector<1x3xf32> to vector<1x3xf32>
    %23 = vector.broadcast %22 : vector<1x3xf32> to vector<16x3xf32>
    %24 = vector.extract_strided_slice %0 {offsets = [7, 0], sizes = [1, 3], strides = [1, 1]} : vector<16x3xf32> to vector<1x3xf32>
    %25 = vector.shape_cast %24 : vector<1x3xf32> to vector<1x3xf32>
    %26 = vector.broadcast %25 : vector<1x3xf32> to vector<16x3xf32>
    %27 = vector.extract_strided_slice %0 {offsets = [8, 0], sizes = [1, 3], strides = [1, 1]} : vector<16x3xf32> to vector<1x3xf32>
    %28 = vector.shape_cast %27 : vector<1x3xf32> to vector<1x3xf32>
    %29 = vector.broadcast %28 : vector<1x3xf32> to vector<16x3xf32>
    %30 = vector.extract_strided_slice %0 {offsets = [9, 0], sizes = [1, 3], strides = [1, 1]} : vector<16x3xf32> to vector<1x3xf32>
    %31 = vector.shape_cast %30 : vector<1x3xf32> to vector<1x3xf32>
    %32 = vector.broadcast %31 : vector<1x3xf32> to vector<16x3xf32>
    %33 = vector.extract_strided_slice %0 {offsets = [10, 0], sizes = [1, 3], strides = [1, 1]} : vector<16x3xf32> to vector<1x3xf32>
    %34 = vector.shape_cast %33 : vector<1x3xf32> to vector<1x3xf32>
    %35 = vector.broadcast %34 : vector<1x3xf32> to vector<16x3xf32>
    %36 = vector.extract_strided_slice %0 {offsets = [11, 0], sizes = [1, 3], strides = [1, 1]} : vector<16x3xf32> to vector<1x3xf32>
    %37 = vector.shape_cast %36 : vector<1x3xf32> to vector<1x3xf32>
    %38 = vector.broadcast %37 : vector<1x3xf32> to vector<16x3xf32>
    %39 = vector.extract_strided_slice %0 {offsets = [12, 0], sizes = [1, 3], strides = [1, 1]} : vector<16x3xf32> to vector<1x3xf32>
    %40 = vector.shape_cast %39 : vector<1x3xf32> to vector<1x3xf32>
    %41 = vector.broadcast %40 : vector<1x3xf32> to vector<16x3xf32>
    %42 = vector.extract_strided_slice %0 {offsets = [13, 0], sizes = [1, 3], strides = [1, 1]} : vector<16x3xf32> to vector<1x3xf32>
    %43 = vector.shape_cast %42 : vector<1x3xf32> to vector<1x3xf32>
    %44 = vector.broadcast %43 : vector<1x3xf32> to vector<16x3xf32>
    %45 = vector.extract_strided_slice %0 {offsets = [14, 0], sizes = [1, 3], strides = [1, 1]} : vector<16x3xf32> to vector<1x3xf32>
    %46 = vector.shape_cast %45 : vector<1x3xf32> to vector<1x3xf32>
    %47 = vector.broadcast %46 : vector<1x3xf32> to vector<16x3xf32>
    %48 = vector.extract_strided_slice %0 {offsets = [15, 0], sizes = [1, 3], strides = [1, 1]} : vector<16x3xf32> to vector<1x3xf32>
    %49 = vector.shape_cast %48 : vector<1x3xf32> to vector<1x3xf32>
    %50 = vector.broadcast %49 : vector<1x3xf32> to vector<16x3xf32>
    %51 = tpu.concatenate %5, %8, %11, %14, %17, %20, %23, %26, %29, %32, %35, %38, %41, %44, %47, %50 in 0 : vector<16x3xf32>, vector<16x3xf32>, vector<16x3xf32>, vector<16x3xf32>, vector<16x3xf32>, vector<16x3xf32>, vector<16x3xf32>, vector<16x3xf32>, vector<16x3xf32>, vector<16x3xf32>, vector<16x3xf32>, vector<16x3xf32>, vector<16x3xf32>, vector<16x3xf32>, vector<16x3xf32>, vector<16x3xf32> -> vector<256x3xf32>
    %52 = arith.subf %51, %2 : vector<256x3xf32>
    %53 = arith.mulf %52, %52 : vector<256x3xf32>
    %cst = arith.constant dense<0.000000e+00> : vector<256xf32>
    %54 = vector.multi_reduction <add>, %53, %cst [1] : vector<256x3xf32> to vector<256xf32>
    %55 = vector.shape_cast %54 : vector<256xf32> to vector<256x1xf32>
    %56 = math.sqrt %55 : vector<256x1xf32>
    %57 = tpu.iota {dimensions = array<i32: 0>} : vector<256x1xi32>
    %58 = arith.sitofp %57 : vector<256x1xi32> to vector<256x1xf32>
    %cst_3 = arith.constant 6.250000e-02 : f32
    %59 = vector.broadcast %cst_3 : f32 to vector<256x1xf32>
    %60 = arith.mulf %58, %59 : vector<256x1xf32>
    %61 = math.floor %60 : vector<256x1xf32>
    %cst_4 = arith.constant 1.600000e+01 : f32
    %62 = vector.broadcast %cst_4 : f32 to vector<256x1xf32>
    %63 = arith.mulf %61, %62 : vector<256x1xf32>
    %64 = arith.subf %58, %63 : vector<256x1xf32>
    %cst_5 = arith.constant 1.250000e-01 : f32
    %65 = vector.broadcast %cst_5 : f32 to vector<256x1xf32>
    %66 = arith.mulf %61, %65 : vector<256x1xf32>
    %67 = math.floor %66 : vector<256x1xf32>
    %cst_6 = arith.constant 1.250000e-01 : f32
    %68 = vector.broadcast %cst_6 : f32 to vector<256x1xf32>
    %69 = arith.mulf %64, %68 : vector<256x1xf32>
    %70 = math.floor %69 : vector<256x1xf32>
    %71 = arith.cmpf oeq, %67, %70 : vector<256x1xf32>
    %72 = arith.cmpf one, %61, %64 : vector<256x1xf32>
    %cst_7 = arith.constant 4.000000e+00 : f32
    %73 = vector.broadcast %cst_7 : f32 to vector<256x1xf32>
    %74 = arith.cmpf ole, %56, %73 : vector<256x1xf32>
    %75 = arith.andi %71, %72 : vector<256x1xi1>
    %76 = arith.andi %75, %74 : vector<256x1xi1>
    %77 = arith.extui %76 : vector<256x1xi1> to vector<256x1xi32>
    %78 = arith.sitofp %77 : vector<256x1xi32> to vector<256x1xf32>
    %79 = tpu.iota {dimensions = array<i32: 1>} : vector<1x16xi32>
    %80 = arith.sitofp %79 : vector<1x16xi32> to vector<1x16xf32>
    %cst_8 = arith.constant 0.266666681 : f32
    %81 = vector.broadcast %cst_8 : f32 to vector<1x16xf32>
    %82 = arith.mulf %80, %81 : vector<1x16xf32>
    %83 = vector.broadcast %56 : vector<256x1xf32> to vector<256x16xf32>
    %84 = vector.broadcast %82 : vector<1x16xf32> to vector<256x16xf32>
    %85 = arith.subf %83, %84 : vector<256x16xf32>
    %86 = arith.mulf %85, %85 : vector<256x16xf32>
    %cst_9 = arith.constant -7.031250e+00 : f32
    %87 = vector.broadcast %cst_9 : f32 to vector<256x16xf32>
    %88 = arith.mulf %87, %86 : vector<256x16xf32>
    %89 = math.exp %88 : vector<256x16xf32>
    %cst_10 = arith.constant 0.785398185 : f32
    %90 = vector.broadcast %cst_10 : f32 to vector<256x1xf32>
    %91 = arith.mulf %56, %90 : vector<256x1xf32>
    %92 = math.cos %91 : vector<256x1xf32>
    %cst_11 = arith.constant 1.000000e+00 : f32
    %93 = vector.broadcast %cst_11 : f32 to vector<256x1xf32>
    %94 = arith.addf %92, %93 : vector<256x1xf32>
    %cst_12 = arith.constant 5.000000e-01 : f32
    %95 = vector.broadcast %cst_12 : f32 to vector<256x1xf32>
    %96 = arith.mulf %95, %94 : vector<256x1xf32>
    %97 = arith.mulf %96, %78 : vector<256x1xf32>
    %c0_13 = arith.constant 0 : index
    %c0_14 = arith.constant 0 : index
    %98 = vector.load %arg2[%c0_13, %c0_14] : memref<440x64xf32, #tpu.memory_space<vmem>>, vector<16x64xf32>
    %cst_15 = arith.constant dense<0.000000e+00> : vector<256x64xf32>
    %99 = tpu.matmul %89, %98, %cst_15 {dimension_numbers = #tpu.dot_dimension_numbers<[1], [0], [0], [1], [0, 0, 1, 1], [], []>} : vector<256x16xf32>, vector<16x64xf32>, vector<256x64xf32> -> vector<256x64xf32>
    %c16 = arith.constant 16 : index
    %c0_16 = arith.constant 0 : index
    %100 = vector.load %arg2[%c16, %c0_16] : memref<440x64xf32, #tpu.memory_space<vmem>>, vector<1x64xf32>
    %101 = vector.broadcast %100 : vector<1x64xf32> to vector<256x64xf32>
    %102 = arith.addf %99, %101 : vector<256x64xf32>
    %cst_17 = arith.constant 0.000000e+00 : f32
    %103 = vector.broadcast %cst_17 : f32 to vector<256x64xf32>
    %104 = arith.maximumf %102, %103 : vector<256x64xf32>
    %105 = math.absf %102 : vector<256x64xf32>
    %cst_18 = arith.constant 0.000000e+00 : f32
    %106 = vector.broadcast %cst_18 : f32 to vector<256x64xf32>
    %107 = arith.subf %106, %105 : vector<256x64xf32>
    %108 = math.exp %107 : vector<256x64xf32>
    %109 = math.log1p %108 : vector<256x64xf32>
    %110 = arith.addf %104, %109 : vector<256x64xf32>
    %cst_19 = arith.constant 0.693147182 : f32
    %111 = vector.broadcast %cst_19 : f32 to vector<256x64xf32>
    %112 = arith.subf %110, %111 : vector<256x64xf32>
    %c24 = arith.constant 24 : index
    %c0_20 = arith.constant 0 : index
    %113 = vector.load %arg2[%c24, %c0_20] : memref<440x64xf32, #tpu.memory_space<vmem>>, vector<64x64xf32>
    %cst_21 = arith.constant dense<0.000000e+00> : vector<256x64xf32>
    %114 = tpu.matmul %112, %113, %cst_21 {dimension_numbers = #tpu.dot_dimension_numbers<[1], [0], [0], [1], [0, 0, 1, 1], [], []>} : vector<256x64xf32>, vector<64x64xf32>, vector<256x64xf32> -> vector<256x64xf32>
    %c88 = arith.constant 88 : index
    %c0_22 = arith.constant 0 : index
    %115 = vector.load %arg2[%c88, %c0_22] : memref<440x64xf32, #tpu.memory_space<vmem>>, vector<1x64xf32>
    %116 = vector.broadcast %115 : vector<1x64xf32> to vector<256x64xf32>
    %117 = arith.addf %114, %116 : vector<256x64xf32>
    %118 = vector.broadcast %97 : vector<256x1xf32> to vector<256x64xf32>
    %119 = arith.mulf %117, %118 : vector<256x64xf32>
    %120 = tpu.iota {dimensions = array<i32: 0>} : vector<16x256xi32>
    %121 = arith.sitofp %120 : vector<16x256xi32> to vector<16x256xf32>
    %122 = tpu.iota {dimensions = array<i32: 1>} : vector<16x256xi32>
    %123 = arith.sitofp %122 : vector<16x256xi32> to vector<16x256xf32>
    %cst_23 = arith.constant 6.250000e-02 : f32
    %124 = vector.broadcast %cst_23 : f32 to vector<16x256xf32>
    %125 = arith.mulf %123, %124 : vector<16x256xf32>
    %126 = math.floor %125 : vector<16x256xf32>
    %127 = arith.cmpf oeq, %126, %121 : vector<16x256xf32>
    %128 = arith.extui %127 : vector<16x256xi1> to vector<16x256xi32>
    %129 = arith.sitofp %128 : vector<16x256xi32> to vector<16x256xf32>
    %130 = vector.extract_strided_slice %119 {offsets = [0, 0], sizes = [256, 32], strides = [1, 1]} : vector<256x64xf32> to vector<256x32xf32>
    %c96 = arith.constant 96 : index
    %c0_24 = arith.constant 0 : index
    %131 = vector.load %arg2[%c96, %c0_24] : memref<440x64xf32, #tpu.memory_space<vmem>>, vector<32x32xf32>
    %cst_25 = arith.constant dense<0.000000e+00> : vector<16x32xf32>
    %132 = tpu.matmul %1, %131, %cst_25 {dimension_numbers = #tpu.dot_dimension_numbers<[1], [0], [0], [1], [0, 0, 1, 1], [], []>} : vector<16x32xf32>, vector<32x32xf32>, vector<16x32xf32> -> vector<16x32xf32>
    %133 = tpu.concatenate %132, %132, %132, %132, %132, %132, %132, %132, %132, %132, %132, %132, %132, %132, %132, %132 in 0 : vector<16x32xf32>, vector<16x32xf32>, vector<16x32xf32>, vector<16x32xf32>, vector<16x32xf32>, vector<16x32xf32>, vector<16x32xf32>, vector<16x32xf32>, vector<16x32xf32>, vector<16x32xf32>, vector<16x32xf32>, vector<16x32xf32>, vector<16x32xf32>, vector<16x32xf32>, vector<16x32xf32>, vector<16x32xf32> -> vector<256x32xf32>
    %134 = arith.mulf %130, %133 : vector<256x32xf32>
    %cst_26 = arith.constant dense<0.000000e+00> : vector<16x32xf32>
    %135 = tpu.matmul %129, %134, %cst_26 {dimension_numbers = #tpu.dot_dimension_numbers<[1], [0], [0], [1], [0, 0, 1, 1], [], []>} : vector<16x256xf32>, vector<256x32xf32>, vector<16x32xf32> -> vector<16x32xf32>
    %c128 = arith.constant 128 : index
    %c0_27 = arith.constant 0 : index
    %136 = vector.load %arg2[%c128, %c0_27] : memref<440x64xf32, #tpu.memory_space<vmem>>, vector<32x32xf32>
    %cst_28 = arith.constant dense<0.000000e+00> : vector<16x32xf32>
    %137 = tpu.matmul %135, %136, %cst_28 {dimension_numbers = #tpu.dot_dimension_numbers<[1], [0], [0], [1], [0, 0, 1, 1], [], []>} : vector<16x32xf32>, vector<32x32xf32>, vector<16x32xf32> -> vector<16x32xf32>
    %c160 = arith.constant 160 : index
    %c0_29 = arith.constant 0 : index
    %138 = vector.load %arg2[%c160, %c0_29] : memref<440x64xf32, #tpu.memory_space<vmem>>, vector<1x32xf32>
    %139 = vector.broadcast %138 : vector<1x32xf32> to vector<16x32xf32>
    %140 = arith.addf %137, %139 : vector<16x32xf32>
    %cst_30 = arith.constant 0.000000e+00 : f32
    %141 = vector.broadcast %cst_30 : f32 to vector<16x32xf32>
    %142 = arith.maximumf %140, %141 : vector<16x32xf32>
    %143 = math.absf %140 : vector<16x32xf32>
    %cst_31 = arith.constant 0.000000e+00 : f32
    %144 = vector.broadcast %cst_31 : f32 to vector<16x32xf32>
    %145 = arith.subf %144, %143 : vector<16x32xf32>
    %146 = math.exp %145 : vector<16x32xf32>
    %147 = math.log1p %146 : vector<16x32xf32>
    %148 = arith.addf %142, %147 : vector<16x32xf32>
    %cst_32 = arith.constant 0.693147182 : f32
    %149 = vector.broadcast %cst_32 : f32 to vector<16x32xf32>
    %150 = arith.subf %148, %149 : vector<16x32xf32>
    %c168 = arith.constant 168 : index
    %c0_33 = arith.constant 0 : index
    %151 = vector.load %arg2[%c168, %c0_33] : memref<440x64xf32, #tpu.memory_space<vmem>>, vector<32x32xf32>
    %cst_34 = arith.constant dense<0.000000e+00> : vector<16x32xf32>
    %152 = tpu.matmul %150, %151, %cst_34 {dimension_numbers = #tpu.dot_dimension_numbers<[1], [0], [0], [1], [0, 0, 1, 1], [], []>} : vector<16x32xf32>, vector<32x32xf32>, vector<16x32xf32> -> vector<16x32xf32>
    %153 = arith.addf %1, %152 : vector<16x32xf32>
    %c200 = arith.constant 200 : index
    %c0_35 = arith.constant 0 : index
    %154 = vector.load %arg2[%c200, %c0_35] : memref<440x64xf32, #tpu.memory_space<vmem>>, vector<1x32xf32>
    %155 = vector.broadcast %154 : vector<1x32xf32> to vector<16x32xf32>
    %156 = arith.addf %153, %155 : vector<16x32xf32>
    %157 = vector.extract_strided_slice %119 {offsets = [0, 32], sizes = [256, 32], strides = [1, 1]} : vector<256x64xf32> to vector<256x32xf32>
    %c208 = arith.constant 208 : index
    %c0_36 = arith.constant 0 : index
    %158 = vector.load %arg2[%c208, %c0_36] : memref<440x64xf32, #tpu.memory_space<vmem>>, vector<32x32xf32>
    %cst_37 = arith.constant dense<0.000000e+00> : vector<16x32xf32>
    %159 = tpu.matmul %156, %158, %cst_37 {dimension_numbers = #tpu.dot_dimension_numbers<[1], [0], [0], [1], [0, 0, 1, 1], [], []>} : vector<16x32xf32>, vector<32x32xf32>, vector<16x32xf32> -> vector<16x32xf32>
    %160 = tpu.concatenate %159, %159, %159, %159, %159, %159, %159, %159, %159, %159, %159, %159, %159, %159, %159, %159 in 0 : vector<16x32xf32>, vector<16x32xf32>, vector<16x32xf32>, vector<16x32xf32>, vector<16x32xf32>, vector<16x32xf32>, vector<16x32xf32>, vector<16x32xf32>, vector<16x32xf32>, vector<16x32xf32>, vector<16x32xf32>, vector<16x32xf32>, vector<16x32xf32>, vector<16x32xf32>, vector<16x32xf32>, vector<16x32xf32> -> vector<256x32xf32>
    %161 = arith.mulf %157, %160 : vector<256x32xf32>
    %cst_38 = arith.constant dense<0.000000e+00> : vector<16x32xf32>
    %162 = tpu.matmul %129, %161, %cst_38 {dimension_numbers = #tpu.dot_dimension_numbers<[1], [0], [0], [1], [0, 0, 1, 1], [], []>} : vector<16x256xf32>, vector<256x32xf32>, vector<16x32xf32> -> vector<16x32xf32>
    %c240 = arith.constant 240 : index
    %c0_39 = arith.constant 0 : index
    %163 = vector.load %arg2[%c240, %c0_39] : memref<440x64xf32, #tpu.memory_space<vmem>>, vector<32x32xf32>
    %cst_40 = arith.constant dense<0.000000e+00> : vector<16x32xf32>
    %164 = tpu.matmul %162, %163, %cst_40 {dimension_numbers = #tpu.dot_dimension_numbers<[1], [0], [0], [1], [0, 0, 1, 1], [], []>} : vector<16x32xf32>, vector<32x32xf32>, vector<16x32xf32> -> vector<16x32xf32>
    %c272 = arith.constant 272 : index
    %c0_41 = arith.constant 0 : index
    %165 = vector.load %arg2[%c272, %c0_41] : memref<440x64xf32, #tpu.memory_space<vmem>>, vector<1x32xf32>
    %166 = vector.broadcast %165 : vector<1x32xf32> to vector<16x32xf32>
    %167 = arith.addf %164, %166 : vector<16x32xf32>
    %cst_42 = arith.constant 0.000000e+00 : f32
    %168 = vector.broadcast %cst_42 : f32 to vector<16x32xf32>
    %169 = arith.maximumf %167, %168 : vector<16x32xf32>
    %170 = math.absf %167 : vector<16x32xf32>
    %cst_43 = arith.constant 0.000000e+00 : f32
    %171 = vector.broadcast %cst_43 : f32 to vector<16x32xf32>
    %172 = arith.subf %171, %170 : vector<16x32xf32>
    %173 = math.exp %172 : vector<16x32xf32>
    %174 = math.log1p %173 : vector<16x32xf32>
    %175 = arith.addf %169, %174 : vector<16x32xf32>
    %cst_44 = arith.constant 0.693147182 : f32
    %176 = vector.broadcast %cst_44 : f32 to vector<16x32xf32>
    %177 = arith.subf %175, %176 : vector<16x32xf32>
    %c280 = arith.constant 280 : index
    %c0_45 = arith.constant 0 : index
    %178 = vector.load %arg2[%c280, %c0_45] : memref<440x64xf32, #tpu.memory_space<vmem>>, vector<32x32xf32>
    %cst_46 = arith.constant dense<0.000000e+00> : vector<16x32xf32>
    %179 = tpu.matmul %177, %178, %cst_46 {dimension_numbers = #tpu.dot_dimension_numbers<[1], [0], [0], [1], [0, 0, 1, 1], [], []>} : vector<16x32xf32>, vector<32x32xf32>, vector<16x32xf32> -> vector<16x32xf32>
    %180 = arith.addf %156, %179 : vector<16x32xf32>
    %c312 = arith.constant 312 : index
    %c0_47 = arith.constant 0 : index
    %181 = vector.load %arg2[%c312, %c0_47] : memref<440x64xf32, #tpu.memory_space<vmem>>, vector<1x32xf32>
    %182 = vector.broadcast %181 : vector<1x32xf32> to vector<16x32xf32>
    %183 = arith.addf %180, %182 : vector<16x32xf32>
    %c320 = arith.constant 320 : index
    %c0_48 = arith.constant 0 : index
    %184 = vector.load %arg2[%c320, %c0_48] : memref<440x64xf32, #tpu.memory_space<vmem>>, vector<32x16xf32>
    %cst_49 = arith.constant dense<0.000000e+00> : vector<16x16xf32>
    %185 = tpu.matmul %183, %184, %cst_49 {dimension_numbers = #tpu.dot_dimension_numbers<[1], [0], [0], [1], [0, 0, 1, 1], [], []>} : vector<16x32xf32>, vector<32x16xf32>, vector<16x16xf32> -> vector<16x16xf32>
    %c352 = arith.constant 352 : index
    %c0_50 = arith.constant 0 : index
    %186 = vector.load %arg2[%c352, %c0_50] : memref<440x64xf32, #tpu.memory_space<vmem>>, vector<1x16xf32>
    %187 = vector.broadcast %186 : vector<1x16xf32> to vector<16x16xf32>
    %188 = arith.addf %185, %187 : vector<16x16xf32>
    %cst_51 = arith.constant 0.000000e+00 : f32
    %189 = vector.broadcast %cst_51 : f32 to vector<16x16xf32>
    %190 = arith.maximumf %188, %189 : vector<16x16xf32>
    %191 = math.absf %188 : vector<16x16xf32>
    %cst_52 = arith.constant 0.000000e+00 : f32
    %192 = vector.broadcast %cst_52 : f32 to vector<16x16xf32>
    %193 = arith.subf %192, %191 : vector<16x16xf32>
    %194 = math.exp %193 : vector<16x16xf32>
    %195 = math.log1p %194 : vector<16x16xf32>
    %196 = arith.addf %190, %195 : vector<16x16xf32>
    %cst_53 = arith.constant 0.693147182 : f32
    %197 = vector.broadcast %cst_53 : f32 to vector<16x16xf32>
    %198 = arith.subf %196, %197 : vector<16x16xf32>
    %c360 = arith.constant 360 : index
    %c0_54 = arith.constant 0 : index
    %199 = vector.load %arg2[%c360, %c0_54] : memref<440x64xf32, #tpu.memory_space<vmem>>, vector<16x1xf32>
    %cst_55 = arith.constant dense<0.000000e+00> : vector<16x1xf32>
    %200 = tpu.matmul %198, %199, %cst_55 {dimension_numbers = #tpu.dot_dimension_numbers<[1], [0], [0], [1], [0, 0, 1, 1], [], []>} : vector<16x16xf32>, vector<16x1xf32>, vector<16x1xf32> -> vector<16x1xf32>
    %c376 = arith.constant 376 : index
    %c0_56 = arith.constant 0 : index
    %201 = vector.load %arg2[%c376, %c0_56] : memref<440x64xf32, #tpu.memory_space<vmem>>, vector<1x1xf32>
    %202 = vector.broadcast %201 : vector<1x1xf32> to vector<16x1xf32>
    %203 = arith.addf %200, %202 : vector<16x1xf32>
    %204 = tpu.iota {dimensions = array<i32: 0>} : vector<2x16xi32>
    %205 = arith.sitofp %204 : vector<2x16xi32> to vector<2x16xf32>
    %206 = tpu.iota {dimensions = array<i32: 1>} : vector<2x16xi32>
    %207 = arith.sitofp %206 : vector<2x16xi32> to vector<2x16xf32>
    %cst_57 = arith.constant 1.250000e-01 : f32
    %208 = vector.broadcast %cst_57 : f32 to vector<2x16xf32>
    %209 = arith.mulf %207, %208 : vector<2x16xf32>
    %210 = math.floor %209 : vector<2x16xf32>
    %211 = arith.cmpf oeq, %210, %205 : vector<2x16xf32>
    %212 = arith.extui %211 : vector<2x16xi1> to vector<2x16xi32>
    %213 = arith.sitofp %212 : vector<2x16xi32> to vector<2x16xf32>
    %cst_58 = arith.constant dense<0.000000e+00> : vector<2x1xf32>
    %214 = tpu.matmul %213, %203, %cst_58 {dimension_numbers = #tpu.dot_dimension_numbers<[1], [0], [0], [1], [0, 0, 1, 1], [], []>} : vector<2x16xf32>, vector<16x1xf32>, vector<2x1xf32> -> vector<2x1xf32>
    %c384 = arith.constant 384 : index
    %c0_59 = arith.constant 0 : index
    %215 = vector.load %arg2[%c384, %c0_59] : memref<440x64xf32, #tpu.memory_space<vmem>>, vector<1x32xf32>
    %216 = vector.broadcast %214 : vector<2x1xf32> to vector<2x32xf32>
    %217 = vector.broadcast %215 : vector<1x32xf32> to vector<2x32xf32>
    %218 = arith.mulf %216, %217 : vector<2x32xf32>
    %c392 = arith.constant 392 : index
    %c0_60 = arith.constant 0 : index
    %219 = vector.load %arg2[%c392, %c0_60] : memref<440x64xf32, #tpu.memory_space<vmem>>, vector<1x32xf32>
    %220 = vector.broadcast %219 : vector<1x32xf32> to vector<2x32xf32>
    %221 = arith.addf %218, %220 : vector<2x32xf32>
    %cst_61 = arith.constant 0.000000e+00 : f32
    %222 = vector.broadcast %cst_61 : f32 to vector<2x32xf32>
    %223 = arith.maximumf %221, %222 : vector<2x32xf32>
    %c400 = arith.constant 400 : index
    %c0_62 = arith.constant 0 : index
    %224 = vector.load %arg2[%c400, %c0_62] : memref<440x64xf32, #tpu.memory_space<vmem>>, vector<32x4xf32>
    %cst_63 = arith.constant dense<0.000000e+00> : vector<2x4xf32>
    %225 = tpu.matmul %223, %224, %cst_63 {dimension_numbers = #tpu.dot_dimension_numbers<[1], [0], [0], [1], [0, 0, 1, 1], [], []>} : vector<2x32xf32>, vector<32x4xf32>, vector<2x4xf32> -> vector<2x4xf32>
    %c432 = arith.constant 432 : index
    %c0_64 = arith.constant 0 : index
    %226 = vector.load %arg2[%c432, %c0_64] : memref<440x64xf32, #tpu.memory_space<vmem>>, vector<1x4xf32>
    %227 = vector.broadcast %226 : vector<1x4xf32> to vector<2x4xf32>
    %228 = arith.addf %225, %227 : vector<2x4xf32>
    %c0_65 = arith.constant 0 : index
    %c0_66 = arith.constant 0 : index
    %229 = vector.load %arg3[%c0_65, %c0_66] : memref<2x4xf32, #tpu.memory_space<vmem>>, vector<2x4xf32>
    tpu.vector_store %arg3[%c0_65, %c0_66], %228 {strides = array<i32>} : memref<2x4xf32, #tpu.memory_space<vmem>>, vector<2x4xf32>,
    return
  }
}

</mosaic_0001>

<bundles_post_ra>
// kernel: schnet_classifier_forward.1
= control target key start
LH: loop header
LB: loop body
LE: loop exit
PB: predicated region body
PF: predicated region fallthrough
CT: control target
= control target key end

     0   :  { %v19_v0 = vlaneseq  ;;  %s15760_s0 = inlined_call_operand.vmem [shape: f32[16,3], index: 0, kind: input, shape index: {}]   ;;  %s15761_s1 = inlined_call_operand.vmem [shape: f32[16,32], index: 1, kind: input, shape index: {}]   ;;  %s15762_s2 = inlined_call_operand.vmem [shape: f32[440,64], index: 2, kind: input, shape index: {}]   ;;  %s15763_s3 = inlined_call_operand.hbm [shape: f32[2,4], index: 3, kind: output, shape index: {}]  }
   0x1   :  { %8 = vsyncpa [#allocation3], 0  ;;  %v8765_v2 = vld [vmem:[%s15760_s0] sm:$0xff]  ;;  %v8773_v6 = vld [vmem:[%s15760_s0 + $0x8] sm:$0xff]  ;;  %vm147_vm0 = vcmask 23552   ;;  %s8733_s10 = smov 32  }
   0x2   :  { %v8760_v1 = vshrl.u32 %v19_v0, 7  ;;  %s8738_s4 = smov [#allocation2]  }
   0x3   :  { %s7176_s5 = sshll.u32 %s8738_s4, 4  ;;  %s7177_s5 = int_to_ptr.vmem [resolvable:$true] %s7176_s5 }
   0x4   :  { %16098 = vst [vmem:[#allocation5_spill] sm:$0xff] %v8760_v1  ;;  %v25_v3 = vsub.s32 1, %v8760_v1  ;;  %v21_v4 = vsub.s32 0, %v8760_v1  ;;  %v29_v5 = vsub.s32 2, %v8760_v1  ;;  %v33_v7 = vsub.s32 3, %v8760_v1  ;;  %s8701_s6 = scalar_lea.vmem %s7177_s5, 32  ;;  %p8706_p1 = scmp.lt.s32.totalorder %s7177_s5, %s7177_s5 }
   0x5   :  { %v37_v18 = vsub.s32 4, %v8760_v1  ;;  %v41_v28 = vsub.s32 5, %v8760_v1  ;;  %v45_v36 = vsub.s32 6, %v8760_v1  ;;  %v49_v44 = vsub.s32 7, %v8760_v1  ;;  %p8702_p0 = scmp.ne.s32.totalorder %s7177_s5, %s8701_s6  ;;  %p8707_p2 = scmp.lt.s32.totalorder %s8701_s6, %s8701_s6 }
   0x6   :  { %v26_v8 = vrot.slane %v8765_v2, %v25_v3  ;;  %v22_v9 = vrot.slane %v8765_v2, %v21_v4  ;;  %v30_v10 = vrot.slane %v8765_v2, %v29_v5  ;;  %v34_v17 = vrot.slane %v8765_v2, %v33_v7 }
   0x7   :  { %v38_v27 = vrot.slane %v8765_v2, %v37_v18  ;;  %v42_v35 = vrot.slane %v8765_v2, %v41_v28  ;;  %v46_v43 = vrot.slane %v8765_v2, %v45_v36  ;;  %v50_v51 = vrot.slane %v8765_v2, %v49_v44  ;;  %p8708_p3 = por %p8707_p2, %p8706_p1 }
   0x8   :  { %v85_v11 = vsub.f32 %v26_v8, %v8765_v2  ;;  %v83_v12 = vsub.f32 %v22_v9, %v8765_v2  ;;  %v86_v13 = vsub.f32 %v26_v8, %v8773_v6  ;;  %v84_v14 = vsub.f32 %v22_v9, %v8773_v6 }
   0x9   :  { %v88_v15 = vsub.f32 %v30_v10, %v8773_v6  ;;  %v87_v16 = vsub.f32 %v30_v10, %v8765_v2  ;;  %v90_v25 = vsub.f32 %v34_v17, %v8773_v6  ;;  %v89_v26 = vsub.f32 %v34_v17, %v8765_v2  ;;  %p8709_p4 = pnand %p8708_p3, %p8702_p0 }
   0xa   :  { %v117_v19 = vmul.f32 %v85_v11, %v85_v11  ;;  %v115_v20 = vmul.f32 %v83_v12, %v83_v12  ;;  %v118_v21 = vmul.f32 %v86_v13, %v86_v13  ;;  %v116_v22 = vmul.f32 %v84_v14, %v84_v14 }
   0xb   :  { %v120_v31 = vmul.f32 %v88_v15, %v88_v15  ;;  %v119_v32 = vmul.f32 %v87_v16, %v87_v16  ;;  %v122_v33 = vmul.f32 %v90_v25, %v90_v25  ;;  %v121_v34 = vmul.f32 %v89_v26, %v89_v26 }
   0xc   :  { %v154_v23 = vsel %vm147_vm0, %v117_v19, 0.0  ;;  %v148_v24 = vsel %vm147_vm0, %v115_v20, 0.0  ;;  %v157_v29 = vsel %vm147_vm0, %v118_v21, 0.0  ;;  %v151_v30 = vsel %vm147_vm0, %v116_v22, 0.0 }
   0xd   :  { %155 = vadd.xlane.f32.xlu1 %v154_v23  ;;  %149 = vadd.xlane.f32.xlu0 %v148_v24  ;;  %v163_v37 = vsel %vm147_vm0, %v120_v31, 0.0  ;;  %v160_v38 = vsel %vm147_vm0, %v119_v32, 0.0  ;;  %v92_v39 = vsub.f32 %v38_v27, %v8773_v6  ;;  %v91_v40 = vsub.f32 %v38_v27, %v8765_v2 }
   0xe   :  { %v169_v41 = vsel %vm147_vm0, %v122_v33, 0.0  ;;  %v166_v42 = vsel %vm147_vm0, %v121_v34, 0.0  ;;  %v94_v47 = vsub.f32 %v42_v35, %v8773_v6  ;;  %v93_v48 = vsub.f32 %v42_v35, %v8765_v2 }
   0xf   :  { %v124_v45 = vmul.f32 %v92_v39, %v92_v39  ;;  %v123_v46 = vmul.f32 %v91_v40, %v91_v40  ;;  %v96_v49 = vsub.f32 %v46_v43, %v8773_v6  ;;  %v95_v50 = vsub.f32 %v46_v43, %v8765_v2 }
  0x10   :  { %v126_v54 = vmul.f32 %v94_v47, %v94_v47  ;;  %v125_v55 = vmul.f32 %v93_v48, %v93_v48  ;;  %v98_v57 = vsub.f32 %v50_v51, %v8773_v6  ;;  %v97_v58 = vsub.f32 %v50_v51, %v8765_v2 }
  0x11   :  { %158 = vadd.xlane.f32.xlu1 %v157_v29  ;;  %152 = vadd.xlane.f32.xlu0 %v151_v30  ;;  %v175_v52 = vsel %vm147_vm0, %v124_v45, 0.0  ;;  %v172_v53 = vsel %vm147_vm0, %v123_v46, 0.0  ;;  %v128_v56 = vmul.f32 %v96_v49, %v96_v49  ;;  %v127_v61 = vmul.f32 %v95_v50, %v95_v50 }
  0x12   :  { %v181_v59 = vsel %vm147_vm0, %v126_v54, 0.0  ;;  %v178_v60 = vsel %vm147_vm0, %v125_v55, 0.0  ;;  %v54_v62 = vrot.slane %v8773_v6, %v21_v4  ;;  %v130_v8 = vmul.f32 %v98_v57, %v98_v57 }
  0x13   :  { %v187_v63 = vsel %vm147_vm0, %v128_v56, 0.0  ;;  %v129_v9 = vmul.f32 %v97_v58, %v97_v58  ;;  %v184_v10 = vsel %vm147_vm0, %v127_v61, 0.0  ;;  %v58_v13 = vrot.slane %v8773_v6, %v25_v3 }
  0x14   :  { %v100_v11 = vsub.f32 %v54_v62, %v8773_v6  ;;  %v99_v12 = vsub.f32 %v54_v62, %v8765_v2  ;;  %v193_v4 = vsel %vm147_vm0, %v130_v8, 0.0  ;;  %v62_v15 = vrot.slane %v8773_v6, %v29_v5 }
  0x15   :  { %164 = vadd.xlane.f32.xlu1 %v163_v37  ;;  %161 = vadd.xlane.f32.xlu0 %v160_v38  ;;  %v190_v14 = vsel %vm147_vm0, %v129_v9, 0.0  ;;  %v102_v19 = vsub.f32 %v58_v13, %v8773_v6  ;;  %v101_v20 = vsub.f32 %v58_v13, %v8765_v2  ;;  %v66_v22 = vrot.slane %v8773_v6, %v33_v7 }
  0x16   :  { %v132_v16 = vmul.f32 %v100_v11, %v100_v11  ;;  %v131_v17 = vmul.f32 %v99_v12, %v99_v12  ;;  %v104_v3 = vsub.f32 %v62_v15, %v8773_v6  ;;  %v103_v21 = vsub.f32 %v62_v15, %v8765_v2 }
  0x17   :  { %v134_v24 = vmul.f32 %v102_v19, %v102_v19  ;;  %v133_v25 = vmul.f32 %v101_v20, %v101_v20  ;;  %v106_v27 = vsub.f32 %v66_v22, %v8773_v6  ;;  %v70_v29 = vrot.slane %v8773_v6, %v37_v18 }
  0x18   :  { %v199_v23 = vsel %vm147_vm0, %v132_v16, 0.0  ;;  %v196_v5 = vsel %vm147_vm0, %v131_v17, 0.0  ;;  %v136_v26 = vmul.f32 %v104_v3, %v104_v3  ;;  %v135_v7 = vmul.f32 %v103_v21, %v103_v21 }
  0x19   :  { %170 = vadd.xlane.f32.xlu1 %v169_v41  ;;  %167 = vadd.xlane.f32.xlu0 %v166_v42  ;;  %v205_v30 = vsel %vm147_vm0, %v134_v24, 0.0  ;;  %v202_v31 = vsel %vm147_vm0, %v133_v25, 0.0  ;;  %v105_v32 = vsub.f32 %v66_v22, %v8765_v2  ;;  %v138_v34 = vmul.f32 %v106_v27, %v106_v27 }
  0x1a   :  { %v211_v33 = vsel %vm147_vm0, %v136_v26, 0.0  ;;  %v74_v35 = vrot.slane %v8773_v6, %v41_v28  ;;  %v208_v37 = vsel %vm147_vm0, %v135_v7, 0.0  ;;  %v108_v18 = vsub.f32 %v70_v29, %v8773_v6 }
  0x1b   :  { %v137_v38 = vmul.f32 %v105_v32, %v105_v32  ;;  %v107_v39 = vsub.f32 %v70_v29, %v8765_v2  ;;  %v217_v40 = vsel %vm147_vm0, %v138_v34, 0.0  ;;  %v78_v42 = vrot.slane %v8773_v6, %v45_v36 }
  0x1c   :  { %v110_v41 = vsub.f32 %v74_v35, %v8773_v6  ;;  %v140_v28 = vmul.f32 %v108_v18, %v108_v18  ;;  %v109_v46 = vsub.f32 %v74_v35, %v8765_v2  ;;  %v82_v49 = vrot.slane %v8773_v6, %v49_v44 }
  0x1d   :  { %176 = vadd.xlane.f32.xlu1 %v175_v52  ;;  %173 = vadd.xlane.f32.xlu0 %v172_v53  ;;  %v214_v43 = vsel %vm147_vm0, %v137_v38, 0.0  ;;  %v139_v45 = vmul.f32 %v107_v39, %v107_v39  ;;  %v112_v47 = vsub.f32 %v78_v42, %v8773_v6  ;;  %v111_v48 = vsub.f32 %v78_v42, %v8765_v2 }
  0x1e   :  { %v223_v50 = vsel %vm147_vm0, %v140_v28, 0.0  ;;  %v142_v51 = vmul.f32 %v110_v41, %v110_v41  ;;  %v141_v52 = vmul.f32 %v109_v46, %v109_v46  ;;  %v114_v57 = vsub.f32 %v82_v49, %v8773_v6  ;;  %v4602_v6 = vld [vmem:[%s15762_s2 + $0x8] sm:$0xff] }
  0x1f   :  { %v220_v36 = vsel %vm147_vm0, %v139_v45, 0.0  ;;  %v144_v53 = vmul.f32 %v112_v47, %v112_v47  ;;  %v143_v54 = vmul.f32 %v111_v48, %v111_v48  ;;  %v113_v58 = vsub.f32 %v82_v49, %v8765_v2  ;;  %v4601_v2 = vld [vmem:[%s15762_s2] sm:$0xff] }
  0x20   :  { %v229_v55 = vsel %vm147_vm0, %v142_v51, 0.0  ;;  %v226_v56 = vsel %vm147_vm0, %v141_v52, 0.0  ;;  %v7910_v8 = vpack.c.bf16 %v4602_v6, %v4601_v2  ;;  %v8909_v19 = vand.u32 127, %v19_v0 }
  0x21   :  { %182 = vadd.xlane.f32.xlu1 %v181_v59  ;;  %179 = vadd.xlane.f32.xlu0 %v178_v60  ;;  %v235_v44 = vsel %vm147_vm0, %v144_v53, 0.0  ;;  %v232_v59 = vsel %vm147_vm0, %v143_v54, 0.0  ;;  %v146_v60 = vmul.f32 %v114_v57, %v114_v57  ;;  %v145_v61 = vmul.f32 %v113_v58, %v113_v58 }
  0x22   :  { %7911 = vmatprep.subr.bf16.mxu0 %v7910_v8  ;;  %16099 = vst [vmem:[#allocation6_spill] sm:$0xff] %v8909_v19  ;;  %v8918_v24 = vcvt.s32.f32 %v8909_v19 }
  0x23   :  { %v241_v62 = vsel %vm147_vm0, %v146_v60, 0.0  ;;  %7913 = vmatpush3.bf16.msra.mxu0 %v7910_v8 }
  0x24   :  { %16100 = vst [vmem:[#allocation7_spill] sm:$0xff] %v8918_v24  ;;  %v8930_v7 = vmul.f32 0.26666668, %v8918_v24 }
  0x25   :  { %188 = vadd.xlane.f32.xlu1 %v187_v63  ;;  %185 = vadd.xlane.f32.xlu0 %v184_v10  ;;  %v238_v63 = vsel %vm147_vm0, %v145_v61, 0.0 }
  0x29   :  { %194 = vadd.xlane.f32.xlu1 %v193_v4  ;;  %191 = vadd.xlane.f32.xlu0 %v190_v14 }
  0x2d   :  { %200 = vadd.xlane.f32.xlu1 %v199_v23  ;;  %197 = vadd.xlane.f32.xlu0 %v196_v5 }
  0x31   :  { %206 = vadd.xlane.f32.xlu1 %v205_v30  ;;  %203 = vadd.xlane.f32.xlu0 %v202_v31 }
  0x35   :  { %212 = vadd.xlane.f32.xlu1 %v211_v33  ;;  %209 = vadd.xlane.f32.xlu0 %v208_v37 }
  0x39   :  { %218 = vadd.xlane.f32.xlu1 %v217_v40  ;;  %215 = vadd.xlane.f32.xlu0 %v214_v43 }
  0x3d   :  { %224 = vadd.xlane.f32.xlu1 %v223_v50  ;;  %221 = vadd.xlane.f32.xlu0 %v220_v36 }
  0x41   :  { %230 = vadd.xlane.f32.xlu1 %v229_v55  ;;  %227 = vadd.xlane.f32.xlu0 %v226_v56 }
  0x45   :  { %236 = vadd.xlane.f32.xlu1 %v235_v44  ;;  %233 = vadd.xlane.f32.xlu0 %v232_v59 }
  0x49   :  { %242 = vadd.xlane.f32.xlu1 %v241_v62  ;;  %239 = vadd.xlane.f32.xlu0 %v238_v63 }
  0x9a   :  { %v156_v9 = vpop.xlane.xlu1 %155  ;;  %v150_v10 = vpop.xlane.xlu0 %149 }
  0x9b   :  { %8286 = vrsqrt.f32 %v156_v9  ;;  %vm260_vm1 = vcmp.eq.f32.partialorder %v156_v9, inf  ;;  %v263_v21 = vand.u32 2147483648, %v156_v9  ;;  %vm262_vm2 = vcmp.eq.f32.partialorder %v156_v9, 0.0 }
  0x9c   :  { %8288 = vrsqrt.f32 %v150_v10  ;;  %vm246_vm3 = vcmp.eq.f32.partialorder %v150_v10, inf  ;;  %v249_v27 = vand.u32 2147483648, %v150_v10  ;;  %vm248_vm4 = vcmp.eq.f32.partialorder %v150_v10, 0.0 }
  0x9e   :  { %v159_v11 = vpop.xlane.xlu1 %158  ;;  %v8898_v12 = vpop.xlane.xlu0 %152 }
  0x9f   :  { %8290 = vrsqrt.f32 %v159_v11  ;;  %vm267_vm5 = vcmp.eq.f32.partialorder %v159_v11, inf  ;;  %vm269_vm6 = vcmp.eq.f32.partialorder %v159_v11, 0.0  ;;  %v270_v34 = vand.u32 2147483648, %v159_v11 }
  0xa0   :  { %8292 = vrsqrt.f32 %v8898_v12  ;;  %vm253_vm7 = vcmp.eq.f32.partialorder %v8898_v12, inf  ;;  %vm255_vm8 = vcmp.eq.f32.partialorder %v8898_v12, 0.0  ;;  %v256_v37 = vand.u32 2147483648, %v8898_v12 }
  0xa2   :  { %v8900_v13 = vpop.xlane.xlu1 %164  ;;  %v8902_v14 = vpop.xlane.xlu0 %161 }
  0xa3   :  { %8294 = vrsqrt.f32 %v8900_v13  ;;  %vm281_vm9 = vcmp.eq.f32.partialorder %v8900_v13, inf  ;;  %vm283_vm10 = vcmp.eq.f32.partialorder %v8900_v13, 0.0  ;;  %v284_v28 = vand.u32 2147483648, %v8900_v13 }
  0xa4   :  { %8296 = vrsqrt.f32 %v8902_v14  ;;  %vm274_vm11 = vcmp.eq.f32.partialorder %v8902_v14, inf  ;;  %vm276_vm12 = vcmp.eq.f32.partialorder %v8902_v14, 0.0  ;;  %v277_v46 = vand.u32 2147483648, %v8902_v14 }
  0xa5   :  { %v8287_v4 = vpop.eup %8286 }
  0xa6   :  { %v259_v15 = vmul.f32 %v8287_v4, %v156_v9  ;;  %v8904_v16 = vpop.xlane.xlu1 %170  ;;  %v8289_v17 = vpop.eup %8288 }
  0xa7   :  { %8298 = vrsqrt.f32 %v8904_v16  ;;  %v8913_v3 = vpop.xlane.xlu0 %167  ;;  %v245_v22 = vmul.f32 %v8289_v17, %v150_v10  ;;  %vm295_vm13 = vcmp.eq.f32.partialorder %v8904_v16, inf  ;;  %vm297_vm14 = vcmp.eq.f32.partialorder %v8904_v16, 0.0 }
  0xa8   :  { %v261_v20 = vsel %vm260_vm1, %v156_v9, %v259_v15  ;;  %8300 = vrsqrt.f32 %v8913_v3  ;;  %v298_v52 = vand.u32 2147483648, %v8904_v16  ;;  %vm288_vm15 = vcmp.eq.f32.partialorder %v8913_v3, inf }
  0xa9   :  { %v8291_v5 = vpop.eup %8290  ;;  %v8920_v25 = vsel %vm262_vm2, %v263_v21, %v261_v20  ;;  %v247_v0 = vsel %vm246_vm3, %v150_v10, %v245_v22  ;;  %vm290_vm0 = vcmp.eq.f32.partialorder %v8913_v3, 0.0  ;;  %v291_v60 = vand.u32 2147483648, %v8913_v3 }
  0xaa   :  { %v8915_v23 = vpop.xlane.xlu1 %176  ;;  %16101 = vst [vmem:[#allocation8_spill] sm:$0xff] %v8920_v25  ;;  %v8925_v26 = vmul.f32 0.7853982, %v8920_v25  ;;  %v266_v29 = vmul.f32 %v8291_v5, %v159_v11  ;;  %v8293_v31 = vpop.eup %8292  ;;  %v8932_v33 = vsel %vm248_vm4, %v249_v27, %v247_v0  ;;  %v1019_v41 = vsub.f32 %v8920_v25, %v8930_v7 }
  0xab   :  { %8302 = vrsqrt.f32 %v8915_v23  ;;  %v8927_v30 = vpop.xlane.xlu0 %173  ;;  %16103 = vst [vmem:[#allocation10_spill] sm:$0xff] %v8932_v33  ;;  %v252_v40 = vmul.f32 %v8293_v31, %v8898_v12  ;;  %v8945_v42 = vmul.f32 0.7853982, %v8932_v33  ;;  %vm309_vm1 = vcmp.eq.f32.partialorder %v8915_v23, inf }
  0xac   :  { %16102 = vst [vmem:[#allocation9_spill] sm:$0xff] %v8925_v26  ;;  %8304 = vrsqrt.f32 %v8927_v30  ;;  %v1418_v18 = vand.u32 2139095040, %v8925_v26  ;;  %v268_v39 = vsel %vm267_vm5, %v159_v11, %v266_v29  ;;  %v1051_v55 = vmul.f32 %v1019_v41, %v1019_v41 }
  0xad   :  { %v8295_v32 = vpop.eup %8294  ;;  %16104 = vst [vmem:[#allocation11_spill] sm:$0xff] %v8945_v42  ;;  %v8954_v47 = vsel %vm269_vm6, %v270_v34, %v268_v39  ;;  %v254_v51 = vsel %vm253_vm7, %v8898_v12, %v252_v40  ;;  %v1212_v56 = vand.u32 2139095040, %v8945_v42  ;;  %vm311_vm2 = vcmp.eq.f32.partialorder %v8915_v23, 0.0 }
  0xae   :  { %v8297_v35 = vpop.eup %8296  ;;  %v280_v43 = vmul.f32 %v8295_v32, %v8900_v13  ;;  %16105 = vst [vmem:[#allocation12_spill] sm:$0xff] %v8954_v47  ;;  %v8959_v49 = vpop.xlane.xlu1 %182  ;;  %v1419_v36 = vshrl.u32 %v1418_v18, 23  ;;  %v1020_v58 = vsub.f32 %v8954_v47, %v8930_v7  ;;  %v8976_v44 = vmul.f32 0.7853982, %v8954_v47 }
  0xaf   :  { %v273_v45 = vmul.f32 %v8297_v35, %v8902_v14  ;;  %v8966_v53 = vpop.xlane.xlu0 %179  ;;  %v8984_v61 = vsel %vm255_vm8, %v256_v37, %v254_v51  ;;  %v1083_v10 = vmul.f32 -7.03125, %v1051_v55  ;;  %v1213_v11 = vshrl.u32 %v1212_v56, 23 }
  0xb0   :  { %v282_v57 = vsel %vm281_vm9, %v8900_v13, %v280_v43  ;;  %16106 = vst [vmem:[#allocation13_spill] sm:$0xff] %v8976_v44  ;;  %v7224_v2 = vadd.s32 4294967169, %v1419_v36  ;;  %8306 = vrsqrt.f32 %v8966_v53  ;;  %v1052_v15 = vmul.f32 %v1020_v58, %v1020_v58 }
  0xb1   :  { %v8299_v38 = vpop.eup %8298  ;;  %v275_v59 = vsel %vm274_vm11, %v8902_v14, %v273_v45  ;;  %v8993_v6 = vsel %vm283_vm10, %v284_v28, %v282_v57  ;;  %v1521_v13 = vand.u32 2139095040, %v8976_v44  ;;  %v1018_v17 = vsub.f32 %v8984_v61, %v8930_v7 }
  0xb2   :  { %v294_v48 = vmul.f32 %v8299_v38, %v8904_v16  ;;  %v8301_v50 = vpop.eup %8300  ;;  %16107 = vst [vmem:[#allocation14_spill] sm:$0xff] %v8993_v6  ;;  %v8999_v12 = vsel %vm276_vm12, %v277_v46, %v275_v59  ;;  %v9002_v4 = vpop.xlane.xlu1 %188  ;;  %v9014_v14 = vmul.f32 0.7853982, %v8984_v61  ;;  %v1022_v22 = vsub.f32 %v8993_v6, %v8930_v7 }
  0xb3   :  { %v287_v63 = vmul.f32 %v8301_v50, %v8913_v3  ;;  %16108 = vst [vmem:[#allocation15_spill] sm:$0xff] %v8999_v12  ;;  %v9011_v21 = vpop.xlane.xlu0 %185  ;;  %8308 = vrsqrt.f32 %v8959_v49  ;;  %v1425_v0 = vadd.s32 1, %v7224_v2  ;;  %v1117_v31 = vmul.f32 1.442695, %v1083_v10 }
  0xb4   :  { %v296_v62 = vsel %vm295_vm13, %v8904_v16, %v294_v48  ;;  %16110 = vst [vmem:[#allocation17_spill] sm:$0xff] %v9014_v14  ;;  %v1021_v16 = vsub.f32 %v8999_v12, %v8930_v7  ;;  %v7216_v32 = vadd.s32 4294967169, %v1213_v11  ;;  %v312_v35 = vand.u32 2147483648, %v8915_v23 }
  0xb5   :  { %v8303_v54 = vpop.eup %8302  ;;  %v9009_v20 = vsel %vm297_vm14, %v298_v52, %v296_v62  ;;  %v289_v5 = vsel %vm288_vm15, %v8913_v3, %v287_v63  ;;  %v1084_v37 = vmul.f32 -7.03125, %v1052_v15  ;;  %v1050_v38 = vmul.f32 %v1018_v17, %v1018_v17 }
  0xb6   :  { %v308_v8 = vmul.f32 %v8303_v54, %v8915_v23  ;;  %v8305_v9 = vpop.eup %8304  ;;  %16109 = vst [vmem:[#allocation16_spill] sm:$0xff] %v9009_v20  ;;  %v1024_v34 = vsub.f32 %v9009_v20, %v8930_v7  ;;  %v9033_v18 = vsel %vm290_vm0, %v291_v60, %v289_v5  ;;  %8310 = vrsqrt.f32 %v9002_v4  ;;  %v9041_v43 = vpop.xlane.xlu1 %194 }
  0xb7   :  { %v301_v29 = vmul.f32 %v8305_v9, %v8927_v30  ;;  %16111 = vst [vmem:[#allocation18_spill] sm:$0xff] %v9033_v18  ;;  %v1522_v39 = vshrl.u32 %v1521_v13, 23  ;;  %v1054_v40 = vmul.f32 %v1022_v22, %v1022_v22  ;;  %vm302_vm3 = vcmp.eq.f32.partialorder %v8927_v30, inf  ;;  %v9045_v46 = vpop.xlane.xlu0 %191 }
  0xb8   :  { %v310_v27 = vsel %vm309_vm1, %v8915_v23, %v308_v8  ;;  %vm1426_vm4 = vcmp.gt.s32.totalorder %v1425_v0, 0  ;;  %v1315_v28 = vand.u32 2139095040, %v9014_v14  ;;  %v1053_v45 = vmul.f32 %v1021_v16, %v1021_v16 }
  0xb9   :  { %v9038_v41 = vsel %vm311_vm2, %v312_v35, %v310_v27  ;;  %v303_v3 = vsel %vm302_vm3, %v8927_v30, %v301_v29  ;;  %v1056_v48 = vmul.f32 %v1024_v34, %v1024_v34  ;;  %v1023_v50 = vsub.f32 %v9033_v18, %v8930_v7 }
  0xba   :  { %16112 = vst [vmem:[#allocation19_spill] sm:$0xff] %v9038_v41  ;;  %v305_v23 = vand.u32 2147483648, %v8927_v30  ;;  %8312 = vrsqrt.f32 %v9011_v21  ;;  %v8307_v36 = vpop.eup %8306  ;;  %v1082_v51 = vmul.f32 -7.03125, %v1050_v38  ;;  %v1026_v52 = vsub.f32 %v9038_v41, %v8930_v7  ;;  %v9064_v2 = vpop.xlane.xlu1 %200 }
  0xbb   :  { %vm304_vm5 = vcmp.eq.f32.partialorder %v8927_v30, 0.0  ;;  %8314 = vrsqrt.f32 %v9041_v43  ;;  %v1119_v54 = vmul.f32 1.442695, %v1084_v37  ;;  %v1086_v55 = vmul.f32 -7.03125, %v1054_v40  ;;  %v9070_v15 = vpop.xlane.xlu0 %197 }
  0xbc   :  { %v9055_v56 = vsel %vm304_vm5, %v305_v23, %v303_v3  ;;  %8316 = vrsqrt.f32 %v9045_v46  ;;  %v9059_v57 = vsel %vm1426_vm4, %v1425_v0, 0  ;;  %v1085_v58 = vmul.f32 -7.03125, %v1053_v45 }
  0xbd   :  { %16113 = vst [vmem:[#allocation20_spill] sm:$0xff] %v9055_v56  ;;  %8318 = vpow2.f32 %v1117_v31  ;;  %v8309_v59 = vpop.eup %8308  ;;  %v9061_v60 = vadd.s32 1, %v7216_v32  ;;  %v1088_v62 = vmul.f32 -7.03125, %v1056_v48  ;;  %v1055_v63 = vmul.f32 %v1023_v50, %v1023_v50 }
  0xbe   :  { %v315_v30 = vmul.f32 %v8307_v36, %v8966_v53  ;;  %v9066_v8 = vadd.s32 4294967169, %v1522_v39  ;;  %v1115_v9 = vmul.f32 1.442695, %v1082_v51  ;;  %v1058_v10 = vmul.f32 %v1026_v52, %v1026_v52  ;;  %v9091_v3 = vpop.xlane.xlu1 %206 }
  0xbf   :  { %v1025_v11 = vsub.f32 %v9055_v56, %v8930_v7  ;;  %v9073_v13 = vshrl.u32 %v9059_v57, 5  ;;  %8320 = vpow2.f32 %v1119_v54  ;;  %v9075_v17 = vshrl.u32 %v1315_v28, 23 }
  0xc0   :  { %v1123_v22 = vmul.f32 1.442695, %v1086_v55  ;;  %v8311_v5 = vpop.eup %8310  ;;  %v1121_v0 = vmul.f32 1.442695, %v1085_v58  ;;  %v322_v16 = vmul.f32 %v8309_v59, %v8959_v49  ;;  %vm316_vm6 = vcmp.eq.f32.partialorder %v8966_v53, inf }
  0xc1   :  { %8322 = vrsqrt.f32 %v9064_v2  ;;  %v1127_v27 = vmul.f32 1.442695, %v1088_v62  ;;  %v1087_v29 = vmul.f32 -7.03125, %v1055_v63  ;;  %v317_v31 = vsel %vm316_vm6, %v8966_v53, %v315_v30  ;;  %v9113_v62 = vpop.xlane.xlu0 %203 }
  0xc2   :  { %8324 = vrsqrt.f32 %v9070_v15  ;;  %v1090_v32 = vmul.f32 -7.03125, %v1058_v10  ;;  %v1057_v34 = vmul.f32 %v1025_v11, %v1025_v11  ;;  %v319_v35 = vand.u32 2147483648, %v8966_v53 }
  0xc3   :  { %8326 = vpow2.f32 %v1115_v9  ;;  %vm323_vm7 = vcmp.eq.f32.partialorder %v8959_v49, inf  ;;  %vm318_vm8 = vcmp.eq.f32.partialorder %v8966_v53, 0.0  ;;  %v336_v38 = vmul.f32 %v8311_v5, %v9002_v4 }
  0xc4   :  { %v8313_v37 = vpop.eup %8312  ;;  %8328 = vpow2.f32 %v1123_v22  ;;  %v324_v40 = vsel %vm323_vm7, %v8959_v49, %v322_v16  ;;  %v9087_v28 = vsel %vm318_vm8, %v319_v35, %v317_v31  ;;  %v1017_v45 = vsub.f32 %v8932_v33, %v8930_v7 }
  0xc5   :  { %v8315_v39 = vpop.eup %8314  ;;  %8330 = vpow2.f32 %v1121_v0  ;;  %16114 = vst [vmem:[#allocation21_spill] sm:$0xff] %v9087_v28  ;;  %v9094_v50 = vmul.f32 0.7853982, %v8993_v6  ;;  %v9096_v23 = vmul.f32 1.442695, %v1087_v29  ;;  %v326_v53 = vand.u32 2147483648, %v8959_v49 }
  0xc6   :  { %v8317_v48 = vpop.eup %8316  ;;  %8332 = vpow2.f32 %v1127_v27  ;;  %v9101_v51 = vmul.f32 1.442695, %v1090_v32  ;;  %v9103_v52 = vmul.f32 -7.03125, %v1057_v34  ;;  %vm325_vm9 = vcmp.eq.f32.partialorder %v8959_v49, 0.0  ;;  %v9129_v27 = vpop.xlane.xlu1 %212 }
  0xc7   :  { %16115 = vst [vmem:[#allocation22_spill] sm:$0xff] %v9094_v50  ;;  %v9099_v36 = vpop.eup %8318  ;;  %vm337_vm10 = vcmp.eq.f32.partialorder %v9002_v4, inf  ;;  %v9107_v54 = vsel %vm325_vm9, %v326_v53, %v324_v40  ;;  %v1027_v55 = vsub.f32 %v9087_v28, %v8930_v7  ;;  %v329_v59 = vmul.f32 %v8313_v37, %v9011_v21  ;;  %v9146_v53 = vpop.xlane.xlu0 %209 }
  0xc8   :  { %16116 = vst [vmem:[#allocation23_spill] sm:$0xff] %v9107_v54  ;;  %v338_v58 = vsel %vm337_vm10, %v9002_v4, %v336_v38  ;;  %v340_v63 = vand.u32 2147483648, %v9002_v4  ;;  %v350_v30 = vmul.f32 %v8315_v39, %v9041_v43  ;;  %v343_v9 = vmul.f32 %v8317_v48, %v9045_v46 }
  0xc9   :  { %v1049_v49 = vmul.f32 %v1017_v45, %v1017_v45  ;;  %v9118_v10 = vpop.eup %8320  ;;  %vm339_vm11 = vcmp.eq.f32.partialorder %v9002_v4, 0.0  ;;  %vm330_vm12 = vcmp.eq.f32.partialorder %v9011_v21, inf  ;;  %vm332_vm13 = vcmp.eq.f32.partialorder %v9011_v21, 0.0 }
  0xca   :  { %v333_v11 = vand.u32 2147483648, %v9011_v21  ;;  %v1028_v5 = vsub.f32 %v9107_v54, %v8930_v7  ;;  %v9126_v0 = vsel %vm339_vm11, %v340_v63, %v338_v58  ;;  %vm351_vm14 = vcmp.eq.f32.partialorder %v9041_v43, inf }
  0xcb   :  { %v8323_v22 = vpop.eup %8322  ;;  %16117 = vst [vmem:[#allocation24_spill] sm:$0xff] %v9126_v0  ;;  %v1081_v16 = vmul.f32 -7.03125, %v1049_v49  ;;  %v1059_v31 = vmul.f32 %v1027_v55, %v1027_v55  ;;  %v331_v4 = vsel %vm330_vm12, %v9011_v21, %v329_v59  ;;  %vm344_vm15 = vcmp.eq.f32.partialorder %v9045_v46, inf }
  0xcc   :  { %v8325_v29 = vpop.eup %8324  ;;  %8334 = vrsqrt.f32 %v9091_v3  ;;  %v352_v34 = vsel %vm351_vm14, %v9041_v43, %v350_v30  ;;  %v345_v35 = vsel %vm344_vm15, %v9045_v46, %v343_v9  ;;  %v1030_v39 = vsub.f32 %v9126_v0, %v8930_v7 }
  0xcd   :  { %v9134_v32 = vpop.eup %8326  ;;  %v1113_v37 = vmul.f32 1.442695, %v1081_v16  ;;  %8336 = vrsqrt.f32 %v9113_v62  ;;  %v354_v40 = vand.u32 2147483648, %v9041_v43  ;;  %v347_v45 = vand.u32 2147483648, %v9045_v46 }
  0xce   :  { %v9139_v38 = vpop.eup %8328  ;;  %v364_v48 = vmul.f32 %v8323_v22, %v9064_v2  ;;  %vm353_vm0 = vcmp.eq.f32.partialorder %v9041_v43, 0.0  ;;  %vm346_vm1 = vcmp.eq.f32.partialorder %v9045_v46, 0.0  ;;  %v357_v58 = vmul.f32 %v8325_v29, %v9070_v15  ;;  %v9166_v46 = vpop.xlane.xlu1 %218 }
  0xcf   :  { %v9148_v55 = vpop.eup %8330  ;;  %8338 = vpow2.f32 %v1113_v37  ;;  %vm16061_vm2 = vcmask 130048   ;;  %v9157_v63 = vsel %vm332_vm13, %v333_v11, %v331_v4  ;;  %v9159_v30 = vsel %vm353_vm0, %v354_v40, %v352_v34 }
  0xd0   :  { %v9153_v59 = vpop.eup %8332  ;;  %16118 = vst [vmem:[#allocation25_spill] sm:$0xff] %v9157_v63  ;;  %16119 = vst [vmem:[#allocation26_spill] sm:$0xff] %v9159_v30  ;;  %v9161_v9 = vsel %vm346_vm1, %v347_v45, %v345_v35  ;;  %8340 = vrsqrt.f32 %v9129_v27  ;;  %v1060_v49 = vmul.f32 %v1028_v5, %v1028_v5  ;;  %v1091_v43 = vmul.f32 -7.03125, %v1059_v31 }
  0xd1   :  { %16120 = vst [vmem:[#allocation27_spill] sm:$0xff] %v9161_v9  ;;  %vm365_vm3 = vcmp.eq.f32.partialorder %v9064_v2, inf  ;;  %8342 = vrsqrt.f32 %v9146_v53  ;;  %v1062_v22 = vmul.f32 %v1030_v39, %v1030_v39  ;;  %v368_v21 = vand.u32 2147483648, %v9064_v2 }
  0xd2   :  { %v366_v16 = vsel %vm365_vm3, %v9064_v2, %v364_v48  ;;  %vm358_vm4 = vcmp.eq.f32.partialorder %v9070_v15, inf  ;;  %v1029_v11 = vsub.f32 %v9157_v63, %v8930_v7  ;;  %v1032_v5 = vsub.f32 %v9159_v30, %v8930_v7 }
  0xd3   :  { %v1031_v29 = vsub.f32 %v9161_v9, %v8930_v7  ;;  %v359_v31 = vsel %vm358_vm4, %v9070_v15, %v357_v58  ;;  %v1129_v4 = vmul.f32 1.442695, %v9103_v52  ;;  %vm367_vm5 = vcmp.eq.f32.partialorder %v9064_v2, 0.0 }
  0xd4   :  { %v361_v34 = vand.u32 2147483648, %v9070_v15  ;;  %8344 = vrsqrt.f32 %v9166_v46  ;;  %v1092_v35 = vmul.f32 -7.03125, %v1060_v49  ;;  %v1133_v37 = vmul.f32 1.442695, %v1091_v43  ;;  %v9192_v43 = vpop.xlane.xlu0 %215 }
  0xd5   :  { %v9182_v39 = vsel %vm367_vm5, %v368_v21, %v366_v16  ;;  %vm360_vm6 = vcmp.eq.f32.partialorder %v9070_v15, 0.0  ;;  %v9186_v45 = vadd.s32 1, %v9066_v8  ;;  %8346 = vpow2.f32 %v9096_v23 }
  0xd6   :  { %16121 = vst [vmem:[#allocation28_spill] sm:$0xff] %v9182_v39  ;;  %v8335_v40 = vpop.eup %8334  ;;  %v1094_v48 = vmul.f32 -7.03125, %v1062_v22  ;;  %v9189_v52 = vsel %vm360_vm6, %v361_v34, %v359_v31  ;;  %8348 = vpow2.f32 %v9101_v51  ;;  %v1061_v58 = vmul.f32 %v1029_v11, %v1029_v11 }
  0xd7   :  { %16122 = vst [vmem:[#allocation29_spill] sm:$0xff] %v9189_v52  ;;  %v8337_v2 = vpop.eup %8336  ;;  %v1064_v24 = vmul.f32 %v1032_v5, %v1032_v5  ;;  %v1063_v49 = vmul.f32 %v1031_v29, %v1031_v29  ;;  %8350 = vpow2.f32 %v1129_v4  ;;  %v1034_v8 = vsub.f32 %v9182_v39, %v8930_v7  ;;  %v9205_v4 = vpop.xlane.xlu1 %224 }
  0xd8   :  { %v371_v15 = vmul.f32 %v8337_v2, %v9113_v62  ;;  %v1135_v22 = vmul.f32 1.442695, %v1092_v35  ;;  %8352 = vpow2.f32 %v1133_v37  ;;  %v1033_v21 = vsub.f32 %v9189_v52, %v8930_v7 }
  0xd9   :  { %v8339_v23 = vpop.eup %8338  ;;  %vm372_vm7 = vcmp.eq.f32.partialorder %v9113_v62, inf  ;;  %v1139_v11 = vmul.f32 1.442695, %v1094_v48  ;;  %v378_v5 = vmul.f32 %v8335_v40, %v9091_v3  ;;  %v375_v31 = vand.u32 2147483648, %v9113_v62 }
  0xda   :  { %v8341_v51 = vpop.eup %8340  ;;  %7696 = vmatprep.mubr.msk.f32.mxu0 %vm16061_vm2, %v8339_v23  ;;  %v373_v29 = vsel %vm372_vm7, %v9113_v62, %v371_v15  ;;  %v1093_v35 = vmul.f32 -7.03125, %v1061_v58  ;;  %v1096_v37 = vmul.f32 -7.03125, %v1064_v24  ;;  %v1095_v2 = vmul.f32 -7.03125, %v1063_v49  ;;  %v9219_v24 = vpop.xlane.xlu0 %221 }
  0xdb   :  { %v8343_v34 = vpop.eup %8342  ;;  %vm374_vm8 = vcmp.eq.f32.partialorder %v9113_v62, 0.0  ;;  %7697 = vmatmul.mubr.msk.f32.vlgmr.msra.gmra.mrb[0].mxu0 %vm16061_vm2, %v9134_v32  ;;  %v1066_v48 = vmul.f32 %v1034_v8, %v1034_v8  ;;  %8354 = vrsqrt.f32 %v9192_v43  ;;  %v1065_v15 = vmul.f32 %v1033_v21, %v1033_v21 }
  0xdc   :  { %v9210_v16 = vsel %vm374_vm8, %v375_v31, %v373_v29  ;;  %7699 = vmatprep.mubr.msk.f32.mxu0 %vm16061_vm2, %v9099_v36  ;;  %v385_v40 = vmul.f32 %v8343_v34, %v9146_v53  ;;  %vm379_vm9 = vcmp.eq.f32.partialorder %v9091_v3, inf  ;;  %vm386_vm10 = vcmp.eq.f32.partialorder %v9146_v53, inf }
  0xdd   :  { %16123 = vst [vmem:[#allocation30_spill] sm:$0xff] %v9210_v16  ;;  %8356 = vrsqrt.f32 %v9205_v4  ;;  %v380_v32 = vsel %vm379_vm9, %v9091_v3, %v378_v5  ;;  %v392_v58 = vmul.f32 %v8341_v51, %v9129_v27  ;;  %v389_v49 = vand.u32 2147483648, %v9146_v53 }
  0xde   :  { %v8345_v62 = vpop.eup %8344  ;;  %v387_v36 = vsel %vm386_vm10, %v9146_v53, %v385_v40  ;;  %v1137_v8 = vmul.f32 1.442695, %v1093_v35  ;;  %v382_v23 = vand.u32 2147483648, %v9091_v3  ;;  %v1035_v21 = vsub.f32 %v9210_v16, %v8930_v7 }
  0xdf   :  { %vm388_vm11 = vcmp.eq.f32.partialorder %v9146_v53, 0.0  ;;  %7700 = vmatmul.mubr.msk.f32.gmra.mrb[2].mxu0 %vm16061_vm2, %v9118_v10  ;;  %v8347_v29 = vpop.eup %8346  ;;  %v1143_v31 = vmul.f32 1.442695, %v1096_v37  ;;  %vm381_vm12 = vcmp.eq.f32.partialorder %v9091_v3, 0.0  ;;  %8358 = vrsqrt.f32 %v9219_v24 }
  0xe0   :  { %v9232_v51 = vsel %vm388_vm11, %v389_v49, %v387_v36  ;;  %7702 = vmatprep.mubr.msk.f32.mxu0 %vm16061_vm2, %v9148_v55  ;;  %v8349_v5 = vpop.eup %8348  ;;  %v1097_v34 = vmul.f32 -7.03125, %v1065_v15  ;;  %v9237_v35 = vsel %vm381_vm12, %v382_v23, %v380_v32  ;;  %vm393_vm13 = vcmp.eq.f32.partialorder %v9129_v27, inf }
  0xe1   :  { %16124 = vst [vmem:[#allocation31_spill] sm:$0xff] %v9232_v51  ;;  %16125 = vst [vmem:[#allocation32_spill] sm:$0xff] %v9237_v35  ;;  %v406_v53 = vmul.f32 %v8345_v62, %v9166_v46  ;;  %v8351_v10 = vpop.eup %8350  ;;  %8360 = vpow2.f32 %v1135_v22  ;;  %v1141_v37 = vmul.f32 1.442695, %v1095_v2  ;;  %v1098_v40 = vmul.f32 -7.03125, %v1066_v48  ;;  %v9252_v22 = vpop.xlane.xlu1 %230 }
  0xe2   :  { %v394_v3 = vsel %vm393_vm13, %v9129_v27, %v392_v58  ;;  %v8353_v36 = vpop.eup %8352  ;;  %8362 = vpow2.f32 %v1137_v8  ;;  %v1067_v49 = vmul.f32 %v1035_v21, %v1035_v21  ;;  %v396_v55 = vand.u32 2147483648, %v9129_v27  ;;  %v9257_v58 = vpop.xlane.xlu0 %227 }
  0xe3   :  { %v1037_v15 = vsub.f32 %v9232_v51, %v8930_v7  ;;  %7703 = vmatmul.mubr.msk.f32.gmra.mrb[4].mxu0 %vm16061_vm2, %v9139_v38  ;;  %8364 = vpow2.f32 %v1139_v11  ;;  %v1036_v62 = vsub.f32 %v9237_v35, %v8930_v7  ;;  %vm395_vm14 = vcmp.eq.f32.partialorder %v9129_v27, 0.0 }
  0xe4   :  { %vm407_vm15 = vcmp.eq.f32.partialorder %v9166_v46, inf  ;;  %7705 = vmatprep.mubr.msk.f32.mxu0 %vm16061_vm2, %v8347_v29  ;;  %8366 = vpow2.f32 %v1143_v31  ;;  %v1145_v2 = vmul.f32 1.442695, %v1097_v34  ;;  %v9254_v48 = vsel %vm395_vm14, %v396_v55, %v394_v3 }
  0xe5   :  { %16126 = vst [vmem:[#allocation33_spill] sm:$0xff] %v9254_v48  ;;  %v408_v32 = vsel %vm407_vm15, %v9166_v46, %v406_v53  ;;  %v8355_v38 = vpop.eup %8354  ;;  %v9260_v11 = vmul.f32 0.7853982, %v8999_v12  ;;  %8368 = vpow2.f32 %v1141_v37  ;;  %v1147_v27 = vmul.f32 1.442695, %v1098_v40 }
  0xe6   :  { %v410_v8 = vand.u32 2147483648, %v9166_v46  ;;  %v1099_v21 = vmul.f32 -7.03125, %v1067_v49  ;;  %v1069_v29 = vmul.f32 %v1037_v15, %v1037_v15  ;;  %vm409_vm0 = vcmp.eq.f32.partialorder %v9166_v46, 0.0 }
  0xe7   :  { %16127 = vst [vmem:[#allocation34_spill] sm:$0xff] %v9260_v11  ;;  %v8357_v23 = vpop.eup %8356  ;;  %7706 = vmatmul.mubr.msk.f32.gmra.mrb[6].mxu0 %vm16061_vm2, %v9153_v59  ;;  %8370 = vrsqrt.f32 %v9252_v22  ;;  %v1068_v31 = vmul.f32 %v1036_v62, %v1036_v62  ;;  %v1038_v34 = vsub.f32 %v9254_v48, %v8930_v7  ;;  %v399_v37 = vmul.f32 %v8355_v38, %v9192_v43 }
  0xe8   :  { %v9269_v53 = vsel %vm409_vm0, %v410_v8, %v408_v32  ;;  %7708 = vmatprep.mubr.msk.f32.mxu0 %vm16061_vm2, %v8351_v10  ;;  %8372 = vrsqrt.f32 %v9257_v58  ;;  %vm400_vm1 = vcmp.eq.f32.partialorder %v9192_v43, inf  ;;  %vm402_vm3 = vcmp.eq.f32.partialorder %v9192_v43, 0.0 }
  0xe9   :  { %16128 = vst [vmem:[#allocation35_spill] sm:$0xff] %v9269_v53  ;;  %8374 = vpow2.f32 %v1145_v2  ;;  %v8359_v59 = vpop.eup %8358  ;;  %v403_v46 = vand.u32 2147483648, %v9192_v43  ;;  %v420_v40 = vmul.f32 %v8357_v23, %v9205_v4  ;;  %vm421_vm4 = vcmp.eq.f32.partialorder %v9205_v4, inf }
  0xea   :  { %vm423_vm5 = vcmp.eq.f32.partialorder %v9205_v4, 0.0  ;;  %v1149_v3 = vmul.f32 1.442695, %v1099_v21  ;;  %v1101_v10 = vmul.f32 -7.03125, %v1069_v29  ;;  %v1040_v49 = vsub.f32 %v9269_v53, %v8930_v7 }
  0xeb   :  { %v424_v55 = vand.u32 2147483648, %v9205_v4  ;;  %7709 = vmatmul.mubr.msk.f32.gmra.mrb[8].mxu0 %vm16061_vm2, %v8349_v5  ;;  %v8361_v15 = vpop.eup %8360  ;;  %v1100_v62 = vmul.f32 -7.03125, %v1068_v31  ;;  %v1070_v2 = vmul.f32 %v1038_v34, %v1038_v34  ;;  %v401_v32 = vsel %vm400_vm1, %v9192_v43, %v399_v37 }
  0xec   :  { %v422_v38 = vsel %vm421_vm4, %v9205_v4, %v420_v40  ;;  %7711 = vmatprep.mubr.msk.f32.mxu0 %vm16061_vm2, %v8353_v36  ;;  %v8363_v8 = vpop.eup %8362  ;;  %v16129_v23 = vand.u32 2139095040, %v9094_v50  ;;  %v9291_v29 = vsel %vm402_vm3, %v403_v46, %v401_v32  ;;  %v413_v5 = vmul.f32 %v8359_v59, %v9219_v24  ;;  %v9302_v36 = vpop.xlane.xlu1 %236 }
  0xed   :  { %16130 = vst [vmem:[#allocation36_spill] sm:$0xff] %v9291_v29  ;;  %v9293_v19 = vsel %vm423_vm5, %v424_v55, %v422_v38  ;;  %v8365_v31 = vpop.eup %8364  ;;  %v9297_v34 = vmul.f32 0.7853982, %v9009_v20  ;;  %8376 = vpow2.f32 %v1147_v27  ;;  %v1039_v4 = vsub.f32 %v9291_v29, %v8930_v7 }
  0xee   :  { %v1728_v21 = vshrl.u32 %v16129_v23, 23  ;;  %16131 = vst [vmem:[#allocation37_spill] sm:$0xff] %v9293_v19  ;;  %vm414_vm6 = vcmp.eq.f32.partialorder %v9219_v24, inf  ;;  %v8367_v37 = vpop.eup %8366  ;;  %8378 = vpow2.f32 %v1149_v3  ;;  %v1153_v43 = vmul.f32 1.442695, %v1101_v10 }
  0xef   :  { %16132 = vst [vmem:[#allocation38_spill] sm:$0xff] %v9297_v34  ;;  %v1072_v46 = vmul.f32 %v1040_v49, %v1040_v49  ;;  %v1042_v40 = vsub.f32 %v9293_v19, %v8930_v7  ;;  %7712 = vmatmul.mubr.msk.f32.gmra.mrb[10].mxu0 %vm16061_vm2, %v8361_v15  ;;  %v8369_v59 = vpop.eup %8368  ;;  %v1151_v55 = vmul.f32 1.442695, %v1100_v62  ;;  %v1102_v32 = vmul.f32 -7.03125, %v1070_v2 }
  0xf0   :  { %v1071_v27 = vmul.f32 %v1039_v4, %v1039_v4  ;;  %v417_v38 = vand.u32 2147483648, %v9219_v24  ;;  %7714 = vmatprep.mubr.msk.f32.mxu0 %vm16061_vm2, %v8363_v8  ;;  %vm1220_vm7 = vcmp.gt.s32.totalorder %v9061_v60, 0  ;;  %v7220_v3 = vadd.s32 4294967169, %v9075_v17 }
  0xf1   :  { %v8371_v23 = vpop.eup %8370  ;;  %v415_v10 = vsel %vm414_vm6, %v9219_v24, %v413_v5  ;;  %vm416_vm8 = vcmp.eq.f32.partialorder %v9219_v24, 0.0  ;;  %8380 = vrsqrt.f32 %v9302_v36  ;;  %v7236_v15 = vadd.s32 4294967169, %v1728_v21 }
  0xf2   :  { %v8373_v49 = vpop.eup %8372  ;;  %v1624_v62 = vand.u32 2139095040, %v9260_v11  ;;  %v1103_v2 = vmul.f32 -7.03125, %v1071_v27  ;;  %v9317_v4 = vsel %vm416_vm8, %v417_v38, %v415_v10  ;;  %v1933_v25 = vand.u32 2139095040, %v9297_v34 }
  0xf3   :  { %16133 = vst [vmem:[#allocation39_spill] sm:$0xff] %v9317_v4  ;;  %v8375_v8 = vpop.eup %8374  ;;  %8382 = vpow2.f32 %v1153_v43  ;;  %v1104_v17 = vmul.f32 -7.03125, %v1072_v46  ;;  %v1074_v47 = vmul.f32 %v1042_v40, %v1042_v40  ;;  %7715 = vmatmul.mubr.msk.f32.gmra.mrb[12].mxu0 %vm16061_vm2, %v8365_v31  ;;  %v1155_v5 = vmul.f32 1.442695, %v1102_v32 }
  0xf4   :  { %8384 = vpow2.f32 %v1151_v55  ;;  %v1157_v24 = vmul.f32 1.442695, %v1103_v2  ;;  %v1041_v33 = vsub.f32 %v9317_v4, %v8930_v7  ;;  %7717 = vmatprep.mubr.msk.f32.mxu0 %vm16061_vm2, %v8369_v59  ;;  %v9325_v21 = vmul.f32 0.7853982, %v9033_v18 }
  0xf5   :  { %v9328_v27 = vmul.f32 0.7853982, %v9038_v41  ;;  %v434_v43 = vmul.f32 %v8371_v23, %v9252_v22  ;;  %v427_v46 = vmul.f32 %v8373_v49, %v9257_v58  ;;  %vm435_vm9 = vcmp.eq.f32.partialorder %v9252_v22, inf }
  0xf6   :  { %16134 = vst [vmem:[#allocation40_spill] sm:$0xff] %v9325_v21  ;;  %v1073_v40 = vmul.f32 %v1041_v33, %v1041_v33  ;;  %vm437_vm10 = vcmp.eq.f32.partialorder %v9252_v22, 0.0  ;;  %v438_v31 = vand.u32 2147483648, %v9252_v22  ;;  %v1159_v55 = vmul.f32 1.442695, %v1104_v17 }
  0xf7   :  { %16135 = vst [vmem:[#allocation41_spill] sm:$0xff] %v9328_v27  ;;  %8386 = vpow2.f32 %v1157_v24  ;;  %v1106_v59 = vmul.f32 -7.03125, %v1074_v47  ;;  %v436_v32 = vsel %vm435_vm9, %v9252_v22, %v434_v43  ;;  %7718 = vmatmul.mubr.msk.f32.gmra.mrb[14].mxu0 %vm16061_vm2, %v8367_v37  ;;  %v8377_v38 = vpop.eup %8376  ;;  %vm428_vm11 = vcmp.eq.f32.partialorder %v9257_v58, inf }
  0xf8   :  { %8388 = vpow2.f32 %v1155_v5  ;;  %v1105_v10 = vmul.f32 -7.03125, %v1073_v40  ;;  %v9337_v23 = vsel %vm437_vm10, %v438_v31, %v436_v32  ;;  %7720 = vmatprep.mubr.msk.f32.mxu0 %vm16061_vm2, %v8375_v8  ;;  %v8379_v33 = vpop.eup %8378  ;;  %v1625_v49 = vshrl.u32 %v1624_v62, 23  ;;  %v9358_v32 = vpop.xlane.xlu0 %233 }
  0xf9   :  { %16136 = vst [vmem:[#allocation42_spill] sm:$0xff] %v9337_v23  ;;  %v1934_v2 = vshrl.u32 %v1933_v25, 23  ;;  %v1044_v17 = vsub.f32 %v9337_v23, %v8930_v7  ;;  %v429_v47 = vsel %vm428_vm11, %v9257_v58, %v427_v46  ;;  %v1830_v22 = vand.u32 2139095040, %v9325_v21 }
  0xfa   :  { %v2139_v37 = vand.u32 2139095040, %v9328_v27  ;;  %v1161_v5 = vmul.f32 1.442695, %v1105_v10  ;;  %v431_v24 = vand.u32 2147483648, %v9257_v58  ;;  %8390 = vpow2.f32 %v1159_v55 }
  0xfb   :  { %v8381_v43 = vpop.eup %8380  ;;  %v1163_v40 = vmul.f32 1.442695, %v1106_v59  ;;  %v1076_v31 = vmul.f32 %v1044_v17, %v1044_v17  ;;  %vm430_vm12 = vcmp.eq.f32.partialorder %v9257_v58, 0.0  ;;  %7721 = vmatmul.mubr.msk.f32.gmra.mrb[16].mxu0 %vm16061_vm2, %v8377_v38  ;;  %v1221_v25 = vsel %vm1220_vm7, %v9061_v60, 0 }
  0xfc   :  { %v1322_v62 = vadd.s32 1, %v7220_v3  ;;  %8392 = vpow2.f32 %v1161_v5  ;;  %v9352_v8 = vsel %vm430_vm12, %v431_v24, %v429_v47  ;;  %7723 = vmatprep.mubr.msk.f32.mxu0 %vm16061_vm2, %v8379_v33  ;;  %vm1529_vm13 = vcmp.gt.s32.totalorder %v9186_v45, 0 }
  0xfd   :  { %16137 = vst [vmem:[#allocation43_spill] sm:$0xff] %v9352_v8  ;;  %v8383_v46 = vpop.eup %8382  ;;  %v1734_v55 = vadd.s32 1, %v7236_v15  ;;  %v7232_v59 = vadd.s32 4294967169, %v1625_v49  ;;  %v1043_v58 = vsub.f32 %v9352_v8, %v8930_v7  ;;  %v7244_v10 = vadd.s32 4294967169, %v1934_v2 }
  0xfe   :  { %v8385_v38 = vpop.eup %8384  ;;  %v1831_v17 = vshrl.u32 %v1830_v22, 23  ;;  %v1108_v60 = vmul.f32 -7.03125, %v1076_v31  ;;  %v448_v3 = vmul.f32 %v8381_v43, %v9302_v36  ;;  %v9362_v47 = vand.u32 31, %v9059_v57 }
  0xff   :  { %v2140_v33 = vshrl.u32 %v2139_v37, 23  ;;  %8394 = vpow2.f32 %v1163_v40  ;;  %v1075_v5 = vmul.f32 %v1043_v58, %v1043_v58  ;;  %7724 = vmatmul.mubr.msk.f32.gmra.mrb[18].mxu0 %vm16061_vm2, %v8385_v38  ;;  %v9365_v15 = vshrl.u32 %v1221_v25, 5  ;;  %v9373_v37 = vpop.xlane.xlu1 %242 }
 0x100   :  { %v1530_v49 = vsel %vm1529_vm13, %v9186_v45, 0  ;;  %vm1323_vm14 = vcmp.gt.s32.totalorder %v1322_v62, 0  ;;  %8396 = vrsqrt.f32 %v9358_v32  ;;  %7726 = vmatprep.mubr.msk.f32.mxu0 %vm16061_vm2, %v8383_v46  ;;  %vm1735_vm15 = vcmp.gt.s32.totalorder %v1734_v55, 0 }
 0x101   :  { %v8387_v2 = vpop.eup %8386  ;;  %v1631_v57 = vadd.s32 1, %v7232_v59  ;;  %v1107_v22 = vmul.f32 -7.03125, %v1075_v5  ;;  %vm449_vm0 = vcmp.eq.f32.partialorder %v9302_v36, inf  ;;  %v1940_v43 = vadd.s32 1, %v7244_v10 }
 0x102   :  { %v8389_v24 = vpop.eup %8388  ;;  %v7240_v40 = vadd.s32 4294967169, %v1831_v17  ;;  %v1167_v31 = vmul.f32 1.442695, %v1108_v60  ;;  %v450_v58 = vsel %vm449_vm0, %v9302_v36, %v448_v3  ;;  %v7252_v45 = vadd.s32 4294967169, %v2140_v33  ;;  %v9394_v33 = vpop.xlane.xlu0 %239 }
 0x103   :  { %v9377_v38 = vmul.f32 0.7853982, %v9055_v56  ;;  %v1165_v41 = vmul.f32 1.442695, %v1107_v22  ;;  %v452_v46 = vand.u32 2147483648, %v9302_v36  ;;  %7727 = vmatmul.mubr.msk.f32.gmra.mrb[20].mxu0 %vm16061_vm2, %v8389_v24  ;;  %v9381_v59 = vand.u32 31, %v1221_v25 }
 0x104   :  { %v9384_v5 = vmul.f32 0.7853982, %v9107_v54  ;;  %vm451_vm1 = vcmp.eq.f32.partialorder %v9302_v36, 0.0  ;;  %8398 = vrsqrt.f32 %v9373_v37  ;;  %7729 = vmatprep.mubr.msk.f32.mxu0 %vm16061_vm2, %v8387_v2  ;;  %v8391_v10 = vpop.eup %8390  ;;  %v9389_v17 = vshrl.u32 %v1530_v49, 5 }
 0x105   :  { %16138 = vst [vmem:[#allocation44_spill] sm:$0xff] %v9377_v38  ;;  %v1324_v60 = vsel %vm1323_vm14, %v1322_v62, 0  ;;  %8400 = vpow2.f32 %v1165_v41  ;;  %v9392_v3 = vsel %vm451_vm1, %v452_v46, %v450_v58  ;;  %v1736_v22 = vsel %vm1735_vm15, %v1734_v55, 0 }
 0x106   :  { %16139 = vst [vmem:[#allocation45_spill] sm:$0xff] %v9384_v5  ;;  %16140 = vst [vmem:[#allocation46_spill] sm:$0xff] %v9392_v3  ;;  %v8393_v25 = vpop.eup %8392  ;;  %vm1632_vm3 = vcmp.gt.s32.totalorder %v1631_v57, 0  ;;  %v1837_v24 = vadd.s32 1, %v7240_v40  ;;  %8402 = vpow2.f32 %v1167_v31  ;;  %vm1941_vm4 = vcmp.gt.s32.totalorder %v1940_v43, 0 }
 0x107   :  { %v2146_v36 = vadd.s32 1, %v7252_v45  ;;  %v2036_v2 = vand.u32 2139095040, %v9377_v38  ;;  %v9399_v54 = vmul.f32 0.7853982, %v9087_v28  ;;  %7730 = vmatmul.mubr.msk.f32.gmra.mrb[22].mxu0 %vm16061_vm2, %v8391_v10  ;;  %v9402_v41 = vand.u32 31, %v1530_v49 }
 0x108   :  { %v2345_v62 = vand.u32 2139095040, %v9384_v5  ;;  %v1046_v58 = vsub.f32 %v9392_v3, %v8930_v7  ;;  %8404 = vrsqrt.f32 %v9394_v33  ;;  %7732 = vmatprep.mubr.msk.f32.mxu0 %vm16061_vm2, %v8393_v25  ;;  %v9409_v40 = vshrl.u32 %v1324_v60, 5 }
 0x109   :  { %16141 = vst [vmem:[#allocation47_spill] sm:$0xff] %v9399_v54  ;;  %v8395_v55 = vpop.eup %8394  ;;  %v9411_v31 = vand.u32 31, %v1324_v60  ;;  %v9413_v45 = vshrl.u32 %v1736_v22, 5  ;;  %v9416_v46 = vmul.f32 0.7853982, %v9126_v0  ;;  %v9418_v10 = vand.u32 31, %v1736_v22 }
 0x10a   :  { %v8397_v49 = vpop.eup %8396  ;;  %v1633_v28 = vsel %vm1632_vm3, %v1631_v57, 0  ;;  %v1942_v56 = vsel %vm1941_vm4, %v1940_v43, 0  ;;  %vm1838_vm5 = vcmp.gt.s32.totalorder %v1837_v24, 0  ;;  %vm2147_vm6 = vcmp.gt.s32.totalorder %v2146_v36, 0 }
 0x10b   :  { %16142 = vst [vmem:[#allocation48_spill] sm:$0xff] %v9416_v46  ;;  %v2037_v25 = vshrl.u32 %v2036_v2, 23  ;;  %v2242_v5 = vand.u32 2139095040, %v9399_v54  ;;  %v441_v60 = vmul.f32 %v8397_v49, %v9358_v32  ;;  %7733 = vmatmul.mubr.msk.f32.gmra.mrb[24].mxu0 %vm16061_vm2, %v8395_v55  ;;  %v2346_v18 = vshrl.u32 %v2345_v62, 23 }
 0x10c   :  { %v1078_v38 = vmul.f32 %v1046_v58, %v1046_v58  ;;  %vm442_vm7 = vcmp.eq.f32.partialorder %v9358_v32, inf  ;;  %v445_v22 = vand.u32 2147483648, %v9358_v32  ;;  %v9427_v0 = vshrl.u32 %v1633_v28, 5 }
 0x10d   :  { %v2551_v57 = vand.u32 2139095040, %v9416_v46  ;;  %v443_v43 = vsel %vm442_vm7, %v9358_v32, %v441_v60  ;;  %vm444_vm8 = vcmp.eq.f32.partialorder %v9358_v32, 0.0  ;;  %v9432_v54 = vand.u32 31, %v1633_v28 }
 0x10e   :  { %16143 = vst [vmem:[#allocation49_spill] sm:$0xff] %v9427_v0  ;;  %v8399_v2 = vpop.eup %8398  ;;  %v9434_v49 = vshrl.u32 %v1942_v56, 5  ;;  %v9436_v55 = vand.u32 31, %v1942_v56  ;;  %v9438_v62 = vsel %vm444_vm8, %v445_v22, %v443_v43  ;;  %v1839_v20 = vsel %vm1838_vm5, %v1837_v24, 0 }
 0x10f   :  { %16146 = vst [vmem:[#allocation52_spill] sm:$0xff] %v9438_v62  ;;  %v8401_v58 = vpop.eup %8400  ;;  %v9442_v12 = vsel %vm2147_vm6, %v2146_v36, 0  ;;  %v2243_v46 = vshrl.u32 %v2242_v5, 23  ;;  %v1045_v60 = vsub.f32 %v9438_v62, %v8930_v7  ;;  %v7248_v6 = vadd.s32 4294967169, %v2037_v25 }
 0x110   :  { %16144 = vst [vmem:[#allocation50_spill] sm:$0xff] %v9434_v49  ;;  %16145 = vst [vmem:[#allocation51_spill] sm:$0xff] %v9436_v55  ;;  %v8403_v32 = vpop.eup %8402  ;;  %v7260_v28 = vadd.s32 4294967169, %v2346_v18  ;;  %v1110_v27 = vmul.f32 -7.03125, %v1078_v38  ;;  %v462_v21 = vmul.f32 %v8399_v2, %v9373_v37  ;;  %7735 = vmatprep.mubr.msk.f32.mxu0 %vm16061_vm2, %v8401_v58  ;;  %v2552_v56 = vshrl.u32 %v2551_v57, 23 }
 0x111   :  { %v1077_v22 = vmul.f32 %v1045_v60, %v1045_v60  ;;  %vm463_vm9 = vcmp.eq.f32.partialorder %v9373_v37, inf  ;;  %v466_v24 = vand.u32 2147483648, %v9373_v37  ;;  %7736 = vmatmul.mubr.msk.f32.gmra.mrb[26].mxu0 %vm16061_vm2, %v8403_v32  ;;  %v9452_v36 = vmul.f32 0.7853982, %v9157_v63 }
 0x112   :  { %v8405_v5 = vpop.eup %8404  ;;  %v9455_v25 = vmul.f32 0.7853982, %v9159_v30  ;;  %v464_v18 = vsel %vm463_vm9, %v9373_v37, %v462_v21  ;;  %vm465_vm10 = vcmp.eq.f32.partialorder %v9373_v37, 0.0  ;;  %v7256_v38 = vadd.s32 4294967169, %v2243_v46 }
 0x113   :  { %16147 = vst [vmem:[#allocation53_spill] sm:$0xff] %v9452_v36  ;;  %v1109_v57 = vmul.f32 -7.03125, %v1077_v22  ;;  %v9459_v43 = vsel %vm465_vm10, %v466_v24, %v464_v18  ;;  %v455_v2 = vmul.f32 %v8405_v5, %v9394_v33  ;;  %v1171_v58 = vmul.f32 1.442695, %v1110_v27 }
 0x114   :  { %16148 = vst [vmem:[#allocation54_spill] sm:$0xff] %v9455_v25  ;;  %16149 = vst [vmem:[#allocation55_spill] sm:$0xff] %v9459_v43  ;;  %v1048_v60 = vsub.f32 %v9459_v43, %v8930_v7  ;;  %vm456_vm11 = vcmp.eq.f32.partialorder %v9394_v33, inf  ;;  %v459_v32 = vand.u32 2147483648, %v9394_v33  ;;  %v7268_v30 = vadd.s32 4294967169, %v2552_v56 }
 0x115   :  { %v1169_v63 = vmul.f32 1.442695, %v1109_v57  ;;  %v457_v21 = vsel %vm456_vm11, %v9394_v33, %v455_v2  ;;  %vm458_vm12 = vcmp.eq.f32.partialorder %v9394_v33, 0.0  ;;  %v2448_v37 = vand.u32 2139095040, %v9452_v36 }
 0x116   :  { %v2757_v46 = vand.u32 2139095040, %v9455_v25  ;;  %v1080_v22 = vmul.f32 %v1048_v60, %v1048_v60  ;;  %v9470_v24 = vsel %vm458_vm12, %v459_v32, %v457_v21  ;;  %v9472_v27 = vadd.s32 1, %v7248_v6 }
 0x117   :  { %16150 = vst [vmem:[#allocation56_spill] sm:$0xff] %v9470_v24  ;;  %v9475_v5 = vmul.f32 0.7853982, %v9161_v9  ;;  %8406 = vpow2.f32 %v1169_v63  ;;  %v1047_v56 = vsub.f32 %v9470_v24, %v8930_v7  ;;  %v9479_v18 = vadd.s32 1, %v7260_v28 }
 0x118   :  { %8408 = vpow2.f32 %v1171_v58  ;;  %v1112_v33 = vmul.f32 -7.03125, %v1080_v22  ;;  %v9482_v57 = vsub.s32 32, %v9411_v31  ;;  %v9484_v2 = vshrl.u32 %v1839_v20, 5 }
 0x119   :  { %16151 = vst [vmem:[#allocation57_spill] sm:$0xff] %v9475_v5  ;;  %v9486_v60 = vand.u32 31, %v1839_v20  ;;  %v9489_v6 = vshrl.u32 %v9442_v12, 5  ;;  %v1079_v32 = vmul.f32 %v1047_v56, %v1047_v56  ;;  %v9491_v21 = vadd.s32 1, %v7256_v38 }
 0x11a   :  { %16152 = vst [vmem:[#allocation58_spill] sm:$0xff] %v9484_v2  ;;  %v9493_v63 = vadd.s32 1, %v7268_v30  ;;  %v2449_v7 = vshrl.u32 %v2448_v37, 23  ;;  %v2758_v28 = vshrl.u32 %v2757_v46, 23  ;;  %v2654_v58 = vand.u32 2139095040, %v9475_v5 }
 0x11b   :  { %16153 = vst [vmem:[#allocation59_spill] sm:$0xff] %v9486_v60  ;;  %16154 = vst [vmem:[#allocation60_spill] sm:$0xff] %v9489_v6  ;;  %v9497_v22 = vmul.f32 0.7853982, %v9182_v39  ;;  %v1111_v9 = vmul.f32 -7.03125, %v1079_v32  ;;  %vm2044_vm13 = vcmp.gt.s32.totalorder %v9472_v27, 0 }
 0x11c   :  { %vm2353_vm14 = vcmp.gt.s32.totalorder %v9479_v18, 0  ;;  %v9502_v20 = vmul.f32 0.7853982, %v9189_v52  ;;  %v1175_v56 = vmul.f32 1.442695, %v1112_v33  ;;  %v7264_v55 = vadd.s32 4294967169, %v2449_v7 }
 0x11d   :  { %16155 = vst [vmem:[#allocation61_spill] sm:$0xff] %v9497_v22  ;;  %v15821_v30 = vmov 2475754826   ;;  %v1173_v46 = vmul.f32 1.442695, %v1111_v9  ;;  %vm1344_vm15 = vcmp.lt.s32.totalorder %v9409_v40, 1 }
 0x11e   :  { %16156 = vst [vmem:[#allocation62_spill] sm:$0xff] %v9502_v20  ;;  %v1330_v37 = vshrl.u32 %v15821_v30, %v9482_v57  ;;  %v15818_v5 = vmov 683565275   ;;  %v1332_v32 = vshll.u32 %v15821_v30, %v9411_v31  ;;  %v15825_v25 = vmov 2131351028  }
 0x11f   :  { %v1329_v39 = vshll.u32 %v15818_v5, %v9411_v31  ;;  %v1333_v52 = vshrl.u32 %v15825_v25, %v9482_v57  ;;  %8410 = vpow2.f32 %v1173_v46  ;;  %v1335_v33 = vshll.u32 %v15825_v25, %v9411_v31 }
 0x120   :  { %v15830_v38 = vmov 2102212464   ;;  %8412 = vpow2.f32 %v1175_v56  ;;  %v16157_v9 = vand.u32 2147483647, %v9014_v14  ;;  %v15834_v49 = vmov 920167782  }
 0x121   :  { %v1336_v36 = vshrl.u32 %v15830_v38, %v9482_v57  ;;  %v9519_v5 = vor.u32 %v1330_v37, %v1329_v39  ;;  %v9521_v2 = vor.u32 %v1333_v52, %v1332_v32  ;;  %v8407_v30 = vpop.eup %8406  ;;  %v1338_v46 = vshll.u32 %v15830_v38, %v9411_v31 }
 0x122   :  { %v1319_v6 = vand.u32 8388607, %v16157_v9  ;;  %v1339_v25 = vshrl.u32 %v15834_v49, %v9482_v57  ;;  %v8409_v34 = vpop.eup %8408  ;;  %v2655_v56 = vshrl.u32 %v2654_v58, 23  ;;  %7738 = vmatprep.mubr.msk.f32.mxu0 %vm16061_vm2, %v8407_v30  ;;  %v1341_v39 = vshll.u32 %v15834_v49, %v9411_v31 }
 0x123   :  { %v9523_v60 = vor.u32 %v1336_v36, %v1335_v33  ;;  %v15832_v52 = vmov 1326507024   ;;  %v7276_v37 = vadd.s32 4294967169, %v2758_v28  ;;  %v2963_v32 = vand.u32 2139095040, %v9497_v22  ;;  %7739 = vmatmul.mubr.msk.f32.gmra.mrb[28].mxu0 %vm16061_vm2, %v8409_v34 }
 0x124   :  { %v1342_v36 = vshrl.u32 %v15832_v52, %v9482_v57  ;;  %v1340_v33 = vor.u32 %v1339_v25, %v1338_v46  ;;  %v1320_v9 = vor.u32 8388608, %v1319_v6  ;;  %vm1347_vm0 = vcmp.lt.s32.totalorder %v9409_v40, 4 }
 0x125   :  { %v1352_v31 = vsel %vm1344_vm15, %v9519_v5, %v9521_v2  ;;  %v2860_v58 = vand.u32 2139095040, %v9502_v20  ;;  %vm1346_vm1 = vcmp.lt.s32.totalorder %v9409_v40, 3  ;;  %v1356_v34 = vsel %vm1344_vm15, %v9521_v2, %v9523_v60 }
 0x126   :  { %v1343_v7 = vor.u32 %v1342_v36, %v1341_v39  ;;  %v1353_v28 = vsel %vm1347_vm0, %v1340_v33, 920167782  ;;  %v7272_v25 = vadd.s32 4294967169, %v2655_v56  ;;  %vm1345_vm3 = vcmp.lt.s32.totalorder %v9409_v40, 2 }
 0x127   :  { %v1354_v6 = vsel %vm1346_vm1, %v9523_v60, %v1353_v28  ;;  %v2045_v46 = vsel %vm2044_vm13, %v9472_v27, 0  ;;  %v2354_v39 = vsel %vm2353_vm14, %v9479_v18, 0  ;;  %vm2250_vm4 = vcmp.gt.s32.totalorder %v9491_v21, 0 }
 0x128   :  { %v1357_v30 = vsel %vm1347_vm0, %v1343_v7, 1326507024  ;;  %v1355_v56 = vsel %vm1345_vm3, %v1352_v31, %v1354_v6  ;;  %v2455_v28 = vadd.s32 1, %v7264_v55  ;;  %v9569_v38 = vshll.u32 %v1320_v9, 8 }
 0x129   :  { %v1358_v36 = vsel %vm1346_vm1, %v1340_v33, %v1357_v30  ;;  %v8411_v52 = vpop.eup %8410  ;;  %vm2559_vm5 = vcmp.gt.s32.totalorder %v9493_v63, 0  ;;  %v2764_v27 = vadd.s32 1, %v7276_v37  ;;  %v2964_v49 = vshrl.u32 %v2963_v32, 23 }
 0x12a   :  { %v1359_v7 = vsel %vm1345_vm3, %v1356_v34, %v1358_v36  ;;  %v2861_v18 = vshrl.u32 %v2860_v58, 23  ;;  %v8413_v20 = vpop.eup %8412  ;;  %v9573_v31 = vand.u32 31, %v9442_v12  ;;  %v2661_v6 = vadd.s32 1, %v7272_v25  ;;  %7741 = vmatprep.mubr.msk.f32.mxu0 %vm16061_vm2, %v8411_v52 }
 0x12b   :  { %v9577_v55 = vmul.u32.u64.low %v9569_v38, %v1355_v56  ;;  %v9578_v33 = vmul.u32.u64.high %v9569_v38, %v1355_v56, %v9577_v55  ;;  %v9581_v9 = vshrl.u32 %v2045_v46, 5  ;;  %v2251_v34 = vsel %vm2250_vm4, %v9491_v21, 0  ;;  %7742 = vmatmul.mubr.msk.f32.gmra.mrb[30].mxu0 %vm16061_vm2, %v8413_v20 }
 0x12c   :  { %16158 = vst [vmem:[#allocation63_spill] sm:$0xff] %v9573_v31  ;;  %v9586_v37 = vmul.u32.u64.low %v9569_v38, %v1359_v7  ;;  %v9587_v32 = vmul.u32.u64.high %v9569_v38, %v1359_v7, %v9586_v37  ;;  %v9589_v12 = vand.u32 31, %v2045_v46  ;;  %v9591_v58 = vshrl.u32 %v2354_v39, 5 }
 0x12d   :  { %16159 = vst [vmem:[#allocation64_spill] sm:$0xff] %v9581_v9  ;;  %v2560_v52 = vsel %vm2559_vm5, %v9493_v63, 0  ;;  %vm2456_vm6 = vcmp.gt.s32.totalorder %v2455_v28, 0  ;;  %vm2765_vm7 = vcmp.gt.s32.totalorder %v2764_v27, 0  ;;  %v7284_v25 = vadd.s32 4294967169, %v2964_v49 }
 0x12e   :  { %16160 = vst [vmem:[#allocation65_spill] sm:$0xff] %v9589_v12  ;;  %16161 = vst [vmem:[#allocation66_spill] sm:$0xff] %v9591_v58  ;;  %v7280_v30 = vadd.s32 4294967169, %v2861_v18  ;;  %v9595_v56 = vmul.f32 0.7853982, %v9237_v35  ;;  %v9597_v21 = vand.u32 31, %v2354_v39  ;;  %vm1369_vm9 = vc.u32 %v9587_v32, %v9577_v55 }
 0x12f   :  { %v9599_v20 = vshrl.u32 %v2251_v34, 5  ;;  %vm2662_vm8 = vcmp.gt.s32.totalorder %v2661_v6, 0  ;;  %v9602_v36 = vmul.f32 0.7853982, %v9210_v16  ;;  %v9604_v46 = vand.u32 31, %v2251_v34 }
 0x130   :  { %16162 = vst [vmem:[#allocation67_spill] sm:$0xff] %v9595_v56  ;;  %16163 = vst [vmem:[#allocation68_spill] sm:$0xff] %v9597_v21  ;;  %v9606_v7 = vshrl.u32 %v2560_v52, 5  ;;  %v9608_v63 = vand.u32 31, %v2560_v52  ;;  %v1349_v49 = vsel %vm1347_vm0, %v9523_v60, 2102212464 }
 0x131   :  { %16164 = vst [vmem:[#allocation69_spill] sm:$0xff] %v9599_v20  ;;  %16165 = vst [vmem:[#allocation70_spill] sm:$0xff] %v9602_v36  ;;  %v2457_v18 = vsel %vm2456_vm6, %v2455_v28, 0  ;;  %v2766_v37 = vsel %vm2765_vm7, %v2764_v27, 0  ;;  %v16169_v39 = vmov 683565275  }
 0x132   :  { %16166 = vst [vmem:[#allocation71_spill] sm:$0xff] %v9604_v46  ;;  %16167 = vst [vmem:[#allocation72_spill] sm:$0xff] %v9606_v7  ;;  %v1328_v35 = vshrl.u32 %v16169_v39, %v9482_v57  ;;  %v9616_v22 = vsub.s32 32, %v9381_v59  ;;  %v9618_v16 = vsel %vm2662_vm8, %v2661_v6, 0  ;;  %v9620_v34 = vadd.s32 1, %v7284_v25 }
 0x133   :  { %16168 = vst [vmem:[#allocation73_spill] sm:$0xff] %v9608_v63  ;;  %v9622_v20 = vadd.s32 1, %v7280_v30  ;;  %v3169_v52 = vand.u32 2139095040, %v9595_v56  ;;  %v3066_v7 = vand.u32 2139095040, %v9602_v36  ;;  %v1350_v57 = vsel %vm1346_vm1, %v9521_v2, %v1349_v49 }
 0x134   :  { %v1348_v60 = vsel %vm1344_vm15, %v1328_v35, %v9519_v5  ;;  %v1370_v28 = vadd.s32 1, %v9578_v33  ;;  %v9633_v27 = vshrl.u32 %v2457_v18, 5  ;;  %v9635_v6 = vand.u32 31, %v2457_v18 }
 0x135   :  { %v9637_v25 = vshrl.u32 %v2766_v37, 5  ;;  %v9641_v30 = vand.u32 31, %v2766_v37  ;;  %v9644_v36 = vmul.f32 0.7853982, %v9254_v48  ;;  %v9647_v35 = vmul.f32 0.7853982, %v9232_v51 }
 0x136   :  { %16170 = vst [vmem:[#allocation74_spill] sm:$0xff] %v9633_v27  ;;  %16171 = vst [vmem:[#allocation75_spill] sm:$0xff] %v9635_v6  ;;  %v16176_v5 = vmov 920167782   ;;  %v9652_v49 = vshrl.u32 %v9618_v16, 5  ;;  %v3170_v18 = vshrl.u32 %v3169_v52, 23  ;;  %v1351_v56 = vsel %vm1345_vm3, %v1348_v60, %v1350_v57 }
 0x137   :  { %16172 = vst [vmem:[#allocation76_spill] sm:$0xff] %v9637_v25  ;;  %16173 = vst [vmem:[#allocation77_spill] sm:$0xff] %v9641_v30  ;;  %v1236_v2 = vshrl.u32 %v16176_v5, %v9616_v22  ;;  %v16178_v25 = vmov 1326507024   ;;  %vm2971_vm10 = vcmp.gt.s32.totalorder %v9620_v34, 0  ;;  %vm2868_vm11 = vcmp.gt.s32.totalorder %v9622_v20, 0 }
 0x138   :  { %16174 = vst [vmem:[#allocation78_spill] sm:$0xff] %v9644_v36  ;;  %16175 = vst [vmem:[#allocation79_spill] sm:$0xff] %v9647_v35  ;;  %v1239_v37 = vshrl.u32 %v16178_v25, %v9616_v22  ;;  %v3067_v48 = vshrl.u32 %v3066_v7, 23  ;;  %v1371_v51 = vsel %vm1369_vm9, %v1370_v28, %v9578_v33  ;;  %v16179_v27 = vmov 2102212464  }
 0x139   :  { %16177 = vst [vmem:[#allocation80_spill] sm:$0xff] %v9652_v49  ;;  %v1235_v6 = vshll.u32 %v16179_v27, %v9381_v59  ;;  %v16180_v52 = vmov 2475754826   ;;  %v16181_v40 = vmov 2131351028   ;;  %v1233_v57 = vshrl.u32 %v16179_v27, %v9616_v22 }
 0x13a   :  { %v1227_v49 = vshrl.u32 %v16180_v52, %v9616_v22  ;;  %v1230_v60 = vshrl.u32 %v16181_v40, %v9616_v22  ;;  %v1238_v63 = vshll.u32 %v16176_v5, %v9381_v59  ;;  %v3375_v7 = vand.u32 2139095040, %v9644_v36 }
 0x13b   :  { %v3272_v33 = vand.u32 2139095040, %v9647_v35  ;;  %v1367_v28 = vmul.u32 %v9569_v38, %v1351_v56  ;;  %v1237_v30 = vor.u32 %v1236_v2, %v1235_v6  ;;  %v1226_v46 = vshll.u32 %v16169_v39, %v9381_v59 }
 0x13c   :  { %v1229_v58 = vshll.u32 %v16180_v52, %v9381_v59  ;;  %v1232_v21 = vshll.u32 %v16181_v40, %v9381_v59  ;;  %v1240_v9 = vor.u32 %v1239_v37, %v1238_v63  ;;  %v7292_v12 = vadd.s32 4294967169, %v3170_v18 }
 0x13d   :  { %v9682_v31 = vmul.f32 0.7853982, %v9269_v53  ;;  %v1372_v36 = vadd.s32 %v1371_v51, %v1367_v28  ;;  %v16183_v35 = vand.u32 2147483647, %v8945_v42  ;;  %v9686_v38 = vor.u32 %v1227_v49, %v1226_v46 }
 0x13e   :  { %v9688_v56 = vor.u32 %v1230_v60, %v1229_v58  ;;  %v1234_v6 = vor.u32 %v1233_v57, %v1232_v21  ;;  %vm1244_vm12 = vcmp.lt.s32.totalorder %v9365_v15, 4  ;;  %v9692_v2 = vmul.f32 0.7853982, %v9291_v29 }
 0x13f   :  { %16182 = vst [vmem:[#allocation81_spill] sm:$0xff] %v9682_v31  ;;  %v1216_v0 = vand.u32 8388607, %v16183_v35  ;;  %v9695_v59 = vmul.f32 0.7853982, %v9293_v19  ;;  %v7288_v51 = vadd.s32 4294967169, %v3067_v48 }
 0x140   :  { %16184 = vst [vmem:[#allocation82_spill] sm:$0xff] %v9692_v2  ;;  %v1250_v63 = vsel %vm1244_vm12, %v1237_v30, 920167782  ;;  %v3376_v18 = vshrl.u32 %v3375_v7, 23  ;;  %v3273_v37 = vshrl.u32 %v3272_v33, 23  ;;  %v1373_v21 = vadd.s32 536870912, %v1372_v36 }
 0x141   :  { %16185 = vst [vmem:[#allocation83_spill] sm:$0xff] %v9695_v59  ;;  %v1254_v46 = vsel %vm1244_vm12, %v1240_v9, 1326507024  ;;  %v9702_v58 = vmul.f32 0.7853982, %v9317_v4  ;;  %vm1241_vm13 = vcmp.lt.s32.totalorder %v9365_v15, 1 }
 0x142   :  { %vm1243_vm14 = vcmp.lt.s32.totalorder %v9365_v15, 3  ;;  %v3581_v35 = vand.u32 2139095040, %v9682_v31  ;;  %v1217_v49 = vor.u32 8388608, %v1216_v0  ;;  %v1249_v48 = vsel %vm1241_vm13, %v9686_v38, %v9688_v56 }
 0x143   :  { %16186 = vst [vmem:[#allocation84_spill] sm:$0xff] %v9702_v58  ;;  %v1251_v60 = vsel %vm1243_vm14, %v1234_v6, %v1250_v63  ;;  %v3478_v9 = vand.u32 2139095040, %v9692_v2  ;;  %v3787_v57 = vand.u32 2139095040, %v9695_v59  ;;  %v1253_v7 = vsel %vm1241_vm13, %v9688_v56, %v1234_v6 }
 0x144   :  { %v1255_v33 = vsel %vm1243_vm14, %v1237_v30, %v1254_v46  ;;  %v9721_v0 = vand.u32 31, %v9618_v16  ;;  %v2972_v28 = vsel %vm2971_vm10, %v9620_v34, 0  ;;  %v2869_v63 = vsel %vm2868_vm11, %v9622_v20, 0 }
 0x145   :  { %vm1242_vm15 = vcmp.lt.s32.totalorder %v9365_v15, 2  ;;  %v3176_v4 = vadd.s32 1, %v7292_v12  ;;  %v3684_v19 = vand.u32 2139095040, %v9702_v58  ;;  %v9731_v29 = vshrl.u32 %v1373_v21, 30 }
 0x146   :  { %16187 = vst [vmem:[#allocation85_spill] sm:$0xff] %v9721_v0  ;;  %v1252_v30 = vsel %vm1242_vm15, %v1249_v48, %v1251_v60  ;;  %v7300_v16 = vadd.s32 4294967169, %v3376_v18  ;;  %v7296_v46 = vadd.s32 4294967169, %v3273_v37  ;;  %v1256_v53 = vsel %vm1242_vm15, %v1253_v7, %v1255_v33 }
 0x147   :  { %v9737_v34 = vshll.u32 %v1217_v49, 8  ;;  %v3073_v59 = vadd.s32 1, %v7288_v51  ;;  %v3582_v2 = vshrl.u32 %v3581_v35, 23  ;;  %v3479_v20 = vshrl.u32 %v3478_v9, 23 }
 0x148   :  { %v3788_v31 = vshrl.u32 %v3787_v57, 23  ;;  %v9739_v0 = vshrl.u32 %v2972_v28, 5  ;;  %v9741_v12 = vand.u32 31, %v2972_v28  ;;  %v3685_v18 = vshrl.u32 %v3684_v19, 23 }
 0x149   :  { %v9744_v21 = vmul.u32.u64.low %v9737_v34, %v1252_v30  ;;  %v9745_v58 = vmul.u32.u64.high %v9737_v34, %v1252_v30, %v9744_v21  ;;  %v1375_v37 = vshll.u32 %v9731_v29, 30  ;;  %v9753_v51 = vshrl.u32 %v2869_v63, 5 }
 0x14a   :  { %16188 = vst [vmem:[#allocation86_spill] sm:$0xff] %v9739_v0  ;;  %16189 = vst [vmem:[#allocation87_spill] sm:$0xff] %v9741_v12  ;;  %v9750_v48 = vmul.u32.u64.low %v9737_v34, %v1256_v53  ;;  %v9751_v49 = vmul.u32.u64.high %v9737_v34, %v1256_v53, %v9750_v48  ;;  %vm3177_vm0 = vcmp.gt.s32.totalorder %v3176_v4, 0  ;;  %v3382_v35 = vadd.s32 1, %v7300_v16 }
 0x14b   :  { %16190 = vst [vmem:[#allocation88_spill] sm:$0xff] %v9753_v51  ;;  %v3279_v60 = vadd.s32 1, %v7296_v46  ;;  %vm3074_vm1 = vcmp.gt.s32.totalorder %v3073_v59, 0  ;;  %v7308_v9 = vadd.s32 4294967169, %v3582_v2  ;;  %v7304_v57 = vadd.s32 4294967169, %v3479_v20 }
 0x14c   :  { %v7316_v7 = vadd.s32 4294967169, %v3788_v31  ;;  %v9756_v33 = vmul.f32 0.7853982, %v9337_v23  ;;  %v9759_v19 = vmul.f32 0.7853982, %v9352_v8  ;;  %v9763_v53 = vand.u32 31, %v2869_v63 }
 0x14d   :  { %v1246_v28 = vsel %vm1244_vm12, %v1234_v6, 2102212464  ;;  %v7312_v30 = vadd.s32 4294967169, %v3685_v18  ;;  %v9765_v48 = vsub.s32 %v1372_v36, %v1375_v37  ;;  %v1225_v16 = vshrl.u32 %v16169_v39, %v9616_v22 }
 0x14e   :  { %16191 = vst [vmem:[#allocation89_spill] sm:$0xff] %v9756_v33  ;;  %16192 = vst [vmem:[#allocation90_spill] sm:$0xff] %v9759_v19  ;;  %v3178_v2 = vsel %vm3177_vm0, %v3176_v4, 0  ;;  %v3075_v31 = vsel %vm3074_vm1, %v3073_v59, 0  ;;  %vm3383_vm3 = vcmp.gt.s32.totalorder %v3382_v35, 0  ;;  %vm3280_vm4 = vcmp.gt.s32.totalorder %v3279_v60, 0 }
 0x14f   :  { %16193 = vst [vmem:[#allocation91_spill] sm:$0xff] %v9763_v53  ;;  %v3588_v46 = vadd.s32 1, %v7308_v9  ;;  %v3485_v20 = vadd.s32 1, %v7304_v57  ;;  %v1245_v8 = vsel %vm1241_vm13, %v1225_v16, %v9686_v38  ;;  %v1247_v6 = vsel %vm1243_vm14, %v9688_v56, %v1246_v28 }
 0x150   :  { %v3794_v36 = vadd.s32 1, %v7316_v7  ;;  %v3993_v63 = vand.u32 2139095040, %v9756_v33  ;;  %v3890_v22 = vand.u32 2139095040, %v9759_v19  ;;  %v1267_v4 = vadd.s32 1, %v9745_v58 }
 0x151   :  { %v9779_v59 = vshrl.u32 %v3178_v2, 5  ;;  %v3691_v18 = vadd.s32 1, %v7312_v30  ;;  %v1378_v37 = vsub.s32 0, %v9765_v48  ;;  %vm1266_vm5 = vc.u32 %v9751_v49, %v9744_v21 }
 0x152   :  { %v9784_v38 = vand.u32 31, %v3178_v2  ;;  %v9786_v9 = vshrl.u32 %v3075_v31, 5  ;;  %v9788_v56 = vand.u32 31, %v3075_v31  ;;  %v1248_v57 = vsel %vm1242_vm15, %v1245_v8, %v1247_v6 }
 0x153   :  { %16194 = vst [vmem:[#allocation92_spill] sm:$0xff] %v9779_v59  ;;  %v3384_v7 = vsel %vm3383_vm3, %v3382_v35, 0  ;;  %v3281_v28 = vsel %vm3280_vm4, %v3279_v60, 0  ;;  %vm3589_vm6 = vcmp.gt.s32.totalorder %v3588_v46, 0  ;;  %vm3486_vm7 = vcmp.gt.s32.totalorder %v3485_v20, 0 }
 0x154   :  { %16195 = vst [vmem:[#allocation93_spill] sm:$0xff] %v9784_v38  ;;  %16196 = vst [vmem:[#allocation94_spill] sm:$0xff] %v9786_v9  ;;  %vm3795_vm8 = vcmp.gt.s32.totalorder %v3794_v36, 0  ;;  %v3994_v30 = vshrl.u32 %v3993_v63, 23  ;;  %v3891_v16 = vshrl.u32 %v3890_v22, 23  ;;  %v1268_v23 = vsel %vm1266_vm5, %v1267_v4, %v9745_v58 }
 0x155   :  { %16197 = vst [vmem:[#allocation95_spill] sm:$0xff] %v9788_v56  ;;  %vm3692_vm9 = vcmp.gt.s32.totalorder %v3691_v18, 0  ;;  %v470_v2 = vadd.s32 8, %v8760_v1  ;;  %v7221_v31 = vmin.u32 %v1378_v37, %v9765_v48  ;;  %v1264_v19 = vmul.u32 %v9737_v34, %v1248_v57 }
 0x156   :  { %v9798_v15 = vshrl.u32 %v3384_v7, 5  ;;  %v9800_v8 = vand.u32 31, %v3384_v7  ;;  %v9802_v35 = vshrl.u32 %v3281_v28, 5  ;;  %v3590_v60 = vsel %vm3589_vm6, %v3588_v46, 0 }
 0x157   :  { %v3487_v6 = vsel %vm3486_vm7, %v3485_v20, 0  ;;  %v3796_v33 = vsel %vm3795_vm8, %v3794_v36, 0  ;;  %v9804_v63 = vadd.s32 %v1268_v23, %v1264_v19  ;;  %v9807_v58 = vsub.s32 32, %v9402_v41 }
 0x158   :  { %16198 = vst [vmem:[#allocation96_spill] sm:$0xff] %v9798_v15  ;;  %16199 = vst [vmem:[#allocation97_spill] sm:$0xff] %v9800_v8  ;;  %v3693_v22 = vsel %vm3692_vm9, %v3691_v18, 0  ;;  %v7324_v4 = vadd.s32 4294967169, %v3994_v30  ;;  %v7320_v9 = vadd.s32 4294967169, %v3891_v16  ;;  %v9812_v34 = vand.u32 31, %v3281_v28 }
 0x159   :  { %16200 = vst [vmem:[#allocation98_spill] sm:$0xff] %v9802_v35  ;;  %v9810_v37 = vmul.f32 0.7853982, %v9392_v3  ;;  %v9814_v57 = vshrl.u32 %v3590_v60, 5  ;;  %v9816_v7 = vcvt.s32.f32 %v470_v2  ;;  %v1380_v46 = vclz %v7221_v31 }
 0x15a   :  { %16202 = vst [vmem:[#allocation100_spill] sm:$0xff] %v9812_v34  ;;  %v9818_v20 = vand.u32 31, %v3590_v60  ;;  %v9820_v23 = vshrl.u32 %v3487_v6, 5  ;;  %v9822_v19 = vand.u32 31, %v3487_v6  ;;  %v9824_v36 = vshrl.u32 %v3796_v33, 5 }
 0x15b   :  { %16201 = vst [vmem:[#allocation99_spill] sm:$0xff] %v9810_v37  ;;  %16203 = vst [vmem:[#allocation101_spill] sm:$0xff] %v9814_v57  ;;  %v9826_v18 = vand.u32 31, %v3796_v33  ;;  %v9828_v30 = vshrl.u32 %v3693_v22, 5  ;;  %v1270_v28 = vadd.s32 536870912, %v9804_v63  ;;  %v1545_v16 = vshrl.u32 %v16176_v5, %v9807_v58  ;;  %v5443_v33 = vld [vmem:[%s15762_s2 + $0x20] sm:$0xff] }
 0x15c   :  { %16204 = vst [vmem:[#allocation102_spill] sm:$0xff] %v9816_v7  ;;  %16205 = vst [vmem:[#allocation103_spill] sm:$0xff] %v9818_v20  ;;  %v4000_v2 = vadd.s32 1, %v7324_v4  ;;  %v3897_v3 = vadd.s32 1, %v7320_v9  ;;  %v4199_v31 = vand.u32 2139095040, %v9810_v37  ;;  %v1548_v60 = vshrl.u32 %v16178_v25, %v9807_v58 }
 0x15d   :  { %16206 = vst [vmem:[#allocation104_spill] sm:$0xff] %v9820_v23  ;;  %16207 = vst [vmem:[#allocation105_spill] sm:$0xff] %v9822_v19  ;;  %v534_v6 = vmul.f32 0.0625, %v9816_v7  ;;  %v7222_v23 = vadd.s32 4294967294, %v1380_v46  ;;  %v1539_v4 = vshrl.u32 %v16181_v40, %v9807_v58  ;;  %v1542_v9 = vshrl.u32 %v16179_v27, %v9807_v58  ;;  %v5442_v46 = vld [vmem:[%s15762_s2 + $0x18] sm:$0xff] }
 0x15e   :  { %16208 = vst [vmem:[#allocation106_spill] sm:$0xff] %v9824_v36  ;;  %16209 = vst [vmem:[#allocation107_spill] sm:$0xff] %v9826_v18  ;;  %v1536_v36 = vshrl.u32 %v16180_v52, %v9807_v58  ;;  %v1547_v37 = vshll.u32 %v16176_v5, %v9402_v41  ;;  %v9849_v18 = vmul.f32 0.7853982, %v9438_v62  ;;  %v9857_v19 = vshrl.u32 %v1270_v28, 30 }
 0x15f   :  { %16210 = vst [vmem:[#allocation108_spill] sm:$0xff] %v9828_v30  ;;  %v1544_v30 = vshll.u32 %v16179_v27, %v9402_v41  ;;  %v1535_v57 = vshll.u32 %v16169_v39, %v9402_v41  ;;  %v7914_v35 = vpack.c.bf16 %v5443_v33, %v5442_v46  ;;  %v1538_v34 = vshll.u32 %v16180_v52, %v9402_v41  ;;  %v5444_v46 = vld [vmem:[%s15762_s2 + $0x28] sm:$0xff] }
 0x160   :  { %16211 = vst [vmem:[#allocation109_spill] sm:$0xff] %v9849_v18  ;;  %v1541_v62 = vshll.u32 %v16181_v40, %v9402_v41  ;;  %v1549_v15 = vor.u32 %v1548_v60, %v1547_v37  ;;  %vm4001_vm10 = vcmp.gt.s32.totalorder %v4000_v2, 0  ;;  %v9865_v8 = vfloor.f32 %v534_v6 }
 0x161   :  { %v1546_v20 = vor.u32 %v1545_v16, %v1544_v30  ;;  %vm7223_vm11 = vcmp.lt.s32.totalorder %v7222_v23, 0  ;;  %v16212_v56 = vand.u32 2147483647, %v8976_v44  ;;  %7915 = vmatprep.subr.bf16.mxu1 %v7914_v35  ;;  %v9869_v59 = vor.u32 %v1536_v36, %v1535_v57 }
 0x162   :  { %v9871_v38 = vor.u32 %v1539_v4, %v1538_v34  ;;  %v9873_v30 = vor.u32 %v1542_v9, %v1541_v62  ;;  %vm1553_vm12 = vcmp.lt.s32.totalorder %v9389_v17, 4  ;;  %v9876_v16 = vand.u32 31, %v3693_v22  ;;  %7917 = vmatpush3.bf16.msra.mxu1 %v7914_v35 }
 0x163   :  { %v1525_v28 = vand.u32 8388607, %v16212_v56  ;;  %v4200_v41 = vshrl.u32 %v4199_v31, 23  ;;  %v1272_v37 = vshll.u32 %v9857_v19, 30  ;;  %v1559_v60 = vsel %vm1553_vm12, %v1546_v20, 920167782 }
 0x164   :  { %16213 = vst [vmem:[#allocation110_spill] sm:$0xff] %v9876_v16  ;;  %v4002_v6 = vsel %vm4001_vm10, %v4000_v2, 0  ;;  %vm3898_vm13 = vcmp.gt.s32.totalorder %v3897_v3, 0  ;;  %v4096_v56 = vand.u32 2139095040, %v9849_v18  ;;  %v1563_v34 = vsel %vm1553_vm12, %v1549_v15, 1326507024 }
 0x165   :  { %v598_v62 = vmul.f32 16.0, %v9865_v8  ;;  %v9886_v57 = vsel %vm7223_vm11, 0, %v7222_v23  ;;  %vm1550_vm14 = vcmp.lt.s32.totalorder %v9389_v17, 1  ;;  %vm1552_vm15 = vcmp.lt.s32.totalorder %v9389_v17, 3 }
 0x166   :  { %v9891_v35 = vcvt.s32.f32 %v8760_v1  ;;  %v1526_v22 = vor.u32 8388608, %v1525_v28  ;;  %v1558_v36 = vsel %vm1550_vm14, %v9869_v59, %v9871_v38  ;;  %v1560_v15 = vsel %vm1552_vm15, %v9873_v30, %v1559_v60 }
 0x167   :  { %v7332_v2 = vadd.s32 4294967169, %v4200_v41  ;;  %v9901_v23 = vsub.s32 %v9804_v63, %v1272_v37  ;;  %v1562_v31 = vsel %vm1550_vm14, %v9871_v38, %v9873_v30  ;;  %v1564_v33 = vsel %vm1552_vm15, %v1546_v20, %v1563_v34  ;;  %v5445_v63 = vld [vmem:[%s15762_s2 + $0x30] sm:$0xff] }
 0x168   :  { %16214 = vst [vmem:[#allocation111_spill] sm:$0xff] %v9891_v35  ;;  %v9909_v4 = vshrl.u32 %v4002_v6, 5  ;;  %v9911_v9 = vand.u32 31, %v4002_v6  ;;  %v1388_v28 = vsub.s32 4294967266, %v9886_v57  ;;  %vm1551_vm0 = vcmp.lt.s32.totalorder %v9389_v17, 2 }
 0x169   :  { %v4097_v41 = vshrl.u32 %v4096_v56, 23  ;;  %v7918_v37 = vpack.c.bf16 %v5445_v63, %v5444_v46  ;;  %v9922_v20 = vsub.f32 %v9816_v7, %v598_v62  ;;  %v1561_v60 = vsel %vm1551_vm0, %v1558_v36, %v1560_v15 }
 0x16a   :  { %16215 = vst [vmem:[#allocation112_spill] sm:$0xff] %v9909_v4  ;;  %16216 = vst [vmem:[#allocation113_spill] sm:$0xff] %v9911_v9  ;;  %v3899_v6 = vsel %vm3898_vm13, %v3897_v3, 0  ;;  %v533_v34 = vmul.f32 0.0625, %v9891_v35  ;;  %v1565_v18 = vsel %vm1551_vm0, %v1562_v31, %v1564_v33  ;;  %v9930_v4 = vshll.u32 %v1526_v22, 8  ;;  %v5447_v31 = vld [vmem:[%s15762_s2 + $0x40] sm:$0xff] }
 0x16b   :  { %v4206_v9 = vadd.s32 1, %v7332_v2  ;;  %v9933_v16 = vmul.f32 0.7853982, %v9459_v43  ;;  %7919 = vmatprep.subr.bf16.mxu1 %v7918_v37  ;;  %v662_v56 = vmul.f32 0.125, %v9865_v8  ;;  %v1275_v62 = vsub.s32 0, %v9901_v23  ;;  %v5446_v2 = vld [vmem:[%s15762_s2 + $0x38] sm:$0xff] }
 0x16c   :  { %7921 = vmatpush3.bf16.msra.mxu1 %v7918_v37  ;;  %v1389_v36 = vadd.s32 127, %v1388_v28  ;;  %v9938_v3 = vadd.s32 24, %v8760_v1  ;;  %v9941_v15 = vmul.u32.u64.low %v9930_v4, %v1561_v60  ;;  %v9942_v46 = vmul.u32.u64.high %v9930_v4, %v1561_v60, %v9941_v15 }
 0x16d   :  { %16217 = vst [vmem:[#allocation114_spill] sm:$0xff] %v9933_v16  ;;  %v7328_v22 = vadd.s32 4294967169, %v4097_v41  ;;  %v726_v33 = vmul.f32 0.125, %v9922_v20  ;;  %v9953_v63 = vmul.u32.u64.low %v9930_v4, %v1565_v18  ;;  %v9954_v28 = vmul.u32.u64.high %v9930_v4, %v1565_v18, %v9953_v63 }
 0x16e   :  { %v9956_v37 = vshrl.u32 %v3899_v6, 5  ;;  %v7922_v60 = vpack.c.bf16 %v5447_v31, %v5446_v2  ;;  %v1384_v7 = vsub.s32 32, %v9886_v57  ;;  %v9959_v41 = vfloor.f32 %v533_v34 }
 0x16f   :  { %v9961_v43 = vand.u32 31, %v3899_v6  ;;  %vm4207_vm1 = vcmp.gt.s32.totalorder %v4206_v9, 0  ;;  %v694_v51 = vfloor.f32 %v662_v56  ;;  %v7217_v53 = vmin.u32 %v1275_v62, %v9901_v23  ;;  %v5448_v6 = vld [vmem:[%s15762_s2 + $0x48] sm:$0xff]  ;;  %v5449_v56 = vld [vmem:[%s15762_s2 + $0x50] sm:$0xff] }
 0x170   :  { %16218 = vst [vmem:[#allocation115_spill] sm:$0xff] %v9956_v37  ;;  %16219 = vst [vmem:[#allocation116_spill] sm:$0xff] %v9959_v41  ;;  %7923 = vmatprep.subr.bf16.mxu1 %v7922_v60  ;;  %v1368_v0 = vadd.s32 %v9577_v55, %v9587_v32  ;;  %v1390_v12 = vshll.u32 %v1389_v36, 23  ;;  %v1555_v2 = vsel %vm1553_vm12, %v9873_v30, 2102212464  ;;  %v4103_v31 = vadd.s32 1, %v7328_v22 }
 0x171   :  { %16220 = vst [vmem:[#allocation117_spill] sm:$0xff] %v9961_v43  ;;  %v4405_v34 = vand.u32 2139095040, %v9933_v16  ;;  %7925 = vmatpush3.bf16.msra.mxu1 %v7922_v60  ;;  %v5827_v55 = vld [vmem:[%s15762_s2 + $0x60] sm:$0xff]  ;;  %v758_v32 = vfloor.f32 %v726_v33  ;;  %v1534_v30 = vshrl.u32 %v16169_v39, %v9807_v58  ;;  %v9983_v62 = vmul.f32 0.7853982, %v9470_v24  ;;  %v5828_v22 = vld [vmem:[%s15762_s2 + $0x68] sm:$0xff] }
 0x172   :  { %v7926_v36 = vpack.c.bf16 %v5449_v56, %v5448_v6  ;;  %v1386_v63 = vshrl.u32 %v1368_v0, %v1384_v7  ;;  %v597_v60 = vmul.f32 16.0, %v9959_v41  ;;  %v7930_v18 = vpack.c.bf16 %v5828_v22, %v5827_v55 }
 0x173   :  { %16221 = vst [vmem:[#allocation118_spill] sm:$0xff] %v9983_v62  ;;  %v1277_v16 = vclz %v7217_v53  ;;  %v1554_v33 = vsel %vm1550_vm14, %v1534_v30, %v9869_v59  ;;  %v1556_v58 = vsel %vm1552_vm15, %v9871_v38, %v1555_v2  ;;  %v1385_v6 = vshll.u32 %v9765_v48, %v9886_v57 }
 0x174   :  { %7927 = vmatprep.subr.bf16.mxu1 %v7926_v36  ;;  %v1391_v56 = vor.u32 4788187, %v1390_v12  ;;  %v16222_v24 = vcvt.s32.f32 %v9938_v3  ;;  %v1576_v7 = vadd.s32 1, %v9942_v46  ;;  %7931 = vmatprep.subr.bf16.mxu0 %v7930_v18  ;;  %vm790_vm3 = vcmp.eq.f32.partialorder %v694_v51, %v758_v32  ;;  %v5830_v32 = vld [vmem:[%s15762_s2 + $0x78] sm:$0xff] }
 0x175   :  { %7929 = vmatpush3.bf16.msra.mxu1 %v7926_v36  ;;  %vm822_vm4 = vcmp.ne.f32.partialorder %v9865_v8, %v9922_v20  ;;  %v1398_v53 = vsub.s32 4, %v9731_v29  ;;  %vm1575_vm5 = vc.u32 %v9954_v28, %v9941_v15  ;;  %7933 = vmatpush3.bf16.msra.mxu0 %v7930_v18  ;;  %vm854_vm6 = vcmp.le.f32.partialorder %v8984_v61, 4.0 }
 0x176   :  { %v536_v0 = vmul.f32 0.0625, %v16222_v24  ;;  %v1387_v12 = vor.u32 %v1386_v63, %v1385_v6  ;;  %v1557_v24 = vsel %vm1551_vm0, %v1554_v33, %v1556_v58  ;;  %v4208_v48 = vsel %vm4207_vm1, %v4206_v9, 0  ;;  %vm886_vm8 = vmand %vm790_vm3, %vm822_vm4 }
 0x177   :  { %vm4104_vm7 = vcmp.gt.s32.totalorder %v4103_v31, 0  ;;  %v10010_v51 = vsub.f32 %v9891_v35, %v597_v60  ;;  %v7218_v59 = vadd.s32 4294967294, %v1277_v16  ;;  %vm1314_vm9 = vcmp.lt.s32.totalorder %v9014_v14, 0  ;;  %vm918_vm11 = vmand %vm886_vm8, %vm854_vm6 }
 0x178   :  { %v1392_v38 = vand.u32 2147483647, %v1391_v56  ;;  %v10013_v8 = vfloor.f32 %v536_v0  ;;  %v1577_v57 = vsel %vm1575_vm5, %v1576_v7, %v9942_v46  ;;  %v4406_v20 = vshrl.u32 %v4405_v34, 23 }
 0x179   :  { %16223 = vst [vmem:[#allocation119_spill] sm:$0xff] %v10010_v51  ;;  %v4302_v18 = vand.u32 2139095040, %v9983_v62  ;;  %v1399_v17 = vsel %vm1314_vm9, %v1398_v53, %v9731_v29  ;;  %v1573_v9 = vmul.u32 %v9930_v4, %v1557_v24  ;;  %v10021_v2 = vshrl.u32 %v4208_v48, 5 }
 0x17a   :  { %16224 = vst [vmem:[#allocation120_spill] sm:$0xff] %v10013_v8  ;;  %v10023_v16 = vsel %vm4104_vm7, %v4103_v31, 0  ;;  %v16227_v55 = vand.u32 2147483647, %v9014_v14  ;;  %v1394_v46 = vcvt.s32.f32 %v1387_v12  ;;  %v10034_v34 = vmul.f32 0.125, %v9959_v41 }
 0x17b   :  { %16225 = vst [vmem:[#allocation121_spill] sm:$0xff] %v10021_v2  ;;  %16226 = vst [vmem:[#allocation122_spill] sm:$0xff] %v10023_v16  ;;  %v10037_v29 = vmul.f32 0.125, %v10010_v51  ;;  %vm7219_vm12 = vcmp.lt.s32.totalorder %v7218_v59, 0  ;;  %v10039_v4 = vadd.s32 %v1577_v57, %v1573_v9  ;;  %v10041_v31 = vand.u32 31, %v4208_v48 }
 0x17c   :  { %vm10027_vm10 = vcmp.le.f32.partialorder %v16227_v55, 0.7853982  ;;  %16230 = vst [vmem:[#allocation123_spill] sm:$0xff] %v10034_v34  ;;  %v10043_v30 = vmul.f32 %v1394_v46, %v1392_v38  ;;  %v600_v22 = vmul.f32 16.0, %v10013_v8  ;;  %v10049_v61 = vshrl.u32 %v10023_v16, 5 }
 0x17d   :  { %16231 = vst [vmem:[#allocation124_spill] sm:$0xff] %v10037_v29  ;;  %16232 = vst [vmem:[#allocation125_spill] sm:$0xff] %v10041_v31  ;;  %v1401_v36 = vsel %vm10027_vm10, 0, %v1399_v17  ;;  %v10051_v63 = vadd.s32 4294967169, %v4406_v20  ;;  %v10053_v60 = vshrl.u32 %v4302_v18, 23  ;;  %v10056_v33 = vsub.s32 32, %v9418_v10 }
 0x17e   :  { %16233 = vst [vmem:[#allocation126_spill] sm:$0xff] %v10049_v61  ;;  %v15932_v58 = vmov 0.0   ;;  %v10061_v56 = vsel %vm7219_vm12, 0, %v7218_v59  ;;  %v15931_v0 = vand.u32 2147483647, %v8925_v26  ;;  %v10065_v7 = vsub.s32 32, %v9362_v47 }
 0x17f   :  { %16234 = vst [vmem:[#allocation127_spill] sm:$0xff] %v10051_v63  ;;  %16235 = vst [vmem:[#allocation128_spill] sm:$0xff] %v10053_v60  ;;  %v10059_v6 = vsel %vm918_vm11, 1.0, %v15932_v58  ;;  %v10067_v53 = vand.u32 3, %v1401_v36  ;;  %v1579_v48 = vadd.s32 536870912, %v10039_v4  ;;  %v10075_v57 = vadd.s32 %v9744_v21, %v9751_v49 }
 0x180   :  { %16236 = vst [vmem:[#allocation129_spill] sm:$0xff] %v10059_v6  ;;  %v16237_v59 = vcvt.s32.f32 %v9938_v3  ;;  %v15941_v18 = vand.u32 2147483647, %v9094_v50  ;;  %v10084_v9 = vadd.s32 16, %v8760_v1  ;;  %v1742_v55 = vshrl.u32 %v16180_v52, %v10056_v33 }
 0x181   :  { %v1745_v46 = vshrl.u32 %v16181_v40, %v10056_v33  ;;  %v10092_v21 = vand.u32 8388607, %v15931_v0  ;;  %v1432_v49 = vshll.u32 %v16169_v39, %v9362_v47  ;;  %v1433_v3 = vshrl.u32 %v16180_v52, %v10065_v7 }
 0x182   :  { %v10079_v20 = vsub.f32 %v16237_v59, %v600_v22  ;;  %v1748_v36 = vshrl.u32 %v16179_v27, %v10056_v33  ;;  %v10100_v22 = vshrl.u32 %v1579_v48, 30  ;;  %v1435_v59 = vshll.u32 %v16180_v52, %v9362_v47 }
 0x183   :  { %v1741_v12 = vshll.u32 %v16169_v39, %v9418_v10  ;;  %v1744_v24 = vshll.u32 %v16180_v52, %v9418_v10  ;;  %v1731_v0 = vand.u32 8388607, %v15941_v18  ;;  %v1747_v58 = vshll.u32 %v16181_v40, %v9418_v10 }
 0x184   :  { %16238 = vst [vmem:[#allocation130_spill] sm:$0xff] %v10079_v20  ;;  %v1750_v17 = vshll.u32 %v16179_v27, %v9418_v10  ;;  %v1751_v48 = vshrl.u32 %v16176_v5, %v10056_v33  ;;  %v1436_v38 = vshrl.u32 %v16181_v40, %v10065_v7  ;;  %v1445_v35 = vshrl.u32 %v16178_v25, %v10065_v7 }
 0x185   :  { %v1743_v62 = vor.u32 %v1742_v55, %v1741_v12  ;;  %v1746_v61 = vor.u32 %v1745_v46, %v1744_v24  ;;  %v1749_v2 = vor.u32 %v1748_v36, %v1747_v58  ;;  %v1753_v18 = vshll.u32 %v16176_v5, %v9418_v10 }
 0x186   :  { %v1752_v31 = vor.u32 %v1751_v48, %v1750_v17  ;;  %v1754_v37 = vshrl.u32 %v16178_v25, %v10056_v33  ;;  %v1438_v43 = vshll.u32 %v16181_v40, %v9362_v47  ;;  %v1439_v16 = vshrl.u32 %v16179_v27, %v10065_v7 }
 0x187   :  { %v1442_v60 = vshrl.u32 %v16176_v5, %v10065_v7  ;;  %v1444_v12 = vshll.u32 %v16176_v5, %v9362_v47  ;;  %v1581_v58 = vshll.u32 %v10100_v22, 30  ;;  %v1441_v10 = vshll.u32 %v16179_v27, %v9362_v47 }
 0x188   :  { %v1732_v24 = vor.u32 8388608, %v1731_v0  ;;  %v1755_v17 = vor.u32 %v1754_v37, %v1753_v18  ;;  %vm1756_vm13 = vcmp.lt.s32.totalorder %v9413_v45, 1  ;;  %vm1758_vm14 = vcmp.lt.s32.totalorder %v9413_v45, 3 }
 0x189   :  { %v1446_v55 = vor.u32 %v1445_v35, %v1444_v12  ;;  %vm1759_vm15 = vcmp.lt.s32.totalorder %v9413_v45, 4  ;;  %v1764_v46 = vsel %vm1756_vm13, %v1743_v62, %v1746_v61  ;;  %v1768_v48 = vsel %vm1756_vm13, %v1746_v61, %v1749_v2 }
 0x18a   :  { %v1765_v36 = vsel %vm1759_vm15, %v1752_v31, 920167782  ;;  %v1769_v63 = vsel %vm1759_vm15, %v1755_v17, 1326507024  ;;  %v1443_v6 = vor.u32 %v1442_v60, %v1441_v10  ;;  %vm1757_vm0 = vcmp.lt.s32.totalorder %v9413_v45, 2 }
 0x18b   :  { %v1766_v47 = vsel %vm1758_vm14, %v1749_v2, %v1765_v36  ;;  %v1770_v35 = vsel %vm1758_vm14, %v1752_v31, %v1769_v63  ;;  %v10147_v37 = vor.u32 %v1436_v38, %v1435_v59  ;;  %v1761_v0 = vsel %vm1759_vm15, %v1749_v2, 2102212464 }
 0x18c   :  { %v1771_v18 = vsel %vm1757_vm0, %v1768_v48, %v1770_v35  ;;  %v1772_v12 = vshll.u32 %v1732_v24, 8  ;;  %v10151_v41 = vor.u32 %v1439_v16, %v1438_v43  ;;  %vm1450_vm1 = vcmp.lt.s32.totalorder %v9073_v13, 4 }
 0x18d   :  { %v1740_v60 = vshrl.u32 %v16169_v39, %v10056_v33  ;;  %v1767_v10 = vsel %vm1757_vm0, %v1764_v46, %v1766_v47  ;;  %v10158_v17 = vor.u32 %v1433_v3, %v1432_v49  ;;  %v1460_v31 = vsel %vm1450_vm1, %v1446_v55, 1326507024 }
 0x18e   :  { %v10162_v2 = vmul.u32.u64.low %v1772_v12, %v1771_v18  ;;  %v10163_v63 = vmul.u32.u64.high %v1772_v12, %v1771_v18, %v10162_v2  ;;  %v10166_v38 = vsub.s32 %v10039_v4, %v1581_v58  ;;  %v1456_v43 = vsel %vm1450_vm1, %v1443_v6, 920167782 }
 0x18f   :  { %v1760_v16 = vsel %vm1756_vm13, %v1740_v60, %v1743_v62  ;;  %v1762_v33 = vsel %vm1758_vm14, %v1746_v61, %v1761_v0  ;;  %vm1447_vm3 = vcmp.lt.s32.totalorder %v9073_v13, 1  ;;  %vm1449_vm4 = vcmp.lt.s32.totalorder %v9073_v13, 3 }
 0x190   :  { %v10176_v49 = vmul.u32.u64.low %v1772_v12, %v1767_v10  ;;  %v10177_v3 = vmul.u32.u64.high %v1772_v12, %v1767_v10, %v10176_v49  ;;  %v15948_v4 = vcvt.s32.f32 %v10084_v9  ;;  %v1423_v59 = vor.u32 8388608, %v10092_v21 }
 0x191   :  { %v1459_v62 = vsel %vm1447_vm3, %v10147_v37, %v10151_v41  ;;  %v1461_v61 = vsel %vm1449_vm4, %v1443_v6, %v1460_v31  ;;  %v1281_v58 = vsub.s32 32, %v10061_v56  ;;  %v1455_v24 = vsel %vm1447_vm3, %v10158_v17, %v10147_v37 }
 0x192   :  { %v1457_v55 = vsel %vm1449_vm4, %v10151_v41, %v1456_v43  ;;  %v1763_v21 = vsel %vm1757_vm0, %v1760_v16, %v1762_v33  ;;  %v16239_v46 = vxor.u32 2147483648, %v10043_v30  ;;  %v16240_v36 = vsub.s32 4294967266, %v10061_v56 }
 0x193   :  { %vm1448_vm5 = vcmp.lt.s32.totalorder %v9073_v13, 2  ;;  %vm1781_vm6 = vc.u32 %v10163_v63, %v10176_v49  ;;  %v10209_v47 = vmul.f32 0.125, %v10013_v8  ;;  %v1584_v45 = vsub.s32 0, %v10166_v38 }
 0x194   :  { %v1397_v6 = vsel %vm1314_vm9, %v16239_v46, %v10043_v30  ;;  %v1286_v48 = vadd.s32 127, %v16240_v36  ;;  %v1462_v35 = vsel %vm1448_vm5, %v1459_v62, %v1461_v61  ;;  %v1782_v0 = vadd.s32 1, %v10177_v3 }
 0x195   :  { %16241 = vst [vmem:[#allocation131_spill] sm:$0xff] %v10209_v47  ;;  %v10216_v30 = vmul.f32 0.125, %v10079_v20  ;;  %v1458_v18 = vsel %vm1448_vm5, %v1455_v24, %v1457_v55  ;;  %v10220_v60 = vshll.u32 %v1423_v59, 8  ;;  %v1779_v10 = vmul.u32 %v1772_v12, %v1763_v21  ;;  %v5829_v12 = vld [vmem:[%s15762_s2 + $0x70] sm:$0xff] }
 0x196   :  { %v1400_v31 = vsel %vm10027_vm10, %v9014_v14, %v1397_v6  ;;  %v1283_v2 = vshrl.u32 %v10075_v57, %v1281_v58  ;;  %v535_v43 = vmul.f32 0.0625, %v15948_v4  ;;  %v1783_v16 = vsel %vm1781_vm6, %v1782_v0, %v10177_v3 }
 0x197   :  { %16242 = vst [vmem:[#allocation132_spill] sm:$0xff] %v10216_v30  ;;  %v1287_v33 = vshll.u32 %v1286_v48, 23  ;;  %v10230_v62 = vmul.u32.u64.low %v10220_v60, %v1462_v35  ;;  %v10231_v61 = vmul.u32.u64.high %v10220_v60, %v1462_v35, %v10230_v62  ;;  %v1784_v24 = vadd.s32 %v1783_v16, %v1779_v10  ;;  %v18_v16 = vld [vmem:[%s15761_s1 + $0x8] sm:$0xff] }
 0x198   :  { %v7229_v57 = vmin.u32 %v1584_v45, %v10166_v38  ;;  %v10241_v59 = vmul.u32.u64.low %v10220_v60, %v1458_v18  ;;  %v10242_v58 = vmul.u32.u64.high %v10220_v60, %v1458_v18, %v10241_v59  ;;  %v10246_v3 = vsub.s32 32, %v9432_v54 }
 0x199   :  { %16243 = vst [vmem:[#allocation133_spill] sm:$0xff] %v10231_v61  ;;  %v7934_v55 = vpack.c.bf16 %v5830_v32, %v5829_v12  ;;  %8414 = vcosq.f32 %v1400_v31  ;;  %v1282_v21 = vshll.u32 %v9901_v23, %v10061_v56  ;;  %v1785_v46 = vadd.s32 536870912, %v1784_v24 }
 0x19a   :  { %16244 = vst [vmem:[#allocation134_spill] sm:$0xff] %v10241_v59  ;;  %8416 = vsinq.f32 %v1400_v31  ;;  %v10251_v36 = vfloor.f32 %v535_v43  ;;  %v15947_v48 = vand.u32 2147483647, %v9260_v11  ;;  %v10256_v35 = vor.u32 4788187, %v1287_v33 }
 0x19b   :  { %7935 = vmatprep.subr.bf16.mxu0 %v7934_v55  ;;  %v10254_v45 = vor.u32 %v1283_v2, %v1282_v21  ;;  %v1431_v0 = vshrl.u32 %v16169_v39, %v10065_v7  ;;  %v10260_v18 = vshrl.u32 %v1785_v46, 30  ;;  %v1586_v23 = vclz %v7229_v57  ;;  %v17_v2 = vld [vmem:[%s15761_s1] sm:$0xff] }
 0x19c   :  { %16245 = vst [vmem:[#allocation135_spill] sm:$0xff] %v10251_v36  ;;  %7937 = vmatpush3.bf16.msra.mxu0 %v7934_v55  ;;  %v1452_v56 = vsel %vm1450_vm1, %v10151_v41, 2102212464  ;;  %v1639_v10 = vshrl.u32 %v16180_v52, %v10246_v3  ;;  %v1642_v31 = vshrl.u32 %v16181_v40, %v10246_v3  ;;  %vm16062_vm7 = vcmask 261120  }
 0x19d   :  { %v1451_v7 = vsel %vm1447_vm3, %v1431_v0, %v10158_v17  ;;  %v1787_v43 = vshll.u32 %v10260_v18, 30  ;;  %v1645_v41 = vshrl.u32 %v16179_v27, %v10246_v3  ;;  %7816 = vmatprep.mubr.msk.f32.mxu0 %vm16062_vm7, %v17_v2  ;;  %v1628_v33 = vand.u32 8388607, %v15947_v48 }
 0x19e   :  { %v1638_v62 = vshll.u32 %v16169_v39, %v9432_v54  ;;  %v1641_v17 = vshll.u32 %v16180_v52, %v9432_v54  ;;  %v1648_v12 = vshrl.u32 %v16176_v5, %v10246_v3  ;;  %v1453_v32 = vsel %vm1449_vm4, %v10147_v37, %v1452_v56 }
 0x19f   :  { %7817 = vmatmul.mubr.msk.f32.vlgmr.msra.gmra.mrb[32].mxu0 %vm16062_vm7, %v18_v16  ;;  %v10294_v57 = vsub.s32 %v1784_v24, %v1787_v43  ;;  %v1644_v55 = vshll.u32 %v16181_v40, %v9432_v54  ;;  %v1647_v21 = vshll.u32 %v16179_v27, %v9432_v54  ;;  %vm1211_vm8 = vcmp.lt.s32.totalorder %v8945_v42, 0 }
 0x1a0   :  { %vm1472_vm9 = vc.u32 %v10231_v61, %v10241_v59  ;;  %v1473_v46 = vadd.s32 1, %v10242_v58  ;;  %v1640_v0 = vor.u32 %v1639_v10, %v1638_v62  ;;  %v1643_v2 = vor.u32 %v1642_v31, %v1641_v17 }
 0x1a1   :  { %v1790_v16 = vsub.s32 0, %v10294_v57  ;;  %v1646_v37 = vor.u32 %v1645_v41, %v1644_v55  ;;  %v1649_v24 = vor.u32 %v1648_v12, %v1647_v21  ;;  %v1651_v56 = vshrl.u32 %v16178_v25, %v10246_v3 }
 0x1a2   :  { %v1289_v43 = vand.u32 2147483647, %v10256_v35  ;;  %v1291_v48 = vcvt.s32.f32 %v10254_v45  ;;  %v1629_v4 = vor.u32 8388608, %v1628_v33  ;;  %v1650_v6 = vshll.u32 %v16176_v5, %v9432_v54  ;;  %v16249_v35 = vld [vmem:[#allocation49_spill] sm:$0xff] }
 0x1a3   :  { %v8415_v8 = vpop.eup %8414  ;;  %v16246_v20 = vand.u32 2147483647, %v8945_v42  ;;  %v7230_v31 = vadd.s32 4294967294, %v1586_v23  ;;  %v1454_v41 = vsel %vm1448_vm5, %v1451_v7, %v1453_v32  ;;  %v7237_v62 = vmin.u32 %v1790_v16, %v10294_v57 }
 0x1a4   :  { %vm1653_vm11 = vcmp.lt.s32.totalorder %v16249_v35, 1  ;;  %v8417_v45 = vpop.eup %8416  ;;  %v1474_v54 = vsel %vm1472_vm9, %v1473_v46, %v10242_v58  ;;  %v1652_v33 = vor.u32 %v1651_v56, %v1650_v6  ;;  %vm1656_vm12 = vcmp.lt.s32.totalorder %v16249_v35, 4 }
 0x1a5   :  { %vm10313_vm10 = vcmp.le.f32.partialorder %v16246_v20, 0.7853982  ;;  %v1661_v20 = vsel %vm1653_vm11, %v1640_v0, %v1643_v2  ;;  %v1792_v23 = vclz %v7237_v62  ;;  %vm1655_vm13 = vcmp.lt.s32.totalorder %v16249_v35, 3 }
 0x1a6   :  { %v1662_v13 = vsel %vm1656_vm12, %v1649_v24, 920167782  ;;  %v1665_v7 = vsel %vm1653_vm11, %v1643_v2, %v1646_v37  ;;  %vm1654_vm14 = vcmp.lt.s32.totalorder %v16249_v35, 2  ;;  %v1666_v6 = vsel %vm1656_vm12, %v1652_v33, 1326507024 }
 0x1a7   :  { %v1663_v58 = vsel %vm1655_vm13, %v1646_v37, %v1662_v13  ;;  %v10338_v17 = vshll.u32 %v1629_v4, 8  ;;  %v1470_v12 = vmul.u32 %v10220_v60, %v1454_v41  ;;  %v7238_v32 = vadd.s32 4294967294, %v1792_v23 }
 0x1a8   :  { %v1664_v55 = vsel %vm1654_vm14, %v1661_v20, %v1663_v58  ;;  %v1667_v21 = vsel %vm1655_vm13, %v1649_v24, %v1666_v6  ;;  %v1292_v46 = vmul.f32 %v1291_v48, %v1289_v43  ;;  %v16250_v4 = vsub.s32 4, %v9857_v19 }
 0x1a9   :  { %v1668_v16 = vsel %vm1654_vm14, %v1665_v7, %v1667_v21  ;;  %v10348_v56 = vmul.u32.u64.low %v10338_v17, %v1664_v55  ;;  %v10349_v62 = vmul.u32.u64.high %v10338_v17, %v1664_v55, %v10348_v56  ;;  %v10357_v41 = vadd.s32 %v1474_v54, %v1470_v12 }
 0x1aa   :  { %v1296_v60 = vsel %vm1211_vm8, %v16250_v4, %v9857_v19  ;;  %v10360_v33 = vmul.u32.u64.low %v10338_v17, %v1668_v16  ;;  %v10361_v24 = vmul.u32.u64.high %v10338_v17, %v1668_v16, %v10360_v33  ;;  %vm1406_vm15 = vcmp.lt.s32.totalorder %v10067_v53, 2 }
 0x1ab   :  { %vm1407_vm0 = vcmp.eq.s32.totalorder %v10067_v53, 0  ;;  %vm1410_vm1 = vcmp.eq.s32.totalorder %v10067_v53, 2  ;;  %vm7239_vm3 = vcmp.lt.s32.totalorder %v7238_v32, 0  ;;  %v1411_v48 = vxor.u32 2147483648, %v8415_v8 }
 0x1ac   :  { %vm7231_vm4 = vcmp.lt.s32.totalorder %v7230_v31, 0  ;;  %v599_v43 = vmul.f32 16.0, %v10251_v36  ;;  %v1658_v19 = vsel %vm1656_vm12, %v1646_v37, 2102212464  ;;  %v1408_v54 = vxor.u32 2147483648, %v8417_v45 }
 0x1ad   :  { %v1293_v20 = vxor.u32 2147483648, %v1292_v46  ;;  %v1298_v23 = vsel %vm10313_vm10, 0, %v1296_v60  ;;  %vm1520_vm5 = vcmp.lt.s32.totalorder %v8976_v44, 0  ;;  %v1637_v13 = vshrl.u32 %v16169_v39, %v10246_v3  ;;  %v10391_v3 = vld [vmem:[%s15762_s2 + $0x10] ss:$0 sm:$0xff] }
 0x1ae   :  { %v1476_v6 = vadd.s32 536870912, %v10357_v41  ;;  %v10377_v12 = vsel %vm7239_vm3, 0, %v7238_v32  ;;  %v10379_v55 = vsel %vm7231_vm4, 0, %v7230_v31  ;;  %v10382_v37 = vmul.f32 0.125, %v10251_v36 }
 0x1af   :  { %v1657_v21 = vsel %vm1653_vm11, %v1637_v13, %v1640_v0  ;;  %v1659_v16 = vsel %vm1655_vm13, %v1643_v2, %v1658_v19  ;;  %v1412_v32 = vsel %vm1410_vm1, %v1411_v48, %v8417_v45  ;;  %v10395_v4 = vand.u32 3, %v1298_v23  ;;  %v7698_v45 = vpop.f32.mrb[0].mxu0 }
 0x1b0   :  { %16251 = vst [vmem:[#allocation49_spill] sm:$0xff] %v10382_v37  ;;  %v16253_v31 = vcvt.s32.f32 %v10084_v9  ;;  %v1679_v33 = vadd.s32 1, %v10349_v62  ;;  %v1409_v0 = vsel %vm1407_vm0, %v8415_v8, %v1408_v54  ;;  %v1294_v2 = vsel %vm1211_vm8, %v1293_v20, %v1292_v46  ;;  %v4771_v54 = vpop.f32.mrb[1].mxu0 }
 0x1b1   :  { %16252 = vst [vmem:[#allocation136_spill] sm:$0xff] %v10395_v4  ;;  %v1800_v19 = vsub.s32 4294967266, %v10377_v12  ;;  %vm1678_vm6 = vc.u32 %v10361_v24, %v10348_v56  ;;  %v1594_v48 = vsub.s32 4294967266, %v10379_v55  ;;  %v1604_v9 = vsub.s32 4, %v10100_v22 }
 0x1b2   :  { %v10399_v60 = vsub.f32 %v16253_v31, %v599_v43  ;;  %v10411_v43 = vshrl.u32 %v1476_v6, 30  ;;  %v1660_v23 = vsel %vm1654_vm14, %v1657_v21, %v1659_v16  ;;  %v10416_v8 = vadd.f32 %v7698_v45, %v10391_v3  ;;  %v7701_v53 = vpop.f32.mrb[2].mxu0 }
 0x1b3   :  { %v1574_v46 = vadd.s32 %v9941_v15, %v9954_v28  ;;  %v10422_v13 = vadd.s32 40, %v8760_v1  ;;  %v10426_v31 = vsel %vm1406_vm15, %v1409_v0, %v1412_v32  ;;  %v10431_v35 = vsel %vm10313_vm10, %v8945_v42, %v1294_v2 }
 0x1b4   :  { %16254 = vst [vmem:[#allocation137_spill] sm:$0xff] %v10399_v60  ;;  %16255 = vst [vmem:[#allocation138_spill] sm:$0xff] %v10411_v43  ;;  %v10434_v6 = vmul.f32 0.125, %v10399_v60  ;;  %v1680_v21 = vsel %vm1678_vm6, %v1679_v33, %v10349_v62  ;;  %v4963_v15 = vand.u32 2147483647, %v10416_v8  ;;  %v1590_v28 = vsub.s32 32, %v10379_v55 }
 0x1b5   :  { %16256 = vst [vmem:[#allocation139_spill] sm:$0xff] %v10426_v31  ;;  %16257 = vst [vmem:[#allocation140_spill] sm:$0xff] %v10431_v35  ;;  %v1801_v16 = vadd.s32 127, %v1800_v19  ;;  %v1676_v45 = vmul.u32 %v10338_v17, %v1660_v23  ;;  %v1595_v32 = vadd.s32 127, %v1594_v48  ;;  %v10443_v10 = vsel %vm1520_vm5, %v1604_v9, %v10100_v22  ;;  %v4781_v33 = vpop.f32.mrb[3].mxu0 }
 0x1b6   :  { %16258 = vst [vmem:[#allocation141_spill] sm:$0xff] %v10434_v6  ;;  %16259 = vst [vmem:[#allocation142_spill] sm:$0xff] %v10443_v10  ;;  %v1478_v0 = vshll.u32 %v10411_v43, 30  ;;  %v1796_v2 = vsub.s32 32, %v10377_v12  ;;  %v4995_v20 = vsub.f32 0.0, %v4963_v15  ;;  %v10448_v62 = vadd.f32 %v7701_v53, %v10391_v3 }
 0x1b7   :  { %v10451_v7 = vadd.s32 %v1680_v21, %v1676_v45  ;;  %v10454_v17 = vadd.f32 %v10391_v3, %v4781_v33  ;;  %8418 = vcosq.f32 %v10431_v35  ;;  %v1591_v22 = vshll.u32 %v10166_v38, %v10379_v55  ;;  %v7704_v21 = vpop.f32.mrb[4].mxu0 }
 0x1b8   :  { %v1780_v48 = vadd.s32 %v10176_v49, %v10163_v63  ;;  %v5028_v9 = vmul.f32 1.442695, %v4995_v20  ;;  %v4965_v23 = vand.u32 2147483647, %v10448_v62  ;;  %v1592_v15 = vshrl.u32 %v1574_v46, %v1590_v28  ;;  %v4791_v38 = vpop.f32.mrb[5].mxu0 }
 0x1b9   :  { %v1802_v53 = vshll.u32 %v1801_v16, 23  ;;  %v4964_v58 = vand.u32 2147483647, %v10454_v17  ;;  %v1596_v45 = vshll.u32 %v1595_v32, 23  ;;  %v10464_v33 = vsub.s32 %v10357_v41, %v1478_v0 }
 0x1ba   :  { %v1798_v19 = vshrl.u32 %v1780_v48, %v1796_v2  ;;  %v4997_v36 = vsub.f32 0.0, %v4965_v23  ;;  %v10467_v60 = vadd.f32 %v7704_v21, %v10391_v3  ;;  %v16261_v63 = vcvt.s32.f32 %v10422_v13  ;;  %v7707_v23 = vpop.f32.mrb[6].mxu0 }
 0x1bb   :  { %16260 = vst [vmem:[#allocation143_spill] sm:$0xff] %v10464_v33  ;;  %v1682_v55 = vadd.s32 536870912, %v10451_v7  ;;  %v10473_v46 = vadd.f32 %v10391_v3, %v4771_v54  ;;  %v4996_v20 = vsub.f32 0.0, %v4964_v58  ;;  %v10476_v28 = vadd.f32 %v10391_v3, %v4791_v38  ;;  %v4801_v38 = vpop.f32.mrb[7].mxu0 }
 0x1bc   :  { %v538_v49 = vmul.f32 0.0625, %v16261_v63  ;;  %v1797_v41 = vshll.u32 %v10294_v57, %v10377_v12  ;;  %8420 = vpow2.f32 %v5028_v9  ;;  %v5032_v16 = vmul.f32 1.442695, %v4997_v36 }
 0x1bd   :  { %v4967_v32 = vand.u32 2147483647, %v10467_v60  ;;  %v1803_v0 = vor.u32 4788187, %v1802_v53  ;;  %v5030_v2 = vmul.f32 1.442695, %v4996_v20  ;;  %v10484_v58 = vadd.f32 %v7707_v23, %v10391_v3 }
 0x1be   :  { %v4966_v48 = vand.u32 2147483647, %v10476_v28  ;;  %v1481_v21 = vsub.s32 0, %v10464_v33  ;;  %v1799_v54 = vor.u32 %v1798_v19, %v1797_v41  ;;  %v10487_v37 = vadd.s32 32, %v8760_v1 }
 0x1bf   :  { %v4999_v63 = vsub.f32 0.0, %v4967_v32  ;;  %v10489_v57 = vshrl.u32 %v1682_v55, 30  ;;  %v4962_v36 = vand.u32 2147483647, %v10473_v46  ;;  %8422 = vpow2.f32 %v5032_v16  ;;  %v7710_v32 = vpop.f32.mrb[8].mxu0 }
 0x1c0   :  { %16262 = vst [vmem:[#allocation144_spill] sm:$0xff] %v10487_v37  ;;  %v4998_v12 = vsub.f32 0.0, %v4966_v48  ;;  %v10493_v9 = vadd.f32 %v10391_v3, %v4801_v38  ;;  %8424 = vpow2.f32 %v5030_v2  ;;  %v4969_v19 = vand.u32 2147483647, %v10484_v58  ;;  %v4811_v2 = vpop.f32.mrb[9].mxu0 }
 0x1c1   :  { %16263 = vst [vmem:[#allocation145_spill] sm:$0xff] %v10489_v57  ;;  %v5036_v53 = vmul.f32 1.442695, %v4999_v63  ;;  %v1804_v20 = vand.u32 2147483647, %v1803_v0  ;;  %v10496_v41 = vpop.eup %8418  ;;  %v7225_v47 = vmin.u32 %v1481_v21, %v10464_v33  ;;  %v10499_v55 = vfloor.f32 %v538_v49 }
 0x1c2   :  { %16264 = vst [vmem:[#allocation146_spill] sm:$0xff] %v10496_v41  ;;  %v1597_v23 = vor.u32 4788187, %v1596_v45  ;;  %v1806_v30 = vcvt.s32.f32 %v1799_v54  ;;  %v5034_v51 = vmul.f32 1.442695, %v4998_v12  ;;  %v10503_v48 = vadd.f32 %v7710_v32, %v10391_v3 }
 0x1c3   :  { %16265 = vst [vmem:[#allocation147_spill] sm:$0xff] %v10499_v55  ;;  %v4968_v16 = vand.u32 2147483647, %v10493_v9  ;;  %v1684_v63 = vshll.u32 %v10489_v57, 30  ;;  %v4994_v38 = vsub.f32 0.0, %v4962_v36  ;;  %v10507_v0 = vadd.f32 %v10391_v3, %v4811_v2  ;;  %v7713_v2 = vpop.f32.mrb[10].mxu0 }
 0x1c4   :  { %v1593_v34 = vor.u32 %v1592_v15, %v1591_v22  ;;  %8426 = vpow2.f32 %v5036_v53  ;;  %v5001_v49 = vsub.f32 0.0, %v4969_v19  ;;  %v4971_v21 = vand.u32 2147483647, %v10503_v48 }
 0x1c5   :  { %v1807_v54 = vmul.f32 %v1806_v30, %v1804_v20  ;;  %v1598_v12 = vand.u32 2147483647, %v1597_v23  ;;  %v1483_v29 = vclz %v7225_v47  ;;  %v602_v32 = vmul.f32 16.0, %v10499_v55  ;;  %v10520_v20 = vpop.f32.mrb[11].mxu0 }
 0x1c6   :  { %vm1726_vm8 = vcmp.lt.s32.totalorder %v9094_v50, 0  ;;  %v10513_v42 = vpop.eup %8420  ;;  %8428 = vpow2.f32 %v5034_v51  ;;  %v5000_v36 = vsub.f32 0.0, %v4968_v16  ;;  %v1810_v22 = vsub.s32 4, %v10260_v18 }
 0x1c7   :  { %v10517_v15 = vsub.s32 %v10451_v7, %v1684_v63  ;;  %v5026_v53 = vmul.f32 1.442695, %v4994_v38  ;;  %v5003_v19 = vsub.f32 0.0, %v4971_v21  ;;  %v4970_v30 = vand.u32 2147483647, %v10507_v0  ;;  %v10533_v38 = vpop.f32.mrb[12].mxu0 }
 0x1c8   :  { %v1600_v47 = vcvt.s32.f32 %v1593_v34  ;;  %v5040_v23 = vmul.f32 1.442695, %v5001_v49  ;;  %v16267_v45 = vand.u32 2147483647, %v9094_v50  ;;  %v16268_v43 = vmov 0  ;;  %v10546_v31 = vpop.f32.mrb[13].mxu0 }
 0x1c9   :  { %16266 = vst [vmem:[#allocation148_spill] sm:$0xff] %v10517_v15  ;;  %v1808_v51 = vxor.u32 2147483648, %v1807_v54  ;;  %v16271_v16 = vcvt.s32.f32 %v10487_v37  ;;  %v10530_v7 = vpop.eup %8422  ;;  %v5099_v63 = vadd.f32 1.0, %v10513_v42  ;;  %v16273_v34 = vcvt.s32.f32 %v10422_v13 }
 0x1ca   :  { %vm10524_vm9 = vcmp.le.f32.partialorder %v16267_v45, 0.7853982  ;;  %v10535_v21 = vmul.f32 %v1600_v47, %v1598_v12  ;;  %v10542_v45 = vadd.s32 56, %v8760_v1  ;;  %v10544_v10 = vpop.eup %8424  ;;  %v5038_v41 = vmul.f32 1.442695, %v5000_v36 }
 0x1cb   :  { %v16269_v43 = vsel %vm10524_vm9, 4294967295, %v16268_v43  ;;  %v537_v6 = vmul.f32 0.0625, %v16271_v16  ;;  %v10539_v49 = vsub.f32 %v16273_v34, %v602_v32  ;;  %v10548_v16 = vadd.s32 4294967294, %v1483_v29 }
 0x1cc   :  { %16270 = vst [vmem:[#allocation149_spill] sm:$0xff] %v16269_v43  ;;  %16272 = vst [vmem:[#allocation150_spill] sm:$0xff] %v10535_v21  ;;  %v10553_v26 = vsel %vm1726_vm8, %v1810_v22, %v10260_v18  ;;  %v1687_v12 = vsub.s32 0, %v10517_v15  ;;  %8430 = vpow2.f32 %v5026_v53  ;;  %v5044_v13 = vmul.f32 1.442695, %v5003_v19  ;;  %v10565_v22 = vpop.f32.mrb[14].mxu0 }
 0x1cd   :  { %16274 = vst [vmem:[#allocation151_spill] sm:$0xff] %v10539_v49  ;;  %16275 = vst [vmem:[#allocation152_spill] sm:$0xff] %v10542_v45  ;;  %v5002_v32 = vsub.f32 0.0, %v4970_v30  ;;  %v10557_v47 = vadd.f32 %v7713_v2, %v10391_v3  ;;  %v5117_v34 = vadd.f32 1.0, %v10530_v7  ;;  %8432 = vpow2.f32 %v5040_v23  ;;  %v10574_v23 = vpop.f32.mrb[15].mxu0 }
 0x1ce   :  { %16276 = vst [vmem:[#allocation153_spill] sm:$0xff] %v10548_v16  ;;  %16277 = vst [vmem:[#allocation154_spill] sm:$0xff] %v10553_v26  ;;  %v1809_v29 = vsel %vm1726_vm8, %v1808_v51, %v1807_v54  ;;  %v10562_v36 = vfloor.f32 %v537_v6  ;;  %8434 = vlog2.f32 %v5099_v63  ;;  %v5108_v18 = vadd.f32 1.0, %v10544_v10  ;;  %v10571_v19 = vpop.eup %8426 }
 0x1cf   :  { %8436 = vpow2.f32 %v5038_v41  ;;  %v10578_v6 = vadd.s32 %v10348_v56, %v10361_v24  ;;  %v7233_v54 = vmin.u32 %v1687_v12, %v10517_v15  ;;  %v5042_v51 = vmul.f32 1.442695, %v5002_v32 }
 0x1d0   :  { %16278 = vst [vmem:[#allocation155_spill] sm:$0xff] %v10562_v36  ;;  %8438 = vpow2.f32 %v5044_v13  ;;  %v4973_v63 = vand.u32 2147483647, %v10557_v47  ;;  %v1812_v2 = vsel %vm10524_vm9, %v9094_v50, %v1809_v29  ;;  %v10585_v53 = vpop.eup %8428  ;;  %v5102_v41 = vmul.f32 -0.5, %v10513_v42  ;;  %v10593_v13 = vpop.f32.mrb[16].mxu0 }
 0x1d1   :  { %16279 = vst [vmem:[#allocation156_spill] sm:$0xff] %v10578_v6  ;;  %8440 = vlog2.f32 %v5117_v34  ;;  %v5135_v12 = vadd.f32 1.0, %v10571_v19  ;;  %v5120_v32 = vmul.f32 -0.5, %v10530_v7  ;;  %v10596_v14 = vpop.f32.mrb[17].mxu0  ;;  %v1689_v33 = vclz %v7233_v54 }
 0x1d2   :  { %8442 = vlog2.f32 %v5108_v18  ;;  %v5005_v29 = vsub.f32 0.0, %v4973_v63  ;;  %v5111_v30 = vmul.f32 -0.5, %v10544_v10  ;;  %v5126_v56 = vadd.f32 1.0, %v10585_v53  ;;  %v10610_v34 = vpop.f32.mrb[18].mxu0 }
 0x1d3   :  { %8444 = vcosq.f32 %v1812_v2  ;;  %v5103_v18 = vadd.f32 1.0, %v5102_v41  ;;  %v5105_v24 = vand.u32 2147483647, %v10513_v42  ;;  %v5123_v63 = vand.u32 2147483647, %v10530_v7  ;;  %v10629_v4 = vpop.f32.mrb[19].mxu0 }
 0x1d4   :  { %8446 = vpow2.f32 %v5042_v51  ;;  %v5048_v50 = vmul.f32 1.442695, %v5005_v29  ;;  %v10608_v54 = vadd.f32 %v10391_v3, %v10520_v20  ;;  %v5121_v51 = vadd.f32 1.0, %v5120_v32 }
 0x1d5   :  { %8448 = vsinq.f32 %v1812_v2  ;;  %v5114_v41 = vand.u32 2147483647, %v10544_v10  ;;  %v10616_v2 = vadd.s32 4294967294, %v1689_v33  ;;  %v5112_v37 = vadd.f32 1.0, %v5111_v30 }
 0x1d6   :  { %v10603_v1 = vpop.eup %8430  ;;  %8450 = vlog2.f32 %v5135_v12  ;;  %v5104_v44 = vmul.f32 %v10513_v42, %v5103_v18  ;;  %vm10623_vm10 = vcmp.lt.f32.partialorder %v5105_v24, 0.0004427343  ;;  %v5138_v32 = vmul.f32 -0.5, %v10571_v19  ;;  %v10640_v18 = vpop.f32.mrb[20].mxu0 }
 0x1d7   :  { %v10612_v57 = vpop.eup %8432  ;;  %16280 = vst [vmem:[#allocation157_spill] sm:$0xff] %v10616_v2  ;;  %8452 = vlog2.f32 %v5126_v56  ;;  %v5141_v33 = vand.u32 2147483647, %v10571_v19  ;;  %vm10633_vm11 = vcmp.lt.f32.partialorder %v5123_v63, 0.0004427343  ;;  %v5129_v29 = vmul.f32 -0.5, %v10585_v53 }
 0x1d8   :  { %v8435_v11 = vpop.eup %8434  ;;  %v5153_v42 = vadd.f32 1.0, %v10612_v57  ;;  %8454 = vpow2.f32 %v5048_v50  ;;  %v4972_v24 = vand.u32 2147483647, %v10608_v54  ;;  %v5122_v36 = vmul.f32 %v10530_v7, %v5121_v51  ;;  %v10652_v49 = vpop.f32.mrb[21].mxu0 }
 0x1d9   :  { %v10620_v20 = vpop.eup %8436  ;;  %vm10643_vm12 = vcmp.lt.f32.partialorder %v5114_v41, 0.0004427343  ;;  %v10650_v43 = vadd.f32 %v10533_v38, %v10391_v3  ;;  %v5113_v59 = vmul.f32 %v10544_v10, %v5112_v37  ;;  %v5132_v61 = vand.u32 2147483647, %v10585_v53 }
 0x1da   :  { %v10631_v30 = vpop.eup %8438  ;;  %v5144_v35 = vadd.f32 1.0, %v10620_v20  ;;  %v5004_v7 = vsub.f32 0.0, %v4972_v24  ;;  %v5101_v41 = vmul.f32 0.6931472, %v8435_v11  ;;  %v5139_v55 = vadd.f32 1.0, %v5138_v32  ;;  %v10668_v5 = vpop.f32.mrb[22].mxu0 }
 0x1db   :  { %v8441_v12 = vpop.eup %8440  ;;  %v5171_v63 = vadd.f32 1.0, %v10631_v30  ;;  %v4975_v21 = vand.u32 2147483647, %v10650_v43  ;;  %vm10663_vm13 = vcmp.lt.f32.partialorder %v5141_v33, 0.0004427343  ;;  %v5130_v37 = vadd.f32 1.0, %v5129_v29 }
 0x1dc   :  { %v8443_v50 = vpop.eup %8442  ;;  %8456 = vlog2.f32 %v5153_v42  ;;  %v5156_v10 = vmul.f32 -0.5, %v10612_v57  ;;  %v5119_v11 = vmul.f32 0.6931472, %v8441_v12  ;;  %v10674_v16 = vadd.f32 %v10391_v3, %v10546_v31  ;;  %v10681_v40 = vpop.f32.mrb[23].mxu0 }
 0x1dd   :  { %v10657_v51 = vpop.eup %8444  ;;  %v5110_v32 = vmul.f32 0.6931472, %v8443_v50  ;;  %vm10676_vm14 = vcmp.lt.f32.partialorder %v5132_v61, 0.0004427343  ;;  %8458 = vlog2.f32 %v5144_v35  ;;  %v5007_v42 = vsub.f32 0.0, %v4975_v21 }
 0x1de   :  { %16287 = vst [vmem:[#allocation158_spill] sm:$0xff] %v10657_v51  ;;  %v10661_v38 = vpop.eup %8446  ;;  %v5046_v51 = vmul.f32 1.442695, %v5004_v7  ;;  %v5107_v12 = vsel %vm10623_vm10, %v5104_v44, %v5101_v41  ;;  %v5140_v50 = vmul.f32 %v10571_v19, %v5139_v55  ;;  %8460 = vlog2.f32 %v5171_v63  ;;  %v10688_v35 = vpop.f32.mrb[24].mxu0 }
 0x1df   :  { %v10670_v24 = vpop.eup %8448  ;;  %v5162_v31 = vadd.f32 1.0, %v10661_v38  ;;  %v5159_v61 = vand.u32 2147483647, %v10612_v57  ;;  %v5052_v39 = vmul.f32 1.442695, %v5007_v42  ;;  %v5125_v21 = vsel %vm10633_vm11, %v5122_v36, %v5119_v11  ;;  %v10695_v19 = vpop.f32.mrb[25].mxu0 }
 0x1e0   :  { %16290 = vst [vmem:[#allocation159_spill] sm:$0xff] %v10670_v24  ;;  %v8451_v27 = vpop.eup %8450  ;;  %v5157_v24 = vadd.f32 1.0, %v5156_v10  ;;  %8462 = vpow2.f32 %v5046_v51  ;;  %v5116_v45 = vsel %vm10643_vm12, %v5113_v59, %v5110_v32  ;;  %v4974_v55 = vand.u32 2147483647, %v10674_v16 }
 0x1e1   :  { %v8453_v7 = vpop.eup %8452  ;;  %v5137_v44 = vmul.f32 0.6931472, %v8451_v27  ;;  %v16293_v41 = vmax.f32 %v10416_v8, 0.0  ;;  %v5131_v51 = vmul.f32 %v10585_v53, %v5130_v37  ;;  %v5147_v42 = vmul.f32 -0.5, %v10620_v20 }
 0x1e2   :  { %v10697_v63 = vpop.eup %8454  ;;  %v5150_v56 = vand.u32 2147483647, %v10620_v20  ;;  %v5128_v36 = vmul.f32 0.6931472, %v8453_v7  ;;  %v5174_v26 = vmul.f32 -0.5, %v10631_v30  ;;  %8464 = vlog2.f32 %v5162_v31 }
 0x1e3   :  { %v5379_v10 = vadd.f32 %v5107_v12, %v16293_v41  ;;  %v5006_v27 = vsub.f32 0.0, %v4974_v55  ;;  %v16294_v59 = vmax.f32 %v10448_v62, 0.0  ;;  %v16295_v32 = vmax.f32 %v10454_v17, 0.0 }
 0x1e4   :  { %vm10709_vm15 = vcmp.lt.f32.partialorder %v5159_v61, 0.0004427343  ;;  %v5177_v53 = vand.u32 2147483647, %v10631_v30  ;;  %8466 = vpow2.f32 %v5052_v39  ;;  %v5143_v37 = vsel %vm10663_vm13, %v5140_v50, %v5137_v44  ;;  %v10728_v39 = vpop.f32.mrb[26].mxu0 }
 0x1e5   :  { %v5381_v11 = vadd.f32 %v5125_v21, %v16294_v59  ;;  %v5380_v29 = vadd.f32 %v5116_v45, %v16295_v32  ;;  %v5158_v12 = vmul.f32 %v10612_v57, %v5157_v24  ;;  %v5189_v31 = vadd.f32 1.0, %v10697_v63  ;;  %v10741_v44 = vpop.f32.mrb[27].mxu0 }
 0x1e6   :  { %v10720_v62 = vadd.f32 %v10565_v22, %v10391_v3  ;;  %v8457_v17 = vpop.eup %8456  ;;  %v10722_v7 = vadd.f32 -0.6931472, %v5379_v10  ;;  %v5148_v61 = vadd.f32 1.0, %v5147_v42  ;;  %v5050_v21 = vmul.f32 1.442695, %v5006_v27 }
 0x1e7   :  { %v10726_v45 = vadd.f32 %v10391_v3, %v10574_v23  ;;  %v5134_v25 = vsel %vm10676_vm14, %v5131_v51, %v5128_v36  ;;  %vm10732_vm0 = vcmp.lt.f32.partialorder %v5150_v56, 0.0004427343  ;;  %v5175_v22 = vadd.f32 1.0, %v5174_v26  ;;  %v8459_v23 = vpop.eup %8458 }
 0x1e8   :  { %v4977_v24 = vand.u32 2147483647, %v10720_v62  ;;  %v10739_v50 = vadd.f32 %v10593_v13, %v10391_v3  ;;  %v10743_v55 = vadd.f32 -0.6931472, %v5381_v11  ;;  %v10745_v41 = vadd.f32 -0.6931472, %v5380_v29  ;;  %v8461_v42 = vpop.eup %8460 }
 0x1e9   :  { %v16300_v33 = vmax.f32 %v10467_v60, 0.0  ;;  %vm10749_vm1 = vcmp.lt.f32.partialorder %v5177_v53, 0.0004427343  ;;  %v5155_v56 = vmul.f32 0.6931472, %v8457_v17  ;;  %v5165_v36 = vmul.f32 -0.5, %v10661_v38 }
 0x1ea   :  { %8468 = vlog2.f32 %v5189_v31  ;;  %v5009_v13 = vsub.f32 0.0, %v4977_v24  ;;  %v10754_v26 = vpop.eup %8462  ;;  %v16303_v27 = vmax.f32 %v10476_v28, 0.0  ;;  %v4976_v29 = vand.u32 2147483647, %v10726_v45 }
 0x1eb   :  { %v5383_v10 = vadd.f32 %v5143_v37, %v16300_v33  ;;  %8470 = vpow2.f32 %v5050_v21  ;;  %v10761_v60 = vadd.f32 %v10391_v3, %v10596_v14  ;;  %v5149_v11 = vmul.f32 %v10620_v20, %v5148_v61 }
 0x1ec   :  { %v5382_v59 = vadd.f32 %v5134_v25, %v16303_v27  ;;  %v5168_v32 = vand.u32 2147483647, %v10661_v38  ;;  %v5180_v53 = vadd.f32 1.0, %v10754_v26  ;;  %v4979_v37 = vand.u32 2147483647, %v10739_v50  ;;  %v8465_v25 = vpop.eup %8464 }
 0x1ed   :  { %v5146_v31 = vmul.f32 0.6931472, %v8459_v23  ;;  %v5173_v17 = vmul.f32 0.6931472, %v8461_v42  ;;  %v5176_v28 = vmul.f32 %v10631_v30, %v5175_v22  ;;  %v10769_v24 = vadd.f32 -0.6931472, %v5383_v10 }
 0x1ee   :  { %v5161_v14 = vsel %vm10709_vm15, %v5158_v12, %v5155_v56  ;;  %v5056_v33 = vmul.f32 1.442695, %v5009_v13  ;;  %v10775_v20 = vadd.f32 %v10610_v34, %v10391_v3  ;;  %v10777_v61 = vpop.eup %8466  ;;  %v10779_v27 = vadd.f32 -0.6931472, %v5382_v59 }
 0x1ef   :  { %v5166_v23 = vadd.f32 1.0, %v5165_v36  ;;  %v5008_v42 = vsub.f32 0.0, %v4976_v29  ;;  %v4978_v30 = vand.u32 2147483647, %v10761_v60  ;;  %vm10782_vm3 = vcmp.lt.f32.partialorder %v5168_v32, 0.0004427343 }
 0x1f0   :  { %8472 = vlog2.f32 %v5180_v53  ;;  %v5011_v8 = vsub.f32 0.0, %v4979_v37  ;;  %v10788_v12 = vadd.f32 %v10391_v3, %v10629_v4  ;;  %v16306_v34 = vmax.f32 %v10484_v58, 0.0 }
 0x1f1   :  { %v5152_v56 = vsel %vm10732_vm0, %v5149_v11, %v5146_v31  ;;  %v5179_v36 = vsel %vm10749_vm1, %v5176_v28, %v5173_v17  ;;  %v5192_v13 = vmul.f32 -0.5, %v10697_v63  ;;  %v5164_v59 = vmul.f32 0.6931472, %v8465_v25 }
 0x1f2   :  { %v5385_v10 = vadd.f32 %v5161_v14, %v16306_v34  ;;  %v5207_v29 = vadd.f32 1.0, %v10777_v61  ;;  %8474 = vpow2.f32 %v5056_v33  ;;  %v4981_v32 = vand.u32 2147483647, %v10775_v20 }
 0x1f3   :  { %v5167_v4 = vmul.f32 %v10661_v38, %v5166_v23  ;;  %v5054_v58 = vmul.f32 1.442695, %v5008_v42  ;;  %v5010_v37 = vsub.f32 0.0, %v4978_v30  ;;  %v16307_v57 = vmax.f32 %v10493_v9, 0.0 }
 0x1f4   :  { %v8469_v14 = vpop.eup %8468  ;;  %v5195_v51 = vand.u32 2147483647, %v10697_v63  ;;  %v5060_v31 = vmul.f32 1.442695, %v5011_v8  ;;  %v4980_v17 = vand.u32 2147483647, %v10788_v12  ;;  %v10813_v42 = vadd.f32 %v10640_v18, %v10391_v3 }
 0x1f5   :  { %v5384_v11 = vadd.f32 %v5152_v56, %v16307_v57  ;;  %v10805_v28 = vpop.eup %8470  ;;  %v10807_v25 = vadd.f32 -0.6931472, %v5385_v10  ;;  %v16308_v33 = vmax.f32 %v10503_v48, 0.0  ;;  %v5193_v23 = vadd.f32 1.0, %v5192_v13 }
 0x1f6   :  { %16309 = vst [vmem:[#allocation160_spill] sm:$0xff] %v10813_v42  ;;  %v5170_v9 = vsel %vm10782_vm3, %v5167_v4, %v5164_v59  ;;  %v5183_v30 = vmul.f32 -0.5, %v10754_v26  ;;  %8476 = vlog2.f32 %v5207_v29  ;;  %v5013_v8 = vsub.f32 0.0, %v4981_v32 }
 0x1f7   :  { %v5387_v38 = vadd.f32 %v5179_v36, %v16308_v33  ;;  %v5191_v34 = vmul.f32 0.6931472, %v8469_v14  ;;  %8478 = vpow2.f32 %v5054_v58  ;;  %v5058_v56 = vmul.f32 1.442695, %v5010_v37 }
 0x1f8   :  { %v5012_v10 = vsub.f32 0.0, %v4980_v17  ;;  %v10818_v57 = vadd.f32 -0.6931472, %v5384_v11  ;;  %vm10820_vm4 = vcmp.lt.f32.partialorder %v5195_v51, 0.0004427343  ;;  %v5198_v18 = vadd.f32 1.0, %v10805_v28 }
 0x1f9   :  { %8480 = vpow2.f32 %v5060_v31  ;;  %v10825_v36 = vadd.f32 -0.6931472, %v5387_v38  ;;  %v5194_v22 = vmul.f32 %v10697_v63, %v5193_v23  ;;  %v5186_v13 = vand.u32 2147483647, %v10754_v26  ;;  %v10834_v11 = vpop.f32.mrb[28].mxu0 }
 0x1fa   :  { %v8473_v29 = vpop.eup %8472  ;;  %v16312_v32 = vmax.f32 %v10507_v0, 0.0  ;;  %v5210_v58 = vmul.f32 -0.5, %v10777_v61  ;;  %v5064_v37 = vmul.f32 1.442695, %v5013_v8  ;;  %v4983_v14 = vand.u32 2147483647, %v10813_v42 }
 0x1fb   :  { %v5197_v51 = vsel %vm10820_vm4, %v5194_v22, %v5191_v34  ;;  %v5184_v31 = vadd.f32 1.0, %v5183_v30  ;;  %8482 = vpow2.f32 %v5058_v56  ;;  %v5062_v63 = vmul.f32 1.442695, %v5012_v10  ;;  %v10838_v17 = vpop.f32.mrb[29].mxu0 }
 0x1fc   :  { %v5386_v4 = vadd.f32 %v5170_v9, %v16312_v32  ;;  %v10840_v33 = vpop.eup %8474  ;;  %v5213_v0 = vand.u32 2147483647, %v10777_v61  ;;  %8484 = vlog2.f32 %v5198_v18  ;;  %v5182_v9 = vmul.f32 0.6931472, %v8473_v29 }
 0x1fd   :  { %vm10845_vm6 = vcmp.lt.f32.partialorder %v5186_v13, 0.0004427343  ;;  %v5201_v30 = vmul.f32 -0.5, %v10805_v28  ;;  %v10852_v34 = vadd.f32 %v10391_v3, %v10652_v49  ;;  %v16316_v56 = vmax.f32 %v10557_v47, 0.0 }
 0x1fe   :  { %v5211_v48 = vadd.f32 1.0, %v5210_v58  ;;  %8486 = vpow2.f32 %v5064_v37  ;;  %v5015_v18 = vsub.f32 0.0, %v4983_v14  ;;  %v10856_v22 = vadd.f32 -0.6931472, %v5386_v4 }
 0x1ff   :  { %16315 = vst [vmem:[#allocation161_spill] sm:$0xff] %v10852_v34  ;;  %v5389_v10 = vadd.f32 %v5197_v51, %v16316_v56  ;;  %v5185_v29 = vmul.f32 %v10754_v26, %v5184_v31  ;;  %v5225_v13 = vadd.f32 1.0, %v10840_v33  ;;  %8488 = vpow2.f32 %v5062_v63  ;;  %v10873_v31 = vpop.f32.mrb[30].mxu0 }
 0x200   :  { %v8477_v32 = vpop.eup %8476  ;;  %vm10860_vm8 = vcmp.lt.f32.partialorder %v5213_v0, 0.0004427343  ;;  %v5204_v49 = vand.u32 2147483647, %v10805_v28  ;;  %v5202_v26 = vadd.f32 1.0, %v5201_v30  ;;  %v5212_v56 = vmul.f32 %v10777_v61, %v5211_v48  ;;  %v10881_v38 = vpop.f32.mrb[31].mxu0 }
 0x201   :  { %v10867_v37 = vpop.eup %8478  ;;  %v5188_v4 = vsel %vm10845_vm6, %v5185_v29, %v5182_v9  ;;  %v4982_v51 = vand.u32 2147483647, %v10852_v34  ;;  %v10877_v0 = vadd.f32 -0.6931472, %v5389_v10  ;;  %v5068_v47 = vmul.f32 1.442695, %v5015_v18 }
 0x202   :  { %v5209_v8 = vmul.f32 0.6931472, %v8477_v32  ;;  %8490 = vlog2.f32 %v5225_v13  ;;  %v5228_v9 = vmul.f32 -0.5, %v10840_v33  ;;  %v5090_v30 = vadd.f32 1.0, %v10603_v1 }
 0x203   :  { %v10875_v63 = vpop.eup %8480  ;;  %16319 = vst [vmem:[#allocation162_spill] sm:$0xff] %v10877_v0  ;;  %v16320_v29 = vmax.f32 %v10608_v54, 0.0  ;;  %vm10887_vm10 = vcmp.lt.f32.partialorder %v5204_v49, 0.0004427343  ;;  %v5216_v61 = vadd.f32 1.0, %v10867_v37  ;;  %v5093_v10 = vmul.f32 -0.5, %v10603_v1 }
 0x204   :  { %v5203_v18 = vmul.f32 %v10805_v28, %v5202_v26  ;;  %v5243_v13 = vadd.f32 1.0, %v10875_v63  ;;  %v5014_v32 = vsub.f32 0.0, %v4982_v51  ;;  %v5096_v58 = vand.u32 2147483647, %v10603_v1 }
 0x205   :  { %v5388_v14 = vadd.f32 %v5188_v4, %v16320_v29  ;;  %v10893_v48 = vpop.eup %8482  ;;  %v5219_v54 = vmul.f32 -0.5, %v10867_v37  ;;  %8492 = vpow2.f32 %v5068_v47  ;;  %v10902_v4 = vadd.f32 %v10668_v5, %v10391_v3 }
 0x206   :  { %v8485_v53 = vpop.eup %8484  ;;  %v5215_v29 = vsel %vm10860_vm8, %v5212_v56, %v5209_v8  ;;  %v5229_v21 = vadd.f32 1.0, %v5228_v9  ;;  %v5231_v28 = vand.u32 2147483647, %v10840_v33  ;;  %8494 = vlog2.f32 %v5090_v30 }
 0x207   :  { %v10909_v51 = vadd.f32 -0.6931472, %v5388_v14  ;;  %8496 = vlog2.f32 %v5216_v61  ;;  %v5234_v47 = vadd.f32 1.0, %v10893_v48  ;;  %v5094_v52 = vadd.f32 1.0, %v5093_v10 }
 0x208   :  { %v10907_v26 = vpop.eup %8486  ;;  %v5200_v6 = vmul.f32 0.6931472, %v8485_v53  ;;  %8498 = vlog2.f32 %v5243_v13  ;;  %v5246_v5 = vmul.f32 -0.5, %v10875_v63  ;;  %v5066_v23 = vmul.f32 1.442695, %v5014_v32 }
 0x209   :  { %v10912_v49 = vpop.eup %8488  ;;  %v16323_v56 = vmax.f32 %v10650_v43, 0.0  ;;  %v5220_v9 = vadd.f32 1.0, %v5219_v54  ;;  %v5222_v30 = vand.u32 2147483647, %v10867_v37  ;;  %v4985_v14 = vand.u32 2147483647, %v10902_v4 }
 0x20a   :  { %v5230_v61 = vmul.f32 %v10840_v33, %v5229_v21  ;;  %vm10920_vm11 = vcmp.lt.f32.partialorder %v5231_v28, 0.0004427343  ;;  %v5249_v53 = vand.u32 2147483647, %v10875_v63  ;;  %v5261_v10 = vadd.f32 1.0, %v10907_v26 }
 0x20b   :  { %v5391_v8 = vadd.f32 %v5215_v29, %v16323_v56  ;;  %vm10926_vm12 = vcmp.lt.f32.partialorder %v5096_v58, 0.0004427343  ;;  %v10932_v43 = vadd.f32 %v10391_v3, %v10681_v40  ;;  %8500 = vlog2.f32 %v5234_v47 }
 0x20c   :  { %v5252_v32 = vadd.f32 1.0, %v10912_v49  ;;  %v5017_v21 = vsub.f32 0.0, %v4985_v14  ;;  %v10937_v33 = vadd.f32 %v10688_v35, %v10391_v3  ;;  %v8491_v54 = vpop.eup %8490  ;;  %v5206_v29 = vsel %vm10887_vm10, %v5203_v18, %v5200_v6 }
 0x20d   :  { %v5247_v58 = vadd.f32 1.0, %v5246_v5  ;;  %8502 = vpow2.f32 %v5066_v23  ;;  %v4984_v28 = vand.u32 2147483647, %v10932_v43  ;;  %v10942_v56 = vadd.f32 -0.6931472, %v5391_v8 }
 0x20e   :  { %v10945_v40 = vmul.f32 %v10867_v37, %v5220_v9  ;;  %v5237_v47 = vmul.f32 -0.5, %v10893_v48  ;;  %v5072_v14 = vmul.f32 1.442695, %v5017_v21  ;;  %8504 = vlog2.f32 %v5261_v10 }
 0x20f   :  { %16328 = vst [vmem:[#allocation163_spill] sm:$0xff] %v10942_v56  ;;  %v5264_v35 = vmul.f32 -0.5, %v10907_v26  ;;  %v5255_v2 = vmul.f32 -0.5, %v10912_v49  ;;  %vm5455_vm13 = vcmask 523264   ;;  %v5016_v59 = vsub.f32 0.0, %v4984_v28  ;;  %v10950_v6 = vpop.eup %8492 }
 0x210   :  { %v16329_v18 = vmax.f32 %v10674_v16, 0.0  ;;  %v5227_v23 = vmul.f32 0.6931472, %v8491_v54  ;;  %vm10954_vm14 = vcmp.lt.f32.partialorder %v5222_v30, 0.0004427343  ;;  %8506 = vlog2.f32 %v5252_v32  ;;  %v8495_v9 = vpop.eup %8494 }
 0x211   :  { %v4987_v37 = vand.u32 2147483647, %v10937_v33  ;;  %v5248_v10 = vmul.f32 %v10875_v63, %v5247_v58  ;;  %vm10960_vm15 = vcmp.lt.f32.partialorder %v5249_v53, 0.0004427343  ;;  %v5240_v28 = vand.u32 2147483647, %v10893_v48  ;;  %v8497_v16 = vpop.eup %8496 }
 0x212   :  { %v5390_v5 = vadd.f32 %v5206_v29, %v16329_v18  ;;  %8508 = vpow2.f32 %v5072_v14  ;;  %v5238_v29 = vadd.f32 1.0, %v5237_v47  ;;  %v5267_v30 = vand.u32 2147483647, %v10907_v26  ;;  %v8499_v32 = vpop.eup %8498 }
 0x213   :  { %v5092_v54 = vmul.f32 0.6931472, %v8495_v9  ;;  %v5095_v18 = vmul.f32 %v10603_v1, %v5094_v52  ;;  %v5265_v56 = vadd.f32 1.0, %v5264_v35  ;;  %v5256_v34 = vadd.f32 1.0, %v5255_v2 }
 0x214   :  { %v5258_v0 = vand.u32 2147483647, %v10912_v49  ;;  %v5070_v63 = vmul.f32 1.442695, %v5016_v59  ;;  %v5233_v53 = vsel %vm10920_vm11, %v5230_v61, %v5227_v23  ;;  %v5279_v58 = vadd.f32 1.0, %v10950_v6 }
 0x215   :  { %v5098_v14 = vsel %vm10926_vm12, %v5095_v18, %v5092_v54  ;;  %v5019_v47 = vsub.f32 0.0, %v4987_v37  ;;  %v10973_v42 = vadd.f32 -0.6931472, %v5390_v5  ;;  %v5218_v9 = vmul.f32 0.6931472, %v8497_v16  ;;  %v8501_v2 = vpop.eup %8500 }
 0x216   :  { %vm10975_vm0 = vcmp.lt.f32.partialorder %v5240_v28, 0.0004427343  ;;  %v10981_v52 = vadd.f32 %v10391_v3, %v10695_v19  ;;  %v5245_v15 = vmul.f32 0.6931472, %v8499_v32  ;;  %v5239_v61 = vmul.f32 %v10893_v48, %v5238_v29 }
 0x217   :  { %v16336_v35 = vmax.f32 %v10473_v46, 0.0  ;;  %8510 = vpow2.f32 %v5070_v63  ;;  %v10986_v59 = vpop.eup %8502  ;;  %v16337_v5 = vmax.f32 %v10720_v62, 0.0  ;;  %v10991_v37 = vmul.f32 %v10907_v26, %v5265_v56 }
 0x218   :  { %v4953_v28 = vmax.f32 %v10902_v4, 0.0  ;;  %v5076_v19 = vmul.f32 1.442695, %v5019_v47  ;;  %vm10994_vm1 = vcmp.lt.f32.partialorder %v5267_v30, 0.0004427343  ;;  %v10999_v48 = vmul.f32 %v10912_v49, %v5256_v34  ;;  %v8505_v56 = vpop.eup %8504 }
 0x219   :  { %v5378_v13 = vadd.f32 %v5098_v14, %v16336_v35  ;;  %v5393_v23 = vadd.f32 %v5233_v53, %v16337_v5  ;;  %vm11001_vm3 = vcmp.lt.f32.partialorder %v5258_v0, 0.0004427343  ;;  %8512 = vlog2.f32 %v5279_v58  ;;  %v11016_v34 = vld [vmem:[%s15762_s2 + $0x10] ss:$0 sm:$0xff] }
 0x21a   :  { %v11007_v26 = vadd.f32 %v10728_v39, %v10391_v3  ;;  %v5224_v29 = vsel %vm10954_vm14, %v10945_v40, %v5218_v9  ;;  %8514 = vpow2.f32 %v5076_v19  ;;  %v4986_v30 = vand.u32 2147483647, %v10981_v52  ;;  %v8507_v49 = vpop.eup %8506 }
 0x21b   :  { %v7377_v62 = vadd.f32 -0.6931472, %v5378_v13  ;;  %v11020_v0 = vadd.f32 %v11016_v34, %v10741_v44  ;;  %v5251_v3 = vsel %vm10960_vm15, %v5248_v10, %v5245_v15  ;;  %v5236_v39 = vmul.f32 0.6931472, %v8501_v2 }
 0x21c   :  { %v5270_v8 = vadd.f32 1.0, %v10986_v59  ;;  %v4989_v40 = vand.u32 2147483647, %v11007_v26  ;;  %v11027_v54 = vpop.eup %8508  ;;  %v11029_v18 = vadd.f32 -0.6931472, %v5393_v23  ;;  %v5018_v44 = vsub.f32 0.0, %v4986_v30 }
 0x21d   :  { %7760 = vmatprep.mubr.msk.f32.mxu1 %vm5455_vm13, %v7377_v62  ;;  %v4988_v32 = vand.u32 2147483647, %v11020_v0  ;;  %v11036_v10 = vadd.f32 %v11016_v34, %v10834_v11  ;;  %v16342_v21 = vmax.f32 %v10726_v45, 0.0  ;;  %v5263_v53 = vmul.f32 0.6931472, %v8505_v56 }
 0x21e   :  { %7761 = vmatmul.mubr.msk.f32.vlgmr.msra.gmra.mrb[0].mxu1 %vm5455_vm13, %v10722_v7  ;;  %v4952_v58 = vmax.f32 %v10932_v43, 0.0  ;;  %v5021_v14 = vsub.f32 0.0, %v4989_v40  ;;  %v16343_v47 = vmax.f32 %v10739_v50, 0.0  ;;  %v5254_v9 = vmul.f32 0.6931472, %v8507_v49 }
 0x21f   :  { %v5392_v63 = vadd.f32 %v5224_v29, %v16342_v21  ;;  %7763 = vmatprep.mubr.msk.f32.mxu1 %vm5455_vm13, %v10745_v41  ;;  %v5074_v2 = vmul.f32 1.442695, %v5018_v44  ;;  %v5020_v15 = vsub.f32 0.0, %v4988_v32  ;;  %v5242_v11 = vsel %vm10975_vm0, %v5239_v61, %v5236_v39 }
 0x220   :  { %v5395_v7 = vadd.f32 %v5251_v3, %v16343_v47  ;;  %8516 = vlog2.f32 %v5270_v8  ;;  %v5297_v45 = vadd.f32 1.0, %v11027_v54  ;;  %v5080_v35 = vmul.f32 1.442695, %v5021_v14 }
 0x221   :  { %8518 = vpow2.f32 %v5074_v2  ;;  %v5078_v13 = vmul.f32 1.442695, %v5020_v15  ;;  %v4991_v41 = vand.u32 2147483647, %v11036_v10  ;;  %v11053_v50 = vadd.f32 %v11016_v34, %v10838_v17  ;;  %v11055_v5 = vpop.eup %8510 }
 0x222   :  { %7764 = vmatmul.mubr.msk.f32.gmra.mrb[2].mxu1 %vm5455_vm13, %v10743_v55  ;;  %v11057_v23 = vadd.f32 -0.6931472, %v5392_v63  ;;  %v5282_v1 = vmul.f32 -0.5, %v10950_v6  ;;  %v5285_v61 = vand.u32 2147483647, %v10950_v6  ;;  %8520 = vpow2.f32 %v5080_v35 }
 0x223   :  { %7766 = vmatprep.mubr.msk.f32.mxu1 %vm5455_vm13, %v10779_v27  ;;  %v16344_v55 = vmax.f32 %v10761_v60, 0.0  ;;  %v5269_v17 = vsel %vm10994_vm1, %v10991_v37, %v5263_v53  ;;  %v5260_v62 = vsel %vm11001_vm3, %v10999_v48, %v5254_v9  ;;  %8522 = vpow2.f32 %v5078_v13  ;;  %v8513_v56 = vpop.eup %8512 }
 0x224   :  { %8524 = vlog2.f32 %v5297_v45  ;;  %v5288_v29 = vadd.f32 1.0, %v11055_v5  ;;  %v5023_v30 = vsub.f32 0.0, %v4991_v41  ;;  %v11074_v27 = vadd.f32 %v11016_v34, %v10873_v31  ;;  %v11076_v60 = vpop.eup %8514 }
 0x225   :  { %v5394_v19 = vadd.f32 %v5242_v11, %v16344_v55  ;;  %v11078_v49 = vadd.f32 -0.6931472, %v5395_v7  ;;  %v5273_v37 = vmul.f32 -0.5, %v10986_v59  ;;  %v4955_v16 = vmax.f32 %v10937_v33, 0.0  ;;  %v16384_v33 = vld [vmem:[#allocation153_spill] sm:$0xff] }
 0x226   :  { %7767 = vmatmul.mubr.msk.f32.gmra.mrb[4].mxu1 %vm5455_vm13, %v10769_v24  ;;  %v4990_v48 = vand.u32 2147483647, %v11053_v50  ;;  %v16345_v46 = vmax.f32 %v10775_v20, 0.0  ;;  %v5283_v39 = vadd.f32 1.0, %v5282_v1  ;;  %vm11087_vm4 = vcmp.lt.f32.partialorder %v5285_v61, 0.0004427343 }
 0x227   :  { %v5315_v8 = vadd.f32 1.0, %v11076_v60  ;;  %7769 = vmatprep.mubr.msk.f32.mxu1 %vm5455_vm13, %v10818_v57  ;;  %v16348_v40 = vmax.f32 %v10788_v12, 0.0  ;;  %v5276_v24 = vand.u32 2147483647, %v10986_v59  ;;  %v5084_v32 = vmul.f32 1.442695, %v5023_v30 }
 0x228   :  { %v5397_v3 = vadd.f32 %v5269_v17, %v16345_v46  ;;  %v5022_v21 = vsub.f32 0.0, %v4990_v48  ;;  %v11097_v63 = vadd.f32 -0.6931472, %v5394_v19  ;;  %v5281_v20 = vmul.f32 0.6931472, %v8513_v56 }
 0x229   :  { %v5396_v44 = vadd.f32 %v5260_v62, %v16348_v40  ;;  %8526 = vlog2.f32 %v5288_v29  ;;  %v4993_v53 = vand.u32 2147483647, %v11074_v27  ;;  %v5274_v14 = vadd.f32 1.0, %v5273_v37  ;;  %v16351_v29 = vld [vmem:[#allocation160_spill] sm:$0xff]  ;;  %v16355_v40 = vld [vmem:[#allocation162_spill] sm:$0xff] }
 0x22a   :  { %7770 = vmatmul.mubr.msk.f32.gmra.mrb[6].mxu1 %vm5455_vm13, %v10807_v25  ;;  %8528 = vpow2.f32 %v5084_v32  ;;  %v5082_v47 = vmul.f32 1.442695, %v5022_v21  ;;  %v11104_v12 = vadd.f32 %v11016_v34, %v10881_v38  ;;  %v8517_v57 = vpop.eup %8516  ;;  %v5284_v7 = vmul.f32 %v10950_v6, %v5283_v39 }
 0x22b   :  { %v5300_v9 = vmul.f32 -0.5, %v11027_v54  ;;  %8530 = vlog2.f32 %v5315_v8  ;;  %7772 = vmatprep.mubr.msk.f32.mxu1 %vm5455_vm13, %v10856_v22  ;;  %v5025_v2 = vsub.f32 0.0, %v4993_v53  ;;  %v11110_v15 = vpop.eup %8518  ;;  %v11112_v11 = vadd.f32 -0.6931472, %v5397_v3 }
 0x22c   :  { %v11114_v25 = vadd.f32 -0.6931472, %v5396_v44  ;;  %vm11116_vm6 = vcmp.lt.f32.partialorder %v5276_v24, 0.0004427343  ;;  %8532 = vpow2.f32 %v5082_v47  ;;  %v11120_v38 = vpop.eup %8520  ;;  %v5287_v6 = vsel %vm11087_vm4, %v5284_v7, %v5281_v20 }
 0x22d   :  { %v5303_v34 = vand.u32 2147483647, %v11027_v54  ;;  %v4954_v22 = vmax.f32 %v10981_v52, 0.0  ;;  %v5306_v35 = vadd.f32 1.0, %v11110_v15  ;;  %v11127_v13 = vpop.eup %8522  ;;  %v5272_v41 = vmul.f32 0.6931472, %v8517_v57 }
 0x22e   :  { %v5275_v1 = vmul.f32 %v10986_v59, %v5274_v14  ;;  %v5333_v61 = vadd.f32 1.0, %v11120_v38  ;;  %7773 = vmatmul.mubr.msk.f32.gmra.mrb[8].mxu1 %vm5455_vm13, %v10825_v36  ;;  %v4992_v55 = vand.u32 2147483647, %v11104_v12  ;;  %v8525_v19 = vpop.eup %8524  ;;  %v5301_v17 = vadd.f32 1.0, %v5300_v9  ;;  %v16356_v9 = vld [vmem:[#allocation161_spill] sm:$0xff] }
 0x22f   :  { %8534 = vlog2.f32 %v5306_v35  ;;  %v4957_v62 = vmax.f32 %v11007_v26, 0.0  ;;  %v5088_v56 = vmul.f32 1.442695, %v5025_v2  ;;  %7775 = vmatprep.mubr.msk.f32.mxu1 %vm5455_vm13, %v10909_v51  ;;  %v16352_v30 = vmax.f32 %v16351_v29, 0.0 }
 0x230   :  { %v5291_v59 = vmul.f32 -0.5, %v11055_v5  ;;  %v4956_v48 = vmax.f32 %v11020_v0, 0.0  ;;  %v5324_v36 = vadd.f32 1.0, %v11127_v13  ;;  %vm11142_vm8 = vcmp.lt.f32.partialorder %v5303_v34, 0.0004427343 }
 0x231   :  { %v5399_v37 = vadd.f32 %v5287_v6, %v16352_v30  ;;  %v5318_v3 = vmul.f32 -0.5, %v11076_v60  ;;  %8536 = vlog2.f32 %v5333_v61  ;;  %v4959_v39 = vmax.f32 %v11036_v10, 0.0  ;;  %v16358_v61 = vld [vmem:[#allocation163_spill] sm:$0xff] }
 0x232   :  { %v5278_v51 = vsel %vm11116_vm6, %v5275_v1, %v5272_v41  ;;  %v5299_v31 = vmul.f32 0.6931472, %v8525_v19  ;;  %8538 = vlog2.f32 %v5324_v36  ;;  %v5024_v8 = vsub.f32 0.0, %v4992_v55  ;;  %7776 = vmatmul.mubr.msk.f32.gmra.mrb[10].mxu1 %vm5455_vm13, %v16355_v40  ;;  %v16359_v55 = vld [vmem:[#allocation157_spill] sm:$0xff] }
 0x233   :  { %v8527_v44 = vpop.eup %8526  ;;  %v5302_v24 = vmul.f32 %v11027_v54, %v5301_v17  ;;  %v5294_v32 = vand.u32 2147483647, %v11055_v5  ;;  %v4958_v21 = vmax.f32 %v11053_v50, 0.0  ;;  %8540 = vpow2.f32 %v5088_v56  ;;  %7778 = vmatprep.mubr.msk.f32.mxu1 %vm5455_vm13, %v10973_v42 }
 0x234   :  { %v11157_v20 = vpop.eup %8528  ;;  %v11159_v53 = vadd.f32 -0.6931472, %v5399_v37  ;;  %v5292_v14 = vadd.f32 1.0, %v5291_v59  ;;  %v4961_v47 = vmax.f32 %v11074_v27, 0.0  ;;  %v5086_v57 = vmul.f32 1.442695, %v5024_v8 }
 0x235   :  { %v8531_v7 = vpop.eup %8530  ;;  %v16357_v2 = vmax.f32 %v16356_v9, 0.0  ;;  %v5319_v45 = vadd.f32 1.0, %v5318_v3  ;;  %v5321_v6 = vand.u32 2147483647, %v11076_v60  ;;  %v5351_v34 = vadd.f32 1.0, %v11157_v20 }
 0x236   :  { %v11166_v35 = vpop.eup %8532  ;;  %v5305_v42 = vsel %vm11142_vm8, %v5302_v24, %v5299_v31  ;;  %v5290_v41 = vmul.f32 0.6931472, %v8527_v44  ;;  %v5309_v1 = vmul.f32 -0.5, %v11110_v15  ;;  %8542 = vpow2.f32 %v5086_v57  ;;  %7779 = vmatmul.mubr.msk.f32.gmra.mrb[12].mxu1 %vm5455_vm13, %v16358_v61 }
 0x237   :  { %v5398_v54 = vadd.f32 %v5278_v51, %v16357_v2  ;;  %vm7235_vm10 = vcmp.lt.s32.totalorder %v16359_v55, 0  ;;  %v5312_v19 = vand.u32 2147483647, %v11110_v15  ;;  %v5336_v17 = vmul.f32 -0.5, %v11120_v38  ;;  %7781 = vmatprep.mubr.msk.f32.mxu1 %vm5455_vm13, %v11057_v23 }
 0x238   :  { %v5327_v56 = vmul.f32 -0.5, %v11127_v13  ;;  %8544 = vlog2.f32 %v5351_v34  ;;  %v5293_v29 = vmul.f32 %v11055_v5, %v5292_v14  ;;  %vm11180_vm11 = vcmp.lt.f32.partialorder %v5294_v32, 0.0004427343 }
 0x239   :  { %v5339_v37 = vand.u32 2147483647, %v11120_v38  ;;  %v5342_v59 = vadd.f32 1.0, %v11166_v35  ;;  %v8535_v36 = vpop.eup %8534  ;;  %v7397_v46 = vadd.f32 -0.6931472, %v5398_v54  ;;  %v5401_v3 = vadd.f32 %v5305_v42, %v4953_v28 }
 0x23a   :  { %v5317_v51 = vmul.f32 0.6931472, %v8531_v7  ;;  %vm11188_vm12 = vcmp.lt.f32.partialorder %v5321_v6, 0.0004427343  ;;  %v5296_v5 = vsel %vm11180_vm11, %v5293_v29, %v5290_v41  ;;  %v5320_v23 = vmul.f32 %v11076_v60, %v5319_v45  ;;  %7782 = vmatmul.mubr.msk.f32.gmra.mrb[14].mxu1 %vm5455_vm13, %v11029_v18 }
 0x23b   :  { %v5310_v8 = vadd.f32 1.0, %v5309_v1  ;;  %8546 = vlog2.f32 %v5342_v59  ;;  %v8537_v40 = vpop.eup %8536  ;;  %vm11197_vm14 = vcmp.lt.f32.partialorder %v5312_v19, 0.0004427343  ;;  %v5337_v4 = vadd.f32 1.0, %v5336_v17  ;;  %7784 = vmatprep.mubr.msk.f32.mxu1 %vm5455_vm13, %v11097_v63 }
 0x23c   :  { %v5328_v28 = vadd.f32 1.0, %v5327_v56  ;;  %v5330_v24 = vand.u32 2147483647, %v11127_v13  ;;  %v8539_v32 = vpop.eup %8538  ;;  %v5308_v14 = vmul.f32 0.6931472, %v8535_v36  ;;  %v5354_v18 = vmul.f32 -0.5, %v11157_v20 }
 0x23d   :  { %vm11204_vm15 = vcmp.lt.f32.partialorder %v5339_v37, 0.0004427343  ;;  %v4960_v57 = vmax.f32 %v11104_v12, 0.0  ;;  %v11210_v7 = vpop.eup %8540  ;;  %v11212_v9 = vadd.f32 -0.6931472, %v5401_v3  ;;  %v5400_v2 = vadd.f32 %v5296_v5, %v4952_v58 }
 0x23e   :  { %v5323_v63 = vsel %vm11188_vm12, %v5320_v23, %v5317_v51  ;;  %v5345_v54 = vmul.f32 -0.5, %v11166_v35  ;;  %v5311_v45 = vmul.f32 %v11110_v15, %v5310_v8  ;;  %v5335_v6 = vmul.f32 0.6931472, %v8537_v40  ;;  %7785 = vmatmul.mubr.msk.f32.gmra.mrb[16].mxu1 %vm5455_vm13, %v11078_v49 }
 0x23f   :  { %v5357_v34 = vand.u32 2147483647, %v11157_v20  ;;  %v5369_v42 = vadd.f32 1.0, %v11210_v7  ;;  %v5338_v41 = vmul.f32 %v11120_v38, %v5337_v4  ;;  %v5326_v1 = vmul.f32 0.6931472, %v8539_v32  ;;  %7787 = vmatprep.mubr.msk.f32.mxu1 %vm5455_vm13, %v11114_v25 }
 0x240   :  { %v5329_v43 = vmul.f32 %v11127_v13, %v5328_v28  ;;  %vm11226_vm0 = vcmp.lt.f32.partialorder %v5330_v24, 0.0004427343  ;;  %v8543_v15 = vpop.eup %8542  ;;  %v5403_v61 = vadd.f32 %v5323_v63, %v4955_v16  ;;  %v5314_v19 = vsel %vm11197_vm14, %v5311_v45, %v5308_v14  ;;  %v16374_v24 = vld [vmem:[#allocation51_spill] sm:$0xff] }
 0x241   :  { %v5355_v49 = vadd.f32 1.0, %v5354_v18  ;;  %8548 = vlog2.f32 %v5369_v42  ;;  %v7399_v17 = vadd.f32 -0.6931472, %v5400_v2  ;;  %v5346_v56 = vadd.f32 1.0, %v5345_v54  ;;  %v16375_v18 = vld [vmem:[#allocation38_spill] sm:$0xff] }
 0x242   :  { %v8545_v38 = vpop.eup %8544  ;;  %v5360_v13 = vadd.f32 1.0, %v8543_v15  ;;  %v11239_v29 = vsel %vm7235_vm10, 0, %v16359_v55  ;;  %v5341_v25 = vsel %vm11204_vm15, %v5338_v41, %v5335_v6  ;;  %vm11243_vm1 = vcmp.lt.f32.partialorder %v5357_v34, 0.0004427343  ;;  %7788 = vmatmul.mubr.msk.f32.gmra.mrb[18].mxu1 %vm5455_vm13, %v11112_v11  ;;  %v16389_v6 = vld [vmem:[#allocation147_spill] sm:$0xff]  ;;  %v16391_v41 = vld [vmem:[#allocation133_spill] sm:$0xff] }
 0x243   :  { %v5348_v16 = vand.u32 2147483647, %v11166_v35  ;;  %v5372_v30 = vmul.f32 -0.5, %v11210_v7  ;;  %v5402_v37 = vadd.f32 %v5314_v19, %v4954_v22  ;;  %v5332_v55 = vsel %vm11226_vm0, %v5329_v43, %v5326_v1  ;;  %7790 = vmatprep.mubr.msk.f32.mxu1 %vm5455_vm13, %v7397_v46 }
 0x244   :  { %8550 = vlog2.f32 %v5360_v13  ;;  %v5363_v59 = vmul.f32 -0.5, %v8543_v15  ;;  %v7402_v3 = vadd.f32 -0.6931472, %v5403_v61  ;;  %v5353_v51 = vmul.f32 0.6931472, %v8545_v38 }
 0x245   :  { %v8547_v36 = vpop.eup %8546  ;;  %v5356_v31 = vmul.f32 %v11157_v20, %v5355_v49  ;;  %v1693_v5 = vsub.s32 32, %v11239_v29  ;;  %v5405_v11 = vadd.f32 %v5341_v25, %v4957_v62  ;;  %v5347_v52 = vmul.f32 %v11166_v35, %v5346_v56  ;;  %v16372_v35 = vld [vmem:[#allocation148_spill] sm:$0xff] }
 0x246   :  { %v5344_v23 = vmul.f32 0.6931472, %v8547_v36  ;;  %v1697_v22 = vsub.s32 4294967266, %v11239_v29  ;;  %v5404_v8 = vadd.f32 %v5332_v55, %v4956_v48  ;;  %vm5349_vm3 = vcmp.lt.f32.partialorder %v5348_v16, 0.0004427343  ;;  %7791 = vmatmul.mubr.msk.f32.gmra.mrb[20].mxu1 %vm5455_vm13, %v11159_v53  ;;  %v16373_v48 = vld [vmem:[#allocation156_spill] sm:$0xff] }
 0x247   :  { %v5373_v46 = vadd.f32 1.0, %v5372_v30  ;;  %v5375_v40 = vand.u32 2147483647, %v11210_v7  ;;  %v7401_v20 = vadd.f32 -0.6931472, %v5402_v37  ;;  %v5364_v4 = vadd.f32 1.0, %v5363_v59  ;;  %7793 = vmatprep.mubr.msk.f32.mxu1 %vm5455_vm13, %v7399_v17 }
 0x248   :  { %v5350_v44 = vsel %vm5349_vm3, %v5347_v52, %v5344_v23  ;;  %v5366_v26 = vand.u32 2147483647, %v8543_v15  ;;  %v5359_v62 = vsel %vm11243_vm1, %v5356_v31, %v5353_v51  ;;  %v1694_v0 = vshll.u32 %v16372_v35, %v11239_v29 }
 0x249   :  { %v1695_v28 = vshrl.u32 %v16373_v48, %v1693_v5  ;;  %v1945_v32 = vsub.s32 32, %v16374_v24  ;;  %v7404_v14 = vadd.f32 -0.6931472, %v5405_v11  ;;  %v5406_v53 = vadd.f32 %v5350_v44, %v4958_v21 }
 0x24a   :  { %v1698_v60 = vadd.s32 127, %v1697_v22  ;;  %v16014_v2 = vand.u32 2147483647, %v16375_v18  ;;  %v7403_v54 = vadd.f32 -0.6931472, %v5404_v8  ;;  %v5374_v45 = vmul.f32 %v11210_v7, %v5373_v46  ;;  %7794 = vmatmul.mubr.msk.f32.gmra.mrb[22].mxu1 %vm5455_vm13, %v11212_v9 }
 0x24b   :  { %v8549_v63 = vpop.eup %8548  ;;  %vm11278_vm4 = vcmp.lt.f32.partialorder %v5375_v40, 0.0004427343  ;;  %v16378_v34 = vmov 2475754826   ;;  %v5407_v50 = vadd.f32 %v5359_v62, %v4959_v39  ;;  %v5365_v21 = vmul.f32 %v8543_v15, %v5364_v4  ;;  %7796 = vmatprep.mubr.msk.f32.mxu1 %vm5455_vm13, %v7401_v20  ;;  %v16387_v40 = vld [vmem:[#allocation50_spill] sm:$0xff] }
 0x24c   :  { %v1948_v42 = vshrl.u32 %v16378_v34, %v1945_v32  ;;  %vm11287_vm6 = vcmp.lt.f32.partialorder %v5366_v26, 0.0004427343  ;;  %v16381_v7 = vmov 683565275   ;;  %v5371_v43 = vmul.f32 0.6931472, %v8549_v63 }
 0x24d   :  { %v1947_v1 = vshll.u32 %v16381_v7, %v16374_v24  ;;  %v1950_v58 = vshll.u32 %v16378_v34, %v16374_v24  ;;  %v16382_v9 = vmov 2131351028   ;;  %v16383_v19 = vmov 2102212464  }
 0x24e   :  { %v1951_v61 = vshrl.u32 %v16382_v9, %v1945_v32  ;;  %v1954_v49 = vshrl.u32 %v16383_v19, %v1945_v32  ;;  %v8551_v10 = vpop.eup %8550  ;;  %v7405_v39 = vadd.f32 -0.6931472, %v5406_v53  ;;  %v1699_v15 = vshll.u32 %v1698_v60, 23  ;;  %7797 = vmatmul.mubr.msk.f32.gmra.mrb[24].mxu1 %vm5455_vm13, %v7402_v3 }
 0x24f   :  { %v1937_v38 = vand.u32 8388607, %v16014_v2  ;;  %v1953_v17 = vshll.u32 %v16382_v9, %v16374_v24  ;;  %v5362_v56 = vmul.f32 0.6931472, %v8551_v10  ;;  %v1949_v13 = vor.u32 %v1948_v42, %v1947_v1  ;;  %7799 = vmatprep.mubr.msk.f32.mxu1 %vm5455_vm13, %v7403_v54  ;;  %v16388_v54 = vld [vmem:[#allocation150_spill] sm:$0xff] }
 0x250   :  { %v1952_v29 = vor.u32 %v1951_v61, %v1950_v58  ;;  %v1956_v25 = vshll.u32 %v16383_v19, %v16374_v24  ;;  %vm7227_vm8 = vcmp.lt.s32.totalorder %v16384_v33, 0  ;;  %v16385_v30 = vmov 920167782   ;;  %v16392_v1 = vld [vmem:[#allocation134_spill] sm:$0xff]  ;;  %v16393_v58 = vld [vmem:[#allocation151_spill] sm:$0xff] }
 0x251   :  { %v1955_v16 = vor.u32 %v1954_v49, %v1953_v17  ;;  %v1957_v37 = vshrl.u32 %v16385_v30, %v1945_v32  ;;  %v1959_v55 = vshll.u32 %v16385_v30, %v16374_v24  ;;  %v16386_v59 = vmov 1326507024  }
 0x252   :  { %v1960_v36 = vshrl.u32 %v16386_v59, %v1945_v32  ;;  %v7406_v51 = vadd.f32 -0.6931472, %v5407_v50  ;;  %v5377_v3 = vsel %vm11278_vm4, %v5374_v45, %v5371_v43  ;;  %v5368_v31 = vsel %vm11287_vm6, %v5365_v21, %v5362_v56  ;;  %7800 = vmatmul.mubr.msk.f32.gmra.mrb[26].mxu1 %vm5455_vm13, %v7404_v14  ;;  %v16390_v21 = vld [vmem:[#allocation140_spill] sm:$0xff]  ;;  %v16397_v56 = vld [vmem:[#allocation155_spill] sm:$0xff] }
 0x253   :  { %v1696_v5 = vor.u32 %v1695_v28, %v1694_v0  ;;  %v5408_v11 = vadd.f32 %v5368_v31, %v4960_v57  ;;  %v1938_v23 = vor.u32 8388608, %v1937_v38  ;;  %v1958_v52 = vor.u32 %v1957_v37, %v1956_v25  ;;  %7802 = vmatprep.mubr.msk.f32.mxu1 %vm5455_vm13, %v7405_v39  ;;  %v16398_v25 = vld [vmem:[#allocation152_spill] sm:$0xff] }
 0x254   :  { %v1961_v22 = vor.u32 %v1960_v36, %v1959_v55  ;;  %v1700_v8 = vor.u32 4788187, %v1699_v15  ;;  %v1946_v46 = vshrl.u32 %v16381_v7, %v1945_v32  ;;  %vm1962_vm10 = vcmp.lt.s32.totalorder %v16387_v40, 1  ;;  %v16395_v15 = vld [vmem:[#allocation154_spill] sm:$0xff]  ;;  %v16400_v36 = vld [vmem:[#allocation59_spill] sm:$0xff] }
 0x255   :  { %vm1965_vm11 = vcmp.lt.s32.totalorder %v16387_v40, 4  ;;  %v5409_v20 = vadd.f32 %v5377_v3, %v4961_v47  ;;  %v7407_v44 = vadd.f32 -0.6931472, %v5408_v11  ;;  %v1970_v57 = vsel %vm1962_vm10, %v1949_v13, %v1952_v29 }
 0x256   :  { %v1967_v12 = vsel %vm1965_vm11, %v1955_v16, 2102212464  ;;  %vm1964_vm12 = vcmp.lt.s32.totalorder %v16387_v40, 3  ;;  %v1971_v4 = vsel %vm1965_vm11, %v1958_v52, 920167782  ;;  %v1974_v26 = vsel %vm1962_vm10, %v1952_v29, %v1955_v16  ;;  %7803 = vmatmul.mubr.msk.f32.gmra.mrb[28].mxu1 %vm5455_vm13, %v7406_v51 }
 0x257   :  { %v1975_v62 = vsel %vm1965_vm11, %v1961_v22, 1326507024  ;;  %vm1963_vm14 = vcmp.lt.s32.totalorder %v16387_v40, 2  ;;  %v1972_v35 = vsel %vm1964_vm12, %v1955_v16, %v1971_v4  ;;  %v1978_v27 = vshll.u32 %v1938_v23, 8  ;;  %7805 = vmatprep.mubr.msk.f32.mxu1 %vm5455_vm13, %v7407_v44  ;;  %v16405_v44 = vld [vmem:[#allocation34_spill] sm:$0xff] }
 0x258   :  { %v1976_v0 = vsel %vm1964_vm12, %v1958_v52, %v1975_v62  ;;  %v1966_v47 = vsel %vm1962_vm10, %v1946_v46, %v1949_v13  ;;  %v1968_v48 = vsel %vm1964_vm12, %v1952_v29, %v1967_v12  ;;  %v1973_v28 = vsel %vm1963_vm14, %v1970_v57, %v1972_v35  ;;  %v16403_v46 = vld [vmem:[#allocation144_spill] sm:$0xff] }
 0x259   :  { %v1977_v24 = vsel %vm1963_vm14, %v1974_v26, %v1976_v0  ;;  %v11341_v53 = vmul.u32.u64.low %v1978_v27, %v1973_v28  ;;  %v11342_v60 = vmul.u32.u64.high %v1978_v27, %v1973_v28, %v11341_v53  ;;  %v7408_v63 = vadd.f32 -0.6931472, %v5409_v20  ;;  %v16406_v57 = vld [vmem:[#allocation40_spill] sm:$0xff] }
 0x25a   :  { %v11338_v32 = vmul.u32.u64.low %v1978_v27, %v1977_v24  ;;  %v11339_v14 = vmul.u32.u64.high %v1978_v27, %v1977_v24, %v11338_v32  ;;  %v1602_v45 = vxor.u32 2147483648, %v16388_v54  ;;  %v11347_v42 = vmul.f32 0.125, %v16389_v6 }
 0x25b   :  { %v1701_v50 = vand.u32 2147483647, %v1700_v8  ;;  %8552 = vsinq.f32 %v16390_v21  ;;  %v11352_v43 = vadd.s32 %v16392_v1, %v16391_v41  ;;  %v11355_v61 = vmul.f32 0.125, %v16393_v58  ;;  %7806 = vmatmul.mubr.msk.f32.gmra.mrb[30].mxu1 %vm5455_vm13, %v7408_v63 }
 0x25c   :  { %v1969_v49 = vsel %vm1963_vm14, %v1966_v47, %v1968_v48  ;;  %v11363_v10 = vsel %vm7227_vm8, 0, %v16384_v33  ;;  %v16396_v38 = vsel %vm10524_vm9, 0, %v16395_v15  ;;  %v601_v13 = vmul.f32 16.0, %v16397_v56  ;;  %v16410_v48 = vld [vmem:[#allocation145_spill] sm:$0xff] }
 0x25d   :  { %v11369_v17 = vand.u32 3, %v16396_v38  ;;  %v1703_v29 = vcvt.s32.f32 %v1696_v5  ;;  %v16399_v16 = vcvt.s32.f32 %v16398_v25  ;;  %vm1987_vm13 = vc.u32 %v11339_v14, %v11341_v53 }
 0x25e   :  { %v1988_v55 = vadd.s32 1, %v11342_v60  ;;  %v1842_v33 = vsub.s32 32, %v16400_v36  ;;  %v11381_v3 = vsel %vm1520_vm5, %v1602_v45, %v16388_v54  ;;  %v698_v31 = vfloor.f32 %v11347_v42 }
 0x25f   :  { %v540_v37 = vmul.f32 0.0625, %v16399_v16  ;;  %16402 = vst [vmem:[#allocation160_spill] sm:$0xff] %v11381_v3  ;;  %v1704_v11 = vmul.f32 %v1703_v29, %v1701_v50  ;;  %v1985_v23 = vmul.u32 %v1978_v27, %v1969_v49  ;;  %v1487_v5 = vsub.s32 32, %v11363_v10  ;;  %v16413_v16 = vld [vmem:[#allocation158_spill] sm:$0xff] }
 0x260   :  { %v1491_v52 = vsub.s32 4294967266, %v11363_v10  ;;  %v762_v22 = vfloor.f32 %v11355_v61  ;;  %v1989_v8 = vsel %vm1987_vm13, %v1988_v55, %v11342_v60  ;;  %v16404_v40 = vcvt.s32.f32 %v16403_v46 }
 0x261   :  { %vm1623_vm9 = vcmp.lt.s32.totalorder %v16405_v44, 0  ;;  %v1990_v12 = vadd.s32 %v1989_v8, %v1985_v23  ;;  %v16013_v4 = vand.u32 2147483647, %v16406_v57  ;;  %vm1819_vm5 = vcmp.eq.s32.totalorder %v11369_v17, 0 }
 0x262   :  { %v11390_v20 = vsub.f32 %v16404_v40, %v601_v13  ;;  %v11395_v26 = vfloor.f32 %v540_v37  ;;  %v1845_v62 = vshrl.u32 %v16378_v34, %v1842_v33  ;;  %v1848_v35 = vshrl.u32 %v16382_v9, %v1842_v33  ;;  %v16412_v13 = vld [vmem:[#allocation159_spill] sm:$0xff] }
 0x263   :  { %v16407_v0 = vand.u32 2147483647, %v16405_v44  ;;  %v1705_v47 = vxor.u32 2147483648, %v1704_v11  ;;  %v1707_v28 = vsub.s32 4, %v16410_v48  ;;  %v1991_v24 = vadd.s32 536870912, %v1990_v12 }
 0x264   :  { %v1851_v32 = vshrl.u32 %v16383_v19, %v1842_v33  ;;  %v1844_v60 = vshll.u32 %v16381_v7, %v16400_v36  ;;  %v1847_v63 = vshll.u32 %v16378_v34, %v16400_v36  ;;  %v1853_v54 = vshll.u32 %v16383_v19, %v16400_v36 }
 0x265   :  { %vm11401_vm15 = vcmp.le.f32.partialorder %v16407_v0, 0.7853982  ;;  %v1854_v45 = vshrl.u32 %v16385_v30, %v1842_v33  ;;  %vm1818_vm0 = vcmp.lt.s32.totalorder %v11369_v17, 2  ;;  %vm1822_vm1 = vcmp.eq.s32.totalorder %v11369_v17, 2  ;;  %v11422_v1 = vpop.eup %8552 }
 0x266   :  { %v11416_v50 = vshrl.u32 %v1991_v24, 30  ;;  %v1834_v21 = vand.u32 8388607, %v16013_v4  ;;  %v1850_v41 = vshll.u32 %v16382_v9, %v16400_v36  ;;  %16411 = vst [vmem:[#allocation162_spill] sm:$0xff] %v11422_v1  ;;  %v1846_v49 = vor.u32 %v1845_v62, %v1844_v60  ;;  %v16414_v24 = vld [vmem:[#allocation58_spill] sm:$0xff] }
 0x267   :  { %v1849_v39 = vor.u32 %v1848_v35, %v1847_v63  ;;  %v1855_v15 = vor.u32 %v1854_v45, %v1853_v54  ;;  %v1857_v38 = vshrl.u32 %v16386_v59, %v1842_v33  ;;  %v1820_v29 = vxor.u32 2147483648, %v16412_v13 }
 0x268   :  { %v1823_v37 = vxor.u32 2147483648, %v16413_v16  ;;  %v1993_v55 = vshll.u32 %v11416_v50, 30  ;;  %v1852_v23 = vor.u32 %v1851_v32, %v1850_v41  ;;  %v1706_v8 = vsel %vm1623_vm9, %v1705_v47, %v1704_v11 }
 0x269   :  { %v1708_v46 = vsel %vm1623_vm9, %v1707_v28, %v16410_v48  ;;  %v604_v40 = vmul.f32 16.0, %v11395_v26  ;;  %v1856_v62 = vshll.u32 %v16385_v30, %v16400_v36  ;;  %v1835_v0 = vor.u32 8388608, %v1834_v21  ;;  %v16415_v48 = vld [vmem:[#allocation22_spill] sm:$0xff] }
 0x26a   :  { %v11436_v35 = vsub.s32 %v1990_v12, %v1993_v55  ;;  %vm1859_vm3 = vcmp.lt.s32.totalorder %v16414_v24, 1  ;;  %vm1862_vm4 = vcmp.lt.s32.totalorder %v16414_v24, 4  ;;  %vm1861_vm6 = vcmp.lt.s32.totalorder %v16414_v24, 3 }
 0x26b   :  { %v1858_v32 = vor.u32 %v1857_v38, %v1856_v62  ;;  %v1867_v11 = vsel %vm1859_vm3, %v1846_v49, %v1849_v39  ;;  %v1868_v47 = vsel %vm1862_vm4, %v1855_v15, 920167782  ;;  %vm1816_vm8 = vweird.f32 %v16415_v48  ;;  %v16419_v48 = vld [vmem:[#allocation63_spill] sm:$0xff] }
 0x26c   :  { %v1821_v36 = vsel %vm1819_vm5, %v16413_v16, %v1820_v29  ;;  %v1824_v12 = vsel %vm1822_vm1, %v1823_v37, %v16412_v13  ;;  %v1996_v28 = vsub.s32 0, %v11436_v35  ;;  %v1869_v60 = vsel %vm1861_vm6, %v1852_v23, %v1868_v47 }
 0x26d   :  { %v1709_v63 = vsel %vm11401_vm15, %v16405_v44, %v1706_v8  ;;  %v16416_v54 = vcvt.s32.f32 %v16398_v25  ;;  %v1843_v21 = vshrl.u32 %v16381_v7, %v1842_v33  ;;  %vm1860_vm10 = vcmp.lt.s32.totalorder %v16414_v24, 2 }
 0x26e   :  { %v7245_v41 = vmin.u32 %v1996_v28, %v11436_v35  ;;  %v1864_v38 = vsel %vm1862_vm4, %v1852_v23, 2102212464  ;;  %v1870_v13 = vsel %vm1860_vm10, %v1867_v11, %v1869_v60  ;;  %v1871_v29 = vsel %vm1859_vm3, %v1849_v39, %v1852_v23 }
 0x26f   :  { %v11460_v45 = vsub.f32 %v16416_v54, %v604_v40  ;;  %v1825_v25 = vsel %vm1818_vm0, %v1821_v36, %v1824_v12  ;;  %v1710_v16 = vsel %vm11401_vm15, 0, %v1708_v46  ;;  %v1872_v33 = vsel %vm1862_vm4, %v1858_v32, 1326507024 }
 0x270   :  { %v1875_v37 = vshll.u32 %v1835_v0, 8  ;;  %8554 = vcosq.f32 %v1709_v63  ;;  %v1998_v55 = vclz %v7245_v41  ;;  %v1863_v8 = vsel %vm1859_vm3, %v1843_v21, %v1846_v49  ;;  %v16417_v0 = vld [vmem:[#allocation5_spill] sm:$0xff]  ;;  %v16418_v49 = vld [vmem:[#allocation143_spill] sm:$0xff] }
 0x271   :  { %v1873_v40 = vsel %vm1861_vm6, %v1855_v15, %v1872_v33  ;;  %v1865_v23 = vsel %vm1861_vm6, %v1849_v39, %v1864_v38  ;;  %v11490_v32 = vadd.s32 48, %v16417_v0  ;;  %v11500_v39 = vshrl.u32 %v11352_v43, %v1487_v5 }
 0x272   :  { %v1874_v17 = vsel %vm1860_vm10, %v1871_v29, %v1873_v40  ;;  %v11485_v27 = vmul.u32.u64.low %v1875_v37, %v1870_v13  ;;  %v11486_v46 = vmul.u32.u64.high %v1875_v37, %v1870_v13, %v11485_v27  ;;  %v7246_v62 = vadd.s32 4294967294, %v1998_v55  ;;  %v16420_v55 = vld [vmem:[#allocation41_spill] sm:$0xff] }
 0x273   :  { %v11492_v11 = vmul.u32.u64.low %v1875_v37, %v1874_v17  ;;  %v11493_v47 = vmul.u32.u64.high %v1875_v37, %v1874_v17, %v11492_v11  ;;  %v11504_v36 = vadd.s32 127, %v1491_v52  ;;  %v665_v12 = vmul.f32 0.125, %v16397_v56 }
 0x274   :  { %v729_v28 = vmul.f32 0.125, %v11390_v20  ;;  %v11509_v60 = vmul.f32 0.125, %v11395_v26  ;;  %vm7247_vm11 = vcmp.lt.s32.totalorder %v7246_v62, 0  ;;  %v1866_v54 = vsel %vm1860_vm10, %v1863_v8, %v1865_v23 }
 0x275   :  { %v1826_v21 = vsel %vm1816_vm8, nan, %v1825_v25  ;;  %v11515_v43 = vand.u32 3, %v1710_v16  ;;  %v11517_v5 = vsel %vm7247_vm11, 0, %v7246_v62  ;;  %v1885_v52 = vadd.s32 1, %v11486_v46 }
 0x276   :  { %8556 = vsinq.f32 %v1709_v63  ;;  %v11521_v41 = vmul.f32 0.125, %v11460_v45  ;;  %v2006_v38 = vsub.s32 4294967266, %v11517_v5  ;;  %v16015_v13 = vcvt.s32.f32 %v11490_v32 }
 0x277   :  { %v1882_v29 = vmul.u32 %v1875_v37, %v1866_v54  ;;  %vm1884_vm12 = vc.u32 %v11493_v47, %v11485_v27  ;;  %v11528_v24 = vadd.s32 72, %v16417_v0  ;;  %v11531_v25 = vsub.s32 32, %v16419_v48 }
 0x278   :  { %v697_v63 = vfloor.f32 %v665_v12  ;;  %v1886_v33 = vsel %vm1884_vm12, %v1885_v52, %v11486_v46  ;;  %v16016_v8 = vand.u32 2147483647, %v16420_v55  ;;  %v11536_v40 = vadd.f32 1.0, %v1826_v21  ;;  %v11562_v21 = vpop.f32.mrb[32].mxu0 }
 0x279   :  { %v761_v23 = vfloor.f32 %v729_v28  ;;  %v1887_v17 = vadd.s32 %v1886_v33, %v1882_v29  ;;  %v1986_v54 = vadd.s32 %v11341_v53, %v11339_v14  ;;  %v2007_v4 = vadd.s32 127, %v2006_v38  ;;  %16423 = vst [vmem:[#allocation161_spill] sm:$0xff] %v11562_v21  ;;  %v11571_v38 = vpop.f32.mrb[33].mxu0 }
 0x27a   :  { %v11539_v62 = vpop.eup %8554  ;;  %v539_v12 = vmul.f32 0.0625, %v16015_v13  ;;  %vm11550_vm14 = vcmp.eq.f32.partialorder %v698_v31, %v762_v22  ;;  %vm826_vm13 = vcmp.ne.f32.partialorder %v16389_v6, %v16393_v58  ;;  %vm1719_vm9 = vcmp.eq.s32.totalorder %v11515_v43, 2  ;;  %16424 = vst [vmem:[#allocation163_spill] sm:$0xff] %v11571_v38 }
 0x27b   :  { %v1888_v28 = vadd.s32 536870912, %v1887_v17  ;;  %v2154_v53 = vshrl.u32 %v16378_v34, %v11531_v25  ;;  %v2157_v61 = vshrl.u32 %v16382_v9, %v11531_v25  ;;  %v2002_v42 = vsub.s32 32, %v11517_v5  ;;  %vm890_vm11 = vmand %vm11550_vm14, %vm826_vm13 }
 0x27c   :  { %v2143_v31 = vand.u32 8388607, %v16016_v8  ;;  %v2160_v22 = vshrl.u32 %v16383_v19, %v11531_v25  ;;  %v2163_v52 = vshrl.u32 %v16385_v30, %v11531_v25  ;;  %v2153_v33 = vshll.u32 %v16381_v7, %v16419_v48  ;;  %v16426_v8 = vld [vmem:[#allocation14_spill] sm:$0xff] }
 0x27d   :  { %v11573_v29 = vshrl.u32 %v1888_v28, 30  ;;  %v2156_v2 = vshll.u32 %v16378_v34, %v16419_v48  ;;  %v2162_v13 = vshll.u32 %v16383_v19, %v16419_v48  ;;  %vm858_vm5 = vcmp.le.f32.partialorder %v16426_v8, 4.0 }
 0x27e   :  { %v1720_v16 = vxor.u32 2147483648, %v11539_v62  ;;  %v2008_v15 = vshll.u32 %v2007_v4, 23  ;;  %v2159_v37 = vshll.u32 %v16382_v9, %v16419_v48  ;;  %v2166_v28 = vshrl.u32 %v16386_v59, %v11531_v25  ;;  %vm11646_vm12 = vmand %vm890_vm11, %vm858_vm5 }
 0x27f   :  { %16425 = vst [vmem:[#allocation157_spill] sm:$0xff] %v11573_v29  ;;  %vm11587_vm15 = vcmp.eq.f32.partialorder %v697_v63, %v761_v23  ;;  %vm825_vm0 = vcmp.ne.f32.partialorder %v16397_v56, %v11390_v20  ;;  %v1890_v14 = vshll.u32 %v11573_v29, 30  ;;  %v2155_v3 = vor.u32 %v2154_v53, %v2153_v33 }
 0x280   :  { %v2158_v1 = vor.u32 %v2157_v61, %v2156_v2  ;;  %v2164_v51 = vor.u32 %v2163_v52, %v2162_v13  ;;  %v8557_v38 = vpop.eup %8556  ;;  %v2004_v4 = vshrl.u32 %v1986_v54, %v2002_v42  ;;  %v11594_v21 = vfloor.f32 %v539_v12  ;;  %v16430_v13 = vld [vmem:[#allocation15_spill] sm:$0xff]  ;;  %v16431_v61 = vld [vmem:[#allocation60_spill] sm:$0xff]  ;;  %vm11661_vm14 = vmand %vm11587_vm15, %vm825_vm0 }
 0x281   :  { %v2161_v55 = vor.u32 %v2160_v22, %v2159_v37  ;;  %v2165_v57 = vshll.u32 %v16385_v30, %v16419_v48  ;;  %vm1716_vm1 = vcmp.eq.s32.totalorder %v11515_v43, 0  ;;  %v2003_v63 = vshll.u32 %v11436_v35, %v11517_v5 }
 0x282   :  { %v11601_v23 = vsub.s32 %v1887_v17, %v1890_v14  ;;  %v16429_v29 = vcvt.s32.f32 %v11528_v24  ;;  %v2144_v2 = vor.u32 8388608, %v2143_v31  ;;  %vm857_vm3 = vcmp.le.f32.partialorder %v16430_v13, 4.0 }
 0x283   :  { %v2009_v54 = vor.u32 4788187, %v2008_v15  ;;  %v2167_v12 = vor.u32 %v2166_v28, %v2165_v57  ;;  %vm2168_vm4 = vcmp.lt.s32.totalorder %v16431_v61, 1  ;;  %vm2171_vm6 = vcmp.lt.s32.totalorder %v16431_v61, 4  ;;  %vm11702_vm0 = vmand %vm11661_vm14, %vm857_vm3 }
 0x284   :  { %v542_v53 = vmul.f32 0.0625, %v16429_v29  ;;  %v1893_v48 = vsub.s32 0, %v11601_v23  ;;  %vm2170_vm8 = vcmp.lt.s32.totalorder %v16431_v61, 3  ;;  %v2176_v35 = vsel %vm2168_vm4, %v2155_v3, %v2158_v1 }
 0x285   :  { %v2177_v5 = vsel %vm2171_vm6, %v2164_v51, 920167782  ;;  %v1717_v37 = vxor.u32 2147483648, %v8557_v38  ;;  %v1721_v17 = vsel %vm1719_vm9, %v1720_v16, %v8557_v38  ;;  %v2005_v15 = vor.u32 %v2004_v4, %v2003_v63 }
 0x286   :  { %v2178_v57 = vsel %vm2170_vm8, %v2161_v55, %v2177_v5  ;;  %v603_v14 = vmul.f32 16.0, %v11594_v21  ;;  %v7241_v42 = vmin.u32 %v1893_v48, %v11601_v23  ;;  %vm2169_vm10 = vcmp.lt.s32.totalorder %v16431_v61, 2 }
 0x287   :  { %v2173_v31 = vsel %vm2171_vm6, %v2161_v55, 2102212464  ;;  %v2010_v16 = vand.u32 2147483647, %v2009_v54  ;;  %v2152_v22 = vshrl.u32 %v16381_v7, %v11531_v25  ;;  %v2179_v52 = vsel %vm2169_vm10, %v2176_v35, %v2178_v57 }
 0x288   :  { %v2180_v38 = vsel %vm2168_vm4, %v2158_v1, %v2161_v55  ;;  %v1895_v29 = vclz %v7241_v42  ;;  %v11634_v33 = vfloor.f32 %v542_v53  ;;  %v2181_v28 = vsel %vm2171_vm6, %v2167_v12, 1326507024 }
 0x289   :  { %v2184_v6 = vshll.u32 %v2144_v2, 8  ;;  %v2012_v58 = vcvt.s32.f32 %v2005_v15  ;;  %v2172_v46 = vsel %vm2168_vm4, %v2152_v22, %v2155_v3  ;;  %v2174_v25 = vsel %vm2170_vm8, %v2158_v1, %v2173_v31 }
 0x28a   :  { %v2182_v4 = vsel %vm2170_vm8, %v2164_v51, %v2181_v28  ;;  %v7242_v63 = vadd.s32 4294967294, %v1895_v29  ;;  %v1718_v3 = vsel %vm1716_vm1, %v11539_v62, %v1717_v37  ;;  %v16436_v48 = vfloor.f32 %v11521_v41 }
 0x28b   :  { %v2183_v53 = vsel %vm2169_vm10, %v2180_v38, %v2182_v4  ;;  %v11652_v2 = vmul.u32.u64.low %v2184_v6, %v2179_v52  ;;  %v11653_v54 = vmul.u32.u64.high %v2184_v6, %v2179_v52, %v11652_v2  ;;  %v2013_v1 = vmul.f32 %v2012_v58, %v2010_v16 }
 0x28c   :  { %v11668_v8 = vmul.u32.u64.low %v2184_v6, %v2183_v53  ;;  %v11669_v12 = vmul.u32.u64.high %v2184_v6, %v2183_v53, %v11668_v8  ;;  %v16437_v35 = vfloor.f32 %v11509_v60  ;;  %vm828_vm9 = vcmp.ne.f32.partialorder %v11395_v26, %v11460_v45 }
 0x28d   :  { %v606_v20 = vmul.f32 16.0, %v11634_v33  ;;  %v2175_v62 = vsel %vm2169_vm10, %v2172_v46, %v2174_v25  ;;  %v16440_v11 = vshll.u32 %v16418_v49, %v11363_v10  ;;  %v16441_v60 = vshll.u32 %v11504_v36, 23  ;;  %v16445_v49 = vld [vmem:[#allocation16_spill] sm:$0xff] }
 0x28e   :  { %vm11675_vm13 = vcmp.eq.f32.partialorder %v16437_v35, %v16436_v48  ;;  %vm1715_vm5 = vcmp.lt.s32.totalorder %v11515_v43, 2  ;;  %vm7243_vm15 = vcmp.lt.s32.totalorder %v7242_v63, 0  ;;  %v16442_v37 = vmov 0.0  }
 0x28f   :  { %v11688_v5 = vor.u32 %v11500_v39, %v16440_v11  ;;  %v11692_v41 = vor.u32 4788187, %v16441_v60  ;;  %v7189_v26 = vsel %vm11646_vm12, 1.0, %v16442_v37  ;;  %v1722_v45 = vsel %vm1715_vm5, %v1718_v3, %v1721_v17  ;;  %vm11710_vm4 = vmand %vm11675_vm13, %vm828_vm9 }
 0x290   :  { %vm860_vm1 = vcmp.le.f32.partialorder %v16445_v49, 4.0  ;;  %v2194_v39 = vadd.s32 1, %v11653_v54  ;;  %v2014_v43 = vxor.u32 2147483648, %v2013_v1  ;;  %v16448_v13 = vcvt.s32.f32 %v11490_v32 }
 0x291   :  { %v2191_v15 = vmul.u32 %v2184_v6, %v2175_v62  ;;  %vm2193_vm3 = vc.u32 %v11669_v12, %v11652_v2  ;;  %v4542_v17 = vmul.f32 0.5, %v11536_v40  ;;  %v11721_v57 = vsel %vm7243_vm15, 0, %v7242_v63  ;;  %vm924_vm8 = vmand %vm11710_vm4, %vm860_vm1  ;;  %v16454_v62 = vld [vmem:[#allocation44_spill] sm:$0xff] }
 0x292   :  { %v11716_v61 = vsub.f32 %v16448_v13, %v603_v14  ;;  %v16449_v42 = vcvt.s32.f32 %v11528_v24  ;;  %v2195_v16 = vsel %vm2193_vm3, %v2194_v39, %v11653_v54  ;;  %vm1713_vm6 = vweird.f32 %v16405_v44  ;;  %v16453_v54 = vld [vmem:[#allocation65_spill] sm:$0xff] }
 0x293   :  { %v2196_v14 = vadd.s32 %v2195_v16, %v2191_v15  ;;  %v11734_v52 = vsel %vm11702_vm0, 1.0, %v16442_v37  ;;  %v1723_v40 = vsel %vm1713_vm6, nan, %v1722_v45  ;;  %vm1932_vm10 = vcmp.lt.s32.totalorder %v16375_v18, 0 }
 0x294   :  { %v11725_v31 = vsub.f32 %v16449_v42, %v606_v20  ;;  %v667_v24 = vmul.f32 0.125, %v11594_v21  ;;  %v2015_v38 = vsel %vm1932_vm10, %v2014_v43, %v2013_v1  ;;  %v731_v44 = vmul.f32 0.125, %v11716_v61 }
 0x295   :  { %v1903_v29 = vsub.s32 4294967266, %v11721_v57  ;;  %v2197_v28 = vadd.s32 536870912, %v2196_v14  ;;  %v11746_v6 = vmul.f32 %v7189_v26, %v4542_v17  ;;  %v2016_v58 = vsub.s32 4, %v11416_v50 }
 0x296   :  { %v11750_v46 = vmul.f32 0.125, %v11634_v33  ;;  %v11753_v25 = vmul.f32 0.125, %v11725_v31  ;;  %v11756_v4 = vsel %vm924_vm8, 1.0, %v16442_v37  ;;  %v16450_v55 = vand.u32 2147483647, %v16375_v18 }
 0x297   :  { %v11764_v53 = vshrl.u32 %v2197_v28, 30  ;;  %v2048_v51 = vsub.s32 32, %v16453_v54  ;;  %v11767_v3 = vadd.f32 1.0, %v1723_v40  ;;  %v699_v8 = vfloor.f32 %v667_v24 }
 0x298   :  { %vm11760_vm11 = vcmp.le.f32.partialorder %v16450_v55, 0.7853982  ;;  %v1899_v48 = vsub.s32 32, %v11721_v57  ;;  %v763_v35 = vfloor.f32 %v731_v44  ;;  %v1904_v56 = vadd.s32 127, %v1903_v29 }
 0x299   :  { %v2018_v1 = vsel %vm11760_vm11, %v16375_v18, %v2015_v38  ;;  %v2199_v20 = vshll.u32 %v11764_v53, 30  ;;  %v2033_v11 = vand.u32 2147483647, %v16454_v62  ;;  %v11778_v60 = vsel %vm1932_vm10, %v2016_v58, %v11416_v50 }
 0x29a   :  { %v1883_v26 = vadd.s32 %v11485_v27, %v11493_v47  ;;  %v702_v10 = vfloor.f32 %v11750_v46  ;;  %v766_v45 = vfloor.f32 %v11753_v25  ;;  %8558 = vcosq.f32 %v2018_v1  ;;  %v16471_v25 = vld [vmem:[#allocation41_spill] sm:$0xff] }
 0x29b   :  { %v11784_v49 = vsub.s32 %v2196_v14, %v2199_v20  ;;  %v2051_v39 = vshrl.u32 %v16378_v34, %v2048_v51  ;;  %v2054_v36 = vshrl.u32 %v16382_v9, %v2048_v51  ;;  %v2050_v13 = vshll.u32 %v16381_v7, %v16453_v54  ;;  %v16457_v20 = vld [vmem:[#allocation64_spill] sm:$0xff] }
 0x29c   :  { %v1901_v43 = vshrl.u32 %v1883_v26, %v1899_v48  ;;  %v2053_v50 = vshll.u32 %v16378_v34, %v16453_v54  ;;  %v2057_v27 = vshrl.u32 %v16383_v19, %v2048_v51  ;;  %v1905_v47 = vshll.u32 %v1904_v56, 23 }
 0x29d   :  { %v2202_v15 = vsub.s32 0, %v11784_v49  ;;  %v2040_v17 = vand.u32 8388607, %v2033_v11  ;;  %v2060_v42 = vshrl.u32 %v16385_v30, %v2048_v51  ;;  %8560 = vsinq.f32 %v2018_v1 }
 0x29e   :  { %v1900_v16 = vshll.u32 %v11601_v23, %v11721_v57  ;;  %v2056_v14 = vshll.u32 %v16382_v9, %v16453_v54  ;;  %v2059_v40 = vshll.u32 %v16383_v19, %v16453_v54  ;;  %vm11803_vm12 = vcmp.eq.f32.partialorder %v699_v8, %v763_v35 }
 0x29f   :  { %vm827_vm14 = vcmp.ne.f32.partialorder %v11594_v21, %v11716_v61  ;;  %v7253_v38 = vmin.u32 %v2202_v15, %v11784_v49  ;;  %v2049_v44 = vshrl.u32 %v16381_v7, %v2048_v51  ;;  %v2052_v29 = vor.u32 %v2051_v39, %v2050_v13 }
 0x2a0   :  { %v2055_v28 = vor.u32 %v2054_v36, %v2053_v50  ;;  %v2058_v23 = vor.u32 %v2057_v27, %v2056_v14  ;;  %v2061_v57 = vor.u32 %v2060_v42, %v2059_v40  ;;  %v2062_v58 = vshll.u32 %v16385_v30, %v16453_v54  ;;  %vm11855_vm4 = vmand %vm11803_vm12, %vm827_vm14 }
 0x2a1   :  { %v2063_v55 = vshrl.u32 %v16386_v59, %v2048_v51  ;;  %v1902_v1 = vor.u32 %v1901_v43, %v1900_v16  ;;  %v1906_v8 = vor.u32 4788187, %v1905_v47  ;;  %v2204_v48 = vclz %v7253_v38 }
 0x2a2   :  { %v2041_v35 = vor.u32 8388608, %v2040_v17  ;;  %vm2065_vm13 = vcmp.lt.s32.totalorder %v16457_v20, 1  ;;  %vm2066_vm9 = vcmp.lt.s32.totalorder %v16457_v20, 2  ;;  %vm2068_vm5 = vcmp.lt.s32.totalorder %v16457_v20, 4 }
 0x2a3   :  { %v2064_v56 = vor.u32 %v2063_v55, %v2062_v58  ;;  %v7254_v26 = vadd.s32 4294967294, %v2204_v48  ;;  %vm2067_vm15 = vcmp.lt.s32.totalorder %v16457_v20, 3  ;;  %v2073_v39 = vsel %vm2065_vm13, %v2052_v29, %v2055_v28 }
 0x2a4   :  { %v2074_v54 = vsel %vm2068_vm5, %v2061_v57, 920167782  ;;  %v2070_v36 = vsel %vm2068_vm5, %v2058_v23, 2102212464  ;;  %v2077_v43 = vsel %vm2065_vm13, %v2055_v28, %v2058_v23  ;;  %v11824_v50 = vpop.eup %8558  ;;  %v1907_v27 = vand.u32 2147483647, %v1906_v8 }
 0x2a5   :  { %v2075_v51 = vsel %vm2067_vm15, %v2058_v23, %v2074_v54  ;;  %v2078_v13 = vsel %vm2068_vm5, %v2064_v56, 1326507024  ;;  %vm7255_vm0 = vcmp.lt.s32.totalorder %v7254_v26, 0  ;;  %v11831_v42 = vadd.s32 64, %v16417_v0 }
 0x2a6   :  { %v2076_v47 = vsel %vm2066_vm9, %v2073_v39, %v2075_v51  ;;  %v2079_v15 = vsel %vm2067_vm15, %v2061_v57, %v2078_v13  ;;  %v2207_v17 = vsel %vm7255_vm0, 0, %v7254_v26  ;;  %v2081_v14 = vshll.u32 %v2041_v35, 8  ;;  %v16462_v51 = vld [vmem:[#allocation40_spill] sm:$0xff] }
 0x2a7   :  { %v2080_v16 = vsel %vm2066_vm9, %v2077_v43, %v2079_v15  ;;  %v1909_v40 = vcvt.s32.f32 %v1902_v1  ;;  %v2212_v38 = vsub.s32 4294967266, %v2207_v17  ;;  %v2069_v23 = vsel %vm2065_vm13, %v2049_v44, %v2052_v29  ;;  %v8561_v55 = vpop.eup %8560  ;;  %v16458_v1 = vld [vmem:[#allocation18_spill] sm:$0xff]  ;;  %v16461_v29 = vld [vmem:[#allocation157_spill] sm:$0xff]  ;;  %v16468_v15 = vld [vmem:[#allocation19_spill] sm:$0xff] }
 0x2a8   :  { %v2071_v58 = vsel %vm2067_vm15, %v2055_v28, %v2070_v36  ;;  %v11839_v8 = vmul.u32.u64.low %v2081_v14, %v2080_v16  ;;  %v11840_v48 = vmul.u32.u64.high %v2081_v14, %v2080_v16, %v11839_v8  ;;  %v2019_v35 = vsel %vm11760_vm11, 0, %v11778_v60 }
 0x2a9   :  { %v11842_v57 = vmul.u32.u64.low %v2081_v14, %v2076_v47  ;;  %v11843_v56 = vmul.u32.u64.high %v2081_v14, %v2076_v47, %v11842_v57  ;;  %vm859_vm1 = vcmp.le.f32.partialorder %v16458_v1, 4.0  ;;  %v1910_v26 = vmul.f32 %v1909_v40, %v1907_v27 }
 0x2aa   :  { %v2213_v39 = vadd.s32 127, %v2212_v38  ;;  %v1913_v28 = vsub.s32 4, %v16461_v29  ;;  %v2208_v54 = vsub.s32 32, %v2207_v17  ;;  %v509_v36 = vcvt.s32.f32 %v11831_v42  ;;  %vm923_vm11 = vmand %vm11855_vm4, %vm859_vm1 }
 0x2ab   :  { %v2072_v63 = vsel %vm2066_vm9, %v2069_v23, %v2071_v58  ;;  %v4541_v60 = vmul.f32 0.5, %v11767_v3  ;;  %vm1829_vm3 = vcmp.lt.s32.totalorder %v16462_v51, 0  ;;  %vm11869_vm6 = vcmp.eq.f32.partialorder %v702_v10, %v766_v45 }
 0x2ac   :  { %vm830_vm8 = vcmp.ne.f32.partialorder %v11634_v33, %v11725_v31  ;;  %v2192_v61 = vadd.s32 %v11652_v2, %v11669_v12  ;;  %v2214_v24 = vshll.u32 %v2213_v39, 23  ;;  %vm2090_vm10 = vc.u32 %v11840_v48, %v11842_v57  ;;  %v16469_v31 = vld [vmem:[#allocation68_spill] sm:$0xff] }
 0x2ad   :  { %v2091_v3 = vadd.s32 1, %v11843_v56  ;;  %v2023_v20 = vand.u32 3, %v2019_v35  ;;  %v16465_v46 = vand.u32 2147483647, %v16462_v51  ;;  %v1911_v10 = vxor.u32 2147483648, %v1910_v26  ;;  %vm894_vm13 = vmand %vm11869_vm6, %vm830_vm8 }
 0x2ae   :  { %v2088_v2 = vmul.u32 %v2081_v14, %v2072_v63  ;;  %v1914_v12 = vsel %vm1829_vm3, %v1913_v28, %v16461_v29  ;;  %v2210_v45 = vshrl.u32 %v2192_v61, %v2208_v54  ;;  %v541_v43 = vmul.f32 0.0625, %v509_v36  ;;  %v16470_v29 = vld [vmem:[#allocation45_spill] sm:$0xff] }
 0x2af   :  { %vm11886_vm12 = vcmp.le.f32.partialorder %v16465_v46, 0.7853982  ;;  %v2092_v13 = vsel %vm2090_vm10, %v2091_v3, %v11843_v56  ;;  %v2026_v27 = vxor.u32 2147483648, %v8561_v55  ;;  %v2029_v47 = vxor.u32 2147483648, %v11824_v50 }
 0x2b0   :  { %vm862_vm14 = vcmp.le.f32.partialorder %v16468_v15, 4.0  ;;  %v2093_v16 = vadd.s32 %v2092_v13, %v2088_v2  ;;  %v11904_v14 = vmul.f32 %v11734_v52, %v4541_v60  ;;  %v11907_v40 = vsel %vm923_vm11, 1.0, %v16442_v37 }
 0x2b1   :  { %v2209_v38 = vshll.u32 %v11784_v49, %v2207_v17  ;;  %v2215_v23 = vor.u32 4788187, %v2214_v24  ;;  %v1912_v58 = vsel %vm1829_vm3, %v1911_v10, %v1910_v26  ;;  %v1916_v8 = vsel %vm11886_vm12, 0, %v1914_v12  ;;  %vm926_vm0 = vmand %vm894_vm13, %vm862_vm14 }
 0x2b2   :  { %v2094_v33 = vadd.s32 536870912, %v2093_v16  ;;  %v11915_v56 = vsub.s32 32, %v16469_v31  ;;  %vm2022_vm9 = vweird.f32 %v16375_v18  ;;  %vm2025_vm5 = vcmp.eq.s32.totalorder %v2023_v20, 0  ;;  %v16475_v18 = vld [vmem:[#allocation66_spill] sm:$0xff] }
 0x2b3   :  { %vm2028_vm15 = vcmp.eq.s32.totalorder %v2023_v20, 2  ;;  %v2211_v52 = vor.u32 %v2210_v45, %v2209_v38  ;;  %v11918_v35 = vfloor.f32 %v541_v43  ;;  %vm2024_vm1 = vcmp.lt.s32.totalorder %v2023_v20, 2 }
 0x2b4   :  { %v2027_v49 = vsel %vm2025_vm5, %v11824_v50, %v2026_v27  ;;  %v2030_v17 = vsel %vm2028_vm15, %v2029_v47, %v8561_v55  ;;  %v11921_v1 = vshrl.u32 %v2094_v33, 30  ;;  %v1915_v26 = vsel %vm11886_vm12, %v16462_v51, %v1912_v58 }
 0x2b5   :  { %v11926_v39 = vand.u32 3, %v1916_v8  ;;  %v2216_v44 = vand.u32 2147483647, %v2215_v23  ;;  %v16025_v28 = vand.u32 2147483647, %v16470_v29  ;;  %v11930_v54 = vsel %vm926_vm0, 1.0, %v16442_v37 }
 0x2b6   :  { %v2096_v63 = vshll.u32 %v11921_v1, 30  ;;  %v2360_v50 = vshrl.u32 %v16378_v34, %v11915_v56  ;;  %v2363_v55 = vshrl.u32 %v16382_v9, %v11915_v56  ;;  %v2031_v60 = vsel %vm2024_vm1, %v2027_v49, %v2030_v17 }
 0x2b7   :  { %v2218_v21 = vcvt.s32.f32 %v2211_v52  ;;  %v605_v61 = vmul.f32 16.0, %v11918_v35  ;;  %v2366_v24 = vshrl.u32 %v16383_v19, %v11915_v56  ;;  %8562 = vcosq.f32 %v1915_v26 }
 0x2b8   :  { %v11940_v3 = vsub.s32 %v2093_v16, %v2096_v63  ;;  %v2359_v20 = vshll.u32 %v16381_v7, %v16469_v31  ;;  %v2362_v46 = vshll.u32 %v16378_v34, %v16469_v31  ;;  %8564 = vsinq.f32 %v1915_v26 }
 0x2b9   :  { %vm2138_vm4 = vcmp.lt.s32.totalorder %v16471_v25, 0  ;;  %v2219_v10 = vmul.f32 %v2218_v21, %v2216_v44  ;;  %v2349_v2 = vand.u32 8388607, %v16025_v28  ;;  %v2365_v12 = vshll.u32 %v16382_v9, %v16469_v31 }
 0x2ba   :  { %v2099_v45 = vsub.s32 0, %v11940_v3  ;;  %v2361_v43 = vor.u32 %v2360_v50, %v2359_v20  ;;  %v2364_v13 = vor.u32 %v2363_v55, %v2362_v46  ;;  %v2369_v27 = vshrl.u32 %v16385_v30, %v11915_v56 }
 0x2bb   :  { %v2367_v47 = vor.u32 %v2366_v24, %v2365_v12  ;;  %v2368_v15 = vshll.u32 %v16383_v19, %v16469_v31  ;;  %v2371_v16 = vshll.u32 %v16385_v30, %v16469_v31  ;;  %v2372_v38 = vshrl.u32 %v16386_v59, %v11915_v56 }
 0x2bc   :  { %v2032_v23 = vsel %vm2022_vm9, nan, %v2031_v60  ;;  %v16472_v58 = vand.u32 2147483647, %v16471_v25  ;;  %v2222_v33 = vsub.s32 4, %v11764_v53  ;;  %v7249_v52 = vmin.u32 %v2099_v45, %v11940_v3 }
 0x2bd   :  { %v11971_v49 = vadd.s32 88, %v16417_v0  ;;  %v2220_v31 = vxor.u32 2147483648, %v2219_v10  ;;  %v2350_v17 = vor.u32 8388608, %v2349_v2  ;;  %v2370_v26 = vor.u32 %v2369_v27, %v2368_v15 }
 0x2be   :  { %vm11964_vm3 = vcmp.le.f32.partialorder %v16472_v58, 0.7853982  ;;  %v2373_v44 = vor.u32 %v2372_v38, %v2371_v16  ;;  %v2101_v63 = vclz %v7249_v52  ;;  %vm2374_vm6 = vcmp.lt.s32.totalorder %v16475_v18, 1 }
 0x2bf   :  { %vm2376_vm8 = vcmp.lt.s32.totalorder %v16475_v18, 3  ;;  %vm2377_vm10 = vcmp.lt.s32.totalorder %v16475_v18, 4  ;;  %v2382_v50 = vsel %vm2374_vm6, %v2361_v43, %v2364_v13  ;;  %v2386_v60 = vsel %vm2374_vm6, %v2364_v13, %v2367_v47 }
 0x2c0   :  { %v2383_v55 = vsel %vm2377_vm10, %v2370_v26, 920167782  ;;  %v2387_v21 = vsel %vm2377_vm10, %v2373_v44, 1326507024  ;;  %v7250_v24 = vadd.s32 4294967294, %v2101_v63  ;;  %vm2375_vm11 = vcmp.lt.s32.totalorder %v16475_v18, 2 }
 0x2c1   :  { %v2384_v20 = vsel %vm2376_vm8, %v2367_v47, %v2383_v55  ;;  %v2388_v46 = vsel %vm2376_vm8, %v2370_v26, %v2387_v21  ;;  %v512_v2 = vcvt.s32.f32 %v11971_v49  ;;  %v2379_v12 = vsel %vm2377_vm10, %v2367_v47, 2102212464  ;;  %v8563_v15 = vpop.eup %8562 }
 0x2c2   :  { %v2389_v45 = vsel %vm2375_vm11, %v2386_v60, %v2388_v46  ;;  %v2390_v27 = vshll.u32 %v2350_v17, 8  ;;  %vm1925_vm12 = vcmp.eq.s32.totalorder %v11926_v39, 2  ;;  %v2221_v16 = vsel %vm2138_vm4, %v2220_v31, %v2219_v10  ;;  %v8565_v52 = vpop.eup %8564 }
 0x2c3   :  { %vm7251_vm14 = vcmp.lt.s32.totalorder %v7250_v24, 0  ;;  %v2358_v38 = vshrl.u32 %v16381_v7, %v11915_v56  ;;  %v2385_v58 = vsel %vm2375_vm11, %v2382_v50, %v2384_v20  ;;  %vm1922_vm13 = vcmp.eq.s32.totalorder %v11926_v39, 0 }
 0x2c4   :  { %v2089_v47 = vadd.s32 %v11842_v57, %v11840_v48  ;;  %v2104_v17 = vsel %vm7251_vm14, 0, %v7250_v24  ;;  %v11998_v26 = vmul.u32.u64.low %v2390_v27, %v2389_v45  ;;  %v11999_v44 = vmul.u32.u64.high %v2390_v27, %v2389_v45, %v11998_v26 }
 0x2c5   :  { %v2105_v63 = vsub.s32 32, %v2104_v17  ;;  %v2109_v55 = vsub.s32 4294967266, %v2104_v17  ;;  %v2378_v10 = vsel %vm2374_vm6, %v2358_v38, %v2361_v43  ;;  %v2380_v56 = vsel %vm2376_vm8, %v2364_v13, %v2379_v12 }
 0x2c6   :  { %v2224_v31 = vsel %vm11964_vm3, %v16471_v25, %v2221_v16  ;;  %v12010_v50 = vsub.f32 %v509_v36, %v605_v61  ;;  %v12012_v48 = vmul.u32.u64.low %v2390_v27, %v2385_v58  ;;  %v12013_v57 = vmul.u32.u64.high %v2390_v27, %v2385_v58, %v12012_v48 }
 0x2c7   :  { %v4512_v60 = vadd.f32 1.0, %v2032_v23  ;;  %v2223_v43 = vsel %vm2138_vm4, %v2222_v33, %v11764_v53  ;;  %v2107_v21 = vshrl.u32 %v2089_v47, %v2105_v63  ;;  %v2110_v24 = vadd.s32 127, %v2109_v55  ;;  %v16476_v55 = vld [vmem:[#allocation71_spill] sm:$0xff] }
 0x2c8   :  { %v1926_v13 = vxor.u32 2147483648, %v8563_v15  ;;  %v2106_v20 = vshll.u32 %v11940_v3, %v2104_v17  ;;  %v544_v46 = vmul.f32 0.0625, %v512_v2  ;;  %v2381_v42 = vsel %vm2375_vm11, %v2378_v10, %v2380_v56 }
 0x2c9   :  { %v1923_v36 = vxor.u32 2147483648, %v8565_v52  ;;  %8566 = vcosq.f32 %v2224_v31  ;;  %v2111_v61 = vshll.u32 %v2110_v24, 23  ;;  %vm2399_vm9 = vc.u32 %v11999_v44, %v12012_v48 }
 0x2ca   :  { %8568 = vsinq.f32 %v2224_v31  ;;  %v669_v53 = vmul.f32 0.125, %v11918_v35  ;;  %v2108_v23 = vor.u32 %v2107_v21, %v2106_v20  ;;  %v2400_v33 = vadd.s32 1, %v12013_v57 }
 0x2cb   :  { %v4544_v12 = vmul.f32 0.5, %v4512_v60  ;;  %v733_v3 = vmul.f32 0.125, %v12010_v50  ;;  %v2112_v45 = vor.u32 4788187, %v2111_v61  ;;  %v2397_v16 = vmul.u32 %v2390_v27, %v2381_v42 }
 0x2cc   :  { %vm1919_vm5 = vweird.f32 %v16462_v51  ;;  %v1927_v18 = vsel %vm1925_vm12, %v1926_v13, %v8565_v52  ;;  %v2225_v38 = vsel %vm11964_vm3, 0, %v2223_v43  ;;  %v12034_v58 = vfloor.f32 %v544_v46  ;;  %v16477_v52 = vld [vmem:[#allocation47_spill] sm:$0xff] }
 0x2cd   :  { %v2401_v47 = vsel %vm2399_vm9, %v2400_v33, %v12013_v57  ;;  %v1924_v17 = vsel %vm1922_vm13, %v8563_v15, %v1923_v36  ;;  %v2113_v26 = vand.u32 2147483647, %v2112_v45  ;;  %v2254_v10 = vsub.s32 32, %v16476_v55 }
 0x2ce   :  { %v2402_v63 = vadd.s32 %v2401_v47, %v2397_v16  ;;  %vm1921_vm15 = vcmp.lt.s32.totalorder %v11926_v39, 2  ;;  %vm2035_vm0 = vcmp.lt.s32.totalorder %v16454_v62, 0  ;;  %v2115_v27 = vcvt.s32.f32 %v2108_v23 }
 0x2cf   :  { %v16024_v56 = vand.u32 2147483647, %v16477_v52  ;;  %v12043_v8 = vand.u32 3, %v2225_v38  ;;  %v701_v31 = vfloor.f32 %v669_v53  ;;  %v765_v60 = vfloor.f32 %v733_v3 }
 0x2d0   :  { %v2403_v43 = vadd.s32 536870912, %v2402_v63  ;;  %v12046_v57 = vmul.f32 %v11756_v4, %v4544_v12  ;;  %v1928_v15 = vsel %vm1921_vm15, %v1924_v17, %v1927_v18  ;;  %v2116_v21 = vmul.f32 %v2115_v27, %v2113_v26 }
 0x2d1   :  { %v12049_v24 = vmul.f32 16.0, %v12034_v58  ;;  %v2119_v39 = vsub.s32 4, %v11921_v1  ;;  %v2257_v20 = vshrl.u32 %v16378_v34, %v2254_v10  ;;  %v2260_v46 = vshrl.u32 %v16382_v9, %v2254_v10 }
 0x2d2   :  { %v12052_v13 = vshrl.u32 %v2403_v43, 30  ;;  %v12057_v42 = vadd.s32 80, %v16417_v0  ;;  %v2246_v4 = vand.u32 8388607, %v16024_v56  ;;  %v2263_v36 = vshrl.u32 %v16383_v19, %v2254_v10 }
 0x2d3   :  { %v2266_v61 = vshrl.u32 %v16385_v30, %v2254_v10  ;;  %v12063_v53 = vpop.eup %8566  ;;  %vm12067_vm1 = vcmp.le.f32.partialorder %v2033_v11, 0.7853982  ;;  %v2256_v12 = vshll.u32 %v16381_v7, %v16476_v55  ;;  %v2259_v3 = vshll.u32 %v16378_v34, %v16476_v55 }
 0x2d4   :  { %v2405_v33 = vshll.u32 %v12052_v13, 30  ;;  %v2262_v45 = vshll.u32 %v16382_v9, %v16476_v55  ;;  %v12078_v16 = vpop.eup %8568  ;;  %v2117_v18 = vxor.u32 2147483648, %v2116_v21  ;;  %v2265_v11 = vshll.u32 %v16383_v19, %v16476_v55 }
 0x2d5   :  { %v2268_v38 = vshll.u32 %v16385_v30, %v16476_v55  ;;  %v2269_v47 = vshrl.u32 %v16386_v59, %v2254_v10  ;;  %v1929_v17 = vsel %vm1919_vm5, nan, %v1928_v15  ;;  %vm12087_vm4 = vcmp.eq.f32.partialorder %v701_v31, %v765_v60 }
 0x2d6   :  { %vm829_vm3 = vcmp.ne.f32.partialorder %v11918_v35, %v12010_v50  ;;  %v12093_v27 = vsub.s32 %v2402_v63, %v2405_v33  ;;  %v2258_v43 = vor.u32 %v2257_v20, %v2256_v12  ;;  %v2261_v32 = vor.u32 %v2260_v46, %v2259_v3  ;;  %v16482_v63 = vld [vmem:[#allocation20_spill] sm:$0xff]  ;;  %v16483_v46 = vld [vmem:[#allocation69_spill] sm:$0xff] }
 0x2d7   :  { %v12098_v55 = vsel %vm2035_vm0, %v2119_v39, %v11921_v1  ;;  %v2264_v22 = vor.u32 %v2263_v36, %v2262_v45  ;;  %v2267_v56 = vor.u32 %v2266_v61, %v2265_v11  ;;  %v2270_v51 = vor.u32 %v2269_v47, %v2268_v38  ;;  %vm12154_vm15 = vmand %vm12087_vm4, %vm829_vm3 }
 0x2d8   :  { %v2232_v31 = vxor.u32 2147483648, %v12078_v16  ;;  %v2235_v60 = vxor.u32 2147483648, %v12063_v53  ;;  %v2408_v15 = vsub.s32 0, %v12093_v27  ;;  %v511_v28 = vcvt.s32.f32 %v12057_v42 }
 0x2d9   :  { %vm2234_vm6 = vcmp.eq.s32.totalorder %v12043_v8, 2  ;;  %vm861_vm8 = vcmp.le.f32.partialorder %v16482_v63, 4.0  ;;  %v2118_v20 = vsel %vm2035_vm0, %v2117_v18, %v2116_v21  ;;  %v2247_v1 = vor.u32 8388608, %v2246_v4 }
 0x2da   :  { %v2255_v39 = vshrl.u32 %v16381_v7, %v2254_v10  ;;  %vm2271_vm10 = vcmp.lt.s32.totalorder %v16483_v46, 1  ;;  %vm2231_vm11 = vcmp.eq.s32.totalorder %v12043_v8, 0  ;;  %v7261_v36 = vmin.u32 %v2408_v15, %v12093_v27 }
 0x2db   :  { %vm2273_vm12 = vcmp.lt.s32.totalorder %v16483_v46, 3  ;;  %vm2274_vm14 = vcmp.lt.s32.totalorder %v16483_v46, 4  ;;  %v2279_v61 = vsel %vm2271_vm10, %v2258_v43, %v2261_v32  ;;  %v2283_v21 = vsel %vm2271_vm10, %v2261_v32, %v2264_v22 }
 0x2dc   :  { %v2276_v33 = vsel %vm2274_vm14, %v2264_v22, 2102212464  ;;  %v2280_v12 = vsel %vm2274_vm14, %v2267_v56, 920167782  ;;  %v2284_v4 = vsel %vm2274_vm14, %v2270_v51, 1326507024  ;;  %v2410_v10 = vclz %v7261_v36 }
 0x2dd   :  { %vm2272_vm13 = vcmp.lt.s32.totalorder %v16483_v46, 2  ;;  %v2281_v3 = vsel %vm2273_vm12, %v2264_v22, %v2280_v12  ;;  %v2285_v45 = vsel %vm2273_vm12, %v2267_v56, %v2284_v4  ;;  %v2121_v18 = vsel %vm12067_vm1, %v16454_v62, %v2118_v20 }
 0x2de   :  { %v2282_v11 = vsel %vm2272_vm13, %v2279_v61, %v2281_v3  ;;  %v2286_v38 = vsel %vm2272_vm13, %v2283_v21, %v2285_v45  ;;  %v2287_v47 = vshll.u32 %v2247_v1, 8  ;;  %v7262_v51 = vadd.s32 4294967294, %v2410_v10  ;;  %v16486_v45 = vld [vmem:[#allocation73_spill] sm:$0xff] }
 0x2df   :  { %v543_v15 = vmul.f32 0.0625, %v511_v28  ;;  %v2275_v22 = vsel %vm2271_vm10, %v2255_v39, %v2258_v43  ;;  %v2277_v56 = vsel %vm2273_vm12, %v2261_v32, %v2276_v33  ;;  %v4511_v61 = vadd.f32 1.0, %v1929_v17 }
 0x2e0   :  { %v12136_v36 = vmul.u32.u64.low %v2287_v47, %v2286_v38  ;;  %v12137_v12 = vmul.u32.u64.high %v2287_v47, %v2286_v38, %v12136_v36  ;;  %v12139_v20 = vmul.u32.u64.low %v2287_v47, %v2282_v11  ;;  %v12140_v4 = vmul.u32.u64.high %v2287_v47, %v2282_v11, %v12139_v20 }
 0x2e1   :  { %vm2228_vm9 = vweird.f32 %v16471_v25  ;;  %8570 = vcosq.f32 %v2121_v18  ;;  %v12147_v1 = vsub.f32 %v512_v2, %v12049_v24  ;;  %vm7263_vm5 = vcmp.lt.s32.totalorder %v7262_v51, 0 }
 0x2e2   :  { %v2122_v17 = vsel %vm12067_vm1, 0, %v12098_v55  ;;  %8572 = vsinq.f32 %v2121_v18  ;;  %v2413_v43 = vsel %vm7263_vm5, 0, %v7262_v51  ;;  %v2278_v49 = vsel %vm2272_vm13, %v2275_v22, %v2277_v56  ;;  %vm925_vm1 = vmand %vm12154_vm15, %vm861_vm8 }
 0x2e3   :  { %v2236_v2 = vsel %vm2234_vm6, %v2235_v60, %v12078_v16  ;;  %v2398_v35 = vadd.s32 %v12012_v48, %v11999_v44  ;;  %v2414_v50 = vsub.s32 32, %v2413_v43  ;;  %v2418_v24 = vsub.s32 4294967266, %v2413_v43 }
 0x2e4   :  { %v2233_v26 = vsel %vm2231_vm11, %v12063_v53, %v2232_v31  ;;  %v12171_v23 = vfloor.f32 %v543_v15  ;;  %vm2296_vm0 = vc.u32 %v12137_v12, %v12139_v20  ;;  %v2297_v55 = vadd.s32 1, %v12140_v4 }
 0x2e5   :  { %v2415_v44 = vshll.u32 %v12093_v27, %v2413_v43  ;;  %v2416_v48 = vshrl.u32 %v2398_v35, %v2414_v50  ;;  %v2419_v16 = vadd.s32 127, %v2418_v24  ;;  %v2294_v60 = vmul.u32 %v2287_v47, %v2278_v49  ;;  %v16490_v49 = vld [vmem:[#allocation48_spill] sm:$0xff] }
 0x2e6   :  { %v4543_v39 = vmul.f32 0.5, %v4511_v61  ;;  %vm2230_vm4 = vcmp.lt.s32.totalorder %v12043_v8, 2  ;;  %v12183_v53 = vmul.f32 0.125, %v12034_v58  ;;  %v2298_v31 = vsel %vm2296_vm0, %v2297_v55, %v12140_v4 }
 0x2e7   :  { %v2237_v46 = vsel %vm2230_vm4, %v2233_v26, %v2236_v2  ;;  %v2417_v33 = vor.u32 %v2416_v48, %v2415_v44  ;;  %v2420_v21 = vshll.u32 %v2419_v16, 23  ;;  %v2299_v63 = vadd.s32 %v2298_v31, %v2294_v60 }
 0x2e8   :  { %v12187_v10 = vsel %vm925_vm1, 1.0, %v16442_v37  ;;  %v12189_v3 = vand.u32 3, %v2122_v17  ;;  %v12192_v27 = vmul.f32 0.125, %v12147_v1  ;;  %v12195_v18 = vsub.s32 32, %v16486_v45 }
 0x2e9   :  { %vm2344_vm3 = vcmp.lt.s32.totalorder %v16470_v29, 0  ;;  %v2421_v8 = vor.u32 4788187, %v2420_v21  ;;  %v607_v11 = vmul.f32 16.0, %v12171_v23  ;;  %v2300_v38 = vadd.s32 536870912, %v2299_v63 }
 0x2ea   :  { %v2238_v47 = vsel %vm2228_vm9, nan, %v2237_v46  ;;  %v704_v51 = vfloor.f32 %v12183_v53  ;;  %v16487_v15 = vand.u32 2147483647, %v16470_v29  ;;  %v2428_v56 = vsub.s32 4, %v12052_v13 }
 0x2eb   :  { %v8571_v36 = vpop.eup %8570  ;;  %v12210_v4 = vmul.f32 %v11907_v40, %v4543_v39  ;;  %v2422_v61 = vand.u32 2147483647, %v2421_v8  ;;  %v2424_v32 = vcvt.s32.f32 %v2417_v33  ;;  %v12212_v17 = vshrl.u32 %v2300_v38, 30 }
 0x2ec   :  { %vm12204_vm6 = vcmp.le.f32.partialorder %v16487_v15, 0.7853982  ;;  %v8573_v25 = vpop.eup %8572  ;;  %vm2131_vm8 = vcmp.eq.s32.totalorder %v12189_v3, 2  ;;  %v768_v43 = vfloor.f32 %v12192_v27  ;;  %v16026_v2 = vand.u32 2147483647, %v16490_v49 }
 0x2ed   :  { %v2566_v35 = vshrl.u32 %v16378_v34, %v12195_v18  ;;  %v12219_v50 = vadd.f32 1.0, %v2238_v47  ;;  %vm2128_vm10 = vcmp.eq.s32.totalorder %v12189_v3, 0  ;;  %v2425_v40 = vmul.f32 %v2424_v32, %v2422_v61 }
 0x2ee   :  { %v12224_v24 = vsub.f32 %v511_v28, %v607_v11  ;;  %v2302_v26 = vshll.u32 %v12212_v17, 30  ;;  %v2132_v55 = vxor.u32 2147483648, %v8571_v36  ;;  %v12230_v44 = vsel %vm2344_vm3, %v2428_v56, %v12052_v13 }
 0x2ef   :  { %v2565_v48 = vshll.u32 %v16381_v7, %v16486_v45  ;;  %v2569_v16 = vshrl.u32 %v16382_v9, %v12195_v18  ;;  %v2129_v60 = vxor.u32 2147483648, %v8573_v25  ;;  %v2426_v39 = vxor.u32 2147483648, %v2425_v40 }
 0x2f0   :  { %v12236_v31 = vsub.s32 %v2299_v63, %v2302_v26  ;;  %v2572_v28 = vshrl.u32 %v16383_v19, %v12195_v18  ;;  %v2555_v42 = vand.u32 8388607, %v16026_v2  ;;  %v2568_v13 = vshll.u32 %v16378_v34, %v16486_v45 }
 0x2f1   :  { %v2567_v46 = vor.u32 %v2566_v35, %v2565_v48  ;;  %v2575_v33 = vshrl.u32 %v16385_v30, %v12195_v18  ;;  %v2427_v21 = vsel %vm2344_vm3, %v2426_v39, %v2425_v40  ;;  %v2571_v63 = vshll.u32 %v16382_v9, %v16486_v45 }
 0x2f2   :  { %v2305_v8 = vsub.s32 0, %v12236_v31  ;;  %v2574_v11 = vshll.u32 %v16383_v19, %v16486_v45  ;;  %v2430_v38 = vsel %vm12204_vm6, %v16470_v29, %v2427_v21  ;;  %v2570_v47 = vor.u32 %v2569_v16, %v2568_v13  ;;  %v16491_v13 = vld [vmem:[#allocation72_spill] sm:$0xff] }
 0x2f3   :  { %v2577_v15 = vshll.u32 %v16385_v30, %v16486_v45  ;;  %v2578_v56 = vshrl.u32 %v16386_v59, %v12195_v18  ;;  %8574 = vcosq.f32 %v2430_v38  ;;  %v2573_v32 = vor.u32 %v2572_v28, %v2571_v63 }
 0x2f4   :  { %v7257_v61 = vmin.u32 %v2305_v8, %v12236_v31  ;;  %v2576_v35 = vor.u32 %v2575_v33, %v2574_v11  ;;  %v2431_v40 = vsel %vm12204_vm6, 0, %v12230_v44  ;;  %8576 = vsinq.f32 %v2430_v38 }
 0x2f5   :  { %v2556_v26 = vor.u32 8388608, %v2555_v42  ;;  %v2579_v48 = vor.u32 %v2578_v56, %v2577_v15  ;;  %v2133_v16 = vsel %vm2131_vm8, %v2132_v55, %v8573_v25  ;;  %v2295_v45 = vadd.s32 %v12139_v20, %v12137_v12 }
 0x2f6   :  { %v2307_v39 = vclz %v7257_v61  ;;  %vm2580_vm11 = vcmp.lt.s32.totalorder %v16491_v13, 1  ;;  %v2130_v28 = vsel %vm2128_vm10, %v8571_v36, %v2129_v60  ;;  %vm2581_vm12 = vcmp.lt.s32.totalorder %v16491_v13, 2 }
 0x2f7   :  { %vm2583_vm14 = vcmp.lt.s32.totalorder %v16491_v13, 4  ;;  %v2588_v22 = vsel %vm2580_vm11, %v2567_v46, %v2570_v47  ;;  %vm2582_vm13 = vcmp.lt.s32.totalorder %v16491_v13, 3  ;;  %v2592_v12 = vsel %vm2580_vm11, %v2570_v47, %v2573_v32 }
 0x2f8   :  { %v7258_v44 = vadd.s32 4294967294, %v2307_v39  ;;  %v2589_v25 = vsel %vm2583_vm14, %v2576_v35, 920167782  ;;  %vm2125_vm9 = vweird.f32 %v16454_v62  ;;  %v2585_v20 = vsel %vm2583_vm14, %v2573_v32, 2102212464 }
 0x2f9   :  { %v2590_v36 = vsel %vm2582_vm13, %v2573_v32, %v2589_v25  ;;  %v2593_v55 = vsel %vm2583_vm14, %v2579_v48, 1326507024  ;;  %v2596_v60 = vshll.u32 %v2556_v26, 8  ;;  %v2564_v42 = vshrl.u32 %v16381_v7, %v12195_v18  ;;  %v12297_v32 = vpop.f32.mrb[0].mxu1 }
 0x2fa   :  { %vm7259_vm5 = vcmp.lt.s32.totalorder %v7258_v44, 0  ;;  %v2591_v33 = vsel %vm2581_vm12, %v2588_v22, %v2590_v36  ;;  %v2594_v21 = vsel %vm2582_vm13, %v2576_v35, %v2593_v55  ;;  %v2586_v18 = vsel %vm2582_vm13, %v2570_v47, %v2585_v20  ;;  %16492 = vst [vmem:[#allocation148_spill] sm:$0xff] %v12297_v32  ;;  %v12304_v22 = vpop.f32.mrb[1].mxu1 }
 0x2fb   :  { %v2310_v8 = vsel %vm7259_vm5, 0, %v7258_v44  ;;  %v2595_v63 = vsel %vm2581_vm12, %v2592_v12, %v2594_v21  ;;  %v12289_v11 = vmul.u32.u64.low %v2596_v60, %v2591_v33  ;;  %v12290_v38 = vmul.u32.u64.high %v2596_v60, %v2591_v33, %v12289_v11  ;;  %16493 = vst [vmem:[#allocation156_spill] sm:$0xff] %v12304_v22  ;;  %v16501_v33 = vld [vmem:[#allocation23_spill] sm:$0xff] }
 0x2fc   :  { %v2311_v15 = vsub.s32 32, %v2310_v8  ;;  %v2315_v56 = vsub.s32 4294967266, %v2310_v8  ;;  %v2584_v61 = vsel %vm2580_vm11, %v2564_v42, %v2567_v46  ;;  %vm2127_vm15 = vcmp.lt.s32.totalorder %v12189_v3, 2 }
 0x2fd   :  { %v671_v35 = vmul.f32 0.125, %v12171_v23  ;;  %v12301_v26 = vmul.u32.u64.low %v2596_v60, %v2595_v63  ;;  %v12302_v48 = vmul.u32.u64.high %v2596_v60, %v2595_v63, %v12301_v26  ;;  %v8575_v39 = vpop.eup %8574  ;;  %v735_v44 = vmul.f32 0.125, %v12224_v24 }
 0x2fe   :  { %v2312_v25 = vshll.u32 %v12236_v31, %v2310_v8  ;;  %v2313_v46 = vshrl.u32 %v2295_v45, %v2311_v15  ;;  %v2316_v12 = vadd.s32 127, %v2315_v56  ;;  %v8577_v36 = vpop.eup %8576  ;;  %v2134_v47 = vsel %vm2127_vm15, %v2130_v28, %v2133_v16  ;;  %v16502_v56 = vld [vmem:[#allocation21_spill] sm:$0xff] }
 0x2ff   :  { %vm12312_vm0 = vcmp.eq.f32.partialorder %v704_v51, %v768_v43  ;;  %vm832_vm1 = vcmp.ne.f32.partialorder %v12034_v58, %v12147_v1  ;;  %v2435_v20 = vand.u32 3, %v2431_v40  ;;  %v2587_v55 = vsel %vm2581_vm12, %v2584_v61, %v2586_v18  ;;  %v12329_v43 = vpop.f32.mrb[2].mxu1 }
 0x300   :  { %v2606_v31 = vadd.s32 1, %v12290_v38  ;;  %v4546_v45 = vmul.f32 0.5, %v12219_v50  ;;  %v16496_v16 = vand.u32 2147483647, %v16477_v52  ;;  %vm2241_vm3 = vcmp.lt.s32.totalorder %v16477_v52, 0  ;;  %16499 = vst [vmem:[#allocation51_spill] sm:$0xff] %v12329_v43  ;;  %vm12383_vm15 = vmand %vm12312_vm0, %vm832_vm1 }
 0x301   :  { %v2314_v53 = vor.u32 %v2313_v46, %v2312_v25  ;;  %v2317_v51 = vshll.u32 %v2316_v12, 23  ;;  %v2438_v40 = vxor.u32 2147483648, %v8577_v36  ;;  %v2441_v28 = vxor.u32 2147483648, %v8575_v39  ;;  %v12333_v42 = vpop.f32.mrb[3].mxu1  ;;  %v12348_v25 = vld [vmem:[%s15762_s2 + $0x58] ss:$0 sm:$0xff] }
 0x302   :  { %vm12324_vm4 = vcmp.le.f32.partialorder %v16496_v16, 0.7853982  ;;  %v703_v13 = vfloor.f32 %v671_v35  ;;  %vm2605_vm6 = vc.u32 %v12302_v48, %v12289_v11  ;;  %16500 = vst [vmem:[#allocation38_spill] sm:$0xff] %v12333_v42  ;;  %v2135_v50 = vsel %vm2125_vm9, nan, %v2134_v47  ;;  %v7768_v46 = vpop.f32.mrb[4].mxu1 }
 0x303   :  { %vm864_vm8 = vcmp.le.f32.partialorder %v16501_v33, 4.0  ;;  %vm2434_vm10 = vweird.f32 %v16470_v29  ;;  %v2318_v21 = vor.u32 4788187, %v2317_v51  ;;  %v2325_v8 = vsub.s32 4, %v12212_v17 }
 0x304   :  { %v2603_v63 = vmul.u32 %v2596_v60, %v2587_v55  ;;  %vm2437_vm11 = vcmp.eq.s32.totalorder %v2435_v20, 0  ;;  %v767_v15 = vfloor.f32 %v735_v44  ;;  %vm863_vm12 = vcmp.le.f32.partialorder %v16502_v56, 4.0  ;;  %v5638_v55 = vpop.f32.mrb[5].mxu1  ;;  %vm928_vm1 = vmand %vm12383_vm15, %vm864_vm8 }
 0x305   :  { %v12342_v61 = vadd.s32 104, %v16417_v0  ;;  %v2607_v18 = vsel %vm2605_vm6, %v2606_v31, %v12290_v38  ;;  %vm2440_vm14 = vcmp.eq.s32.totalorder %v2435_v20, 2  ;;  %v2319_v62 = vand.u32 2147483647, %v2318_v21 }
 0x306   :  { %v2321_v35 = vcvt.s32.f32 %v2314_v53  ;;  %v2608_v26 = vadd.s32 %v2607_v18, %v2603_v63  ;;  %v4513_v60 = vadd.f32 1.0, %v2135_v50  ;;  %v2439_v12 = vsel %vm2437_vm11, %v8575_v39, %v2438_v40  ;;  %v16507_v63 = vld [vmem:[#allocation161_spill] sm:$0xff] }
 0x307   :  { %v2442_v44 = vsel %vm2440_vm14, %v2441_v28, %v8577_v36  ;;  %vm831_vm13 = vcmp.ne.f32.partialorder %v12171_v23, %v12224_v24  ;;  %v5644_v47 = vadd.f32 %v7768_v46, %v12348_v25  ;;  %v2326_v31 = vsel %vm2241_vm3, %v2325_v8, %v12212_v17  ;;  %v7771_v17 = vpop.f32.mrb[6].mxu1 }
 0x308   :  { %v2322_v38 = vmul.f32 %v2321_v35, %v2319_v62  ;;  %v2609_v16 = vadd.s32 536870912, %v2608_v26  ;;  %v5639_v53 = vadd.f32 %v12348_v25, %v5638_v55  ;;  %vm2436_vm9 = vcmp.lt.s32.totalorder %v2435_v20, 2  ;;  %v5648_v18 = vpop.f32.mrb[7].mxu1  ;;  %v16511_v62 = vld [vmem:[#allocation163_spill] sm:$0xff] }
 0x309   :  { %vm12357_vm5 = vcmp.eq.f32.partialorder %v703_v13, %v767_v15  ;;  %v16027_v39 = vcvt.s32.f32 %v12342_v61  ;;  %v12363_v36 = vmul.f32 %v5644_v47, %v11746_v6  ;;  %v2443_v40 = vsel %vm2436_vm9, %v2439_v12, %v2442_v44  ;;  %v7774_v44 = vpop.f32.mrb[8].mxu1 }
 0x30a   :  { %v2323_v28 = vxor.u32 2147483648, %v2322_v38  ;;  %v12365_v50 = vshrl.u32 %v2609_v16, 30  ;;  %v12368_v21 = vmul.f32 %v5639_v53, %v11904_v14  ;;  %v4578_v8 = vmul.f32 %v11930_v54, %v4546_v45  ;;  %vm12402_vm0 = vmand %vm12357_vm5, %vm831_vm13  ;;  %v5658_v47 = vpop.f32.mrb[9].mxu1 }
 0x30b   :  { %16505 = vst [vmem:[#allocation153_spill] sm:$0xff] %v12363_v36  ;;  %v4545_v20 = vmul.f32 0.5, %v4513_v60  ;;  %v2328_v13 = vsel %vm12324_vm4, 0, %v2326_v31  ;;  %v12375_v15 = vmul.f32 %v16507_v63, %v12363_v36  ;;  %v5654_v6 = vadd.f32 %v7771_v17, %v12348_v25 }
 0x30c   :  { %16506 = vst [vmem:[#allocation50_spill] sm:$0xff] %v12368_v21  ;;  %v2324_v54 = vsel %vm2241_vm3, %v2323_v28, %v2322_v38  ;;  %v2611_v45 = vshll.u32 %v12365_v50, 30  ;;  %v12392_v35 = vmul.f32 %v16511_v62, %v12368_v21  ;;  %v5649_v46 = vadd.f32 %v12348_v25, %v5648_v18 }
 0x30d   :  { %16508 = vst [vmem:[#allocation150_spill] sm:$0xff] %v12375_v15  ;;  %v2444_v58 = vsel %vm2434_vm10, nan, %v2443_v40  ;;  %v2327_v3 = vsel %vm12324_vm4, %v16477_v52, %v2324_v54  ;;  %v12410_v60 = vmul.f32 %v5654_v6, %v12046_v57  ;;  %v546_v29 = vmul.f32 0.0625, %v16027_v39  ;;  %vm927_vm4 = vmand %vm12402_vm0, %vm863_vm12  ;;  %v16524_v54 = vld [vmem:[#allocation53_spill] sm:$0xff] }
 0x30e   :  { %16512 = vst [vmem:[#allocation147_spill] sm:$0xff] %v12392_v35  ;;  %8578 = vcosq.f32 %v2327_v3  ;;  %v12414_v12 = vsub.s32 %v2608_v26, %v2611_v45  ;;  %v12419_v24 = vmul.f32 %v5649_v46, %v12210_v4  ;;  %v12425_v57 = vand.u32 3, %v2328_v13  ;;  %v7777_v13 = vpop.f32.mrb[10].mxu1 }
 0x30f   :  { %16515 = vst [vmem:[#allocation140_spill] sm:$0xff] %v12410_v60  ;;  %8580 = vsinq.f32 %v2327_v3  ;;  %v12429_v27 = vmul.f32 %v16507_v63, %v12410_v60  ;;  %v5664_v26 = vadd.f32 %v7774_v44, %v12348_v25  ;;  %v4516_v55 = vadd.f32 1.0, %v2444_v58  ;;  %v5668_v18 = vpop.f32.mrb[11].mxu1  ;;  %v16526_v58 = vld [vmem:[#allocation75_spill] sm:$0xff] }
 0x310   :  { %16516 = vst [vmem:[#allocation133_spill] sm:$0xff] %v12419_v24  ;;  %v2614_v4 = vsub.s32 0, %v12414_v12  ;;  %v16518_v33 = vand.u32 2147483647, %v11692_v41  ;;  %v16519_v38 = vcvt.s32.f32 %v11688_v5  ;;  %v12445_v16 = vmul.f32 %v16511_v62, %v12419_v24  ;;  %v16528_v24 = vld [vmem:[#allocation13_spill] sm:$0xff] }
 0x311   :  { %16517 = vst [vmem:[#allocation134_spill] sm:$0xff] %v12429_v27  ;;  %v4577_v53 = vmul.f32 %v12187_v10, %v4545_v20  ;;  %v5659_v51 = vadd.f32 %v12348_v25, %v5658_v47  ;;  %v12449_v56 = vmul.f32 %v5664_v26, %v4578_v8  ;;  %v7195_v40 = vsel %vm928_vm1, 1.0, %v16442_v37 }
 0x312   :  { %v12441_v31 = vmul.f32 %v16519_v38, %v16518_v33  ;;  %16520 = vst [vmem:[#allocation151_spill] sm:$0xff] %v12445_v16  ;;  %v7269_v28 = vmin.u32 %v2614_v4, %v12414_v12  ;;  %v12454_v41 = vadd.s32 96, %v16417_v0  ;;  %v12461_v6 = vsel %vm927_vm4, 1.0, %v16442_v37 }
 0x313   :  { %16521 = vst [vmem:[#allocation149_spill] sm:$0xff] %v12449_v56  ;;  %v12458_v17 = vmul.f32 %v5659_v51, %v4577_v53  ;;  %v12463_v10 = vfloor.f32 %v546_v29  ;;  %v12467_v8 = vmul.f32 %v16507_v63, %v12449_v56  ;;  %v4548_v20 = vmul.f32 0.5, %v4516_v55  ;;  %v12488_v55 = vpop.f32.mrb[12].mxu1 }
 0x314   :  { %vm2333_vm3 = vcmp.lt.s32.totalorder %v12425_v57, 2  ;;  %v2616_v14 = vclz %v7269_v28  ;;  %v16030_v45 = vand.u32 2147483647, %v16524_v54  ;;  %vm2331_vm6 = vweird.f32 %v16477_v52  ;;  %v12499_v28 = vpop.f32.mrb[13].mxu1 }
 0x315   :  { %16522 = vst [vmem:[#allocation154_spill] sm:$0xff] %v12458_v17  ;;  %16523 = vst [vmem:[#allocation155_spill] sm:$0xff] %v12467_v8  ;;  %v12473_v46 = vmul.f32 %v16511_v62, %v12458_v17  ;;  %vm2334_vm8 = vcmp.eq.s32.totalorder %v12425_v57, 0  ;;  %vm2337_vm10 = vcmp.eq.s32.totalorder %v12425_v57, 2  ;;  %v12479_v1 = vsub.s32 32, %v16526_v58 }
 0x316   :  { %v2604_v3 = vadd.s32 %v12289_v11, %v12302_v48  ;;  %v7270_v29 = vadd.s32 4294967294, %v2616_v14  ;;  %v2462_v26 = vshll.u32 %v16381_v7, %v16526_v58  ;;  %v2465_v33 = vshll.u32 %v16378_v34, %v16526_v58 }
 0x317   :  { %16525 = vst [vmem:[#allocation152_spill] sm:$0xff] %v12473_v46  ;;  %v2463_v4 = vshrl.u32 %v16378_v34, %v12479_v1  ;;  %v2466_v11 = vshrl.u32 %v16382_v9, %v12479_v1  ;;  %v4580_v38 = vmul.f32 %v7195_v40, %v4548_v20  ;;  %v5674_v53 = vadd.f32 %v7777_v13, %v12348_v25 }
 0x318   :  { %v8579_v48 = vpop.eup %8578  ;;  %vm7271_vm11 = vcmp.lt.s32.totalorder %v7270_v29, 0  ;;  %v2452_v51 = vand.u32 8388607, %v16030_v45  ;;  %v2468_v13 = vshll.u32 %v16382_v9, %v16526_v58  ;;  %v2469_v20 = vshrl.u32 %v16383_v19, %v12479_v1 }
 0x319   :  { %v8581_v14 = vpop.eup %8580  ;;  %v2338_v47 = vxor.u32 2147483648, %v8579_v48  ;;  %v2619_v5 = vsel %vm7271_vm11, 0, %v7270_v29  ;;  %v2464_v23 = vor.u32 %v2463_v4, %v2462_v26  ;;  %v2467_v2 = vor.u32 %v2466_v11, %v2465_v33  ;;  %v12510_v29 = vpop.f32.mrb[14].mxu1 }
 0x31a   :  { %v2335_v39 = vxor.u32 2147483648, %v8581_v14  ;;  %v2620_v44 = vsub.s32 32, %v2619_v5  ;;  %v2621_v56 = vshll.u32 %v12414_v12, %v2619_v5  ;;  %v2624_v17 = vsub.s32 4294967266, %v2619_v5 }
 0x31b   :  { %v2339_v40 = vsel %vm2337_vm10, %v2338_v47, %v8581_v14  ;;  %v2471_v45 = vshll.u32 %v16383_v19, %v16526_v58  ;;  %v2472_v5 = vshrl.u32 %v16385_v30, %v12479_v1  ;;  %v12516_v47 = vpop.f32.mrb[15].mxu1  ;;  %v2470_v11 = vor.u32 %v2469_v20, %v2468_v13 }
 0x31c   :  { %v2336_v26 = vsel %vm2334_vm8, %v8579_v48, %v2335_v39  ;;  %v2622_v4 = vshrl.u32 %v2604_v3, %v2620_v44  ;;  %v2625_v12 = vadd.s32 127, %v2624_v17  ;;  %v2474_v14 = vshll.u32 %v16385_v30, %v16526_v58  ;;  %v16527_v48 = vld [vmem:[#allocation17_spill] sm:$0xff] }
 0x31d   :  { %v2340_v33 = vsel %vm2333_vm3, %v2336_v26, %v2339_v40  ;;  %v2475_v60 = vshrl.u32 %v16386_v59, %v12479_v1  ;;  %v2473_v44 = vor.u32 %v2472_v5, %v2471_v45  ;;  %vm1404_vm12 = vweird.f32 %v16527_v48  ;;  %v16545_v48 = vld [vmem:[#allocation160_spill] sm:$0xff] }
 0x31e   :  { %v2341_v39 = vsel %vm2331_vm6, nan, %v2340_v33  ;;  %v2623_v3 = vor.u32 %v2622_v4, %v2621_v56  ;;  %v2626_v17 = vshll.u32 %v2625_v12, 23  ;;  %v16529_v36 = vand.u32 2147483647, %v16528_v24  ;;  %v16533_v33 = vld [vmem:[#allocation74_spill] sm:$0xff] }
 0x31f   :  { %v4515_v40 = vadd.f32 1.0, %v2341_v39  ;;  %v5669_v58 = vadd.f32 %v12348_v25, %v5668_v18  ;;  %v2453_v13 = vor.u32 8388608, %v2452_v51  ;;  %v2476_v20 = vor.u32 %v2475_v60, %v2474_v14 }
 0x320   :  { %vm12529_vm14 = vcmp.le.f32.partialorder %v16529_v36, 0.7853982  ;;  %v12534_v26 = vmul.f32 %v5674_v53, %v4580_v38  ;;  %v2627_v52 = vor.u32 4788187, %v2626_v17  ;;  %vm2477_vm13 = vcmp.lt.s32.totalorder %v16533_v33, 1  ;;  %v16534_v38 = vld [vmem:[#allocation136_spill] sm:$0xff] }
 0x321   :  { %vm2478_vm9 = vcmp.lt.s32.totalorder %v16533_v33, 2  ;;  %v4547_v56 = vmul.f32 0.5, %v4515_v40  ;;  %v2630_v45 = vcvt.s32.f32 %v2623_v3  ;;  %vm2480_vm5 = vcmp.lt.s32.totalorder %v16533_v33, 4  ;;  %v16535_v40 = vld [vmem:[#allocation9_spill] sm:$0xff] }
 0x322   :  { %16532 = vst [vmem:[#allocation59_spill] sm:$0xff] %v12534_v26  ;;  %v2485_v36 = vsel %vm2477_vm13, %v2464_v23, %v2467_v2  ;;  %v2628_v4 = vand.u32 2147483647, %v2627_v52  ;;  %vm2479_vm15 = vcmp.lt.s32.totalorder %v16533_v33, 3  ;;  %v2486_v18 = vsel %vm2480_vm5, %v2473_v44, 920167782 }
 0x323   :  { %v2489_v60 = vsel %vm2477_vm13, %v2467_v2, %v2470_v11  ;;  %vm1307_vm0 = vcmp.eq.s32.totalorder %v16534_v38, 2  ;;  %v4579_v53 = vmul.f32 %v12461_v6, %v4547_v56  ;;  %v2482_v51 = vsel %vm2480_vm5, %v2470_v11, 2102212464 }
 0x324   :  { %v2487_v12 = vsel %vm2479_vm15, %v2470_v11, %v2486_v18  ;;  %v2490_v5 = vsel %vm2480_vm5, %v2476_v20, 1326507024  ;;  %vm1304_vm1 = vcmp.eq.s32.totalorder %v16534_v38, 0  ;;  %v2461_v14 = vshrl.u32 %v16381_v7, %v12479_v1 }
 0x325   :  { %v2488_v39 = vsel %vm2478_vm9, %v2485_v36, %v2487_v12  ;;  %v2491_v3 = vsel %vm2479_vm15, %v2473_v44, %v2490_v5  ;;  %v2493_v17 = vshll.u32 %v2453_v13, 8  ;;  %vm1417_vm4 = vcmp.lt.s32.totalorder %v16535_v40, 0 }
 0x326   :  { %v12558_v6 = vmul.f32 %v16507_v63, %v12534_v26  ;;  %v12560_v11 = vmul.f32 %v5669_v58, %v4579_v53  ;;  %v2631_v20 = vmul.f32 %v2630_v45, %v2628_v4  ;;  %v2492_v52 = vsel %vm2478_vm9, %v2489_v60, %v2491_v3  ;;  %v16539_v4 = vld [vmem:[#allocation139_spill] sm:$0xff]  ;;  %v16541_v60 = vld [vmem:[#allocation146_spill] sm:$0xff] }
 0x327   :  { %v2481_v1 = vsel %vm2477_vm13, %v2461_v14, %v2464_v23  ;;  %v2483_v56 = vsel %vm2479_vm15, %v2467_v2, %v2482_v51  ;;  %v12568_v44 = vmul.u32.u64.low %v2493_v17, %v2492_v52  ;;  %v12569_v13 = vmul.u32.u64.high %v2493_v17, %v2492_v52, %v12568_v44  ;;  %v16542_v53 = vld [vmem:[#allocation142_spill] sm:$0xff] }
 0x328   :  { %16536 = vst [vmem:[#allocation144_spill] sm:$0xff] %v12558_v6  ;;  %16537 = vst [vmem:[#allocation34_spill] sm:$0xff] %v12560_v11  ;;  %v12573_v36 = vmul.f32 %v16511_v62, %v12560_v11  ;;  %v610_v58 = vmul.f32 16.0, %v12463_v10  ;;  %v12576_v18 = vmul.u32.u64.low %v2493_v17, %v2488_v39  ;;  %v12577_v45 = vmul.u32.u64.high %v2493_v17, %v2488_v39, %v12576_v18  ;;  %v16544_v14 = vld [vmem:[#allocation162_spill] sm:$0xff] }
 0x329   :  { %v12583_v23 = vsel %vm1404_vm12, nan, %v16539_v4  ;;  %v1308_v2 = vxor.u32 2147483648, %v16541_v60  ;;  %v1607_v51 = vsel %vm12529_vm14, 0, %v16542_v53  ;;  %v1305_v3 = vxor.u32 2147483648, %v16544_v14  ;;  %v16546_v26 = vld [vmem:[#allocation138_spill] sm:$0xff] }
 0x32a   :  { %16538 = vst [vmem:[#allocation145_spill] sm:$0xff] %v12573_v36  ;;  %16540 = vst [vmem:[#allocation159_spill] sm:$0xff] %v12583_v23  ;;  %v2632_v52 = vxor.u32 2147483648, %v2631_v20  ;;  %v2484_v44 = vsel %vm2478_vm9, %v2481_v1, %v2483_v56  ;;  %v12599_v4 = vsel %vm12529_vm14, %v16528_v24, %v16545_v48  ;;  %v1501_v11 = vsub.s32 4, %v16546_v26 }
 0x32b   :  { %v16547_v53 = vcvt.s32.f32 %v12454_v41  ;;  %vm2502_vm3 = vc.u32 %v12569_v13, %v12576_v18  ;;  %v12606_v21 = vand.u32 3, %v1607_v51  ;;  %v1499_v39 = vxor.u32 2147483648, %v12441_v31 }
 0x32c   :  { %v16548_v33 = vcvt.s32.f32 %v12342_v61  ;;  %v2503_v57 = vadd.s32 1, %v12577_v45  ;;  %v12617_v56 = vsel %vm1307_vm0, %v1308_v2, %v16544_v14  ;;  %vm2550_vm6 = vcmp.lt.s32.totalorder %v16490_v49, 0 }
 0x32d   :  { %v545_v5 = vmul.f32 0.0625, %v16547_v53  ;;  %v2500_v48 = vmul.u32 %v2493_v17, %v2484_v44  ;;  %v16549_v53 = vld [vmem:[#allocation77_spill] sm:$0xff]  ;;  %v12624_v51 = vsel %vm1304_vm1, %v16541_v60, %v1305_v3  ;;  %8582 = vcosq.f32 %v12599_v4 }
 0x32e   :  { %v12611_v1 = vsub.f32 %v16548_v33, %v610_v58  ;;  %v2769_v36 = vsub.s32 32, %v16549_v53  ;;  %v2633_v61 = vsel %vm2550_vm6, %v2632_v52, %v2631_v20  ;;  %v2504_v58 = vsel %vm2502_vm3, %v2503_v57, %v12577_v45  ;;  %v16556_v57 = vld [vmem:[#allocation54_spill] sm:$0xff] }
 0x32f   :  { %v16550_v2 = vand.u32 2147483647, %v16535_v40  ;;  %v12639_v17 = vsel %vm1417_vm4, %v1501_v11, %v16546_v26  ;;  %v674_v60 = vmul.f32 0.125, %v12463_v10  ;;  %v12642_v3 = vfloor.f32 %v545_v5 }
 0x330   :  { %v2505_v44 = vadd.s32 %v2504_v58, %v2500_v48  ;;  %v1500_v20 = vsel %vm1417_vm4, %v1499_v39, %v12441_v31  ;;  %v738_v45 = vmul.f32 0.125, %v12611_v1  ;;  %v16553_v52 = vand.u32 2147483647, %v16490_v49 }
 0x331   :  { %vm12632_vm8 = vcmp.le.f32.partialorder %v16550_v2, 0.7853982  ;;  %v2772_v48 = vshrl.u32 %v16378_v34, %v2769_v36  ;;  %v2781_v58 = vshrl.u32 %v16385_v30, %v2769_v36  ;;  %v2775_v31 = vshrl.u32 %v16382_v9, %v2769_v36 }
 0x332   :  { %vm12650_vm10 = vcmp.le.f32.partialorder %v16553_v52, 0.7853982  ;;  %v2506_v5 = vadd.s32 536870912, %v2505_v44  ;;  %v2778_v39 = vshrl.u32 %v16383_v19, %v2769_v36  ;;  %v2780_v2 = vshll.u32 %v16383_v19, %v16549_v53 }
 0x333   :  { %v2636_v11 = vsel %vm12650_vm10, %v16490_v49, %v2633_v61  ;;  %v2784_v52 = vshrl.u32 %v16386_v59, %v2769_v36  ;;  %v706_v6 = vfloor.f32 %v674_v60  ;;  %v609_v26 = vmul.f32 16.0, %v12642_v3 }
 0x334   :  { %v12666_v46 = vshrl.u32 %v2506_v5, 30  ;;  %v2771_v61 = vshll.u32 %v16381_v7, %v16549_v53  ;;  %v2774_v8 = vshll.u32 %v16378_v34, %v16549_v53  ;;  %v2777_v16 = vshll.u32 %v16382_v9, %v16549_v53 }
 0x335   :  { %v2782_v27 = vor.u32 %v2781_v58, %v2780_v2  ;;  %v2783_v35 = vshll.u32 %v16385_v30, %v16549_v53  ;;  %v770_v15 = vfloor.f32 %v738_v45  ;;  %8584 = vcosq.f32 %v2636_v11  ;;  %v16558_v58 = vld [vmem:[#allocation76_spill] sm:$0xff]  ;;  %v12700_v45 = vpop.f32.mrb[16].mxu1 }
 0x336   :  { %v2508_v60 = vshll.u32 %v12666_v46, 30  ;;  %v16557_v5 = vand.u32 2147483647, %v16556_v57  ;;  %v2773_v43 = vor.u32 %v2772_v48, %v2771_v61  ;;  %v2776_v22 = vor.u32 %v2775_v31, %v2774_v8  ;;  %16560 = vst [vmem:[#allocation158_spill] sm:$0xff] %v12700_v45 }
 0x337   :  { %v2779_v32 = vor.u32 %v2778_v39, %v2777_v16  ;;  %v2785_v24 = vor.u32 %v2784_v52, %v2783_v35  ;;  %v2634_v12 = vsub.s32 4, %v12365_v50  ;;  %8586 = vsinq.f32 %v2636_v11  ;;  %v12683_v2 = vpop.eup %8582 }
 0x338   :  { %v2761_v42 = vand.u32 8388607, %v16557_v5  ;;  %v12680_v23 = vsub.s32 %v2505_v44, %v2508_v60  ;;  %vm2789_vm11 = vcmp.lt.s32.totalorder %v16558_v58, 4  ;;  %vm1303_vm12 = vcmp.lt.s32.totalorder %v16534_v38, 2 }
 0x339   :  { %v12689_v53 = vsel %vm12632_vm8, %v16535_v40, %v1500_v20  ;;  %v1504_v35 = vsel %vm12632_vm8, 0, %v12639_v17  ;;  %v16559_v16 = vcvt.s32.f32 %v12454_v41  ;;  %v2795_v44 = vsel %vm2789_vm11, %v2782_v27, 920167782 }
 0x33a   :  { %v2511_v11 = vsub.s32 0, %v12680_v23  ;;  %v2762_v48 = vor.u32 8388608, %v2761_v42  ;;  %vm2786_vm14 = vcmp.lt.s32.totalorder %v16558_v58, 1  ;;  %vm2788_vm13 = vcmp.lt.s32.totalorder %v16558_v58, 3 }
 0x33b   :  { %v12696_v8 = vsub.f32 %v16559_v16, %v609_v26  ;;  %v2794_v14 = vsel %vm2786_vm14, %v2773_v43, %v2776_v22  ;;  %v2796_v41 = vsel %vm2788_vm13, %v2779_v32, %v2795_v44  ;;  %v2798_v17 = vsel %vm2786_vm14, %v2776_v22, %v2779_v32 }
 0x33c   :  { %v2799_v20 = vsel %vm2789_vm11, %v2785_v24, 1326507024  ;;  %vm12713_vm9 = vcmp.eq.f32.partialorder %v706_v6, %v770_v15  ;;  %vm834_vm5 = vcmp.ne.f32.partialorder %v12463_v10, %v12611_v1  ;;  %v2635_v42 = vsel %vm2550_vm6, %v2634_v12, %v12365_v50 }
 0x33d   :  { %v7265_v31 = vmin.u32 %v2511_v11, %v12680_v23  ;;  %v2770_v39 = vshrl.u32 %v16381_v7, %v2769_v36  ;;  %vm2787_vm15 = vcmp.lt.s32.totalorder %v16558_v58, 2  ;;  %v2791_v24 = vsel %vm2789_vm11, %v2779_v32, 2102212464  ;;  %vm898_vm1 = vmand %vm12713_vm9, %vm834_vm5 }
 0x33e   :  { %v2800_v15 = vsel %vm2788_vm13, %v2782_v27, %v2799_v20  ;;  %v2797_v52 = vsel %vm2787_vm15, %v2794_v14, %v2796_v41  ;;  %v2802_v50 = vshll.u32 %v2762_v48, 8  ;;  %v2637_v12 = vsel %vm12650_vm10, 0, %v2635_v42  ;;  %v16563_v48 = vld [vmem:[#allocation24_spill] sm:$0xff] }
 0x33f   :  { %v2513_v6 = vclz %v7265_v31  ;;  %v2801_v61 = vsel %vm2787_vm15, %v2798_v17, %v2800_v15  ;;  %v673_v36 = vmul.f32 0.125, %v12642_v3  ;;  %v737_v60 = vmul.f32 0.125, %v12696_v8  ;;  %v8585_v5 = vpop.eup %8584 }
 0x340   :  { %v2790_v32 = vsel %vm2786_vm14, %v2770_v39, %v2773_v43  ;;  %v2792_v16 = vsel %vm2788_vm13, %v2776_v22, %v2791_v24  ;;  %v12741_v44 = vmul.u32.u64.low %v2802_v50, %v2801_v61  ;;  %v12742_v11 = vmul.u32.u64.high %v2802_v50, %v2801_v61, %v12741_v44 }
 0x341   :  { %v7266_v27 = vadd.s32 4294967294, %v2513_v6  ;;  %8588 = vsinq.f32 %v12599_v4  ;;  %vm866_vm0 = vcmp.le.f32.partialorder %v16563_v48, 4.0  ;;  %v8587_v14 = vpop.eup %8586  ;;  %v12759_v22 = vsel %vm1303_vm12, %v12624_v51, %v12617_v56 }
 0x342   :  { %v12751_v33 = vmul.u32.u64.low %v2802_v50, %v2797_v52  ;;  %v12752_v43 = vmul.u32.u64.high %v2802_v50, %v2797_v52, %v12751_v33  ;;  %8590 = vcosq.f32 %v12689_v53  ;;  %v12762_v4 = vand.u32 3, %v1504_v35  ;;  %vm930_vm3 = vmand %vm898_vm1, %vm866_vm0 }
 0x343   :  { %vm7267_vm4 = vcmp.lt.s32.totalorder %v7266_v27, 0  ;;  %v2641_v10 = vand.u32 3, %v2637_v12  ;;  %v705_v1 = vfloor.f32 %v673_v36  ;;  %v2793_v17 = vsel %vm2787_vm15, %v2790_v32, %v2792_v16  ;;  %v16565_v36 = vld [vmem:[#allocation57_spill] sm:$0xff] }
 0x344   :  { %v2516_v41 = vsel %vm7267_vm4, 0, %v7266_v27  ;;  %v769_v20 = vfloor.f32 %v737_v60  ;;  %v2501_v26 = vadd.s32 %v12576_v18, %v12569_v13  ;;  %v2644_v56 = vxor.u32 2147483648, %v8587_v14  ;;  %v16564_v18 = vld [vmem:[#allocation85_spill] sm:$0xff] }
 0x345   :  { %v2517_v42 = vsub.s32 32, %v2516_v41  ;;  %v2521_v38 = vsub.s32 4294967266, %v2516_v41  ;;  %v2647_v51 = vxor.u32 2147483648, %v8585_v5  ;;  %vm2811_vm6 = vc.u32 %v12742_v11, %v12751_v33 }
 0x346   :  { %v2812_v35 = vadd.s32 1, %v12752_v43  ;;  %v2518_v31 = vshll.u32 %v12680_v23, %v2516_v41  ;;  %v2809_v58 = vmul.u32 %v2802_v50, %v2793_v17  ;;  %v12773_v15 = vsel %vm930_vm3, 1.0, %v16442_v37 }
 0x347   :  { %v2519_v39 = vshrl.u32 %v2501_v26, %v2517_v42  ;;  %v2522_v24 = vadd.s32 127, %v2521_v38  ;;  %v12776_v6 = vadd.s32 120, %v16417_v0  ;;  %v2666_v52 = vsub.s32 32, %v16564_v18 }
 0x348   :  { %v2813_v13 = vsel %vm2811_vm6, %v2812_v35, %v12752_v43  ;;  %vm2640_vm8 = vweird.f32 %v16490_v49  ;;  %vm2642_vm10 = vcmp.lt.s32.totalorder %v2641_v10, 2  ;;  %vm2447_vm11 = vcmp.lt.s32.totalorder %v16524_v54, 0  ;;  %v16571_v35 = vld [vmem:[#allocation25_spill] sm:$0xff] }
 0x349   :  { %v2520_v61 = vor.u32 %v2519_v39, %v2518_v31  ;;  %v2523_v23 = vshll.u32 %v2522_v24, 23  ;;  %v2814_v12 = vadd.s32 %v2813_v13, %v2809_v58  ;;  %vm2643_vm12 = vcmp.eq.s32.totalorder %v2641_v10, 0 }
 0x34a   :  { %vm2646_vm14 = vcmp.eq.s32.totalorder %v2641_v10, 2  ;;  %v12784_v50 = vadd.f32 %v12488_v55, %v12348_v25  ;;  %v16046_v60 = vand.u32 2147483647, %v16565_v36  ;;  %v2645_v32 = vsel %vm2643_vm12, %v8585_v5, %v2644_v56 }
 0x34b   :  { %v2648_v27 = vsel %vm2646_vm14, %v2647_v51, %v8587_v14  ;;  %vm12787_vm13 = vcmp.eq.f32.partialorder %v705_v1, %v769_v20  ;;  %vm833_vm9 = vcmp.ne.f32.partialorder %v12642_v3, %v12696_v8  ;;  %v16568_v44 = vand.u32 2147483647, %v16524_v54  ;;  %v12799_v41 = vpop.eup %8588 }
 0x34c   :  { %v2524_v43 = vor.u32 4788187, %v2523_v23  ;;  %v2815_v55 = vadd.s32 536870912, %v2814_v12  ;;  %v2527_v17 = vcvt.s32.f32 %v2520_v61  ;;  %v2531_v5 = vsub.s32 4, %v12666_v46  ;;  %v12804_v20 = vpop.eup %8590  ;;  %vm897_vm4 = vmand %vm12787_vm13, %vm833_vm9 }
 0x34d   :  { %vm12795_vm5 = vcmp.le.f32.partialorder %v16568_v44, 0.7853982  ;;  %v16047_v14 = vcvt.s32.f32 %v12776_v6  ;;  %v2669_v1 = vshrl.u32 %v16378_v34, %v2666_v52  ;;  %v2672_v38 = vshrl.u32 %v16382_v9, %v2666_v52 }
 0x34e   :  { %v2525_v26 = vand.u32 2147483647, %v2524_v43  ;;  %v12806_v42 = vshrl.u32 %v2815_v55, 30  ;;  %v2675_v56 = vshrl.u32 %v16383_v19, %v2666_v52  ;;  %v2649_v51 = vsel %vm2642_vm10, %v2645_v32, %v2648_v27 }
 0x34f   :  { %vm865_vm15 = vcmp.le.f32.partialorder %v16571_v35, 4.0  ;;  %v2658_v31 = vand.u32 8388607, %v16046_v60  ;;  %v2668_v39 = vshll.u32 %v16381_v7, %v16564_v18  ;;  %v2678_v24 = vshrl.u32 %v16385_v30, %v2666_v52  ;;  %v12829_v60 = vpop.f32.mrb[17].mxu1 }
 0x350   :  { %v2528_v58 = vmul.f32 %v2527_v17, %v2525_v26  ;;  %v2817_v13 = vshll.u32 %v12806_v42, 30  ;;  %v2671_v61 = vshll.u32 %v16378_v34, %v16564_v18  ;;  %v2674_v10 = vshll.u32 %v16382_v9, %v16564_v18 }
 0x351   :  { %v548_v23 = vmul.f32 0.0625, %v16047_v14  ;;  %v2670_v32 = vor.u32 %v2669_v1, %v2668_v39  ;;  %v2677_v27 = vshll.u32 %v16383_v19, %v16564_v18  ;;  %v2681_v44 = vshrl.u32 %v16386_v59, %v2666_v52 }
 0x352   :  { %v2529_v43 = vxor.u32 2147483648, %v2528_v58  ;;  %v12827_v55 = vsub.s32 %v2814_v12, %v2817_v13  ;;  %v2673_v17 = vor.u32 %v2672_v38, %v2671_v61  ;;  %v2676_v26 = vor.u32 %v2675_v56, %v2674_v10  ;;  %v16572_v13 = vld [vmem:[#allocation80_spill] sm:$0xff] }
 0x353   :  { %v2650_v45 = vsel %vm2640_vm8, nan, %v2649_v51  ;;  %v2532_v14 = vsel %vm2447_vm11, %v2531_v5, %v12666_v46  ;;  %v2679_v1 = vor.u32 %v2678_v24, %v2677_v27  ;;  %v2680_v39 = vshll.u32 %v16385_v30, %v16564_v18  ;;  %vm929_vm8 = vmand %vm897_vm4, %vm865_vm15 }
 0x354   :  { %v2530_v40 = vsel %vm2447_vm11, %v2529_v43, %v2528_v58  ;;  %v2820_v12 = vsub.s32 0, %v12827_v55  ;;  %v2659_v38 = vor.u32 8388608, %v2658_v31  ;;  %v2667_v56 = vshrl.u32 %v16381_v7, %v2666_v52 }
 0x355   :  { %v2533_v49 = vsel %vm12795_vm5, %v16524_v54, %v2530_v40  ;;  %v2682_v51 = vor.u32 %v2681_v44, %v2680_v39  ;;  %vm2683_vm0 = vcmp.lt.s32.totalorder %v16572_v13, 1  ;;  %vm2686_vm1 = vcmp.lt.s32.totalorder %v16572_v13, 4 }
 0x356   :  { %8592 = vcosq.f32 %v2533_v49  ;;  %v7277_v46 = vmin.u32 %v2820_v12, %v12827_v55  ;;  %v2688_v18 = vsel %vm2686_vm1, %v2676_v26, 2102212464  ;;  %v2691_v5 = vsel %vm2683_vm0, %v2670_v32, %v2673_v17 }
 0x357   :  { %8594 = vsinq.f32 %v2533_v49  ;;  %vm2684_vm3 = vcmp.lt.s32.totalorder %v16572_v13, 2  ;;  %vm2685_vm6 = vcmp.lt.s32.totalorder %v16572_v13, 3  ;;  %v2692_v40 = vsel %vm2686_vm1, %v2679_v1, 920167782 }
 0x358   :  { %v2822_v52 = vclz %v7277_v46  ;;  %v2687_v31 = vsel %vm2683_vm0, %v2667_v56, %v2670_v32  ;;  %v2693_v24 = vsel %vm2685_vm6, %v2676_v26, %v2692_v40  ;;  %v2695_v58 = vsel %vm2683_vm0, %v2673_v17, %v2676_v26 }
 0x359   :  { %v2689_v61 = vsel %vm2685_vm6, %v2673_v17, %v2688_v18  ;;  %v2694_v10 = vsel %vm2684_vm3, %v2691_v5, %v2693_v24  ;;  %v2696_v3 = vsel %vm2686_vm1, %v2682_v51, 1326507024  ;;  %v2699_v8 = vshll.u32 %v2659_v38, 8 }
 0x35a   :  { %v2534_v16 = vsel %vm12795_vm5, 0, %v2532_v14  ;;  %v12867_v27 = vfloor.f32 %v548_v23  ;;  %v7278_v44 = vadd.s32 4294967294, %v2822_v52  ;;  %v2697_v32 = vsel %vm2685_vm6, %v2679_v1, %v2696_v3 }
 0x35b   :  { %v4518_v43 = vadd.f32 1.0, %v2650_v45  ;;  %v2698_v17 = vsel %vm2684_vm3, %v2695_v58, %v2697_v32  ;;  %v12871_v26 = vmul.u32.u64.low %v2699_v8, %v2694_v10  ;;  %v12872_v39 = vmul.u32.u64.high %v2699_v8, %v2694_v10, %v12871_v26 }
 0x35c   :  { %vm7279_vm10 = vcmp.lt.s32.totalorder %v7278_v44, 0  ;;  %v2690_v35 = vsel %vm2684_vm3, %v2687_v31, %v2689_v61  ;;  %v12877_v12 = vmul.u32.u64.low %v2699_v8, %v2698_v17  ;;  %v12878_v38 = vmul.u32.u64.high %v2699_v8, %v2698_v17, %v12877_v12 }
 0x35d   :  { %v7196_v48 = vsel %vm929_vm8, 1.0, %v16442_v37  ;;  %v2538_v14 = vand.u32 3, %v2534_v16  ;;  %v2825_v23 = vsel %vm7279_vm10, 0, %v7278_v44  ;;  %v12882_v45 = vadd.s32 112, %v16417_v0 }
 0x35e   :  { %vm2537_vm11 = vweird.f32 %v16524_v54  ;;  %v2810_v1 = vadd.s32 %v12751_v33, %v12742_v11  ;;  %v2826_v56 = vsub.s32 32, %v2825_v23  ;;  %v2830_v49 = vsub.s32 4294967266, %v2825_v23 }
 0x35f   :  { %v4550_v51 = vmul.f32 0.5, %v4518_v43  ;;  %v612_v13 = vmul.f32 16.0, %v12867_v27  ;;  %v2706_v46 = vmul.u32 %v2699_v8, %v2690_v35  ;;  %v2709_v18 = vadd.s32 1, %v12872_v39 }
 0x360   :  { %v8593_v5 = vpop.eup %8592  ;;  %v2827_v40 = vshll.u32 %v12827_v55, %v2825_v23  ;;  %v2828_v52 = vshrl.u32 %v2810_v1, %v2826_v56  ;;  %v2831_v31 = vadd.s32 127, %v2830_v49  ;;  %vm2708_vm12 = vc.u32 %v12878_v38, %v12871_v26 }
 0x361   :  { %v8595_v24 = vpop.eup %8594  ;;  %vm2543_vm14 = vcmp.eq.s32.totalorder %v2538_v14, 2  ;;  %v2544_v58 = vxor.u32 2147483648, %v8593_v5  ;;  %v515_v11 = vcvt.s32.f32 %v12882_v45  ;;  %v2710_v33 = vsel %vm2708_vm12, %v2709_v18, %v12872_v39  ;;  %v16575_v18 = vld [vmem:[#allocation87_spill] sm:$0xff] }
 0x362   :  { %v2541_v61 = vxor.u32 2147483648, %v8595_v24  ;;  %v2829_v10 = vor.u32 %v2828_v52, %v2827_v40  ;;  %v2832_v3 = vshll.u32 %v2831_v31, 23  ;;  %v2711_v8 = vadd.s32 %v2710_v33, %v2706_v46  ;;  %v16574_v46 = vld [vmem:[#allocation61_spill] sm:$0xff] }
 0x363   :  { %v4582_v16 = vmul.f32 %v12773_v15, %v4550_v51  ;;  %vm2540_vm13 = vcmp.eq.s32.totalorder %v2538_v14, 0  ;;  %v2545_v55 = vsel %vm2543_vm14, %v2544_v58, %v8595_v24  ;;  %v12896_v44 = vmul.f32 0.125, %v12867_v27 }
 0x364   :  { %vm2539_vm9 = vcmp.lt.s32.totalorder %v2538_v14, 2  ;;  %v2542_v32 = vsel %vm2540_vm13, %v8593_v5, %v2541_v61  ;;  %v2833_v43 = vor.u32 4788187, %v2832_v3  ;;  %v2712_v17 = vadd.s32 536870912, %v2711_v8 }
 0x365   :  { %v12899_v35 = vmul.f32 %v12784_v50, %v4582_v16  ;;  %v2546_v12 = vsel %vm2539_vm9, %v2542_v32, %v2545_v55  ;;  %v2840_v39 = vsub.s32 4, %v12806_v42  ;;  %v547_v23 = vmul.f32 0.0625, %v515_v11 }
 0x366   :  { %v2547_v15 = vsel %vm2537_vm11, nan, %v2546_v12  ;;  %v2834_v1 = vand.u32 2147483647, %v2833_v43  ;;  %v2836_v56 = vcvt.s32.f32 %v2829_v10  ;;  %v12906_v49 = vshrl.u32 %v2712_v17, 30 }
 0x367   :  { %16573 = vst [vmem:[#allocation58_spill] sm:$0xff] %v12899_v35  ;;  %v4517_v14 = vadd.f32 1.0, %v2547_v15  ;;  %v5679_v51 = vadd.f32 %v12348_v25, %v12499_v28  ;;  %v16049_v50 = vand.u32 2147483647, %v16574_v46  ;;  %v12912_v5 = vsub.s32 32, %v16575_v18 }
 0x368   :  { %v16576_v40 = vand.u32 2147483647, %v16556_v57  ;;  %vm2756_vm15 = vcmp.lt.s32.totalorder %v16556_v57, 0  ;;  %v2837_v54 = vmul.f32 %v2836_v56, %v2834_v1  ;;  %v2714_v31 = vshll.u32 %v12906_v49, 30 }
 0x369   :  { %v12924_v24 = vmul.f32 %v16507_v63, %v12899_v35  ;;  %v4549_v25 = vmul.f32 0.5, %v4517_v14  ;;  %v16580_v28 = vcvt.s32.f32 %v12776_v6  ;;  %v708_v33 = vfloor.f32 %v12896_v44  ;;  %v12963_v14 = vpop.f32.mrb[18].mxu1 }
 0x36a   :  { %vm12916_vm5 = vcmp.le.f32.partialorder %v16576_v40, 0.7853982  ;;  %v2838_v61 = vxor.u32 2147483648, %v2837_v54  ;;  %v12932_v10 = vsel %vm2756_vm15, %v2840_v39, %v12806_v42  ;;  %v12934_v3 = vfloor.f32 %v547_v23  ;;  %16582 = vst [vmem:[#allocation143_spill] sm:$0xff] %v12963_v14 }
 0x36b   :  { %16579 = vst [vmem:[#allocation22_spill] sm:$0xff] %v12924_v24  ;;  %v12928_v58 = vsub.f32 %v16580_v28, %v612_v13  ;;  %v12936_v16 = vsub.s32 %v2711_v8, %v2714_v31  ;;  %v4581_v55 = vmul.f32 %v7196_v48, %v4549_v25  ;;  %v2967_v32 = vand.u32 8388607, %v16049_v50 }
 0x36c   :  { %v2981_v43 = vshrl.u32 %v16382_v9, %v12912_v5  ;;  %v2984_v6 = vshrl.u32 %v16383_v19, %v12912_v5  ;;  %v2839_v13 = vsel %vm2756_vm15, %v2838_v61, %v2837_v54  ;;  %v2978_v42 = vshrl.u32 %v16378_v34, %v12912_v5 }
 0x36d   :  { %v2717_v17 = vsub.s32 0, %v12936_v16  ;;  %v2980_v8 = vshll.u32 %v16378_v34, %v16575_v18  ;;  %v12949_v12 = vmul.f32 %v5679_v51, %v4581_v55  ;;  %v2842_v48 = vsel %vm12916_vm5, %v16556_v57, %v2839_v13 }
 0x36e   :  { %v2983_v39 = vshll.u32 %v16382_v9, %v16575_v18  ;;  %v2987_v23 = vshrl.u32 %v16385_v30, %v12912_v5  ;;  %8596 = vcosq.f32 %v2842_v48  ;;  %v2977_v1 = vshll.u32 %v16381_v7, %v16575_v18 }
 0x36f   :  { %16581 = vst [vmem:[#allocation5_spill] sm:$0xff] %v12949_v12  ;;  %v7273_v15 = vmin.u32 %v2717_v17, %v12936_v16  ;;  %v2986_v56 = vshll.u32 %v16383_v19, %v16575_v18  ;;  %v12967_v51 = vmul.f32 %v16511_v62, %v12949_v12  ;;  %8598 = vsinq.f32 %v2842_v48 }
 0x370   :  { %v2982_v40 = vor.u32 %v2981_v43, %v2980_v8  ;;  %v2985_v54 = vor.u32 %v2984_v6, %v2983_v39  ;;  %v2989_v28 = vshll.u32 %v16385_v30, %v16575_v18  ;;  %v2990_v61 = vshrl.u32 %v16386_v59, %v12912_v5  ;;  %v16584_v6 = vld [vmem:[#allocation86_spill] sm:$0xff] }
 0x371   :  { %16583 = vst [vmem:[#allocation63_spill] sm:$0xff] %v12967_v51  ;;  %v2719_v31 = vclz %v7273_v15  ;;  %v2988_v25 = vor.u32 %v2987_v23, %v2986_v56  ;;  %v12976_v13 = vmul.f32 0.125, %v12928_v58  ;;  %v611_v17 = vmul.f32 16.0, %v12934_v3 }
 0x372   :  { %v2979_v50 = vor.u32 %v2978_v42, %v2977_v1  ;;  %v2991_v43 = vor.u32 %v2990_v61, %v2989_v28  ;;  %vm2992_vm0 = vcmp.lt.s32.totalorder %v16584_v6, 1  ;;  %vm2995_vm1 = vcmp.lt.s32.totalorder %v16584_v6, 4 }
 0x373   :  { %v7274_v48 = vadd.s32 4294967294, %v2719_v31  ;;  %v2843_v18 = vsel %vm12916_vm5, 0, %v12932_v10  ;;  %v2968_v8 = vor.u32 8388608, %v2967_v32  ;;  %v3001_v39 = vsel %vm2995_vm1, %v2988_v25, 920167782 }
 0x374   :  { %v3004_v23 = vsel %vm2992_vm0, %v2982_v40, %v2985_v54  ;;  %vm2993_vm3 = vcmp.lt.s32.totalorder %v16584_v6, 2  ;;  %vm2994_vm6 = vcmp.lt.s32.totalorder %v16584_v6, 3  ;;  %v3005_v42 = vsel %vm2995_vm1, %v2991_v43, 1326507024 }
 0x375   :  { %vm7275_vm4 = vcmp.lt.s32.totalorder %v7274_v48, 0  ;;  %v3000_v52 = vsel %vm2992_vm0, %v2979_v50, %v2982_v40  ;;  %v3002_v10 = vsel %vm2994_vm6, %v2985_v54, %v3001_v39  ;;  %v3006_v32 = vsel %vm2994_vm6, %v2988_v25, %v3005_v42 }
 0x376   :  { %v2722_v15 = vsel %vm7275_vm4, 0, %v7274_v48  ;;  %v2707_v1 = vadd.s32 %v12871_v26, %v12878_v38  ;;  %v3007_v28 = vsel %vm2993_vm3, %v3004_v23, %v3006_v32  ;;  %v13004_v61 = vsub.f32 %v515_v11, %v611_v17 }
 0x377   :  { %v2723_v56 = vsub.s32 32, %v2722_v15  ;;  %v2727_v31 = vsub.s32 4294967266, %v2722_v15  ;;  %v2976_v48 = vshrl.u32 %v16381_v7, %v12912_v5  ;;  %v2997_v43 = vsel %vm2995_vm1, %v2985_v54, 2102212464 }
 0x378   :  { %v3008_v39 = vshll.u32 %v2968_v8, 8  ;;  %v8597_v25 = vpop.eup %8596  ;;  %v2724_v42 = vshll.u32 %v12936_v16, %v2722_v15  ;;  %v3003_v55 = vsel %vm2993_vm3, %v3000_v52, %v3002_v10  ;;  %vm836_vm8 = vcmp.ne.f32.partialorder %v12867_v27, %v12928_v58 }
 0x379   :  { %v2725_v26 = vshrl.u32 %v2707_v1, %v2723_v56  ;;  %v2728_v38 = vadd.s32 127, %v2727_v31  ;;  %v8599_v23 = vpop.eup %8598  ;;  %v2847_v45 = vand.u32 3, %v2843_v18  ;;  %v2737_v11 = vsub.s32 4, %v12906_v49 }
 0x37a   :  { %v13016_v5 = vmul.u32.u64.low %v3008_v39, %v3007_v28  ;;  %v13017_v17 = vmul.u32.u64.high %v3008_v39, %v3007_v28, %v13016_v5  ;;  %v2996_v16 = vsel %vm2992_vm0, %v2976_v48, %v2979_v50  ;;  %v2998_v15 = vsel %vm2994_vm6, %v2982_v40, %v2997_v43 }
 0x37b   :  { %v2726_v54 = vor.u32 %v2725_v26, %v2724_v42  ;;  %v2729_v8 = vshll.u32 %v2728_v38, 23  ;;  %v2850_v32 = vxor.u32 2147483648, %v8599_v23  ;;  %v2853_v52 = vxor.u32 2147483648, %v8597_v25 }
 0x37c   :  { %v13023_v10 = vmul.u32.u64.low %v3008_v39, %v3003_v55  ;;  %v13024_v1 = vmul.u32.u64.high %v3008_v39, %v3003_v55, %v13023_v10  ;;  %v772_v18 = vfloor.f32 %v12976_v13  ;;  %v16585_v56 = vand.u32 2147483647, %v16565_v36 }
 0x37d   :  { %vm2653_vm11 = vcmp.lt.s32.totalorder %v16565_v36, 0  ;;  %v2730_v50 = vor.u32 4788187, %v2729_v8  ;;  %vm2849_vm12 = vcmp.eq.s32.totalorder %v2847_v45, 0  ;;  %v675_v40 = vmul.f32 0.125, %v12934_v3 }
 0x37e   :  { %vm13030_vm10 = vcmp.le.f32.partialorder %v16585_v56, 0.7853982  ;;  %v2738_v55 = vsel %vm2653_vm11, %v2737_v11, %v12906_v49  ;;  %v2999_v28 = vsel %vm2993_vm3, %v2996_v16, %v2998_v15  ;;  %vm2852_vm14 = vcmp.eq.s32.totalorder %v2847_v45, 2  ;;  %v16588_v11 = vld [vmem:[#allocation91_spill] sm:$0xff]  ;;  %v16589_v16 = vld [vmem:[#allocation62_spill] sm:$0xff] }
 0x37f   :  { %v2731_v13 = vand.u32 2147483647, %v2730_v50  ;;  %v2733_v48 = vcvt.s32.f32 %v2726_v54  ;;  %vm3017_vm13 = vc.u32 %v13017_v17, %v13023_v10  ;;  %v2851_v43 = vsel %vm2849_vm12, %v8597_v25, %v2850_v32 }
 0x380   :  { %v2854_v42 = vsel %vm2852_vm14, %v2853_v52, %v8599_v23  ;;  %v739_v26 = vmul.f32 0.125, %v13004_v61  ;;  %v3018_v38 = vadd.s32 1, %v13024_v1  ;;  %v2740_v8 = vsel %vm13030_vm10, 0, %v2738_v55  ;;  %v16590_v23 = vld [vmem:[#allocation26_spill] sm:$0xff] }
 0x381   :  { %v2734_v5 = vmul.f32 %v2733_v48, %v2731_v13  ;;  %v3015_v49 = vmul.u32 %v3008_v39, %v2999_v28  ;;  %v2872_v6 = vsub.s32 32, %v16588_v11  ;;  %vm804_vm9 = vcmp.eq.f32.partialorder %v708_v33, %v772_v18 }
 0x382   :  { %vm2848_vm5 = vcmp.lt.s32.totalorder %v2847_v45, 2  ;;  %v3019_v54 = vsel %vm3017_vm13, %v3018_v38, %v13024_v1  ;;  %v16050_v25 = vand.u32 2147483647, %v16589_v16  ;;  %vm868_vm15 = vcmp.le.f32.partialorder %v16590_v23, 4.0  ;;  %vm900_vm1 = vmand %vm804_vm9, %vm836_vm8 }
 0x383   :  { %v2855_v15 = vsel %vm2848_vm5, %v2851_v43, %v2854_v42  ;;  %v2735_v32 = vxor.u32 2147483648, %v2734_v5  ;;  %v3020_v52 = vadd.s32 %v3019_v54, %v3015_v49  ;;  %vm2846_vm0 = vweird.f32 %v16556_v57  ;;  %vm932_vm4 = vmand %vm900_vm1, %vm868_vm15 }
 0x384   :  { %v707_v56 = vfloor.f32 %v675_v40  ;;  %v771_v50 = vfloor.f32 %v739_v26  ;;  %v13054_v39 = vand.u32 3, %v2740_v8  ;;  %v2875_v45 = vshrl.u32 %v16378_v34, %v2872_v6 }
 0x385   :  { %v2736_v44 = vsel %vm2653_vm11, %v2735_v32, %v2734_v5  ;;  %v3021_v33 = vadd.s32 536870912, %v3020_v52  ;;  %v2878_v1 = vshrl.u32 %v16382_v9, %v2872_v6  ;;  %v2856_v18 = vsel %vm2846_vm0, nan, %v2855_v15 }
 0x386   :  { %v2739_v57 = vsel %vm13030_vm10, %v16565_v36, %v2736_v44  ;;  %v2864_v40 = vand.u32 8388607, %v16050_v25  ;;  %v2874_v27 = vshll.u32 %v16381_v7, %v16588_v11  ;;  %v2877_v55 = vshll.u32 %v16378_v34, %v16588_v11 }
 0x387   :  { %8600 = vcosq.f32 %v2739_v57  ;;  %v13070_v58 = vshrl.u32 %v3021_v33, 30  ;;  %v2881_v28 = vshrl.u32 %v16383_v19, %v2872_v6  ;;  %v2880_v31 = vshll.u32 %v16382_v9, %v16588_v11 }
 0x388   :  { %8602 = vsinq.f32 %v2739_v57  ;;  %v2883_v13 = vshll.u32 %v16383_v19, %v16588_v11  ;;  %v2884_v48 = vshrl.u32 %v16385_v30, %v2872_v6  ;;  %v4520_v43 = vadd.f32 1.0, %v2856_v18 }
 0x389   :  { %v3023_v42 = vshll.u32 %v13070_v58, 30  ;;  %v2876_v26 = vor.u32 %v2875_v45, %v2874_v27  ;;  %v2879_v38 = vor.u32 %v2878_v1, %v2877_v55  ;;  %v2882_v5 = vor.u32 %v2881_v28, %v2880_v31  ;;  %v16593_v1 = vld [vmem:[#allocation88_spill] sm:$0xff] }
 0x38a   :  { %v2885_v8 = vor.u32 %v2884_v48, %v2883_v13  ;;  %v2886_v49 = vshll.u32 %v16385_v30, %v16588_v11  ;;  %v2887_v54 = vshrl.u32 %v16386_v59, %v2872_v6  ;;  %8604 = vsinq.f32 %v12689_v53  ;;  %v13100_v53 = vpop.f32.mrb[19].mxu1 }
 0x38b   :  { %v7199_v23 = vsel %vm932_vm4, 1.0, %v16442_v37  ;;  %vm835_vm3 = vcmp.ne.f32.partialorder %v12934_v3, %v13004_v61  ;;  %v13090_v15 = vsub.s32 %v3020_v52, %v3023_v42  ;;  %vm13092_vm6 = vcmp.eq.f32.partialorder %v707_v56, %v771_v50  ;;  %16594 = vst [vmem:[#allocation14_spill] sm:$0xff] %v13100_v53 }
 0x38c   :  { %vm2749_vm8 = vcmp.eq.s32.totalorder %v13054_v39, 2  ;;  %v2865_v44 = vor.u32 8388608, %v2864_v40  ;;  %v2888_v33 = vor.u32 %v2887_v54, %v2886_v49  ;;  %v4552_v11 = vmul.f32 0.5, %v4520_v43  ;;  %v16595_v54 = vld [vmem:[#allocation11_spill] sm:$0xff]  ;;  %vm13136_vm1 = vmand %vm13092_vm6, %vm835_vm3 }
 0x38d   :  { %v3026_v45 = vsub.s32 0, %v13090_v15  ;;  %vm2889_vm10 = vcmp.lt.s32.totalorder %v16593_v1, 1  ;;  %vm2892_vm11 = vcmp.lt.s32.totalorder %v16593_v1, 4  ;;  %v2873_v52 = vshrl.u32 %v16381_v7, %v2872_v6 }
 0x38e   :  { %v2894_v18 = vsel %vm2892_vm11, %v2882_v5, 2102212464  ;;  %v2897_v56 = vsel %vm2889_vm10, %v2876_v26, %v2879_v38  ;;  %v2898_v50 = vsel %vm2892_vm11, %v2885_v8, 920167782  ;;  %vm2890_vm12 = vcmp.lt.s32.totalorder %v16593_v1, 2 }
 0x38f   :  { %v7285_v57 = vmin.u32 %v3026_v45, %v13090_v15  ;;  %vm2891_vm14 = vcmp.lt.s32.totalorder %v16593_v1, 3  ;;  %v2901_v40 = vsel %vm2889_vm10, %v2879_v38, %v2882_v5  ;;  %v2893_v27 = vsel %vm2889_vm10, %v2873_v52, %v2876_v26  ;;  %v16596_v52 = vld [vmem:[#allocation27_spill] sm:$0xff] }
 0x390   :  { %v2899_v55 = vsel %vm2891_vm14, %v2882_v5, %v2898_v50  ;;  %v2902_v28 = vsel %vm2892_vm11, %v2888_v33, 1326507024  ;;  %v2905_v31 = vshll.u32 %v2865_v44, 8  ;;  %v2895_v43 = vsel %vm2891_vm14, %v2879_v38, %v2894_v18 }
 0x391   :  { %v8601_v13 = vpop.eup %8600  ;;  %v3028_v48 = vclz %v7285_v57  ;;  %v2900_v6 = vsel %vm2890_vm12, %v2897_v56, %v2899_v55  ;;  %v2903_v42 = vsel %vm2891_vm14, %v2885_v8, %v2902_v28  ;;  %vm1301_vm13 = vweird.f32 %v16595_v54  ;;  %v13123_v8 = vld [vmem:[%s15762_s2 + $0x58] ss:$0 sm:$0xff] }
 0x392   :  { %v8603_v49 = vpop.eup %8602  ;;  %v2750_v45 = vxor.u32 2147483648, %v8601_v13  ;;  %v2904_v25 = vsel %vm2890_vm12, %v2901_v40, %v2903_v42  ;;  %v13111_v35 = vmul.u32.u64.low %v2905_v31, %v2900_v6  ;;  %v13112_v12 = vmul.u32.u64.high %v2905_v31, %v2900_v6, %v13111_v35 }
 0x393   :  { %vm1616_vm9 = vcmp.eq.s32.totalorder %v12606_v21, 2  ;;  %v2747_v26 = vxor.u32 2147483648, %v8603_v49  ;;  %v7286_v5 = vadd.s32 4294967294, %v3028_v48  ;;  %vm1613_vm5 = vcmp.eq.s32.totalorder %v12606_v21, 0 }
 0x394   :  { %v13116_v38 = vmul.u32.u64.low %v2905_v31, %v2904_v25  ;;  %v13117_v44 = vmul.u32.u64.high %v2905_v31, %v2904_v25, %v13116_v38  ;;  %v5694_v33 = vadd.f32 %v13123_v8, %v12510_v29  ;;  %vm867_vm15 = vcmp.le.f32.partialorder %v16596_v52, 4.0  ;;  %v8605_v56 = vpop.eup %8604 }
 0x395   :  { %vm2746_vm0 = vcmp.eq.s32.totalorder %v13054_v39, 0  ;;  %v2751_v18 = vsel %vm2749_vm8, %v2750_v45, %v8603_v49  ;;  %vm2745_vm4 = vcmp.lt.s32.totalorder %v13054_v39, 2  ;;  %vm7287_vm10 = vcmp.lt.s32.totalorder %v7286_v5, 0  ;;  %vm13154_vm6 = vmand %vm13136_vm1, %vm867_vm15 }
 0x396   :  { %v2748_v29 = vsel %vm2746_vm0, %v8601_v13, %v2747_v26  ;;  %v2896_v50 = vsel %vm2890_vm12, %v2893_v27, %v2895_v43  ;;  %vm2743_vm11 = vweird.f32 %v16565_v36  ;;  %v13144_v40 = vsel %vm7287_vm10, 0, %v7286_v5 }
 0x397   :  { %v2752_v57 = vsel %vm2745_vm4, %v2748_v29, %v2751_v18  ;;  %v2915_v3 = vadd.s32 1, %v13112_v12  ;;  %v1614_v61 = vxor.u32 2147483648, %v12799_v41  ;;  %v1617_v32 = vxor.u32 2147483648, %v12683_v2 }
 0x398   :  { %v4584_v55 = vmul.f32 %v7199_v23, %v4552_v11  ;;  %v2753_v28 = vsel %vm2743_vm11, nan, %v2752_v57  ;;  %vm1612_vm3 = vcmp.lt.s32.totalorder %v12606_v21, 2  ;;  %v3036_v1 = vsub.s32 4294967266, %v13144_v40 }
 0x399   :  { %v4519_v36 = vadd.f32 1.0, %v2753_v28  ;;  %v2912_v27 = vmul.u32 %v2905_v31, %v2896_v50  ;;  %vm2914_vm8 = vc.u32 %v13117_v44, %v13111_v35  ;;  %v1511_v13 = vxor.u32 2147483648, %v8605_v56 }
 0x39a   :  { %v1514_v23 = vxor.u32 2147483648, %v12804_v20  ;;  %v13163_v11 = vadd.s32 136, %v16417_v0  ;;  %v2916_v48 = vsel %vm2914_vm8, %v2915_v3, %v13112_v12  ;;  %v13166_v43 = vmul.f32 %v5694_v33, %v4584_v55  ;;  %v16607_v55 = vld [vmem:[#allocation159_spill] sm:$0xff] }
 0x39b   :  { %v4551_v6 = vmul.f32 0.5, %v4519_v36  ;;  %v5689_v42 = vadd.f32 %v13123_v8, %v12516_v47  ;;  %v2917_v49 = vadd.s32 %v2916_v48, %v2912_v27  ;;  %v1311_v31 = vsel %vm1301_vm13, nan, %v12759_v22  ;;  %v16610_v36 = vld [vmem:[#allocation123_spill] sm:$0xff] }
 0x39c   :  { %16601 = vst [vmem:[#allocation15_spill] sm:$0xff] %v13166_v43  ;;  %vm1510_vm12 = vcmp.eq.s32.totalorder %v12762_v4, 0  ;;  %vm1513_vm14 = vcmp.eq.s32.totalorder %v12762_v4, 2  ;;  %v7198_v45 = vsel %vm13154_vm6, 1.0, %v16442_v37  ;;  %v1618_v12 = vsel %vm1616_vm9, %v1617_v32, %v12799_v41 }
 0x39d   :  { %v4583_v26 = vmul.f32 %v7198_v45, %v4551_v6  ;;  %v3037_v5 = vadd.s32 127, %v3036_v1  ;;  %v2918_v47 = vadd.s32 536870912, %v2917_v49  ;;  %v1615_v54 = vsel %vm1613_vm5, %v12683_v2, %v1614_v61  ;;  %v16604_v2 = vld [vmem:[#allocation67_spill] sm:$0xff] }
 0x39e   :  { %v1512_v22 = vsel %vm1510_vm12, %v12804_v20, %v1511_v13  ;;  %v1515_v38 = vsel %vm1513_vm14, %v1514_v23, %v8605_v56  ;;  %v16054_v33 = vcvt.s32.f32 %v13163_v11  ;;  %v13188_v52 = vmul.f32 %v16507_v63, %v13166_v43  ;;  %v16605_v56 = vld [vmem:[#allocation93_spill] sm:$0xff]  ;;  %v16614_v13 = vld [vmem:[#allocation119_spill] sm:$0xff]  ;;  %v16615_v23 = vld [vmem:[#allocation116_spill] sm:$0xff] }
 0x39f   :  { %v13190_v18 = vmul.f32 %v5689_v42, %v4583_v26  ;;  %v3032_v41 = vsub.s32 32, %v13144_v40  ;;  %v13193_v25 = vshrl.u32 %v2918_v47, 30  ;;  %vm1509_vm13 = vcmp.lt.s32.totalorder %v12762_v4, 2  ;;  %v16608_v4 = vld [vmem:[#allocation124_spill] sm:$0xff]  ;;  %v16616_v47 = vld [vmem:[#allocation10_spill] sm:$0xff] }
 0x3a0   :  { %16602 = vst [vmem:[#allocation60_spill] sm:$0xff] %v13188_v52  ;;  %v13197_v29 = vadd.s32 128, %v16417_v0  ;;  %v16053_v20 = vand.u32 2147483647, %v16604_v2  ;;  %v3181_v50 = vsub.s32 32, %v16605_v56  ;;  %v3016_v3 = vadd.s32 %v13023_v10, %v13017_v17 }
 0x3a1   :  { %16603 = vst [vmem:[#allocation16_spill] sm:$0xff] %v13190_v18  ;;  %v13203_v57 = vmul.f32 %v16511_v62, %v13190_v18  ;;  %v3038_v61 = vshll.u32 %v3037_v5, 23  ;;  %v2920_v32 = vshll.u32 %v13193_v25, 30  ;;  %v13209_v28 = vadd.f32 1.0, %v16607_v55  ;;  %v16633_v5 = vld [vmem:[#allocation135_spill] sm:$0xff] }
 0x3a2   :  { %v16609_v39 = vfloor.f32 %v16608_v4  ;;  %v16611_v1 = vfloor.f32 %v16610_v36  ;;  %vm821_vm5 = vcmp.ne.f32.partialorder %v16615_v23, %v16614_v13  ;;  %v13221_v48 = vadd.f32 1.0, %v1311_v31  ;;  %v16624_v36 = vld [vmem:[#allocation120_spill] sm:$0xff] }
 0x3a3   :  { %16606 = vst [vmem:[#allocation65_spill] sm:$0xff] %v13203_v57  ;;  %v13225_v17 = vsel %vm1612_vm3, %v1615_v54, %v1618_v12  ;;  %v13227_v10 = vsel %vm1509_vm13, %v1512_v22, %v1515_v38  ;;  %v13233_v42 = vmul.f32 0.0625, %v16054_v33  ;;  %v3034_v45 = vshrl.u32 %v3016_v3, %v3032_v41  ;;  %v16617_v41 = vld [vmem:[#allocation132_spill] sm:$0xff]  ;;  %v16632_v33 = vld [vmem:[#allocation137_spill] sm:$0xff] }
 0x3a4   :  { %vm13215_vm9 = vcmp.eq.f32.partialorder %v16611_v1, %v16609_v39  ;;  %v13235_v26 = vsub.s32 %v2917_v49, %v2920_v32  ;;  %v3173_v31 = vand.u32 8388607, %v16053_v20  ;;  %v3184_v21 = vshrl.u32 %v16378_v34, %v3181_v50  ;;  %v16619_v32 = vld [vmem:[#allocation131_spill] sm:$0xff]  ;;  %v16623_v39 = vld [vmem:[#allocation130_spill] sm:$0xff] }
 0x3a5   :  { %v3187_v12 = vshrl.u32 %v16382_v9, %v3181_v50  ;;  %vm853_vm15 = vcmp.le.f32.partialorder %v16616_v47, 4.0  ;;  %v3033_v54 = vshll.u32 %v13090_v15, %v13144_v40  ;;  %v13245_v22 = vor.u32 4788187, %v3038_v61  ;;  %vm885_vm2 = vmand %vm13215_vm9, %vm821_vm5 }
 0x3a6   :  { %v2923_v38 = vsub.s32 0, %v13235_v26  ;;  %v3190_v49 = vshrl.u32 %v16383_v19, %v3181_v50  ;;  %v16618_v3 = vfloor.f32 %v16617_v41  ;;  %v16620_v55 = vfloor.f32 %v16619_v32  ;;  %v13266_v41 = vpop.f32.mrb[20].mxu1  ;;  %vm13312_vm9 = vmand %vm885_vm2, %vm853_vm15 }
 0x3a7   :  { %vm824_vm1 = vcmp.ne.f32.partialorder %v16624_v36, %v16623_v39  ;;  %v3183_v15 = vshll.u32 %v16381_v7, %v16605_v56  ;;  %v3186_v40 = vshll.u32 %v16378_v34, %v16605_v56  ;;  %v3189_v61 = vshll.u32 %v16382_v9, %v16605_v56  ;;  %16625 = vst [vmem:[#allocation44_spill] sm:$0xff] %v13266_v41  ;;  %v16644_v39 = vld [vmem:[#allocation9_spill] sm:$0xff] }
 0x3a8   :  { %vm13253_vm0 = vcmp.eq.f32.partialorder %v16620_v55, %v16618_v3  ;;  %v3193_v1 = vshrl.u32 %v16385_v30, %v3181_v50  ;;  %v16626_v3 = vld [vmem:[#allocation141_spill] sm:$0xff]  ;;  %vm823_vm10 = vcmp.ne.f32.partialorder %v16633_v5, %v16632_v33  ;;  %v3035_v43 = vor.u32 %v3034_v45, %v3033_v54 }
 0x3a9   :  { %v16627_v32 = vfloor.f32 %v16626_v3  ;;  %v16628_v55 = vld [vmem:[#allocation49_spill] sm:$0xff]  ;;  %v2913_v18 = vadd.s32 %v13111_v35, %v13117_v44  ;;  %v7281_v57 = vmin.u32 %v2923_v38, %v13235_v26  ;;  %v3192_v52 = vshll.u32 %v16383_v19, %v16605_v56  ;;  %v16636_v44 = vld [vmem:[#allocation8_spill] sm:$0xff] }
 0x3aa   :  { %v16629_v6 = vfloor.f32 %v16628_v55  ;;  %v3174_v51 = vor.u32 8388608, %v3173_v31  ;;  %v3185_v3 = vor.u32 %v3184_v21, %v3183_v15  ;;  %v3188_v24 = vor.u32 %v3187_v12, %v3186_v40  ;;  %v16637_v21 = vld [vmem:[#allocation92_spill] sm:$0xff] }
 0x3ab   :  { %v3191_v55 = vor.u32 %v3190_v49, %v3189_v61  ;;  %v2925_v41 = vclz %v7281_v57  ;;  %v3194_v53 = vor.u32 %v3193_v1, %v3192_v52  ;;  %v3195_v45 = vshll.u32 %v16385_v30, %v16605_v56 }
 0x3ac   :  { %vm13272_vm4 = vcmp.eq.f32.partialorder %v16629_v6, %v16627_v32  ;;  %v16634_v6 = vld [vmem:[#allocation12_spill] sm:$0xff]  ;;  %v16635_v32 = vld [vmem:[#allocation13_spill] sm:$0xff]  ;;  %v3196_v35 = vshrl.u32 %v16386_v59, %v3181_v50  ;;  %vm855_vm6 = vcmp.le.f32.partialorder %v16636_v44, 4.0  ;;  %v3040_v54 = vand.u32 2147483647, %v13245_v22 }
 0x3ad   :  { %vm856_vm11 = vcmp.le.f32.partialorder %v16634_v6, 4.0  ;;  %vm1610_vm3 = vweird.f32 %v16635_v32  ;;  %v3182_v31 = vshrl.u32 %v16381_v7, %v3181_v50  ;;  %vm3198_vm8 = vcmp.lt.s32.totalorder %v16637_v21, 1  ;;  %vm13341_vm2 = vmand %vm13272_vm4, %vm823_vm10 }
 0x3ae   :  { %vm3199_vm12 = vcmp.lt.s32.totalorder %v16637_v21, 2  ;;  %v7282_v12 = vadd.s32 4294967294, %v2925_v41  ;;  %v3197_v38 = vor.u32 %v3196_v35, %v3195_v45  ;;  %vm3200_vm14 = vcmp.lt.s32.totalorder %v16637_v21, 3 }
 0x3af   :  { %vm3201_vm13 = vcmp.lt.s32.totalorder %v16637_v21, 4  ;;  %v3206_v56 = vsel %vm3198_vm8, %v3185_v3, %v3188_v24  ;;  %v3210_v49 = vsel %vm3198_vm8, %v3188_v24, %v3191_v55  ;;  %v3202_v50 = vsel %vm3198_vm8, %v3182_v31, %v3185_v3 }
 0x3b0   :  { %v3203_v52 = vsel %vm3201_vm13, %v3191_v55, 2102212464  ;;  %v3207_v57 = vsel %vm3201_vm13, %v3194_v53, 920167782  ;;  %vm7283_vm7 = vcmp.lt.s32.totalorder %v7282_v12, 0  ;;  %v3214_v41 = vshll.u32 %v3174_v51, 8 }
 0x3b1   :  { %v3208_v22 = vsel %vm3200_vm14, %v3191_v55, %v3207_v57  ;;  %v3211_v15 = vsel %vm3201_vm13, %v3197_v38, 1326507024  ;;  %v2928_v40 = vsel %vm7283_vm7, 0, %v7282_v12  ;;  %v3204_v27 = vsel %vm3200_vm14, %v3188_v24, %v3203_v52  ;;  %vm13328_vm7 = vmand %vm13253_vm0, %vm824_vm1 }
 0x3b2   :  { %v3209_v61 = vsel %vm3199_vm12, %v3206_v56, %v3208_v22  ;;  %v3212_v1 = vsel %vm3200_vm14, %v3194_v53, %v3211_v15  ;;  %v2929_v45 = vsub.s32 32, %v2928_v40  ;;  %v2933_v35 = vsub.s32 4294967266, %v2928_v40  ;;  %vm13359_vm15 = vmand %vm13328_vm7, %vm856_vm11 }
 0x3b3   :  { %v3213_v13 = vsel %vm3199_vm12, %v3210_v49, %v3212_v1  ;;  %v13319_v31 = vmul.u32.u64.low %v3214_v41, %v3209_v61  ;;  %v13320_v53 = vmul.u32.u64.high %v3214_v41, %v3209_v61, %v13319_v31  ;;  %v3042_v51 = vcvt.s32.f32 %v3035_v43  ;;  %vm919_vm1 = vmand %vm13341_vm2, %vm855_vm6 }
 0x3b4   :  { %v13316_v3 = vmul.u32.u64.low %v3214_v41, %v3213_v13  ;;  %v13317_v55 = vmul.u32.u64.high %v3214_v41, %v3213_v13, %v13316_v3  ;;  %v2930_v47 = vshll.u32 %v13235_v26, %v2928_v40  ;;  %v2931_v12 = vshrl.u32 %v2913_v18, %v2929_v45  ;;  %v16652_v13 = vld [vmem:[#allocation156_spill] sm:$0xff] }
 0x3b5   :  { %v2934_v38 = vadd.s32 127, %v2933_v35  ;;  %v1620_v52 = vsel %vm1610_vm3, nan, %v13225_v17  ;;  %vm1507_vm5 = vweird.f32 %v16644_v39  ;;  %v13347_v43 = vfloor.f32 %v13233_v42  ;;  %v16651_v35 = vld [vmem:[#allocation129_spill] sm:$0xff]  ;;  %v16656_v39 = vld [vmem:[#allocation95_spill] sm:$0xff] }
 0x3b6   :  { %v3205_v18 = vsel %vm3199_vm12, %v3202_v50, %v3204_v27  ;;  %v1517_v26 = vsel %vm1507_vm5, nan, %v13227_v10  ;;  %v3043_v17 = vmul.f32 %v3042_v51, %v3040_v54  ;;  %v2932_v36 = vor.u32 %v2931_v12, %v2930_v47 }
 0x3b7   :  { %v2935_v32 = vshll.u32 %v2934_v38, 23  ;;  %v7184_v33 = vsel %vm13312_vm9, 1.0, %v16442_v37  ;;  %v16647_v42 = vcvt.s32.f32 %v13197_v29  ;;  %vm3223_vm0 = vc.u32 %v13317_v55, %v13319_v31 }
 0x3b8   :  { %v3224_v10 = vadd.s32 1, %v13320_v53  ;;  %v4538_v54 = vmul.f32 0.5, %v13209_v28  ;;  %v4537_v21 = vmul.f32 0.5, %v13221_v48  ;;  %v3221_v56 = vmul.u32 %v3214_v41, %v3205_v18  ;;  %v16648_v28 = vld [vmem:[#allocation148_spill] sm:$0xff] }
 0x3b9   :  { %v549_v5 = vmul.f32 0.0625, %v16647_v42  ;;  %v2936_v6 = vor.u32 4788187, %v2935_v32  ;;  %v4508_v57 = vadd.f32 1.0, %v1620_v52  ;;  %v4507_v49 = vadd.f32 1.0, %v1517_v26 }
 0x3ba   :  { %v614_v50 = vmul.f32 16.0, %v13347_v43  ;;  %v3225_v22 = vsel %vm3223_vm0, %v3224_v10, %v13320_v53  ;;  %v3044_v15 = vxor.u32 2147483648, %v3043_v17  ;;  %v2939_v61 = vcvt.s32.f32 %v2932_v36 }
 0x3bb   :  { %v2937_v40 = vand.u32 2147483647, %v2936_v6  ;;  %v3226_v1 = vadd.s32 %v3225_v22, %v3221_v56  ;;  %v5624_v48 = vadd.f32 %v13123_v8, %v16648_v28  ;;  %v13381_v44 = vsel %vm13359_vm15, 1.0, %v16442_v37  ;;  %v16665_v56 = vld [vmem:[#allocation70_spill] sm:$0xff] }
 0x3bc   :  { %16649 = vst [vmem:[#allocation64_spill] sm:$0xff] %v13381_v44  ;;  %v13384_v41 = vsel %vm919_vm1, 1.0, %v16442_v37  ;;  %v13386_v45 = vfloor.f32 %v549_v5  ;;  %v4570_v27 = vmul.f32 %v16651_v35, %v4538_v54  ;;  %v5619_v23 = vadd.f32 %v13123_v8, %v16652_v13 }
 0x3bd   :  { %16650 = vst [vmem:[#allocation18_spill] sm:$0xff] %v13384_v41  ;;  %v2940_v3 = vmul.f32 %v2939_v61, %v2937_v40  ;;  %v3227_v53 = vadd.s32 536870912, %v3226_v1  ;;  %v4569_v24 = vmul.f32 %v7184_v33, %v4537_v21  ;;  %v13391_v51 = vmul.f32 0.5, %v4508_v57 }
 0x3be   :  { %v16654_v47 = vcvt.s32.f32 %v13163_v11  ;;  %vm2962_vm4 = vcmp.lt.s32.totalorder %v16574_v46, 0  ;;  %v13398_v38 = vmul.f32 0.5, %v4507_v49  ;;  %v13405_v18 = vsub.s32 32, %v16656_v39 }
 0x3bf   :  { %16653 = vst [vmem:[#allocation157_spill] sm:$0xff] %v13391_v51  ;;  %v3045_v52 = vsel %vm2962_vm4, %v3044_v15, %v3043_v17  ;;  %v13402_v4 = vshrl.u32 %v3227_v53, 30  ;;  %v13407_v26 = vmul.f32 %v5624_v48, %v4570_v27  ;;  %v3046_v36 = vsub.s32 4, %v13070_v58 }
 0x3c0   :  { %v13395_v12 = vsub.f32 %v16654_v47, %v614_v50  ;;  %16655 = vst [vmem:[#allocation40_spill] sm:$0xff] %v13398_v38  ;;  %v613_v11 = vmul.f32 16.0, %v13386_v45  ;;  %v2941_v32 = vxor.u32 2147483648, %v2940_v3  ;;  %v13411_v33 = vmul.f32 %v5619_v23, %v4569_v24 }
 0x3c1   :  { %16657 = vst [vmem:[#allocation19_spill] sm:$0xff] %v13407_v26  ;;  %v13414_v20 = vmul.f32 0.125, %v13347_v43  ;;  %v16659_v42 = vand.u32 2147483647, %v16574_v46  ;;  %v3229_v5 = vshll.u32 %v13402_v4, 30  ;;  %vm2859_vm3 = vcmp.lt.s32.totalorder %v16589_v16, 0 }
 0x3c2   :  { %16658 = vst [vmem:[#allocation68_spill] sm:$0xff] %v13411_v33  ;;  %v13424_v10 = vmul.f32 0.125, %v13395_v12  ;;  %v16662_v21 = vand.u32 2147483647, %v16589_v16  ;;  %v16063_v57 = vand.u32 2147483647, %v16665_v56  ;;  %v3081_v50 = vshrl.u32 %v16378_v34, %v13405_v18 }
 0x3c3   :  { %vm13418_vm10 = vcmp.le.f32.partialorder %v16659_v42, 0.7853982  ;;  %v13437_v49 = vsub.s32 %v3226_v1, %v3229_v5  ;;  %v3084_v22 = vshrl.u32 %v16382_v9, %v13405_v18  ;;  %v3047_v15 = vsel %vm2962_vm4, %v3046_v36, %v13070_v58 }
 0x3c4   :  { %v3048_v54 = vsel %vm13418_vm10, %v16574_v46, %v3045_v52  ;;  %vm13431_vm11 = vcmp.le.f32.partialorder %v16662_v21, 0.7853982  ;;  %v16666_v40 = vcvt.s32.f32 %v13197_v29  ;;  %v2942_v28 = vsel %vm2859_vm3, %v2941_v32, %v2940_v3  ;;  %v13467_v3 = vpop.f32.mrb[21].mxu1 }
 0x3c5   :  { %v3087_v1 = vshrl.u32 %v16383_v19, %v13405_v18  ;;  %8606 = vcosq.f32 %v3048_v54  ;;  %v3232_v48 = vsub.s32 0, %v13437_v49  ;;  %v3080_v35 = vshll.u32 %v16381_v7, %v16656_v39  ;;  %16667 = vst [vmem:[#allocation45_spill] sm:$0xff] %v13467_v3 }
 0x3c6   :  { %v13448_v61 = vsub.f32 %v16666_v40, %v613_v11  ;;  %v3083_v27 = vshll.u32 %v16378_v34, %v16656_v39  ;;  %v3070_v58 = vand.u32 8388607, %v16063_v57  ;;  %v3086_v29 = vshll.u32 %v16382_v9, %v16656_v39 }
 0x3c7   :  { %v3089_v13 = vshll.u32 %v16383_v19, %v16656_v39  ;;  %v3090_v23 = vshrl.u32 %v16385_v30, %v13405_v18  ;;  %v2945_v53 = vsel %vm13431_vm11, %v16589_v16, %v2942_v28  ;;  %v7293_v24 = vmin.u32 %v3232_v48, %v13437_v49 }
 0x3c8   :  { %v3082_v47 = vor.u32 %v3081_v50, %v3080_v35  ;;  %v3085_v52 = vor.u32 %v3084_v22, %v3083_v27  ;;  %v3088_v36 = vor.u32 %v3087_v1, %v3086_v29  ;;  %v3092_v32 = vshll.u32 %v16385_v30, %v16656_v39  ;;  %v16668_v50 = vld [vmem:[#allocation94_spill] sm:$0xff] }
 0x3c9   :  { %v3091_v11 = vor.u32 %v3090_v23, %v3089_v13  ;;  %v3093_v42 = vshrl.u32 %v16386_v59, %v13405_v18  ;;  %v3049_v5 = vsel %vm13418_vm10, 0, %v3047_v15  ;;  %8608 = vsinq.f32 %v3048_v54 }
 0x3ca   :  { %v2943_v21 = vsub.s32 4, %v13193_v25  ;;  %v3234_v40 = vclz %v7293_v24  ;;  %8610 = vcosq.f32 %v2945_v53  ;;  %v3071_v28 = vor.u32 8388608, %v3070_v58 }
 0x3cb   :  { %v3094_v48 = vor.u32 %v3093_v42, %v3092_v32  ;;  %vm3098_vm6 = vcmp.lt.s32.totalorder %v16668_v50, 4  ;;  %vm3095_vm8 = vcmp.lt.s32.totalorder %v16668_v50, 1  ;;  %vm3097_vm12 = vcmp.lt.s32.totalorder %v16668_v50, 3 }
 0x3cc   :  { %v7294_v22 = vadd.s32 4294967294, %v3234_v40  ;;  %v3104_v39 = vsel %vm3098_vm6, %v3091_v11, 920167782  ;;  %v3103_v1 = vsel %vm3095_vm8, %v3082_v47, %v3085_v52  ;;  %v3107_v54 = vsel %vm3095_vm8, %v3085_v52, %v3088_v36 }
 0x3cd   :  { %v3105_v17 = vsel %vm3097_vm12, %v3088_v36, %v3104_v39  ;;  %v3108_v15 = vsel %vm3098_vm6, %v3094_v48, 1326507024  ;;  %8612 = vsinq.f32 %v2945_v53  ;;  %vm3096_vm13 = vcmp.lt.s32.totalorder %v16668_v50, 2 }
 0x3ce   :  { %vm7295_vm14 = vcmp.lt.s32.totalorder %v7294_v22, 0  ;;  %v3109_v35 = vsel %vm3097_vm12, %v3091_v11, %v3108_v15  ;;  %v3100_v58 = vsel %vm3098_vm6, %v3088_v36, 2102212464  ;;  %v3111_v13 = vshll.u32 %v3071_v28, 8 }
 0x3cf   :  { %v3237_v27 = vsel %vm7295_vm14, 0, %v7294_v22  ;;  %v3110_v29 = vsel %vm3096_vm13, %v3107_v54, %v3109_v35  ;;  %v8607_v23 = vpop.eup %8606  ;;  %v13495_v24 = vadd.s32 152, %v16417_v0  ;;  %v3079_v53 = vshrl.u32 %v16381_v7, %v13405_v18 }
 0x3d0   :  { %v3242_v32 = vsub.s32 4294967266, %v3237_v27  ;;  %v3106_v42 = vsel %vm3096_vm13, %v3103_v1, %v3105_v17  ;;  %v13502_v40 = vmul.f32 0.125, %v13386_v45  ;;  %v13505_v36 = vmul.f32 0.125, %v13448_v61 }
 0x3d1   :  { %v13507_v11 = vmul.u32.u64.low %v3111_v13, %v3110_v29  ;;  %v13508_v48 = vmul.u32.u64.high %v3111_v13, %v3110_v29, %v13507_v11  ;;  %v3238_v28 = vsub.s32 32, %v3237_v27  ;;  %v3099_v39 = vsel %vm3095_vm8, %v3079_v53, %v3082_v47  ;;  %v16669_v29 = vld [vmem:[#allocation51_spill] sm:$0xff] }
 0x3d2   :  { %v3243_v22 = vadd.s32 127, %v3242_v32  ;;  %v3101_v18 = vsel %vm3097_vm12, %v3085_v52, %v3100_v58  ;;  %v3053_v54 = vand.u32 3, %v3049_v5  ;;  %v2944_v1 = vsel %vm2859_vm3, %v2943_v21, %v13193_v25 }
 0x3d3   :  { %v13517_v17 = vmul.u32.u64.low %v3111_v13, %v3106_v42  ;;  %v13518_v15 = vmul.u32.u64.high %v3111_v13, %v3106_v42, %v13517_v17  ;;  %v8609_v35 = vpop.eup %8608  ;;  %v13523_v11 = vadd.f32 %v13123_v8, %v16669_v29  ;;  %v16064_v32 = vcvt.s32.f32 %v13495_v24 }
 0x3d4   :  { %v3222_v47 = vadd.s32 %v13319_v31, %v13317_v55  ;;  %v3244_v52 = vshll.u32 %v3243_v22, 23  ;;  %v8611_v5 = vpop.eup %8610  ;;  %v710_v58 = vfloor.f32 %v13414_v20  ;;  %v774_v25 = vfloor.f32 %v13424_v10 }
 0x3d5   :  { %16670 = vst [vmem:[#allocation41_spill] sm:$0xff] %v13523_v11  ;;  %v3102_v53 = vsel %vm3096_vm13, %v3099_v39, %v3101_v18  ;;  %v2946_v29 = vsel %vm13431_vm11, 0, %v2944_v1  ;;  %vm3120_vm9 = vc.u32 %v13508_v48, %v13517_v17  ;;  %vm3054_vm7 = vcmp.lt.s32.totalorder %v3053_v54, 2  ;;  %v16671_v1 = vld [vmem:[#allocation97_spill] sm:$0xff] }
 0x3d6   :  { %v3240_v57 = vshrl.u32 %v3222_v47, %v3238_v28  ;;  %v3056_v55 = vxor.u32 2147483648, %v8609_v35  ;;  %v3059_v31 = vxor.u32 2147483648, %v8607_v23  ;;  %v3121_v20 = vadd.s32 1, %v13518_v15 }
 0x3d7   :  { %v8613_v10 = vpop.eup %8612  ;;  %v552_v22 = vmul.f32 0.0625, %v16064_v32  ;;  %v3239_v50 = vshll.u32 %v13437_v49, %v3237_v27  ;;  %v3245_v39 = vor.u32 4788187, %v3244_v52  ;;  %v3118_v18 = vmul.u32 %v3111_v13, %v3102_v53  ;;  %v16672_v53 = vld [vmem:[#allocation78_spill] sm:$0xff] }
 0x3d8   :  { %v2950_v21 = vand.u32 3, %v2946_v29  ;;  %v13543_v6 = vadd.s32 144, %v16417_v0  ;;  %v3122_v28 = vsel %vm3120_vm9, %v3121_v20, %v13518_v15  ;;  %v3387_v47 = vsub.s32 32, %v16671_v1 }
 0x3d9   :  { %vm3055_vm2 = vcmp.eq.s32.totalorder %v3053_v54, 0  ;;  %vm3058_vm5 = vcmp.eq.s32.totalorder %v3053_v54, 2  ;;  %v3241_v42 = vor.u32 %v3240_v57, %v3239_v50  ;;  %v3123_v3 = vadd.s32 %v3122_v28, %v3118_v18 }
 0x3da   :  { %vm3052_vm15 = vweird.f32 %v16574_v46  ;;  %v3057_v14 = vsel %vm3055_vm2, %v8607_v23, %v3056_v55  ;;  %v3060_v32 = vsel %vm3058_vm5, %v3059_v31, %v8609_v35  ;;  %v2953_v11 = vxor.u32 2147483648, %v8613_v10 }
 0x3db   :  { %v2956_v49 = vxor.u32 2147483648, %v8611_v5  ;;  %v13548_v27 = vfloor.f32 %v552_v22  ;;  %v3246_v13 = vand.u32 2147483647, %v3245_v39  ;;  %v3124_v52 = vadd.s32 536870912, %v3123_v3 }
 0x3dc   :  { %v16065_v29 = vand.u32 2147483647, %v16672_v53  ;;  %vm2952_vm0 = vcmp.eq.s32.totalorder %v2950_v21, 0  ;;  %vm2955_vm1 = vcmp.eq.s32.totalorder %v2950_v21, 2  ;;  %v16066_v15 = vcvt.s32.f32 %v13543_v6 }
 0x3dd   :  { %v3390_v20 = vshrl.u32 %v16378_v34, %v3387_v47  ;;  %v3061_v57 = vsel %vm3054_vm7, %v3057_v14, %v3060_v32  ;;  %v3248_v50 = vcvt.s32.f32 %v3241_v42  ;;  %v13554_v18 = vshrl.u32 %v3124_v52, 30 }
 0x3de   :  { %v3393_v23 = vshrl.u32 %v16382_v9, %v3387_v47  ;;  %v2954_v35 = vsel %vm2952_vm0, %v8611_v5, %v2953_v11  ;;  %v2957_v55 = vsel %vm2955_vm1, %v2956_v49, %v8613_v10  ;;  %v3389_v31 = vshll.u32 %v16381_v7, %v16671_v1 }
 0x3df   :  { %v3396_v22 = vshrl.u32 %v16383_v19, %v3387_v47  ;;  %v13560_v39 = vmul.f32 %v3248_v50, %v3246_v13  ;;  %v3126_v28 = vshll.u32 %v13554_v18, 30  ;;  %v3379_v54 = vand.u32 8388607, %v16065_v29 }
 0x3e0   :  { %v3392_v14 = vshll.u32 %v16378_v34, %v16671_v1  ;;  %vm13567_vm4 = vcmp.eq.f32.partialorder %v710_v58, %v774_v25  ;;  %vm838_vm10 = vcmp.ne.f32.partialorder %v13347_v43, %v13395_v12  ;;  %v3391_v11 = vor.u32 %v3390_v20, %v3389_v31  ;;  %v16675_v31 = vld [vmem:[#allocation28_spill] sm:$0xff] }
 0x3e1   :  { %v3395_v5 = vshll.u32 %v16382_v9, %v16671_v1  ;;  %v3398_v42 = vshll.u32 %v16383_v19, %v16671_v1  ;;  %v3399_v10 = vshrl.u32 %v16385_v30, %v3387_v47  ;;  %v13578_v49 = vsub.s32 %v3123_v3, %v3126_v28  ;;  %vm13626_vm2 = vmand %vm13567_vm4, %vm838_vm10 }
 0x3e2   :  { %v3394_v13 = vor.u32 %v3393_v23, %v3392_v14  ;;  %v3401_v58 = vshll.u32 %v16385_v30, %v16671_v1  ;;  %v3402_v25 = vshrl.u32 %v16386_v59, %v3387_v47  ;;  %vm2951_vm11 = vcmp.lt.s32.totalorder %v2950_v21, 2 }
 0x3e3   :  { %v551_v52 = vmul.f32 0.0625, %v16066_v15  ;;  %v3397_v20 = vor.u32 %v3396_v22, %v3395_v5  ;;  %v3400_v50 = vor.u32 %v3399_v10, %v3398_v42  ;;  %vm870_vm3 = vcmp.le.f32.partialorder %v16675_v31, 4.0 }
 0x3e4   :  { %v3062_v29 = vsel %vm3052_vm15, nan, %v3061_v57  ;;  %v3129_v3 = vsub.s32 0, %v13578_v49  ;;  %v3380_v28 = vor.u32 8388608, %v3379_v54  ;;  %v3403_v23 = vor.u32 %v3402_v25, %v3401_v58  ;;  %v16680_v57 = vld [vmem:[#allocation96_spill] sm:$0xff]  ;;  %v16681_v58 = vld [vmem:[#allocation29_spill] sm:$0xff]  ;;  %vm934_vm4 = vmand %vm13626_vm2, %vm870_vm3 }
 0x3e5   :  { %v16676_v14 = vfloor.f32 %v13505_v36  ;;  %v16677_v1 = vfloor.f32 %v13502_v40  ;;  %vm837_vm8 = vcmp.ne.f32.partialorder %v13386_v45, %v13448_v61  ;;  %v2958_v22 = vsel %vm2951_vm11, %v2954_v35, %v2957_v55 }
 0x3e6   :  { %v3250_v5 = vxor.u32 2147483648, %v13560_v39  ;;  %v3388_v46 = vshrl.u32 %v16381_v7, %v3387_v47  ;;  %vm3404_vm12 = vcmp.lt.s32.totalorder %v16680_v57, 1  ;;  %v7289_v54 = vmin.u32 %v3129_v3, %v13578_v49 }
 0x3e7   :  { %vm13593_vm6 = vcmp.eq.f32.partialorder %v16677_v1, %v16676_v14  ;;  %vm3405_vm14 = vcmp.lt.s32.totalorder %v16680_v57, 2  ;;  %vm3407_vm13 = vcmp.lt.s32.totalorder %v16680_v57, 4  ;;  %v3412_v40 = vsel %vm3404_vm12, %v3391_v11, %v3394_v13  ;;  %v13607_v14 = vpop.f32.mrb[22].mxu1 }
 0x3e8   :  { %vm3406_vm9 = vcmp.lt.s32.totalorder %v16680_v57, 3  ;;  %v3409_v36 = vsel %vm3407_vm13, %v3397_v20, 2102212464  ;;  %v3413_v42 = vsel %vm3407_vm13, %v3400_v50, 920167782  ;;  %v3416_v10 = vsel %vm3404_vm12, %v3394_v13, %v3397_v20  ;;  %16682 = vst [vmem:[#allocation66_spill] sm:$0xff] %v13607_v14  ;;  %vm901_vm11 = vmand %vm13593_vm6, %vm837_vm8 }
 0x3e9   :  { %vm869_vm7 = vcmp.le.f32.partialorder %v16681_v58, 4.0  ;;  %v3131_v35 = vclz %v7289_v54  ;;  %v3414_v55 = vsel %vm3406_vm9, %v3397_v20, %v3413_v42  ;;  %v3417_v25 = vsel %vm3407_vm13, %v3403_v23, 1326507024  ;;  %v16689_v42 = vld [vmem:[#allocation158_spill] sm:$0xff] }
 0x3ea   :  { %v3420_v47 = vshll.u32 %v3380_v28, 8  ;;  %v3408_v1 = vsel %vm3404_vm12, %v3388_v46, %v3391_v11  ;;  %v3410_v3 = vsel %vm3406_vm9, %v3394_v13, %v3409_v36  ;;  %v3415_v15 = vsel %vm3405_vm14, %v3412_v40, %v3414_v55  ;;  %vm933_vm3 = vmand %vm901_vm11, %vm869_vm7 }
 0x3eb   :  { %v3418_v53 = vsel %vm3406_vm9, %v3400_v50, %v3417_v25  ;;  %v7290_v41 = vadd.s32 4294967294, %v3131_v35  ;;  %v4522_v54 = vadd.f32 1.0, %v3062_v29  ;;  %v616_v20 = vmul.f32 16.0, %v13548_v27 }
 0x3ec   :  { %v3419_v38 = vsel %vm3405_vm14, %v3416_v10, %v3418_v53  ;;  %v13613_v44 = vmul.u32.u64.low %v3420_v47, %v3415_v15  ;;  %v13614_v51 = vmul.u32.u64.high %v3420_v47, %v3415_v15, %v13613_v44  ;;  %vm2949_vm5 = vweird.f32 %v16589_v16 }
 0x3ed   :  { %v13618_v28 = vmul.u32.u64.low %v3420_v47, %v3419_v38  ;;  %v13619_v23 = vmul.u32.u64.high %v3420_v47, %v3419_v38, %v13618_v28  ;;  %v16685_v53 = vand.u32 2147483647, %v16604_v2  ;;  %v13637_v15 = vfloor.f32 %v551_v52 }
 0x3ee   :  { %vm7291_vm0 = vcmp.lt.s32.totalorder %v7290_v41, 0  ;;  %v2959_v38 = vsel %vm2949_vm5, nan, %v2958_v22  ;;  %vm3168_vm1 = vcmp.lt.s32.totalorder %v16604_v2, 0  ;;  %v3411_v12 = vsel %vm3405_vm14, %v3408_v1, %v3410_v3 }
 0x3ef   :  { %vm13633_vm15 = vcmp.le.f32.partialorder %v16685_v53, 0.7853982  ;;  %v3134_v43 = vsel %vm7291_vm0, 0, %v7290_v41  ;;  %v3251_v16 = vsel %vm3168_vm1, %v3250_v5, %v13560_v39  ;;  %v3119_v32 = vadd.s32 %v13517_v17, %v13508_v48 }
 0x3f0   :  { %v3135_v13 = vsub.s32 32, %v3134_v43  ;;  %v3139_v50 = vsub.s32 4294967266, %v3134_v43  ;;  %v4554_v52 = vmul.f32 0.5, %v4522_v54  ;;  %v16688_v41 = vcvt.s32.f32 %v13495_v24 }
 0x3f1   :  { %vm3429_vm10 = vc.u32 %v13619_v23, %v13613_v44  ;;  %v3430_v39 = vadd.s32 1, %v13614_v51  ;;  %v615_v48 = vmul.f32 16.0, %v13637_v15  ;;  %v3427_v5 = vmul.u32 %v3420_v47, %v3411_v12 }
 0x3f2   :  { %v13653_v22 = vsub.f32 %v16688_v41, %v616_v20  ;;  %v3137_v17 = vshrl.u32 %v3119_v32, %v3135_v13  ;;  %v3140_v31 = vadd.s32 127, %v3139_v50  ;;  %v4521_v46 = vadd.f32 1.0, %v2959_v38  ;;  %v16691_v38 = vld [vmem:[#allocation100_spill] sm:$0xff] }
 0x3f3   :  { %v3252_v24 = vsub.s32 4, %v13402_v4  ;;  %v3254_v57 = vsel %vm13633_vm15, %v16604_v2, %v3251_v16  ;;  %v3431_v40 = vsel %vm3429_vm10, %v3430_v39, %v13614_v51  ;;  %v7201_v36 = vsel %vm934_vm4, 1.0, %v16442_v37 }
 0x3f4   :  { %v3136_v45 = vshll.u32 %v13578_v49, %v3134_v43  ;;  %v3141_v61 = vshll.u32 %v3140_v31, 23  ;;  %v3432_v21 = vadd.s32 %v3431_v40, %v3427_v5  ;;  %v5704_v10 = vadd.f32 %v13123_v8, %v16689_v42 }
 0x3f5   :  { %v680_v35 = vmul.f32 0.125, %v13548_v27  ;;  %v744_v55 = vmul.f32 0.125, %v13653_v22  ;;  %v13678_v25 = vmul.f32 0.125, %v13637_v15  ;;  %8614 = vcosq.f32 %v3254_v57 }
 0x3f6   :  { %v3138_v51 = vor.u32 %v3137_v17, %v3136_v45  ;;  %v3142_v47 = vor.u32 4788187, %v3141_v61  ;;  %v3433_v1 = vadd.s32 536870912, %v3432_v21  ;;  %v4586_v49 = vmul.f32 %v7201_v36, %v4554_v52 }
 0x3f7   :  { %v4553_v3 = vmul.f32 0.5, %v4521_v46  ;;  %v3253_v54 = vsel %vm3168_vm1, %v3252_v24, %v13402_v4  ;;  %v16690_v58 = vcvt.s32.f32 %v13543_v6  ;;  %v7200_v28 = vsel %vm933_vm3, 1.0, %v16442_v37 }
 0x3f8   :  { %v3143_v11 = vand.u32 2147483647, %v3142_v47  ;;  %v13688_v53 = vshrl.u32 %v3433_v1, 30  ;;  %v3284_v43 = vsub.s32 32, %v16691_v38  ;;  %v13691_v12 = vmul.f32 %v5704_v10, %v4586_v49 }
 0x3f9   :  { %v13685_v20 = vsub.f32 %v16690_v58, %v615_v48  ;;  %v5699_v16 = vadd.f32 %v13123_v8, %v12829_v60  ;;  %v712_v32 = vfloor.f32 %v680_v35  ;;  %v776_v13 = vfloor.f32 %v744_v55  ;;  %v16693_v48 = vld [vmem:[#allocation79_spill] sm:$0xff] }
 0x3fa   :  { %16692 = vst [vmem:[#allocation71_spill] sm:$0xff] %v13691_v12  ;;  %v3255_v4 = vsel %vm13633_vm15, 0, %v3253_v54  ;;  %v3145_v50 = vcvt.s32.f32 %v3138_v51  ;;  %v3435_v52 = vshll.u32 %v13688_v53, 30  ;;  %v4585_v41 = vmul.f32 %v7200_v28, %v4553_v3  ;;  %v13739_v28 = vpop.f32.mrb[23].mxu1 }
 0x3fb   :  { %8616 = vsinq.f32 %v3254_v57  ;;  %v13700_v39 = vmul.f32 0.125, %v13685_v20  ;;  %vm3065_vm6 = vcmp.lt.s32.totalorder %v16665_v56, 0  ;;  %v16068_v17 = vand.u32 2147483647, %v16693_v48  ;;  %16698 = vst [vmem:[#allocation20_spill] sm:$0xff] %v13739_v28 }
 0x3fc   :  { %v3146_v60 = vmul.f32 %v3145_v50, %v3143_v11  ;;  %v13704_v31 = vsub.s32 %v3432_v21, %v3435_v52  ;;  %v3287_v29 = vshrl.u32 %v16378_v34, %v3284_v43  ;;  %v3290_v5 = vshrl.u32 %v16382_v9, %v3284_v43 }
 0x3fd   :  { %v13710_v46 = vmul.f32 %v16507_v63, %v13691_v12  ;;  %v13712_v24 = vand.u32 3, %v3255_v4  ;;  %v13715_v57 = vadd.s32 168, %v16417_v0  ;;  %v3293_v40 = vshrl.u32 %v16383_v19, %v3284_v43 }
 0x3fe   :  { %v13718_v36 = vmul.f32 %v5699_v16, %v4585_v41  ;;  %v16695_v45 = vand.u32 2147483647, %v16665_v56  ;;  %v3438_v21 = vsub.s32 0, %v13704_v31  ;;  %v3286_v42 = vshll.u32 %v16381_v7, %v16691_v38 }
 0x3ff   :  { %v3289_v10 = vshll.u32 %v16378_v34, %v16691_v38  ;;  %v3276_v35 = vand.u32 8388607, %v16068_v17  ;;  %v3292_v55 = vshll.u32 %v16382_v9, %v16691_v38  ;;  %v3295_v51 = vshll.u32 %v16383_v19, %v16691_v38  ;;  %v8615_v1 = vpop.eup %8614 }
 0x400   :  { %16694 = vst [vmem:[#allocation47_spill] sm:$0xff] %v13718_v36  ;;  %vm13722_vm8 = vcmp.le.f32.partialorder %v16695_v45, 0.7853982  ;;  %v3296_v47 = vshrl.u32 %v16385_v30, %v3284_v43  ;;  %v3147_v49 = vxor.u32 2147483648, %v3146_v60  ;;  %v7301_v3 = vmin.u32 %v3438_v21, %v13704_v31  ;;  %v16701_v21 = vld [vmem:[#allocation98_spill] sm:$0xff] }
 0x401   :  { %v3288_v54 = vor.u32 %v3287_v29, %v3286_v42  ;;  %v3291_v58 = vor.u32 %v3290_v5, %v3289_v10  ;;  %v775_v11 = vfloor.f32 %v13700_v39  ;;  %v3294_v4 = vor.u32 %v3293_v40, %v3292_v55 }
 0x402   :  { %v3297_v50 = vor.u32 %v3296_v47, %v3295_v51  ;;  %v5929_v52 = vmul.f32 %v16511_v62, %v13718_v36  ;;  %v3440_v41 = vclz %v7301_v3  ;;  %v3298_v45 = vshll.u32 %v16385_v30, %v16691_v38 }
 0x403   :  { %v3299_v17 = vshrl.u32 %v16386_v59, %v3284_v43  ;;  %vm13748_vm12 = vcmp.eq.f32.partialorder %v712_v32, %v776_v13  ;;  %vm840_vm14 = vcmp.ne.f32.partialorder %v13548_v27, %v13653_v22  ;;  %vm3261_vm13 = vcmp.eq.s32.totalorder %v13712_v24, 0  ;;  %v16710_v27 = vld [vmem:[#allocation30_spill] sm:$0xff] }
 0x404   :  { %vm3264_vm9 = vcmp.eq.s32.totalorder %v13712_v24, 2  ;;  %v3265_v39 = vxor.u32 2147483648, %v8615_v1  ;;  %v3277_v5 = vor.u32 8388608, %v3276_v35  ;;  %v3285_v40 = vshrl.u32 %v16381_v7, %v3284_v43  ;;  %vm13818_vm3 = vmand %vm13748_vm12, %vm840_vm14 }
 0x405   :  { %vm3301_vm7 = vcmp.lt.s32.totalorder %v16701_v21, 1  ;;  %v3148_v38 = vsel %vm3065_vm6, %v3147_v49, %v3146_v60  ;;  %v3300_v32 = vor.u32 %v3299_v17, %v3298_v45  ;;  %vm3304_vm2 = vcmp.lt.s32.totalorder %v16701_v21, 4  ;;  %v8617_v42 = vpop.eup %8616 }
 0x406   :  { %v3309_v13 = vsel %vm3301_vm7, %v3288_v54, %v3291_v58  ;;  %vm3303_vm5 = vcmp.lt.s32.totalorder %v16701_v21, 3  ;;  %v3306_v10 = vsel %vm3304_vm2, %v3294_v4, 2102212464  ;;  %v3310_v55 = vsel %vm3304_vm2, %v3297_v50, 920167782 }
 0x407   :  { %v3313_v35 = vsel %vm3301_vm7, %v3291_v58, %v3294_v4  ;;  %v7302_v43 = vadd.s32 4294967294, %v3440_v41  ;;  %vm3302_vm15 = vcmp.lt.s32.totalorder %v16701_v21, 2  ;;  %v3311_v51 = vsel %vm3303_vm5, %v3294_v4, %v3310_v55 }
 0x408   :  { %v3314_v47 = vsel %vm3304_vm2, %v3300_v32, 1326507024  ;;  %v3151_v17 = vsel %vm13722_vm8, %v16665_v56, %v3148_v38  ;;  %v3312_v60 = vsel %vm3302_vm15, %v3309_v13, %v3311_v51  ;;  %v3317_v3 = vshll.u32 %v3277_v5, 8  ;;  %v13878_v51 = vld [vmem:[%s15762_s2 + $0x58] ss:$0 sm:$0xff] }
 0x409   :  { %v3315_v49 = vsel %vm3303_vm5, %v3297_v50, %v3314_v47  ;;  %v3262_v45 = vxor.u32 2147483648, %v8617_v42  ;;  %v3305_v6 = vsel %vm3301_vm7, %v3285_v40, %v3288_v54  ;;  %v3307_v16 = vsel %vm3303_vm5, %v3291_v58, %v3306_v10 }
 0x40a   :  { %v3316_v41 = vsel %vm3302_vm15, %v3313_v35, %v3315_v49  ;;  %v13779_v32 = vmul.u32.u64.low %v3317_v3, %v3312_v60  ;;  %v13780_v55 = vmul.u32.u64.high %v3317_v3, %v3312_v60, %v13779_v32  ;;  %v3149_v38 = vsub.s32 4, %v13554_v18  ;;  %v16715_v49 = vld [vmem:[#allocation157_spill] sm:$0xff] }
 0x40b   :  { %v13776_v36 = vmul.u32.u64.low %v3317_v3, %v3316_v41  ;;  %v13777_v4 = vmul.u32.u64.high %v3317_v3, %v3316_v41, %v13776_v36  ;;  %8618 = vcosq.f32 %v3151_v17  ;;  %v16702_v50 = vcvt.s32.f32 %v13715_v57 }
 0x40c   :  { %vm7303_vm0 = vcmp.lt.s32.totalorder %v7302_v43, 0  ;;  %v3308_v54 = vsel %vm3302_vm15, %v3305_v6, %v3307_v16  ;;  %v7938_v58 = vpack.c.bf16 %v13710_v46, %v5929_v52  ;;  %v5913_v40 = vmul.f32 %v16511_v62, %v13411_v33 }
 0x40d   :  { %v554_v5 = vmul.f32 0.0625, %v16702_v50  ;;  %v5914_v36 = vmul.f32 %v16507_v63, %v13407_v26  ;;  %v3263_v13 = vsel %vm3261_vm13, %v8615_v1, %v3262_v45  ;;  %v3266_v10 = vsel %vm3264_vm9, %v3265_v39, %v8617_v42  ;;  %v16706_v1 = vld [vmem:[#allocation38_spill] sm:$0xff] }
 0x40e   :  { %v16703_v35 = vfloor.f32 %v13678_v25  ;;  %vm839_vm4 = vcmp.ne.f32.partialorder %v13637_v15, %v13685_v20  ;;  %8620 = vsinq.f32 %v3151_v17  ;;  %v13805_v6 = vsel %vm7303_vm0, 0, %v7302_v43  ;;  %7939 = vmatprep.subr.bf16.mxu1 %v7938_v58  ;;  %v16707_v25 = vld [vmem:[#allocation32_spill] sm:$0xff]  ;;  %v16718_v20 = vld [vmem:[#allocation18_spill] sm:$0xff] }
 0x40f   :  { %vm3326_vm10 = vc.u32 %v13777_v4, %v13779_v32  ;;  %v3327_v46 = vadd.s32 1, %v13780_v55  ;;  %v5629_v16 = vadd.f32 %v13123_v8, %v16706_v1  ;;  %vm872_vm11 = vcmp.le.f32.partialorder %v16707_v25, 4.0  ;;  %v16714_v17 = vld [vmem:[#allocation128_spill] sm:$0xff] }
 0x410   :  { %vm13799_vm1 = vcmp.eq.f32.partialorder %v16703_v35, %v775_v11  ;;  %v3324_v52 = vmul.u32 %v3317_v3, %v3308_v54  ;;  %v7940_v39 = vpack.c.bf16 %v5914_v36, %v5913_v40  ;;  %vm3260_vm13 = vcmp.lt.s32.totalorder %v13712_v24, 2  ;;  %v16716_v3 = vld [vmem:[#allocation64_spill] sm:$0xff]  ;;  %v16723_v11 = vld [vmem:[#allocation103_spill] sm:$0xff] }
 0x411   :  { %v3150_v21 = vsel %vm3065_vm6, %v3149_v38, %v13554_v18  ;;  %v13826_v8 = vfloor.f32 %v554_v5  ;;  %v3328_v42 = vsel %vm3326_vm10, %v3327_v46, %v13780_v55  ;;  %v3267_v43 = vsel %vm3260_vm13, %v3263_v13, %v3266_v10  ;;  %vm13835_vm12 = vmand %vm13799_vm1, %vm839_vm4  ;;  %v16713_v18 = vld [vmem:[#allocation127_spill] sm:$0xff]  ;;  %v16717_v15 = vld [vmem:[#allocation40_spill] sm:$0xff] }
 0x412   :  { %vm871_vm9 = vcmp.le.f32.partialorder %v16710_v27, 4.0  ;;  %v3448_v24 = vsub.s32 4294967266, %v13805_v6  ;;  %v3329_v29 = vadd.s32 %v3328_v42, %v3324_v52  ;;  %7941 = vmatpush3.bf16.msra.mxu1 %v7940_v39  ;;  %v13841_v47 = vadd.s32 1, %v16713_v18  ;;  %vm936_vm6 = vmand %vm13818_vm3, %vm872_vm11  ;;  %v16719_v5 = vld [vmem:[#allocation41_spill] sm:$0xff]  ;;  %v16722_v46 = vld [vmem:[#allocation143_spill] sm:$0xff] }
 0x413   :  { %v13844_v60 = vadd.s32 4294967169, %v16714_v17  ;;  %v4572_v45 = vmul.f32 %v16716_v3, %v16715_v49  ;;  %v4571_v41 = vmul.f32 %v16718_v20, %v16717_v15  ;;  %vm3258_vm14 = vweird.f32 %v16604_v2  ;;  %vm935_vm7 = vmand %vm13835_vm12, %vm871_vm9  ;;  %v16724_v27 = vld [vmem:[#allocation14_spill] sm:$0xff]  ;;  %v16726_v15 = vld [vmem:[#allocation81_spill] sm:$0xff] }
 0x414   :  { %v3152_v55 = vsel %vm13722_vm8, 0, %v3150_v21  ;;  %v3444_v38 = vsub.s32 32, %v13805_v6  ;;  %v3330_v50 = vadd.s32 536870912, %v3329_v29  ;;  %v3268_v40 = vsel %vm3258_vm14, nan, %v3267_v43 }
 0x415   :  { %v13859_v54 = vmul.f32 %v16719_v5, %v4572_v45  ;;  %v13861_v58 = vmul.f32 %v5629_v16, %v4571_v41  ;;  %v618_v36 = vmul.f32 16.0, %v13826_v8  ;;  %v8619_v2 = vpop.eup %8618  ;;  %v13869_v61 = vsel %vm936_vm6, 1.0, %v16442_v37 }
 0x416   :  { %v3428_v13 = vadd.s32 %v13613_v44, %v13619_v23  ;;  %v3449_v10 = vadd.s32 127, %v3448_v24  ;;  %v13873_v35 = vshrl.u32 %v3330_v50, 30  ;;  %v13882_v1 = vadd.f32 %v13878_v51, %v16722_v46 }
 0x417   :  { %16720 = vst [vmem:[#allocation69_spill] sm:$0xff] %v13859_v54  ;;  %16721 = vst [vmem:[#allocation73_spill] sm:$0xff] %v13861_v58  ;;  %v13884_v16 = vand.u32 3, %v3152_v55  ;;  %v13887_v25 = vadd.s32 160, %v16417_v0  ;;  %v13890_v52 = vsub.s32 32, %v16723_v11  ;;  %v4524_v44 = vadd.f32 1.0, %v3268_v40 }
 0x418   :  { %v13893_v23 = vsel %vm935_vm7, 1.0, %v16442_v37  ;;  %v3446_v39 = vshrl.u32 %v3428_v13, %v3444_v38  ;;  %v3332_v21 = vshll.u32 %v13873_v35, 30  ;;  %v8621_v42 = vpop.eup %8620  ;;  %v3162_v43 = vxor.u32 2147483648, %v8619_v2 }
 0x419   :  { %v13898_v22 = vadd.f32 %v13878_v51, %v16724_v27  ;;  %v16725_v24 = vcvt.s32.f32 %v13715_v57  ;;  %v13905_v17 = vmul.f32 0.125, %v13826_v8  ;;  %v3445_v49 = vshll.u32 %v13704_v31, %v13805_v6 }
 0x41a   :  { %v3450_v3 = vshll.u32 %v3449_v10, 23  ;;  %v13909_v45 = vsub.s32 %v3329_v29, %v3332_v21  ;;  %v16070_v20 = vand.u32 2147483647, %v16726_v15  ;;  %vm3158_vm8 = vcmp.eq.s32.totalorder %v13884_v16, 0 }
 0x41b   :  { %v13902_v18 = vsub.f32 %v16725_v24, %v618_v36  ;;  %vm3161_vm2 = vcmp.eq.s32.totalorder %v13884_v16, 2  ;;  %v3599_v57 = vshrl.u32 %v16382_v9, %v13890_v52  ;;  %v13917_v55 = vmul.f32 0.5, %v4524_v44 }
 0x41c   :  { %v3159_v38 = vxor.u32 2147483648, %v8621_v42  ;;  %v3447_v50 = vor.u32 %v3446_v39, %v3445_v49  ;;  %v3335_v31 = vsub.s32 0, %v13909_v45  ;;  %vm3157_vm5 = vcmp.lt.s32.totalorder %v13884_v16, 2 }
 0x41d   :  { %v3163_v6 = vsel %vm3161_vm2, %v3162_v43, %v8621_v42  ;;  %v3596_v29 = vshrl.u32 %v16378_v34, %v13890_v52  ;;  %v3598_v5 = vshll.u32 %v16378_v34, %v16723_v11  ;;  %v3602_v40 = vshrl.u32 %v16383_v19, %v13890_v52 }
 0x41e   :  { %v3451_v36 = vor.u32 4788187, %v3450_v3  ;;  %v7297_v13 = vmin.u32 %v3335_v31, %v13909_v45  ;;  %v3585_v10 = vand.u32 8388607, %v16070_v20  ;;  %v3601_v46 = vshll.u32 %v16382_v9, %v16723_v11  ;;  %v13943_v3 = vpop.f32.mrb[24].mxu1 }
 0x41f   :  { %v3595_v44 = vshll.u32 %v16381_v7, %v16723_v11  ;;  %v3600_v39 = vor.u32 %v3599_v57, %v3598_v5  ;;  %v3604_v21 = vshll.u32 %v16383_v19, %v16723_v11  ;;  %v3605_v42 = vshrl.u32 %v16385_v30, %v13890_v52  ;;  %16727 = vst [vmem:[#allocation48_spill] sm:$0xff] %v13943_v3 }
 0x420   :  { %vm3155_vm15 = vweird.f32 %v16665_v56  ;;  %v3337_v43 = vclz %v7297_v13  ;;  %v3603_v27 = vor.u32 %v3602_v40, %v3601_v46  ;;  %v3607_v24 = vshll.u32 %v16385_v30, %v16723_v11  ;;  %v16728_v40 = vld [vmem:[#allocation101_spill] sm:$0xff] }
 0x421   :  { %v3608_v49 = vshrl.u32 %v16386_v59, %v13890_v52  ;;  %v3160_v57 = vsel %vm3158_vm8, %v8619_v2, %v3159_v38  ;;  %v3325_v31 = vadd.s32 %v13779_v32, %v13777_v4  ;;  %v3597_v5 = vor.u32 %v3596_v29, %v3595_v44 }
 0x422   :  { %v3606_v20 = vor.u32 %v3605_v42, %v3604_v21  ;;  %v3454_v41 = vcvt.s32.f32 %v3447_v50  ;;  %v7298_v33 = vadd.s32 4294967294, %v3337_v43  ;;  %vm3613_vm0 = vcmp.lt.s32.totalorder %v16728_v40, 4 }
 0x423   :  { %v3609_v13 = vor.u32 %v3608_v49, %v3607_v24  ;;  %v3452_v46 = vand.u32 2147483647, %v3451_v36  ;;  %v3586_v11 = vor.u32 8388608, %v3585_v10  ;;  %vm3610_vm1 = vcmp.lt.s32.totalorder %v16728_v40, 1 }
 0x424   :  { %v3619_v26 = vsel %vm3613_vm0, %v3606_v20, 920167782  ;;  %vm7299_vm4 = vcmp.lt.s32.totalorder %v7298_v33, 0  ;;  %vm3612_vm10 = vcmp.lt.s32.totalorder %v16728_v40, 3  ;;  %v3622_v4 = vsel %vm3610_vm1, %v3600_v39, %v3603_v27 }
 0x425   :  { %v3623_v32 = vsel %vm3613_vm0, %v3609_v13, 1326507024  ;;  %v3340_v2 = vsel %vm7299_vm4, 0, %v7298_v33  ;;  %v3618_v38 = vsel %vm3610_vm1, %v3597_v5, %v3600_v39  ;;  %v3620_v50 = vsel %vm3612_vm10, %v3603_v27, %v3619_v26 }
 0x426   :  { %v3624_v29 = vsel %vm3612_vm10, %v3606_v20, %v3623_v32  ;;  %v3164_v36 = vsel %vm3157_vm5, %v3160_v57, %v3163_v6  ;;  %v3341_v10 = vsub.s32 32, %v3340_v2  ;;  %v3345_v44 = vsub.s32 4294967266, %v3340_v2 }
 0x427   :  { %vm3611_vm11 = vcmp.lt.s32.totalorder %v16728_v40, 2  ;;  %v3455_v21 = vmul.f32 %v3454_v41, %v3452_v46  ;;  %v3615_v33 = vsel %vm3613_vm0, %v3603_v27, 2102212464  ;;  %v3626_v43 = vshll.u32 %v3586_v11, 8 }
 0x428   :  { %v3625_v42 = vsel %vm3611_vm11, %v3622_v4, %v3624_v29  ;;  %v3343_v24 = vshrl.u32 %v3325_v31, %v3341_v10  ;;  %v3346_v26 = vadd.s32 127, %v3345_v44  ;;  %v3594_v20 = vshrl.u32 %v16381_v7, %v13890_v52 }
 0x429   :  { %v3621_v16 = vsel %vm3611_vm11, %v3618_v38, %v3620_v50  ;;  %v3165_v6 = vsel %vm3155_vm15, nan, %v3164_v36  ;;  %v746_v41 = vmul.f32 0.125, %v13902_v18  ;;  %v3342_v27 = vshll.u32 %v13909_v45, %v3340_v2  ;;  %v16730_v50 = vld [vmem:[#allocation78_spill] sm:$0xff] }
 0x42a   :  { %v13978_v49 = vmul.u32.u64.low %v3626_v43, %v3625_v42  ;;  %v13979_v57 = vmul.u32.u64.high %v3626_v43, %v3625_v42, %v13978_v49  ;;  %v3347_v13 = vshll.u32 %v3346_v26, 23  ;;  %v3614_v31 = vsel %vm3610_vm1, %v3594_v20, %v3597_v5 }
 0x42b   :  { %v3616_v52 = vsel %vm3612_vm10, %v3600_v39, %v3615_v33  ;;  %v3456_v46 = vxor.u32 2147483648, %v3455_v21  ;;  %v16729_v11 = vcvt.s32.f32 %v13887_v25  ;;  %v4588_v38 = vmul.f32 %v13869_v61, %v13917_v55 }
 0x42c   :  { %v13988_v56 = vmul.u32.u64.low %v3626_v43, %v3621_v16  ;;  %v13989_v32 = vmul.u32.u64.high %v3626_v43, %v3621_v16, %v13988_v56  ;;  %vm3374_vm3 = vcmp.lt.s32.totalorder %v16730_v50, 0  ;;  %v3344_v45 = vor.u32 %v3343_v24, %v3342_v27  ;;  %v16735_v16 = vld [vmem:[#allocation105_spill] sm:$0xff] }
 0x42d   :  { %v553_v4 = vmul.f32 0.0625, %v16729_v11  ;;  %v3348_v2 = vor.u32 4788187, %v3347_v13  ;;  %v4523_v29 = vadd.f32 1.0, %v3165_v6  ;;  %v3458_v5 = vsub.s32 4, %v13688_v53 }
 0x42e   :  { %v13997_v39 = vadd.s32 184, %v16417_v0  ;;  %v3617_v36 = vsel %vm3611_vm11, %v3614_v31, %v3616_v52  ;;  %v714_v10 = vfloor.f32 %v13905_v17  ;;  %v778_v44 = vfloor.f32 %v746_v41 }
 0x42f   :  { %v3349_v33 = vand.u32 2147483647, %v3348_v2  ;;  %vm3635_vm13 = vc.u32 %v13979_v57, %v13988_v56  ;;  %v14005_v61 = vmul.f32 %v13882_v1, %v4588_v38  ;;  %v3457_v55 = vsel %vm3374_vm3, %v3456_v46, %v3455_v21  ;;  %v16738_v46 = vld [vmem:[#allocation82_spill] sm:$0xff] }
 0x430   :  { %v14009_v42 = vfloor.f32 %v553_v4  ;;  %v3636_v24 = vadd.s32 1, %v13989_v32  ;;  %v16732_v40 = vand.u32 2147483647, %v16730_v50  ;;  %v3351_v17 = vcvt.s32.f32 %v3344_v45 }
 0x431   :  { %16731 = vst [vmem:[#allocation72_spill] sm:$0xff] %v14005_v61  ;;  %v3633_v20 = vmul.u32 %v3626_v43, %v3617_v36  ;;  %v3490_v6 = vsub.s32 32, %v16735_v16  ;;  %v4555_v41 = vmul.f32 0.5, %v4523_v29  ;;  %v14022_v1 = vsel %vm3374_vm3, %v3458_v5, %v13688_v53  ;;  %v16742_v36 = vld [vmem:[#allocation33_spill] sm:$0xff] }
 0x432   :  { %vm14014_vm9 = vcmp.le.f32.partialorder %v16732_v40, 0.7853982  ;;  %v16073_v21 = vcvt.s32.f32 %v13997_v39  ;;  %v3637_v49 = vsel %vm3635_vm13, %v3636_v24, %v13989_v32  ;;  %vm14026_vm12 = vcmp.eq.f32.partialorder %v714_v10, %v778_v44 }
 0x433   :  { %vm842_vm6 = vcmp.ne.f32.partialorder %v13826_v8, %v13902_v18  ;;  %v3460_v43 = vsel %vm14014_vm9, %v16730_v50, %v3457_v55  ;;  %v3352_v13 = vmul.f32 %v3351_v17, %v3349_v33  ;;  %v3638_v31 = vadd.s32 %v3637_v49, %v3633_v20 }
 0x434   :  { %v14037_v53 = vmul.f32 %v16507_v63, %v14005_v61  ;;  %v14040_v52 = vmul.f32 16.0, %v14009_v42  ;;  %vm3271_vm14 = vcmp.lt.s32.totalorder %v16693_v48, 0  ;;  %v16075_v11 = vand.u32 2147483647, %v16738_v46  ;;  %vm14099_vm0 = vmand %vm14026_vm12, %vm842_vm6 }
 0x435   :  { %v16739_v32 = vand.u32 2147483647, %v16693_v48  ;;  %v3639_v45 = vadd.s32 536870912, %v3638_v31  ;;  %v3493_v2 = vshrl.u32 %v16378_v34, %v3490_v6  ;;  %v3496_v29 = vshrl.u32 %v16382_v9, %v3490_v6 }
 0x436   :  { %v4587_v5 = vmul.f32 %v13893_v23, %v4555_v41  ;;  %vm874_vm8 = vcmp.le.f32.partialorder %v16742_v36, 4.0  ;;  %8622 = vcosq.f32 %v3460_v43  ;;  %v556_v10 = vmul.f32 0.0625, %v16073_v21 }
 0x437   :  { %vm14049_vm7 = vcmp.le.f32.partialorder %v16739_v32, 0.7853982  ;;  %v3499_v44 = vshrl.u32 %v16383_v19, %v3490_v6  ;;  %v3353_v33 = vxor.u32 2147483648, %v3352_v13  ;;  %v14060_v55 = vshrl.u32 %v3639_v45, 30  ;;  %vm938_vm4 = vmand %vm14099_vm0, %vm874_vm8 }
 0x438   :  { %v3492_v24 = vshll.u32 %v16381_v7, %v16735_v16  ;;  %v3495_v40 = vshll.u32 %v16378_v34, %v16735_v16  ;;  %v3482_v23 = vand.u32 8388607, %v16075_v11  ;;  %v3498_v17 = vshll.u32 %v16382_v9, %v16735_v16 }
 0x439   :  { %v3501_v20 = vshll.u32 %v16383_v19, %v16735_v16  ;;  %v3502_v41 = vshrl.u32 %v16385_v30, %v3490_v6  ;;  %v3641_v49 = vshll.u32 %v14060_v55, 30  ;;  %v3505_v21 = vshrl.u32 %v16386_v59, %v3490_v6 }
 0x43a   :  { %v3494_v32 = vor.u32 %v3493_v2, %v3492_v24  ;;  %v3497_v45 = vor.u32 %v3496_v29, %v3495_v40  ;;  %8624 = vsinq.f32 %v3460_v43  ;;  %v3500_v4 = vor.u32 %v3499_v44, %v3498_v17  ;;  %v16744_v24 = vld [vmem:[#allocation104_spill] sm:$0xff] }
 0x43b   :  { %v3503_v12 = vor.u32 %v3502_v41, %v3501_v20  ;;  %v3504_v11 = vshll.u32 %v16385_v30, %v16735_v16  ;;  %v14078_v61 = vmul.f32 %v13898_v22, %v4587_v5  ;;  %v3354_v3 = vsel %vm3271_vm14, %v3353_v33, %v3352_v13 }
 0x43c   :  { %v14082_v28 = vfloor.f32 %v556_v10  ;;  %v14084_v14 = vsub.s32 %v3638_v31, %v3641_v49  ;;  %v3483_v2 = vor.u32 8388608, %v3482_v23  ;;  %vm3507_vm2 = vcmp.lt.s32.totalorder %v16744_v24, 1  ;;  %v14110_v10 = vpop.f32.mrb[25].mxu1 }
 0x43d   :  { %16743 = vst [vmem:[#allocation23_spill] sm:$0xff] %v14078_v61  ;;  %v3506_v29 = vor.u32 %v3505_v21, %v3504_v11  ;;  %vm3510_vm5 = vcmp.lt.s32.totalorder %v16744_v24, 4  ;;  %vm3509_vm15 = vcmp.lt.s32.totalorder %v16744_v24, 3  ;;  %v3515_v22 = vsel %vm3507_vm2, %v3494_v32, %v3497_v45  ;;  %16747 = vst [vmem:[#allocation21_spill] sm:$0xff] %v14110_v10 }
 0x43e   :  { %v3644_v43 = vsub.s32 0, %v14084_v14  ;;  %v3516_v16 = vsel %vm3510_vm5, %v3503_v12, 920167782  ;;  %v3355_v13 = vsub.s32 4, %v13873_v35  ;;  %v3357_v31 = vsel %vm14049_vm7, %v16693_v48, %v3354_v3 }
 0x43f   :  { %v3491_v11 = vshrl.u32 %v16381_v7, %v3490_v6  ;;  %v3517_v5 = vsel %vm3509_vm15, %v3500_v4, %v3516_v16  ;;  %vm3508_vm1 = vcmp.lt.s32.totalorder %v16744_v24, 2  ;;  %v3512_v18 = vsel %vm3510_vm5, %v3500_v4, 2102212464 }
 0x440   :  { %v7309_v8 = vmin.u32 %v3644_v43, %v14084_v14  ;;  %v3519_v27 = vsel %vm3507_vm2, %v3497_v45, %v3500_v4  ;;  %v8623_v44 = vpop.eup %8622  ;;  %v5931_v3 = vmul.f32 %v16511_v62, %v14078_v61  ;;  %v3518_v6 = vsel %vm3508_vm1, %v3515_v22, %v3517_v5  ;;  %v16798_v61 = vld [vmem:[#allocation36_spill] sm:$0xff] }
 0x441   :  { %v3520_v33 = vsel %vm3510_vm5, %v3506_v29, 1326507024  ;;  %v3523_v40 = vshll.u32 %v3483_v2, 8  ;;  %8626 = vcosq.f32 %v3357_v31  ;;  %v3511_v4 = vsel %vm3507_vm2, %v3491_v11, %v3494_v32 }
 0x442   :  { %v3646_v23 = vclz %v7309_v8  ;;  %v3521_v17 = vsel %vm3509_vm15, %v3503_v12, %v3520_v33  ;;  %v3513_v20 = vsel %vm3509_vm15, %v3497_v45, %v3512_v18  ;;  %8628 = vsinq.f32 %v3357_v31 }
 0x443   :  { %v3522_v41 = vsel %vm3508_vm1, %v3519_v27, %v3521_v17  ;;  %v14136_v49 = vmul.u32.u64.low %v3523_v40, %v3518_v6  ;;  %v14137_v2 = vmul.u32.u64.high %v3523_v40, %v3518_v6, %v14136_v49  ;;  %v14144_v32 = vsel %vm938_vm4, 1.0, %v16442_v37 }
 0x444   :  { %v7310_v36 = vadd.s32 4294967294, %v3646_v23  ;;  %v14140_v29 = vmul.u32.u64.low %v3523_v40, %v3522_v41  ;;  %v14141_v43 = vmul.u32.u64.high %v3523_v40, %v3522_v41, %v14140_v29  ;;  %v8625_v22 = vpop.eup %8624  ;;  %v16748_v12 = vcvt.s32.f32 %v13887_v25 }
 0x445   :  { %v7942_v16 = vpack.c.bf16 %v14037_v53, %v5931_v3  ;;  %v5915_v21 = vmul.f32 %v16511_v62, %v13861_v58  ;;  %v620_v31 = vmul.f32 16.0, %v14082_v28  ;;  %v3514_v11 = vsel %vm3508_vm1, %v3511_v4, %v3513_v20 }
 0x446   :  { %v14149_v45 = vsub.f32 %v16748_v12, %v14040_v52  ;;  %vm7311_vm10 = vcmp.lt.s32.totalorder %v7310_v36, 0  ;;  %v5916_v5 = vmul.f32 %v16507_v63, %v13859_v54  ;;  %v16749_v25 = vsel %vm14014_vm9, 0, %v14022_v1 }
 0x447   :  { %v3465_v52 = vand.u32 3, %v16749_v25  ;;  %v14164_v8 = vmul.f32 0.125, %v14009_v42  ;;  %v3649_v53 = vsel %vm7311_vm10, 0, %v7310_v36  ;;  %v3533_v18 = vadd.s32 1, %v14137_v2  ;;  %7943 = vmatprep.subr.bf16.mxu1 %v7942_v16 }
 0x448   :  { %v3468_v27 = vxor.u32 2147483648, %v8625_v22  ;;  %v3471_v3 = vxor.u32 2147483648, %v8623_v44  ;;  %v3356_v24 = vsel %vm3271_vm14, %v3355_v13, %v13873_v35  ;;  %v3654_v6 = vsub.s32 4294967266, %v3649_v53 }
 0x449   :  { %v3650_v33 = vsub.s32 32, %v3649_v53  ;;  %v3530_v23 = vmul.u32 %v3523_v40, %v3514_v11  ;;  %vm3532_vm11 = vc.u32 %v14141_v43, %v14136_v49  ;;  %v7944_v26 = vpack.c.bf16 %v5916_v5, %v5915_v21 }
 0x44a   :  { %vm3464_vm3 = vweird.f32 %v16730_v50  ;;  %v14174_v1 = vmul.f32 0.125, %v14149_v45  ;;  %v16750_v4 = vcvt.s32.f32 %v13997_v39  ;;  %v3655_v20 = vadd.s32 127, %v3654_v6 }
 0x44b   :  { %v3534_v41 = vsel %vm3532_vm11, %v3533_v18, %v14137_v2  ;;  %vm3467_vm13 = vcmp.eq.s32.totalorder %v3465_v52, 0  ;;  %v3358_v35 = vsel %vm14049_vm7, 0, %v3356_v24  ;;  %v3634_v13 = vadd.s32 %v13988_v56, %v13979_v57  ;;  %7945 = vmatpush3.bf16.msra.mxu1 %v7944_v26  ;;  %v8627_v36 = vpop.eup %8626 }
 0x44c   :  { %v14178_v17 = vsub.f32 %v16750_v4, %v620_v31  ;;  %v3535_v40 = vadd.s32 %v3534_v41, %v3530_v23  ;;  %vm3470_vm9 = vcmp.eq.s32.totalorder %v3465_v52, 2  ;;  %v14186_v29 = vmul.f32 0.125, %v14082_v28  ;;  %v8629_v38 = vpop.eup %8628 }
 0x44d   :  { %v3656_v39 = vshll.u32 %v3655_v20, 23  ;;  %v14189_v12 = vadd.s32 176, %v16417_v0  ;;  %v3469_v16 = vsel %vm3467_vm13, %v8623_v44, %v3468_v27  ;;  %v3472_v2 = vsel %vm3470_vm9, %v3471_v3, %v8625_v22  ;;  %v16751_v27 = vld [vmem:[#allocation107_spill] sm:$0xff] }
 0x44e   :  { %v3652_v21 = vshrl.u32 %v3634_v13, %v3650_v33  ;;  %v3536_v31 = vadd.s32 536870912, %v3535_v40  ;;  %v713_v11 = vfloor.f32 %v14164_v8  ;;  %v777_v57 = vfloor.f32 %v14174_v1 }
 0x44f   :  { %v3362_v56 = vand.u32 3, %v3358_v35  ;;  %v14194_v5 = vmul.f32 0.125, %v14178_v17  ;;  %vm3466_vm12 = vcmp.lt.s32.totalorder %v3465_v52, 2  ;;  %v3651_v25 = vshll.u32 %v14084_v14, %v3649_v53  ;;  %v16752_v14 = vld [vmem:[#allocation83_spill] sm:$0xff] }
 0x450   :  { %v3657_v18 = vor.u32 4788187, %v3656_v39  ;;  %v14197_v24 = vshrl.u32 %v3536_v31, 30  ;;  %v3473_v6 = vsel %vm3466_vm12, %v3469_v16, %v3472_v2  ;;  %v3368_v44 = vxor.u32 2147483648, %v8627_v36 }
 0x451   :  { %v16078_v22 = vcvt.s32.f32 %v14189_v12  ;;  %v3799_v3 = vsub.s32 32, %v16751_v27  ;;  %v3365_v33 = vxor.u32 2147483648, %v8629_v38  ;;  %v3653_v23 = vor.u32 %v3652_v21, %v3651_v25 }
 0x452   :  { %v3538_v26 = vshll.u32 %v14197_v24, 30  ;;  %vm3363_vm6 = vcmp.lt.s32.totalorder %v3362_v56, 2  ;;  %vm3364_vm14 = vcmp.eq.s32.totalorder %v3362_v56, 0  ;;  %v16077_v53 = vand.u32 2147483647, %v16752_v14 }
 0x453   :  { %v3474_v1 = vsel %vm3464_vm3, nan, %v3473_v6  ;;  %vm3367_vm7 = vcmp.eq.s32.totalorder %v3362_v56, 2  ;;  %v3658_v4 = vand.u32 2147483647, %v3657_v18  ;;  %v555_v35 = vmul.f32 0.0625, %v16078_v22  ;;  %v16757_v56 = vld [vmem:[#allocation31_spill] sm:$0xff] }
 0x454   :  { %v14207_v20 = vsub.s32 %v3535_v40, %v3538_v26  ;;  %v3369_v41 = vsel %vm3367_vm7, %v3368_v44, %v8629_v38  ;;  %v3802_v13 = vshrl.u32 %v16378_v34, %v3799_v3  ;;  %v3805_v39 = vshrl.u32 %v16382_v9, %v3799_v3 }
 0x455   :  { %v3366_v16 = vsel %vm3364_vm14, %v8627_v36, %v3365_v33  ;;  %v3660_v2 = vcvt.s32.f32 %v3653_v23  ;;  %v3808_v31 = vshrl.u32 %v16383_v19, %v3799_v3  ;;  %v3791_v50 = vand.u32 8388607, %v16077_v53  ;;  %v14228_v33 = vpop.f32.mrb[26].mxu1 }
 0x456   :  { %v3541_v21 = vsub.s32 0, %v14207_v20  ;;  %v3801_v40 = vshll.u32 %v16381_v7, %v16751_v27  ;;  %v3804_v38 = vshll.u32 %v16378_v34, %v16751_v27  ;;  %v3811_v25 = vshrl.u32 %v16385_v30, %v3799_v3  ;;  %16753 = vst [vmem:[#allocation161_spill] sm:$0xff] %v14228_v33 }
 0x457   :  { %vm3580_vm8 = vcmp.lt.s32.totalorder %v16726_v15, 0  ;;  %v3661_v18 = vmul.f32 %v3660_v2, %v3658_v4  ;;  %v3807_v6 = vshll.u32 %v16382_v9, %v16751_v27  ;;  %v3810_v44 = vshll.u32 %v16383_v19, %v16751_v27 }
 0x458   :  { %v7305_v36 = vmin.u32 %v3541_v21, %v14207_v20  ;;  %v4526_v23 = vadd.f32 1.0, %v3474_v1  ;;  %v14230_v26 = vfloor.f32 %v555_v35  ;;  %v3803_v53 = vor.u32 %v3802_v13, %v3801_v40 }
 0x459   :  { %v3806_v22 = vor.u32 %v3805_v39, %v3804_v38  ;;  %vm14232_vm2 = vcmp.eq.f32.partialorder %v713_v11, %v777_v57  ;;  %vm841_vm5 = vcmp.ne.f32.partialorder %v14009_v42, %v14149_v45  ;;  %v3370_v4 = vsel %vm3363_vm6, %v3366_v16, %v3369_v41  ;;  %v16756_v39 = vld [vmem:[#allocation106_spill] sm:$0xff] }
 0x45a   :  { %v3543_v2 = vclz %v7305_v36  ;;  %v3809_v21 = vor.u32 %v3808_v31, %v3807_v6  ;;  %v3812_v52 = vor.u32 %v3811_v25, %v3810_v44  ;;  %v3531_v54 = vadd.s32 %v14136_v49, %v14141_v43  ;;  %vm14293_vm6 = vmand %vm14232_vm2, %vm841_vm5 }
 0x45b   :  { %v3792_v1 = vor.u32 8388608, %v3791_v50  ;;  %v3813_v35 = vshll.u32 %v16385_v30, %v16751_v27  ;;  %v3814_v11 = vshrl.u32 %v16386_v59, %v3799_v3  ;;  %vm3361_vm15 = vweird.f32 %v16693_v48 }
 0x45c   :  { %v3662_v57 = vxor.u32 2147483648, %v3661_v18  ;;  %v7306_v13 = vadd.s32 4294967294, %v3543_v2  ;;  %vm3816_vm0 = vcmp.lt.s32.totalorder %v16756_v39, 1  ;;  %vm3819_vm1 = vcmp.lt.s32.totalorder %v16756_v39, 4 }
 0x45d   :  { %vm873_vm4 = vcmp.le.f32.partialorder %v16757_v56, 4.0  ;;  %v3815_v41 = vor.u32 %v3814_v11, %v3813_v35  ;;  %vm3818_vm10 = vcmp.lt.s32.totalorder %v16756_v39, 3  ;;  %v3824_v49 = vsel %vm3816_vm0, %v3803_v53, %v3806_v22 }
 0x45e   :  { %v3825_v43 = vsel %vm3819_vm1, %v3812_v52, 920167782  ;;  %vm7307_vm11 = vcmp.lt.s32.totalorder %v7306_v13, 0  ;;  %v3800_v27 = vshrl.u32 %v16381_v7, %v3799_v3  ;;  %v3828_v31 = vsel %vm3816_vm0, %v3806_v22, %v3809_v21 }
 0x45f   :  { %v3826_v16 = vsel %vm3818_vm10, %v3809_v21, %v3825_v43  ;;  %vm4413_vm3 = vcmp.gt.s32.totalorder %v13841_v47, 0  ;;  %v3546_v50 = vsel %vm7307_vm11, 0, %v7306_v13  ;;  %vm3817_vm13 = vcmp.lt.s32.totalorder %v16756_v39, 2 }
 0x460   :  { %v3821_v40 = vsel %vm3819_vm1, %v3809_v21, 2102212464  ;;  %v3829_v38 = vsel %vm3819_vm1, %v3815_v41, 1326507024  ;;  %v3547_v25 = vsub.s32 32, %v3546_v50  ;;  %v3551_v36 = vsub.s32 4294967266, %v3546_v50 }
 0x461   :  { %v3827_v6 = vsel %vm3817_vm13, %v3824_v49, %v3826_v16  ;;  %v3830_v3 = vsel %vm3818_vm10, %v3812_v52, %v3829_v38  ;;  %v3663_v44 = vsel %vm3580_vm8, %v3662_v57, %v3661_v18  ;;  %v3820_v2 = vsel %vm3816_vm0, %v3800_v27, %v3803_v53  ;;  %v16777_v57 = vld [vmem:[#allocation84_spill] sm:$0xff] }
 0x462   :  { %v3831_v35 = vsel %vm3817_vm13, %v3828_v31, %v3830_v3  ;;  %v3832_v11 = vshll.u32 %v3792_v1, 8  ;;  %v3548_v21 = vshll.u32 %v14207_v20, %v3546_v50  ;;  %v3549_v13 = vshrl.u32 %v3531_v54, %v3547_v25  ;;  %v16767_v31 = vld [vmem:[#allocation44_spill] sm:$0xff] }
 0x463   :  { %v3552_v41 = vadd.s32 127, %v3551_v36  ;;  %v3822_v49 = vsel %vm3818_vm10, %v3806_v22, %v3821_v40  ;;  %v16758_v53 = vfloor.f32 %v14194_v5  ;;  %v16759_v18 = vfloor.f32 %v14186_v29 }
 0x464   :  { %v14271_v43 = vmul.u32.u64.low %v3832_v11, %v3831_v35  ;;  %v14272_v16 = vmul.u32.u64.high %v3832_v11, %v3831_v35, %v14271_v43  ;;  %v14274_v52 = vmul.u32.u64.low %v3832_v11, %v3827_v6  ;;  %v14275_v38 = vmul.u32.u64.high %v3832_v11, %v3827_v6, %v14274_v52  ;;  %v16771_v6 = vld [vmem:[#allocation122_spill] sm:$0xff] }
 0x465   :  { %vm14282_vm9 = vcmp.eq.f32.partialorder %v16759_v18, %v16758_v53  ;;  %vm844_vm12 = vcmp.ne.f32.partialorder %v14082_v28, %v14178_v17  ;;  %v3550_v54 = vor.u32 %v3549_v13, %v3548_v21  ;;  %v3553_v22 = vshll.u32 %v3552_v41, 23  ;;  %v16776_v18 = vld [vmem:[#allocation110_spill] sm:$0xff] }
 0x466   :  { %v4558_v20 = vmul.f32 0.5, %v4526_v23  ;;  %v3371_v29 = vsel %vm3361_vm15, nan, %v3370_v4  ;;  %v16764_v5 = vand.u32 2147483647, %v16726_v15  ;;  %v3823_v23 = vsel %vm3817_vm13, %v3820_v2, %v3822_v49  ;;  %v16768_v4 = vld [vmem:[#allocation35_spill] sm:$0xff]  ;;  %vm908_vm2 = vmand %vm14282_vm9, %vm844_vm12 }
 0x467   :  { %v5724_v42 = vadd.f32 %v13878_v51, %v16767_v31  ;;  %v3664_v45 = vsub.s32 4, %v14060_v55  ;;  %v3554_v48 = vor.u32 4788187, %v3553_v22  ;;  %vm876_vm7 = vcmp.le.f32.partialorder %v16768_v4, 4.0  ;;  %vm14327_vm15 = vmand %vm14293_vm6, %vm873_vm4 }
 0x468   :  { %vm14301_vm14 = vcmp.le.f32.partialorder %v16764_v5, 0.7853982  ;;  %v619_v39 = vmul.f32 16.0, %v14230_v26  ;;  %vm3841_vm5 = vc.u32 %v14272_v16, %v14274_v52  ;;  %v3842_v50 = vadd.s32 1, %v14275_v38  ;;  %vm940_vm0 = vmand %vm908_vm2, %vm876_vm7 }
 0x469   :  { %v3666_v8 = vsel %vm14301_vm14, %v16726_v15, %v3663_v44  ;;  %v4525_v25 = vadd.f32 1.0, %v3371_v29  ;;  %v3555_v28 = vand.u32 2147483647, %v3554_v48  ;;  %v3557_v17 = vcvt.s32.f32 %v3550_v54 }
 0x46a   :  { %v3839_v36 = vmul.u32 %v3832_v11, %v3823_v23  ;;  %v14332_v3 = vand.u32 31, %v16771_v6  ;;  %v4590_v44 = vmul.f32 %v14144_v32, %v4558_v20  ;;  %8630 = vcosq.f32 %v3666_v8 }
 0x46b   :  { %v3843_v2 = vsel %vm3841_vm5, %v3842_v50, %v14275_v38  ;;  %v14339_v56 = vsel %vm4413_vm3, %v13841_v47, 0  ;;  %v3665_v35 = vsel %vm3580_vm8, %v3664_v45, %v14060_v55  ;;  %v3558_v11 = vmul.f32 %v3557_v17, %v3555_v28  ;;  %v16775_v38 = vld [vmem:[#allocation45_spill] sm:$0xff]  ;;  %v16783_v50 = vld [vmem:[#allocation108_spill] sm:$0xff] }
 0x46c   :  { %16772 = vst [vmem:[#allocation163_spill] sm:$0xff] %v14332_v3  ;;  %v3844_v21 = vadd.s32 %v3843_v2, %v3839_v36  ;;  %v14347_v13 = vadd.s32 1, %v13844_v60  ;;  %v14349_v32 = vmul.f32 %v5724_v42, %v4590_v44  ;;  %v7204_v41 = vsel %vm14327_vm15, 1.0, %v16442_v37 }
 0x46d   :  { %v16774_v47 = vcvt.s32.f32 %v14189_v12  ;;  %v4557_v43 = vmul.f32 0.5, %v4525_v25  ;;  %v5719_v53 = vadd.f32 %v13878_v51, %v16775_v38  ;;  %v14361_v1 = vsub.s32 32, %v16776_v18 }
 0x46e   :  { %16773 = vst [vmem:[#allocation53_spill] sm:$0xff] %v14349_v32  ;;  %v3845_v55 = vadd.s32 536870912, %v3844_v21  ;;  %v14364_v60 = vsel %vm940_vm0, 1.0, %v16442_v37  ;;  %v3667_v54 = vsel %vm14301_vm14, 0, %v3665_v35  ;;  %v3559_v22 = vxor.u32 2147483648, %v3558_v11 }
 0x46f   :  { %v14356_v49 = vsub.f32 %v16774_v47, %v619_v39  ;;  %v14369_v20 = vadd.s32 200, %v16417_v0  ;;  %8632 = vsinq.f32 %v3666_v8  ;;  %vm3477_vm8 = vcmp.lt.s32.totalorder %v16738_v46, 0 }
 0x470   :  { %v14372_v12 = vshrl.u32 %v3845_v55, 30  ;;  %v16080_v29 = vand.u32 2147483647, %v16777_v57  ;;  %v14377_v5 = vmul.f32 %v16507_v63, %v14349_v32  ;;  %v14380_v23 = vmul.f32 0.125, %v14230_v26 }
 0x471   :  { %v14383_v27 = vmul.f32 0.125, %v14356_v49  ;;  %v16778_v31 = vand.u32 2147483647, %v16738_v46  ;;  %v4589_v45 = vmul.f32 %v7204_v41, %v4557_v43  ;;  %v14391_v8 = vand.u32 3, %v3667_v54  ;;  %v14421_v41 = vpop.f32.mrb[27].mxu1 }
 0x472   :  { %v3847_v48 = vshll.u32 %v14372_v12, 30  ;;  %v3699_v4 = vshrl.u32 %v16378_v34, %v14361_v1  ;;  %v3560_v39 = vsel %vm3477_vm8, %v3559_v22, %v3558_v11  ;;  %v3702_v40 = vshrl.u32 %v16382_v9, %v14361_v1  ;;  %16782 = vst [vmem:[#allocation17_spill] sm:$0xff] %v14421_v41 }
 0x473   :  { %vm14387_vm1 = vcmp.le.f32.partialorder %v16778_v31, 0.7853982  ;;  %v3705_v25 = vshrl.u32 %v16383_v19, %v14361_v1  ;;  %v14403_v28 = vmul.f32 %v5719_v53, %v4589_v45  ;;  %v3688_v36 = vand.u32 8388607, %v16080_v29 }
 0x474   :  { %v14405_v17 = vsub.s32 %v3844_v21, %v3847_v48  ;;  %v3698_v6 = vshll.u32 %v16381_v7, %v16776_v18  ;;  %v14411_v44 = vpop.eup %8630  ;;  %v3701_v2 = vshll.u32 %v16378_v34, %v16776_v18  ;;  %v3704_v35 = vshll.u32 %v16382_v9, %v16776_v18 }
 0x475   :  { %16781 = vst [vmem:[#allocation75_spill] sm:$0xff] %v14403_v28  ;;  %v3707_v11 = vshll.u32 %v16383_v19, %v16776_v18  ;;  %v3708_v21 = vshrl.u32 %v16385_v30, %v14361_v1  ;;  %v3563_v47 = vsel %vm14387_vm1, %v16738_v46, %v3560_v39  ;;  %v3711_v53 = vshrl.u32 %v16386_v59, %v14361_v1 }
 0x476   :  { %v3850_v43 = vsub.s32 0, %v14405_v17  ;;  %v3700_v38 = vor.u32 %v3699_v4, %v3698_v6  ;;  %v3703_v55 = vor.u32 %v3702_v40, %v3701_v2  ;;  %v3706_v54 = vor.u32 %v3705_v25, %v3704_v35 }
 0x477   :  { %v3709_v22 = vor.u32 %v3708_v21, %v3707_v11  ;;  %v3710_v31 = vshll.u32 %v16385_v30, %v16776_v18  ;;  %v5933_v45 = vmul.f32 %v16511_v62, %v14403_v28  ;;  %v3677_v48 = vxor.u32 2147483648, %v14411_v44 }
 0x478   :  { %v3561_v29 = vsub.s32 4, %v14197_v24  ;;  %v7317_v39 = vmin.u32 %v3850_v43, %v14405_v17  ;;  %8634 = vcosq.f32 %v3563_v47  ;;  %v3689_v4 = vor.u32 8388608, %v3688_v36 }
 0x479   :  { %v3712_v6 = vor.u32 %v3711_v53, %v3710_v31  ;;  %vm3716_vm4 = vcmp.lt.s32.totalorder %v16783_v50, 4  ;;  %v8633_v40 = vpop.eup %8632  ;;  %vm3673_vm10 = vcmp.eq.s32.totalorder %v14391_v8, 0  ;;  %vm3713_vm11 = vcmp.lt.s32.totalorder %v16783_v50, 1 }
 0x47a   :  { %v3852_v25 = vclz %v7317_v39  ;;  %vm3715_vm3 = vcmp.lt.s32.totalorder %v16783_v50, 3  ;;  %v3722_v18 = vsel %vm3716_vm4, %v3709_v22, 920167782  ;;  %v3721_v2 = vsel %vm3713_vm11, %v3700_v38, %v3703_v55 }
 0x47b   :  { %v3723_v36 = vsel %vm3715_vm3, %v3706_v54, %v3722_v18  ;;  %v3725_v35 = vsel %vm3713_vm11, %v3703_v55, %v3706_v54  ;;  %v3726_v11 = vsel %vm3716_vm4, %v3712_v6, 1326507024  ;;  %8636 = vsinq.f32 %v3563_v47 }
 0x47c   :  { %v7318_v21 = vadd.s32 4294967294, %v3852_v25  ;;  %vm3714_vm13 = vcmp.lt.s32.totalorder %v16783_v50, 2  ;;  %v3727_v43 = vsel %vm3715_vm3, %v3709_v22, %v3726_v11  ;;  %v3674_v53 = vxor.u32 2147483648, %v8633_v40 }
 0x47d   :  { %v3718_v31 = vsel %vm3716_vm4, %v3706_v54, 2102212464  ;;  %v3728_v39 = vsel %vm3714_vm13, %v3725_v35, %v3727_v43  ;;  %v3729_v18 = vshll.u32 %v3689_v4, 8  ;;  %v3697_v58 = vshrl.u32 %v16381_v7, %v14361_v1 }
 0x47e   :  { %vm7319_vm9 = vcmp.lt.s32.totalorder %v7318_v21, 0  ;;  %v3724_v47 = vsel %vm3714_vm13, %v3721_v2, %v3723_v36  ;;  %v7946_v6 = vpack.c.bf16 %v14377_v5, %v5933_v45  ;;  %v3840_v22 = vadd.s32 %v14274_v52, %v14272_v16  ;;  %v16784_v45 = vld [vmem:[#allocation150_spill] sm:$0xff]  ;;  %v16785_v2 = vld [vmem:[#allocation147_spill] sm:$0xff] }
 0x47f   :  { %v3855_v25 = vsel %vm7319_vm9, 0, %v7318_v21  ;;  %v14464_v11 = vmul.u32.u64.low %v3729_v18, %v3728_v39  ;;  %v14465_v28 = vmul.u32.u64.high %v3729_v18, %v3728_v39, %v14464_v11  ;;  %vm3670_vm12 = vweird.f32 %v16726_v15 }
 0x480   :  { %v3856_v54 = vsub.s32 32, %v3855_v25  ;;  %v3860_v4 = vsub.s32 4294967266, %v3855_v25  ;;  %v3717_v35 = vsel %vm3713_vm11, %v3697_v58, %v3700_v38  ;;  %v3719_v1 = vsel %vm3715_vm3, %v3703_v55, %v3718_v31  ;;  %7947 = vmatprep.subr.bf16.mxu1 %v7946_v6 }
 0x481   :  { %vm3676_vm6 = vcmp.eq.s32.totalorder %v14391_v8, 2  ;;  %v3562_v16 = vsel %vm3477_vm8, %v3561_v29, %v14197_v24  ;;  %v14476_v52 = vmul.u32.u64.low %v3729_v18, %v3724_v47  ;;  %v14477_v5 = vmul.u32.u64.high %v3729_v18, %v3724_v47, %v14476_v52 }
 0x482   :  { %v16786_v36 = vpack.c.bf16 %v16784_v45, %v16785_v2  ;;  %v16787_v58 = vcvt.s32.f32 %v14369_v20  ;;  %v3857_v55 = vshll.u32 %v14405_v17, %v3855_v25  ;;  %v3858_v21 = vshrl.u32 %v3840_v22, %v3856_v54  ;;  %v8635_v31 = vpop.eup %8634  ;;  %v16788_v17 = vld [vmem:[#allocation66_spill] sm:$0xff] }
 0x483   :  { %v3861_v43 = vadd.s32 127, %v3860_v4  ;;  %v3675_v24 = vsel %vm3673_vm10, %v14411_v44, %v3674_v53  ;;  %v3678_v29 = vsel %vm3676_vm6, %v3677_v48, %v8633_v40  ;;  %v14490_v39 = vadd.s32 192, %v16417_v0 }
 0x484   :  { %7949 = vmatpush3.bf16.msra.mxu1 %v16786_v36  ;;  %v558_v38 = vmul.f32 0.0625, %v16787_v58  ;;  %v3720_v47 = vsel %vm3714_vm13, %v3717_v35, %v3719_v1  ;;  %v3564_v6 = vsel %vm14387_vm1, 0, %v3562_v16  ;;  %v3859_v11 = vor.u32 %v3858_v21, %v3857_v55  ;;  %v16789_v1 = vld [vmem:[#allocation20_spill] sm:$0xff] }
 0x485   :  { %v3862_v45 = vshll.u32 %v3861_v43, 23  ;;  %vm3738_vm14 = vc.u32 %v14465_v28, %v14476_v52  ;;  %vm3672_vm7 = vcmp.lt.s32.totalorder %v14391_v8, 2  ;;  %v14501_v44 = vadd.f32 %v13878_v51, %v16788_v17  ;;  %v8637_v50 = vpop.eup %8636 }
 0x486   :  { %v715_v48 = vfloor.f32 %v14380_v23  ;;  %v3739_v40 = vadd.s32 1, %v14477_v5  ;;  %v3679_v53 = vsel %vm3672_vm7, %v3675_v24, %v3678_v29  ;;  %v14505_v22 = vfloor.f32 %v558_v38  ;;  %v16791_v24 = vld [vmem:[#allocation89_spill] sm:$0xff] }
 0x487   :  { %v3863_v42 = vor.u32 4788187, %v3862_v45  ;;  %v3736_v25 = vmul.u32 %v3729_v18, %v3720_v47  ;;  %v779_v54 = vfloor.f32 %v14383_v27  ;;  %v3568_v4 = vand.u32 3, %v3564_v6  ;;  %v16790_v18 = vld [vmem:[#allocation113_spill] sm:$0xff] }
 0x488   :  { %v16084_v35 = vcvt.s32.f32 %v14490_v39  ;;  %v3740_v8 = vsel %vm3738_vm14, %v3739_v40, %v14477_v5  ;;  %v14512_v16 = vadd.f32 %v13878_v51, %v16789_v1  ;;  %v3866_v2 = vcvt.s32.f32 %v3859_v11  ;;  %v16807_v11 = vld [vmem:[#allocation90_spill] sm:$0xff] }
 0x489   :  { %v3864_v23 = vand.u32 2147483647, %v3863_v42  ;;  %v3741_v36 = vadd.s32 %v3740_v8, %v3736_v25  ;;  %v3680_v58 = vsel %vm3670_vm12, nan, %v3679_v53  ;;  %v3571_v38 = vxor.u32 2147483648, %v8637_v50 }
 0x48a   :  { %v3574_v55 = vxor.u32 2147483648, %v8635_v31  ;;  %v4005_v21 = vsub.s32 32, %v16790_v18  ;;  %v14518_v27 = vmul.f32 16.0, %v14505_v22  ;;  %vm3786_vm2 = vcmp.lt.s32.totalorder %v16752_v14, 0 }
 0x48b   :  { %v3867_v5 = vmul.f32 %v3866_v2, %v3864_v23  ;;  %v3742_v43 = vadd.s32 536870912, %v3741_v36  ;;  %vm3567_vm5 = vweird.f32 %v16738_v46  ;;  %vm3569_vm15 = vcmp.lt.s32.totalorder %v3568_v4, 2 }
 0x48c   :  { %v14523_v51 = vmul.f32 0.125, %v14505_v22  ;;  %v557_v15 = vmul.f32 0.0625, %v16084_v35  ;;  %v16083_v29 = vand.u32 2147483647, %v16791_v24  ;;  %v4528_v47 = vadd.f32 1.0, %v3680_v58 }
 0x48d   :  { %vm3570_vm0 = vcmp.eq.s32.totalorder %v3568_v4, 0  ;;  %vm3573_vm8 = vcmp.eq.s32.totalorder %v3568_v4, 2  ;;  %v16792_v6 = vand.u32 2147483647, %v16752_v14  ;;  %v14534_v45 = vshrl.u32 %v3742_v43, 30 }
 0x48e   :  { %v3572_v17 = vsel %vm3570_vm0, %v8635_v31, %v3571_v38  ;;  %v3575_v40 = vsel %vm3573_vm8, %v3574_v55, %v8637_v50  ;;  %v4008_v53 = vshrl.u32 %v16378_v34, %v4005_v21  ;;  %v4011_v42 = vshrl.u32 %v16382_v9, %v4005_v21 }
 0x48f   :  { %vm14530_vm1 = vcmp.le.f32.partialorder %v16792_v6, 0.7853982  ;;  %v3868_v25 = vxor.u32 2147483648, %v3867_v5  ;;  %v3744_v8 = vshll.u32 %v14534_v45, 30  ;;  %v4014_v1 = vshrl.u32 %v16383_v19, %v4005_v21 }
 0x490   :  { %v4017_v23 = vshrl.u32 %v16385_v30, %v4005_v21  ;;  %v14541_v2 = vfloor.f32 %v557_v15  ;;  %v3997_v58 = vand.u32 8388607, %v16083_v29  ;;  %v4007_v31 = vshll.u32 %v16381_v7, %v16790_v18 }
 0x491   :  { %v4010_v50 = vshll.u32 %v16378_v34, %v16790_v18  ;;  %vm14549_vm4 = vcmp.eq.f32.partialorder %v715_v48, %v779_v54  ;;  %vm843_vm10 = vcmp.ne.f32.partialorder %v14230_v26, %v14356_v49  ;;  %v3576_v55 = vsel %vm3569_vm15, %v3572_v17, %v3575_v40  ;;  %v14568_v40 = vpop.f32.mrb[28].mxu1 }
 0x492   :  { %v14556_v43 = vsub.s32 %v3741_v36, %v3744_v8  ;;  %v4013_v15 = vshll.u32 %v16382_v9, %v16790_v18  ;;  %v4016_v6 = vshll.u32 %v16383_v19, %v16790_v18  ;;  %v4009_v29 = vor.u32 %v4008_v53, %v4007_v31  ;;  %16797 = vst [vmem:[#allocation74_spill] sm:$0xff] %v14568_v40  ;;  %vm14599_vm14 = vmand %vm14549_vm4, %vm843_vm10 }
 0x493   :  { %v4012_v35 = vor.u32 %v4011_v42, %v4010_v50  ;;  %v4019_v48 = vshll.u32 %v16385_v30, %v16790_v18  ;;  %v4020_v54 = vshrl.u32 %v16386_v59, %v4005_v21  ;;  %v3869_v32 = vsel %vm3786_vm2, %v3868_v25, %v3867_v5  ;;  %v16799_v25 = vld [vmem:[#allocation112_spill] sm:$0xff] }
 0x494   :  { %v3747_v4 = vsub.s32 0, %v14556_v43  ;;  %v4015_v36 = vor.u32 %v4014_v1, %v4013_v15  ;;  %v4018_v17 = vor.u32 %v4017_v23, %v4016_v6  ;;  %v4560_v8 = vmul.f32 0.5, %v4528_v47 }
 0x495   :  { %vm875_vm11 = vcmp.le.f32.partialorder %v16798_v61, 4.0  ;;  %v621_v53 = vmul.f32 16.0, %v14541_v2  ;;  %v3998_v42 = vor.u32 8388608, %v3997_v58  ;;  %v4021_v31 = vor.u32 %v4020_v54, %v4019_v48 }
 0x496   :  { %v3577_v18 = vsel %vm3567_vm5, nan, %v3576_v55  ;;  %v7313_v50 = vmin.u32 %v3747_v4, %v14556_v43  ;;  %v4006_v5 = vshrl.u32 %v16381_v7, %v4005_v21  ;;  %vm4022_vm3 = vcmp.lt.s32.totalorder %v16799_v25, 1  ;;  %vm939_vm7 = vmand %vm14599_vm14, %vm875_vm11 }
 0x497   :  { %v3872_v1 = vsel %vm14530_vm1, %v16752_v14, %v3869_v32  ;;  %vm4024_vm13 = vcmp.lt.s32.totalorder %v16799_v25, 3  ;;  %vm4025_vm9 = vcmp.lt.s32.totalorder %v16799_v25, 4  ;;  %v4030_v47 = vsel %vm4022_vm3, %v4009_v29, %v4012_v35 }
 0x498   :  { %v3749_v23 = vclz %v7313_v50  ;;  %v4027_v58 = vsel %vm4025_vm9, %v4015_v36, 2102212464  ;;  %v4031_v15 = vsel %vm4025_vm9, %v4018_v17, 920167782  ;;  %v4034_v46 = vsel %vm4022_vm3, %v4012_v35, %v4015_v36 }
 0x499   :  { %vm4023_vm12 = vcmp.lt.s32.totalorder %v16799_v25, 2  ;;  %v4032_v55 = vsel %vm4024_vm13, %v4015_v36, %v4031_v15  ;;  %v4035_v6 = vsel %vm4025_vm9, %v4021_v31, 1326507024  ;;  %v4038_v21 = vshll.u32 %v3998_v42, 8 }
 0x49a   :  { %v7314_v48 = vadd.s32 4294967294, %v3749_v23  ;;  %v4026_v54 = vsel %vm4022_vm3, %v4006_v5, %v4009_v29  ;;  %v4033_v4 = vsel %vm4023_vm12, %v4030_v47, %v4032_v55  ;;  %v4036_v32 = vsel %vm4024_vm13, %v4018_v17, %v4035_v6 }
 0x49b   :  { %v4028_v40 = vsel %vm4024_vm13, %v4012_v35, %v4027_v58  ;;  %v4037_v41 = vsel %vm4023_vm12, %v4034_v46, %v4036_v32  ;;  %v14587_v33 = vmul.u32.u64.low %v4038_v21, %v4033_v4  ;;  %v14588_v50 = vmul.u32.u64.high %v4038_v21, %v4033_v4, %v14587_v33 }
 0x49c   :  { %v4527_v3 = vadd.f32 1.0, %v3577_v18  ;;  %vm7315_vm6 = vcmp.lt.s32.totalorder %v7314_v48, 0  ;;  %v14591_v10 = vmul.u32.u64.low %v4038_v21, %v4037_v41  ;;  %v14592_v36 = vmul.u32.u64.high %v4038_v21, %v4037_v41, %v14591_v10 }
 0x49d   :  { %v3870_v35 = vsub.s32 4, %v14372_v12  ;;  %v3737_v17 = vadd.s32 %v14476_v52, %v14465_v28  ;;  %v3752_v42 = vsel %vm7315_vm6, 0, %v7314_v48  ;;  %v14607_v31 = vadd.s32 216, %v16417_v0 }
 0x49e   :  { %8638 = vcosq.f32 %v3872_v1  ;;  %v3753_v10 = vsub.s32 32, %v3752_v42  ;;  %v3757_v41 = vsub.s32 4294967266, %v3752_v42  ;;  %v4029_v26 = vsel %vm4023_vm12, %v4026_v54, %v4028_v40 }
 0x49f   :  { %v4592_v49 = vmul.f32 %v14364_v60, %v4560_v8  ;;  %v16802_v38 = vcvt.s32.f32 %v14369_v20  ;;  %v16803_v5 = vcvt.s32.f32 %v14490_v39  ;;  %v4048_v52 = vadd.s32 1, %v14588_v50 }
 0x4a0   :  { %v4559_v25 = vmul.f32 0.5, %v4527_v3  ;;  %v3754_v40 = vshll.u32 %v14556_v43, %v3752_v42  ;;  %v3755_v60 = vshrl.u32 %v3737_v17, %v3753_v10  ;;  %v3758_v8 = vadd.s32 127, %v3757_v41  ;;  %v16823_v41 = vld [vmem:[#allocation151_spill] sm:$0xff] }
 0x4a1   :  { %v14615_v18 = vsub.f32 %v16802_v38, %v14518_v27  ;;  %v14619_v28 = vsub.f32 %v16803_v5, %v621_v53  ;;  %v3871_v20 = vsel %vm3786_vm2, %v3870_v35, %v14372_v12  ;;  %v16089_v39 = vcvt.s32.f32 %v14607_v31 }
 0x4a2   :  { %v4045_v27 = vmul.u32 %v4038_v21, %v4029_v26  ;;  %vm4047_vm5 = vc.u32 %v14592_v36, %v14587_v33  ;;  %8640 = vsinq.f32 %v3872_v1  ;;  %v3756_v61 = vor.u32 %v3755_v60, %v3754_v40 }
 0x4a3   :  { %v3759_v53 = vshll.u32 %v3758_v8, 23  ;;  %v4049_v47 = vsel %vm4047_vm5, %v4048_v52, %v14588_v50  ;;  %v7206_v3 = vsel %vm939_vm7, 1.0, %v16442_v37  ;;  %v718_v43 = vfloor.f32 %v14523_v51 }
 0x4a4   :  { %v750_v23 = vmul.f32 0.125, %v14615_v18  ;;  %v4050_v58 = vadd.s32 %v4049_v47, %v4045_v27  ;;  %v14638_v12 = vmul.f32 %v14501_v44, %v4592_v49  ;;  %v4591_v15 = vmul.f32 %v7206_v3, %v4559_v25  ;;  %v16806_v44 = vld [vmem:[#allocation117_spill] sm:$0xff] }
 0x4a5   :  { %v685_v46 = vmul.f32 0.125, %v14541_v2  ;;  %v3760_v55 = vor.u32 4788187, %v3759_v53  ;;  %v3873_v1 = vsel %vm14530_vm1, 0, %v3871_v20  ;;  %v749_v6 = vmul.f32 0.125, %v14619_v28 }
 0x4a6   :  { %16804 = vst [vmem:[#allocation136_spill] sm:$0xff] %v14638_v12  ;;  %v560_v21 = vmul.f32 0.0625, %v16089_v39  ;;  %v4051_v48 = vadd.s32 536870912, %v4050_v58  ;;  %v14647_v51 = vmul.f32 %v14512_v16, %v4591_v15  ;;  %v3763_v4 = vcvt.s32.f32 %v3756_v61 }
 0x4a7   :  { %v3761_v54 = vand.u32 2147483647, %v3760_v55  ;;  %v3902_v32 = vsub.s32 32, %v16806_v44  ;;  %v782_v50 = vfloor.f32 %v750_v23  ;;  %vm3683_vm2 = vcmp.lt.s32.totalorder %v16777_v57, 0 }
 0x4a8   :  { %16805 = vst [vmem:[#allocation139_spill] sm:$0xff] %v14647_v51  ;;  %v14651_v29 = vshrl.u32 %v4051_v48, 30  ;;  %v16088_v35 = vand.u32 2147483647, %v16807_v11  ;;  %v14654_v17 = vpop.eup %8638  ;;  %v14658_v42 = vmul.f32 %v16507_v63, %v14638_v12  ;;  %v717_v10 = vfloor.f32 %v685_v46 }
 0x4a9   :  { %v16808_v16 = vand.u32 2147483647, %v16777_v57  ;;  %v3764_v26 = vmul.f32 %v3763_v4, %v3761_v54  ;;  %v14666_v49 = vand.u32 3, %v3873_v1  ;;  %v781_v38 = vfloor.f32 %v749_v6 }
 0x4aa   :  { %v14668_v5 = vfloor.f32 %v560_v21  ;;  %v4053_v52 = vshll.u32 %v14651_v29, 30  ;;  %v14673_v25 = vmul.f32 %v16511_v62, %v14647_v51  ;;  %v3905_v60 = vshrl.u32 %v16378_v34, %v3902_v32 }
 0x4ab   :  { %vm14662_vm15 = vcmp.le.f32.partialorder %v16808_v16, 0.7853982  ;;  %v3765_v40 = vxor.u32 2147483648, %v3764_v26  ;;  %v3908_v8 = vshrl.u32 %v16382_v9, %v3902_v32  ;;  %v3883_v20 = vxor.u32 2147483648, %v14654_v17 }
 0x4ac   :  { %v14679_v61 = vsub.s32 %v4050_v58, %v4053_v52  ;;  %v3894_v53 = vand.u32 8388607, %v16088_v35  ;;  %v8641_v47 = vpop.eup %8640  ;;  %v3904_v23 = vshll.u32 %v16381_v7, %v16806_v44  ;;  %v3907_v15 = vshll.u32 %v16378_v34, %v16806_v44 }
 0x4ad   :  { %v3766_v3 = vsel %vm3683_vm2, %v3765_v40, %v3764_v26  ;;  %v3911_v46 = vshrl.u32 %v16383_v19, %v3902_v32  ;;  %v14695_v1 = vadd.s32 208, %v16417_v0  ;;  %v3910_v6 = vshll.u32 %v16382_v9, %v16806_v44 }
 0x4ae   :  { %v3769_v58 = vsel %vm14662_vm15, %v16777_v57, %v3766_v3  ;;  %v4056_v55 = vsub.s32 0, %v14679_v61  ;;  %vm3882_vm0 = vcmp.eq.s32.totalorder %v14666_v49, 2  ;;  %v3906_v21 = vor.u32 %v3905_v60, %v3904_v23  ;;  %v14718_v3 = vpop.f32.mrb[29].mxu1 }
 0x4af   :  { %v3909_v48 = vor.u32 %v3908_v8, %v3907_v15  ;;  %v3913_v54 = vshll.u32 %v16383_v19, %v16806_v44  ;;  %v3914_v4 = vshrl.u32 %v16385_v30, %v3902_v32  ;;  %vm14703_vm8 = vcmp.eq.f32.partialorder %v718_v43, %v782_v50 }
 0x4b0   :  { %vm846_vm1 = vcmp.ne.f32.partialorder %v14505_v22, %v14615_v18  ;;  %v3880_v26 = vxor.u32 2147483648, %v8641_v47  ;;  %8642 = vcosq.f32 %v3769_v58  ;;  %v7325_v52 = vmin.u32 %v4056_v55, %v14679_v61  ;;  %v16820_v18 = vld [vmem:[#allocation39_spill] sm:$0xff] }
 0x4b1   :  { %v3912_v40 = vor.u32 %v3911_v46, %v3910_v6  ;;  %vm4310_vm4 = vcmp.gt.s32.totalorder %v14347_v13, 0  ;;  %vm14711_vm10 = vcmp.eq.f32.partialorder %v717_v10, %v781_v38  ;;  %vm845_vm11 = vcmp.ne.f32.partialorder %v14541_v2, %v14619_v28  ;;  %v16815_v10 = vld [vmem:[#allocation115_spill] sm:$0xff]  ;;  %vm14772_vm5 = vmand %vm14703_vm8, %vm846_vm1  ;;  %v16822_v28 = vld [vmem:[#allocation134_spill] sm:$0xff] }
 0x4b2   :  { %8644 = vsinq.f32 %v3769_v58  ;;  %v3895_v43 = vor.u32 8388608, %v3894_v53  ;;  %v3903_v50 = vshrl.u32 %v16381_v7, %v3902_v32  ;;  %v3915_v8 = vor.u32 %v3914_v4, %v3913_v54  ;;  %vm909_vm8 = vmand %vm14711_vm10, %vm845_vm11 }
 0x4b3   :  { %v4058_v23 = vclz %v7325_v52  ;;  %v3916_v15 = vshll.u32 %v16385_v30, %v16806_v44  ;;  %v3917_v46 = vshrl.u32 %v16386_v59, %v3902_v32  ;;  %vm3919_vm3 = vcmp.lt.s32.totalorder %v16815_v10, 1 }
 0x4b4   :  { %vm3920_vm13 = vcmp.lt.s32.totalorder %v16815_v10, 2  ;;  %vm3921_vm9 = vcmp.lt.s32.totalorder %v16815_v10, 3  ;;  %vm3922_vm12 = vcmp.lt.s32.totalorder %v16815_v10, 4  ;;  %v3927_v38 = vsel %vm3919_vm3, %v3906_v21, %v3909_v48 }
 0x4b5   :  { %v7326_v53 = vadd.s32 4294967294, %v4058_v23  ;;  %v3918_v58 = vor.u32 %v3917_v46, %v3916_v15  ;;  %v3924_v55 = vsel %vm3922_vm12, %v3912_v40, 2102212464  ;;  %v3928_v6 = vsel %vm3922_vm12, %v3915_v8, 920167782 }
 0x4b6   :  { %v3923_v54 = vsel %vm3919_vm3, %v3903_v50, %v3906_v21  ;;  %v3929_v4 = vsel %vm3921_vm9, %v3912_v40, %v3928_v6  ;;  %v3931_v44 = vsel %vm3919_vm3, %v3909_v48, %v3912_v40  ;;  %v3935_v52 = vshll.u32 %v3895_v43, 8 }
 0x4b7   :  { %vm7327_vm6 = vcmp.lt.s32.totalorder %v7326_v53, 0  ;;  %v3925_v32 = vsel %vm3921_vm9, %v3909_v48, %v3924_v55  ;;  %v3930_v35 = vsel %vm3920_vm13, %v3927_v38, %v3929_v4  ;;  %v3932_v39 = vsel %vm3922_vm12, %v3918_v58, 1326507024 }
 0x4b8   :  { %v14733_v27 = vsel %vm7327_vm6, 0, %v7326_v53  ;;  %v3933_v23 = vsel %vm3921_vm9, %v3915_v8, %v3932_v39  ;;  %v14737_v15 = vmul.u32.u64.low %v3935_v52, %v3930_v35  ;;  %v14738_v21 = vmul.u32.u64.high %v3935_v52, %v3930_v35, %v14737_v15  ;;  %v16816_v53 = vld [vmem:[#allocation37_spill] sm:$0xff] }
 0x4b9   :  { %vm3879_vm14 = vcmp.eq.s32.totalorder %v14666_v49, 0  ;;  %v3884_v40 = vsel %vm3882_vm0, %v3883_v20, %v8641_v47  ;;  %v624_v48 = vmul.f32 16.0, %v14668_v5  ;;  %v3934_v43 = vsel %vm3920_vm13, %v3931_v44, %v3933_v23 }
 0x4ba   :  { %v3881_v50 = vsel %vm3879_vm14, %v14654_v17, %v3880_v26  ;;  %v4066_v46 = vsub.s32 4294967266, %v14733_v27  ;;  %v14749_v38 = vmul.u32.u64.low %v3935_v52, %v3934_v43  ;;  %v14750_v39 = vmul.u32.u64.high %v3935_v52, %v3934_v43, %v14749_v38  ;;  %v14752_v35 = vpop.eup %8642 }
 0x4bb   :  { %v14755_v8 = vshrl.u32 %v14339_v56, 5  ;;  %vm878_vm7 = vcmp.le.f32.partialorder %v16816_v53, 4.0  ;;  %v16817_v20 = vsub.s32 4, %v14534_v45  ;;  %v3926_v17 = vsel %vm3920_vm13, %v3923_v54, %v3925_v32  ;;  %v14829_v38 = vld [vmem:[%s15762_s2 + $0x58] ss:$0 sm:$0xff]  ;;  %v16825_v53 = vld [vmem:[#allocation48_spill] sm:$0xff] }
 0x4bc   :  { %v14765_v26 = vpop.eup %8644  ;;  %vm3878_vm0 = vcmp.lt.s32.totalorder %v14666_v49, 2  ;;  %v16091_v55 = vcvt.s32.f32 %v14695_v1  ;;  %v7950_v10 = vpack.c.bf16 %v14658_v42, %v14673_v25  ;;  %v4311_v6 = vsel %vm4310_vm4, %v14347_v13, 0  ;;  %vm942_vm4 = vmand %vm14772_vm5, %vm878_vm7 }
 0x4bd   :  { %v3768_v47 = vsel %vm3683_vm2, %v16817_v20, %v14534_v45  ;;  %v3945_v45 = vadd.s32 1, %v14738_v21  ;;  %v3885_v22 = vsel %vm3878_vm0, %v3881_v50, %v3884_v40  ;;  %vm877_vm2 = vcmp.le.f32.partialorder %v16820_v18, 4.0 }
 0x4be   :  { %v16821_v49 = vcvt.s32.f32 %v14607_v31  ;;  %v3770_v42 = vsel %vm14662_vm15, 0, %v3768_v47  ;;  %v4067_v25 = vadd.s32 127, %v4066_v46  ;;  %v3942_v54 = vmul.u32 %v3935_v52, %v3926_v17  ;;  %7951 = vmatprep.subr.bf16.mxu1 %v7950_v10  ;;  %vm941_vm15 = vmand %vm909_vm8, %vm877_vm2 }
 0x4bf   :  { %vm3944_vm1 = vc.u32 %v14750_v39, %v14737_v15  ;;  %v14799_v13 = vand.u32 31, %v14339_v56  ;;  %vm3876_vm10 = vweird.f32 %v16752_v14  ;;  %v688_v2 = vmul.f32 0.125, %v14668_v5 }
 0x4c0   :  { %v14792_v16 = vsub.f32 %v16821_v49, %v624_v48  ;;  %v3946_v31 = vsel %vm3944_vm1, %v3945_v45, %v14738_v21  ;;  %v16824_v60 = vpack.c.bf16 %v16822_v28, %v16823_v41  ;;  %v3886_v4 = vsel %vm3876_vm10, nan, %v3885_v22 }
 0x4c1   :  { %v4062_v56 = vsub.s32 32, %v14733_v27  ;;  %v559_v44 = vmul.f32 0.0625, %v16091_v55  ;;  %v3947_v52 = vadd.s32 %v3946_v31, %v3942_v54  ;;  %v14816_v32 = vshrl.u32 %v4311_v6, 5  ;;  %v16827_v31 = vld [vmem:[#allocation99_spill] sm:$0xff] }
 0x4c2   :  { %7953 = vmatpush3.bf16.msra.mxu1 %v16824_v60  ;;  %v14818_v14 = vand.u32 31, %v4311_v6  ;;  %v3774_v23 = vand.u32 3, %v3770_v42  ;;  %v752_v21 = vmul.f32 0.125, %v14792_v16  ;;  %v14822_v40 = vsel %vm942_vm4, 1.0, %v16442_v37 }
 0x4c3   :  { %v4046_v48 = vadd.s32 %v14587_v33, %v14592_v36  ;;  %v4068_v43 = vshll.u32 %v4067_v25, 23  ;;  %v3948_v50 = vadd.s32 536870912, %v3947_v52  ;;  %v4530_v46 = vadd.f32 1.0, %v3886_v4  ;;  %v16826_v36 = vld [vmem:[#allocation125_spill] sm:$0xff] }
 0x4c4   :  { %v14833_v20 = vadd.f32 %v14829_v38, %v16825_v53  ;;  %v14836_v47 = vsel %vm941_vm15, 1.0, %v16442_v37  ;;  %v720_v17 = vfloor.f32 %v688_v2  ;;  %v14838_v45 = vfloor.f32 %v559_v44 }
 0x4c5   :  { %v4064_v58 = vshrl.u32 %v4046_v48, %v4062_v56  ;;  %v14840_v33 = vshrl.u32 %v3948_v50, 30  ;;  %v4211_v10 = vsub.s32 32, %v16826_v36  ;;  %vm3775_vm11 = vcmp.lt.s32.totalorder %v3774_v23, 2 }
 0x4c6   :  { %v3777_v6 = vxor.u32 2147483648, %v14765_v26  ;;  %v3780_v22 = vxor.u32 2147483648, %v14752_v35  ;;  %v784_v18 = vfloor.f32 %v752_v21  ;;  %v4063_v49 = vshll.u32 %v14679_v61, %v14733_v27 }
 0x4c7   :  { %v4069_v42 = vor.u32 4788187, %v4068_v43  ;;  %v3950_v25 = vshll.u32 %v14840_v33, 30  ;;  %v14849_v54 = vadd.s32 232, %v16417_v0  ;;  %v14851_v2 = vmul.f32 0.5, %v4530_v46 }
 0x4c8   :  { %vm3776_vm3 = vcmp.eq.s32.totalorder %v3774_v23, 0  ;;  %vm3779_vm13 = vcmp.eq.s32.totalorder %v3774_v23, 2  ;;  %v16090_v28 = vand.u32 2147483647, %v16827_v31  ;;  %v4065_v41 = vor.u32 %v4064_v58, %v4063_v49 }
 0x4c9   :  { %v14855_v60 = vmul.f32 16.0, %v14838_v45  ;;  %v14857_v4 = vsub.s32 %v3947_v52, %v3950_v25  ;;  %v4214_v27 = vshrl.u32 %v16378_v34, %v4211_v10  ;;  %v3778_v61 = vsel %vm3776_vm3, %v14752_v35, %v3777_v6 }
 0x4ca   :  { %v3781_v56 = vsel %vm3779_vm13, %v3780_v22, %v14765_v26  ;;  %v3943_v44 = vadd.s32 %v14737_v15, %v14750_v39  ;;  %v4217_v21 = vshrl.u32 %v16382_v9, %v4211_v10  ;;  %v4070_v48 = vand.u32 2147483647, %v4069_v42 }
 0x4cb   :  { %v3953_v43 = vsub.s32 0, %v14857_v4  ;;  %v16092_v50 = vcvt.s32.f32 %v14849_v54  ;;  %v4213_v52 = vshll.u32 %v16381_v7, %v16826_v36  ;;  %v4203_v46 = vand.u32 8388607, %v16090_v28 }
 0x4cc   :  { %v4216_v35 = vshll.u32 %v16378_v34, %v16826_v36  ;;  %v4219_v26 = vshll.u32 %v16382_v9, %v16826_v36  ;;  %v4220_v15 = vshrl.u32 %v16383_v19, %v4211_v10  ;;  %v3782_v39 = vsel %vm3775_vm11, %v3778_v61, %v3781_v56 }
 0x4cd   :  { %v4072_v53 = vcvt.s32.f32 %v4065_v41  ;;  %v7321_v58 = vmin.u32 %v3953_v43, %v14857_v4  ;;  %v4215_v6 = vor.u32 %v4214_v27, %v4213_v52  ;;  %vm14878_vm9 = vcmp.eq.f32.partialorder %v720_v17, %v784_v18  ;;  %v14891_v27 = vpop.f32.mrb[30].mxu1  ;;  %v16830_v43 = vld [vmem:[#allocation121_spill] sm:$0xff]  ;;  %v16831_v52 = vld [vmem:[#allocation42_spill] sm:$0xff] }
 0x4ce   :  { %vm848_vm12 = vcmp.ne.f32.partialorder %v14668_v5, %v14792_v16  ;;  %v4218_v49 = vor.u32 %v4217_v21, %v4216_v35  ;;  %v4221_v42 = vor.u32 %v4220_v15, %v4219_v26  ;;  %v4222_v25 = vshll.u32 %v16383_v19, %v16826_v36 }
 0x4cf   :  { %v4223_v28 = vshrl.u32 %v16385_v30, %v4211_v10  ;;  %vm3773_vm6 = vweird.f32 %v16777_v57  ;;  %v4073_v23 = vmul.f32 %v4072_v53, %v4070_v48  ;;  %v3955_v41 = vclz %v7321_v58  ;;  %vm14933_vm1 = vmand %vm14878_vm9, %vm848_vm12 }
 0x4d0   :  { %v4225_v17 = vshll.u32 %v16385_v30, %v16826_v36  ;;  %v4226_v18 = vshrl.u32 %v16386_v59, %v4211_v10  ;;  %v4204_v61 = vor.u32 8388608, %v4203_v46  ;;  %v4212_v56 = vshrl.u32 %v16381_v7, %v4211_v10 }
 0x4d1   :  { %v4224_v21 = vor.u32 %v4223_v28, %v4222_v25  ;;  %vm4228_vm14 = vcmp.lt.s32.totalorder %v16830_v43, 1  ;;  %vm880_vm7 = vcmp.le.f32.partialorder %v16831_v52, 4.0  ;;  %v7322_v35 = vadd.s32 4294967294, %v3955_v41 }
 0x4d2   :  { %v4227_v26 = vor.u32 %v4226_v18, %v4225_v17  ;;  %vm4229_vm5 = vcmp.lt.s32.totalorder %v16830_v43, 2  ;;  %vm4231_vm0 = vcmp.lt.s32.totalorder %v16830_v43, 4  ;;  %vm4230_vm2 = vcmp.lt.s32.totalorder %v16830_v43, 3  ;;  %vm944_vm15 = vmand %vm14933_vm1, %vm880_vm7 }
 0x4d3   :  { %v4233_v36 = vsel %vm4231_vm0, %v4221_v42, 2102212464  ;;  %v4236_v48 = vsel %vm4228_vm14, %v4215_v6, %v4218_v49  ;;  %v4237_v46 = vsel %vm4231_vm0, %v4224_v21, 920167782  ;;  %vm7323_vm8 = vcmp.lt.s32.totalorder %v7322_v35, 0 }
 0x4d4   :  { %v4238_v10 = vsel %vm4230_vm2, %v4221_v42, %v4237_v46  ;;  %v4240_v28 = vsel %vm4228_vm14, %v4218_v49, %v4221_v42  ;;  %v4241_v15 = vsel %vm4231_vm0, %v4227_v26, 1326507024  ;;  %v3958_v53 = vsel %vm7323_vm8, 0, %v7322_v35 }
 0x4d5   :  { %v4239_v58 = vsel %vm4229_vm5, %v4236_v48, %v4238_v10  ;;  %v4242_v25 = vsel %vm4230_vm2, %v4224_v21, %v4241_v15  ;;  %v4244_v41 = vshll.u32 %v4204_v61, 8  ;;  %v3959_v17 = vsub.s32 32, %v3958_v53 }
 0x4d6   :  { %v3963_v18 = vsub.s32 4294967266, %v3958_v53  ;;  %v562_v55 = vmul.f32 0.0625, %v16092_v50  ;;  %v4232_v46 = vsel %vm4228_vm14, %v4212_v56, %v4215_v6  ;;  %v4234_v42 = vsel %vm4230_vm2, %v4218_v49, %v4233_v36 }
 0x4d7   :  { %v4243_v35 = vsel %vm4229_vm5, %v4240_v28, %v4242_v25  ;;  %v14917_v26 = vmul.u32.u64.low %v4244_v41, %v4239_v58  ;;  %v14918_v48 = vmul.u32.u64.high %v4244_v41, %v4239_v58, %v14917_v26  ;;  %v4074_v21 = vxor.u32 2147483648, %v4073_v23 }
 0x4d8   :  { %v3960_v61 = vshll.u32 %v14857_v4, %v3958_v53  ;;  %v3961_v10 = vshrl.u32 %v3943_v44, %v3959_v17  ;;  %v3964_v15 = vadd.s32 127, %v3963_v18  ;;  %v3783_v50 = vsel %vm3773_vm6, nan, %v3782_v39 }
 0x4d9   :  { %v4076_v6 = vsub.s32 4, %v14651_v29  ;;  %v14925_v56 = vmul.u32.u64.low %v4244_v41, %v4243_v35  ;;  %v14926_v12 = vmul.u32.u64.high %v4244_v41, %v4243_v35, %v14925_v56  ;;  %v14937_v36 = vfloor.f32 %v562_v55 }
 0x4da   :  { %v3962_v4 = vor.u32 %v3961_v10, %v3960_v61  ;;  %v3965_v44 = vshll.u32 %v3964_v15, 23  ;;  %v4235_v57 = vsel %vm4229_vm5, %v4232_v46, %v4234_v42  ;;  %v16834_v39 = vand.u32 2147483647, %v16791_v24  ;;  %v16843_v15 = vld [vmem:[#allocation163_spill] sm:$0xff] }
 0x4db   :  { %vm3992_vm10 = vcmp.lt.s32.totalorder %v16791_v24, 0  ;;  %v16837_v5 = vcvt.s32.f32 %v14695_v1  ;;  %v4254_v22 = vadd.s32 1, %v14918_v48  ;;  %v4529_v55 = vadd.f32 1.0, %v3783_v50 }
 0x4dc   :  { %vm14943_vm4 = vcmp.le.f32.partialorder %v16834_v39, 0.7853982  ;;  %v4075_v53 = vsel %vm3992_vm10, %v4074_v21, %v4073_v23  ;;  %v687_v43 = vmul.f32 0.125, %v14838_v45  ;;  %v3966_v58 = vor.u32 4788187, %v3965_v44 }
 0x4dd   :  { %v14951_v16 = vsub.f32 %v16837_v5, %v14855_v60  ;;  %v4594_v25 = vmul.f32 %v14822_v40, %v14851_v2  ;;  %v4077_v17 = vsel %vm3992_vm10, %v4076_v6, %v14651_v29  ;;  %v4251_v1 = vmul.u32 %v4244_v41, %v4235_v57  ;;  %v16839_v41 = vld [vmem:[#allocation21_spill] sm:$0xff] }
 0x4de   :  { %vm4253_vm11 = vc.u32 %v14926_v12, %v14917_v26  ;;  %v3967_v60 = vand.u32 2147483647, %v3966_v58  ;;  %v3969_v50 = vcvt.s32.f32 %v3962_v4  ;;  %v626_v23 = vmul.f32 16.0, %v14937_v36 }
 0x4df   :  { %v4255_v18 = vsel %vm4253_vm11, %v4254_v22, %v14918_v48  ;;  %v14967_v46 = vmul.f32 %v14833_v20, %v4594_v25  ;;  %v4078_v40 = vsel %vm14943_vm4, %v16791_v24, %v4075_v53  ;;  %v751_v2 = vmul.f32 0.125, %v14951_v16  ;;  %v16845_v53 = vld [vmem:[#allocation109_spill] sm:$0xff] }
 0x4e0   :  { %v4256_v29 = vadd.s32 %v4255_v18, %v4251_v1  ;;  %v4561_v52 = vmul.f32 0.5, %v4529_v55  ;;  %v5739_v42 = vadd.f32 %v14829_v38, %v16839_v41  ;;  %v14976_v35 = vsel %vm944_vm15, 1.0, %v16442_v37 }
 0x4e1   :  { %16838 = vst [vmem:[#allocation146_spill] sm:$0xff] %v14967_v46  ;;  %v3970_v21 = vmul.f32 %v3969_v50, %v3967_v60  ;;  %v4079_v48 = vsel %vm14943_vm4, 0, %v4077_v17  ;;  %v16840_v20 = vand.u32 2147483647, %v16807_v11  ;;  %v14987_v6 = vsub.s32 32, %v16843_v15 }
 0x4e2   :  { %v4257_v10 = vadd.s32 536870912, %v4256_v29  ;;  %8646 = vcosq.f32 %v4078_v40  ;;  %vm3889_vm13 = vcmp.lt.s32.totalorder %v16807_v11, 0  ;;  %v16844_v49 = vcvt.s32.f32 %v14849_v54 }
 0x4e3   :  { %vm14982_vm3 = vcmp.le.f32.partialorder %v16840_v20, 0.7853982  ;;  %v3971_v56 = vxor.u32 2147483648, %v3970_v21  ;;  %v14996_v44 = vmul.f32 %v16507_v63, %v14967_v46  ;;  %v719_v57 = vfloor.f32 %v687_v43 }
 0x4e4   :  { %v14992_v4 = vsub.f32 %v16844_v49, %v626_v23  ;;  %v783_v39 = vfloor.f32 %v751_v2  ;;  %v14998_v28 = vshrl.u32 %v4257_v10, 30  ;;  %v4593_v5 = vmul.f32 %v14836_v47, %v4561_v52  ;;  %v15040_v10 = vpop.f32.mrb[31].mxu1 }
 0x4e5   :  { %v15001_v22 = vand.u32 3, %v4079_v48  ;;  %v15004_v55 = vmul.f32 0.125, %v14937_v36  ;;  %v16094_v58 = vand.u32 2147483647, %v16845_v53  ;;  %v3973_v54 = vsub.s32 4, %v14840_v33 }
 0x4e6   :  { %v4259_v25 = vshll.u32 %v14998_v28, 30  ;;  %v4111_v17 = vshrl.u32 %v16378_v34, %v14987_v6  ;;  %v4114_v43 = vshrl.u32 %v16382_v9, %v14987_v6  ;;  %v15013_v1 = vmul.f32 %v5739_v42, %v4593_v5 }
 0x4e7   :  { %v3972_v47 = vsel %vm3889_vm13, %v3971_v56, %v3970_v21  ;;  %v15018_v60 = vmul.f32 0.125, %v14992_v4  ;;  %v4117_v50 = vshrl.u32 %v16383_v19, %v14987_v6  ;;  %8648 = vsinq.f32 %v4078_v40 }
 0x4e8   :  { %16846 = vst [vmem:[#allocation142_spill] sm:$0xff] %v15013_v1  ;;  %v15022_v23 = vsub.s32 %v4256_v29, %v4259_v25  ;;  %v4110_v18 = vshll.u32 %v16381_v7, %v16843_v15  ;;  %v4113_v2 = vshll.u32 %v16378_v34, %v16843_v15  ;;  %v4100_v52 = vand.u32 8388607, %v16094_v58 }
 0x4e9   :  { %v4116_v41 = vshll.u32 %v16382_v9, %v16843_v15  ;;  %v4119_v42 = vshll.u32 %v16383_v19, %v16843_v15  ;;  %v4120_v40 = vshrl.u32 %v16385_v30, %v14987_v6  ;;  %v3975_v29 = vsel %vm14982_vm3, %v16807_v11, %v3972_v47 }
 0x4ea   :  { %v4262_v21 = vsub.s32 0, %v15022_v23  ;;  %v4112_v48 = vor.u32 %v4111_v17, %v4110_v18  ;;  %v4115_v20 = vor.u32 %v4114_v43, %v4113_v2  ;;  %v4122_v5 = vshll.u32 %v16385_v30, %v16843_v15  ;;  %v16849_v2 = vld [vmem:[#allocation126_spill] sm:$0xff] }
 0x4eb   :  { %v4118_v56 = vor.u32 %v4117_v50, %v4116_v41  ;;  %v4121_v49 = vor.u32 %v4120_v40, %v4119_v42  ;;  %v4123_v25 = vshrl.u32 %v16386_v59, %v14987_v6  ;;  %v5937_v58 = vmul.f32 %v16511_v62, %v15013_v1 }
 0x4ec   :  { %vm15048_vm9 = vcmp.eq.f32.partialorder %v719_v57, %v783_v39  ;;  %vm847_vm12 = vcmp.ne.f32.partialorder %v14838_v45, %v14951_v16  ;;  %v15057_v17 = vsel %vm3889_vm13, %v3973_v54, %v14840_v33  ;;  %v722_v15 = vfloor.f32 %v15004_v55  ;;  %v15061_v47 = vpop.eup %8646 }
 0x4ed   :  { %v7333_v43 = vmin.u32 %v4262_v21, %v15022_v23  ;;  %8650 = vcosq.f32 %v3975_v29  ;;  %v786_v57 = vfloor.f32 %v15018_v60  ;;  %v4101_v39 = vor.u32 8388608, %v4100_v52  ;;  %vm15107_vm8 = vmand %vm15048_vm9, %vm847_vm12 }
 0x4ee   :  { %v4124_v50 = vor.u32 %v4123_v25, %v4122_v5  ;;  %vm4125_vm6 = vcmp.lt.s32.totalorder %v16849_v2, 1  ;;  %vm4127_vm14 = vcmp.lt.s32.totalorder %v16849_v2, 3  ;;  %vm4128_vm7 = vcmp.lt.s32.totalorder %v16849_v2, 4 }
 0x4ef   :  { %v4264_v18 = vclz %v7333_v43  ;;  %v4133_v33 = vsel %vm4125_vm6, %v4112_v48, %v4115_v20  ;;  %v4134_v55 = vsel %vm4128_vm7, %v4121_v49, 920167782  ;;  %v4137_v54 = vsel %vm4125_vm6, %v4115_v20, %v4118_v56 }
 0x4f0   :  { %v4138_v41 = vsel %vm4128_vm7, %v4124_v50, 1326507024  ;;  %v4089_v42 = vxor.u32 2147483648, %v15061_v47  ;;  %8652 = vsinq.f32 %v3975_v29  ;;  %v4135_v52 = vsel %vm4127_vm14, %v4118_v56, %v4134_v55 }
 0x4f1   :  { %v7334_v60 = vadd.s32 4294967294, %v4264_v18  ;;  %vm4126_vm5 = vcmp.lt.s32.totalorder %v16849_v2, 2  ;;  %v4130_v40 = vsel %vm4128_vm7, %v4118_v56, 2102212464  ;;  %v4139_v21 = vsel %vm4127_vm14, %v4121_v49, %v4138_v41  ;;  %v8649_v25 = vpop.eup %8648 }
 0x4f2   :  { %v4141_v5 = vshll.u32 %v4101_v39, 8  ;;  %v4109_v43 = vshrl.u32 %v16381_v7, %v14987_v6  ;;  %v4136_v50 = vsel %vm4126_vm5, %v4133_v33, %v4135_v52  ;;  %v4140_v29 = vsel %vm4126_vm5, %v4137_v54, %v4139_v21 }
 0x4f3   :  { %vm7335_vm0 = vcmp.lt.s32.totalorder %v7334_v60, 0  ;;  %v4252_v18 = vadd.s32 %v14917_v26, %v14926_v12  ;;  %v4131_v6 = vsel %vm4127_vm14, %v4115_v20, %v4130_v40  ;;  %v4086_v51 = vxor.u32 2147483648, %v8649_v25  ;;  %v16855_v20 = vld [vmem:[#allocation155_spill] sm:$0xff] }
 0x4f4   :  { %v4267_v55 = vsel %vm7335_vm0, 0, %v7334_v60  ;;  %v15085_v56 = vmul.u32.u64.low %v4141_v5, %v4140_v29  ;;  %v15086_v1 = vmul.u32.u64.high %v4141_v5, %v4140_v29, %v15085_v56  ;;  %v4129_v41 = vsel %vm4125_vm6, %v4109_v43, %v4112_v48 }
 0x4f5   :  { %v4268_v49 = vsub.s32 32, %v4267_v55  ;;  %v4272_v39 = vsub.s32 4294967266, %v4267_v55  ;;  %v15093_v33 = vadd.s32 224, %v16417_v0  ;;  %v4269_v12 = vshll.u32 %v15022_v23, %v4267_v55  ;;  %v16850_v56 = vld [vmem:[#allocation43_spill] sm:$0xff] }
 0x4f6   :  { %v15095_v54 = vmul.u32.u64.low %v4141_v5, %v4136_v50  ;;  %v15096_v52 = vmul.u32.u64.high %v4141_v5, %v4136_v50, %v15095_v54  ;;  %v7954_v21 = vpack.c.bf16 %v14996_v44, %v5937_v58  ;;  %vm879_vm2 = vcmp.le.f32.partialorder %v16850_v56, 4.0 }
 0x4f7   :  { %v4270_v26 = vshrl.u32 %v4252_v18, %v4268_v49  ;;  %v4273_v60 = vadd.s32 127, %v4272_v39  ;;  %v8651_v29 = vpop.eup %8650  ;;  %v3976_v23 = vsel %vm14982_vm3, 0, %v15057_v17  ;;  %vm850_vm1 = vcmp.ne.f32.partialorder %v14937_v36, %v14992_v4  ;;  %v16856_v17 = vld [vmem:[#allocation152_spill] sm:$0xff]  ;;  %vm943_vm13 = vmand %vm15107_vm8, %vm879_vm2  ;;  %v16858_v18 = vld [vmem:[#allocation161_spill] sm:$0xff] }
 0x4f8   :  { %v4132_v44 = vsel %vm4126_vm5, %v4129_v41, %v4131_v6  ;;  %vm4082_vm4 = vweird.f32 %v16791_v24  ;;  %vm15119_vm10 = vcmp.eq.f32.partialorder %v722_v15, %v786_v57  ;;  %vm4150_vm15 = vc.u32 %v15086_v1, %v15095_v54  ;;  %7955 = vmatprep.subr.bf16.mxu1 %v7954_v21  ;;  %v16859_v39 = vld [vmem:[#allocation46_spill] sm:$0xff]  ;;  %v16860_v6 = vld [vmem:[#allocation17_spill] sm:$0xff] }
 0x4f9   :  { %v4271_v16 = vor.u32 %v4270_v26, %v4269_v12  ;;  %v4274_v46 = vshll.u32 %v4273_v60, 23  ;;  %vm4085_vm11 = vcmp.eq.s32.totalorder %v15001_v22, 0  ;;  %vm4088_vm3 = vcmp.eq.s32.totalorder %v15001_v22, 2  ;;  %vm914_vm12 = vmand %vm15119_vm10, %vm850_vm1 }
 0x4fa   :  { %v529_v61 = vcvt.s32.f32 %v15093_v33  ;;  %v4151_v58 = vadd.s32 1, %v15096_v52  ;;  %v16857_v15 = vpack.c.bf16 %v16855_v20, %v16856_v17  ;;  %v8653_v57 = vpop.eup %8652  ;;  %v4087_v2 = vsel %vm4085_vm11, %v15061_v47, %v4086_v51 }
 0x4fb   :  { %v4090_v40 = vsel %vm4088_vm3, %v4089_v42, %v8649_v25  ;;  %v4275_v43 = vor.u32 4788187, %v4274_v46  ;;  %v4148_v50 = vmul.u32 %v4141_v5, %v4132_v44  ;;  %v15139_v55 = vadd.f32 %v14829_v38, %v16858_v18  ;;  %v16864_v44 = vld [vmem:[#allocation114_spill] sm:$0xff] }
 0x4fc   :  { %7957 = vmatpush3.bf16.msra.mxu1 %v16857_v15  ;;  %v3980_v49 = vand.u32 3, %v3976_v23  ;;  %vm882_vm9 = vcmp.le.f32.partialorder %v16859_v39, 4.0  ;;  %v4152_v51 = vsel %vm4150_vm15, %v4151_v58, %v15096_v52  ;;  %vm4084_vm6 = vcmp.lt.s32.totalorder %v15001_v22, 2 }
 0x4fd   :  { %v4276_v47 = vand.u32 2147483647, %v4275_v43  ;;  %v4278_v42 = vcvt.s32.f32 %v4271_v16  ;;  %v4153_v5 = vadd.s32 %v4152_v51, %v4148_v50  ;;  %v4091_v25 = vsel %vm4084_vm6, %v4087_v2, %v4090_v40  ;;  %vm946_vm14 = vmand %vm914_vm12, %vm882_vm9 }
 0x4fe   :  { %v15153_v41 = vsel %vm943_vm13, 1.0, %v16442_v37  ;;  %v15157_v36 = vadd.f32 %v14829_v38, %v16860_v6  ;;  %v561_v4 = vmul.f32 0.0625, %v529_v61  ;;  %v3983_v12 = vxor.u32 2147483648, %v8653_v57 }
 0x4ff   :  { %v3986_v26 = vxor.u32 2147483648, %v8651_v29  ;;  %v4279_v52 = vmul.f32 %v4278_v42, %v4276_v47  ;;  %v4154_v60 = vadd.s32 536870912, %v4153_v5  ;;  %vm3982_vm7 = vcmp.eq.s32.totalorder %v3980_v49, 0 }
 0x500   :  { %v16861_v22 = vand.u32 2147483647, %v16827_v31  ;;  %vm4198_vm0 = vcmp.lt.s32.totalorder %v16827_v31, 0  ;;  %v4417_v56 = vsub.s32 32, %v14799_v13  ;;  %vm3981_vm2 = vcmp.lt.s32.totalorder %v3980_v49, 2 }
 0x501   :  { %vm3985_vm8 = vcmp.eq.s32.totalorder %v3980_v49, 2  ;;  %v4280_v48 = vxor.u32 2147483648, %v4279_v52  ;;  %v15169_v23 = vshrl.u32 %v4154_v60, 30  ;;  %v4402_v45 = vand.u32 2147483647, %v16864_v44 }
 0x502   :  { %vm15163_vm5 = vcmp.le.f32.partialorder %v16861_v22, 0.7853982  ;;  %v4092_v16 = vsel %vm4082_vm4, nan, %v4091_v25  ;;  %v15175_v46 = vsel %vm946_vm14, 1.0, %v16442_v37  ;;  %v4282_v58 = vsub.s32 4, %v14998_v28 }
 0x503   :  { %v15178_v20 = vfloor.f32 %v561_v4  ;;  %v3984_v17 = vsel %vm3982_vm7, %v8651_v29, %v3983_v12  ;;  %v3987_v15 = vsel %vm3985_vm8, %v3986_v26, %v8653_v57  ;;  %v4281_v2 = vsel %vm4198_vm0, %v4280_v48, %v4279_v52 }
 0x504   :  { %v4156_v40 = vshll.u32 %v15169_v23, 30  ;;  %v4284_v43 = vsel %vm15163_vm5, %v16827_v31, %v4281_v2  ;;  %v4420_v24 = vshrl.u32 %v16378_v34, %v4417_v56  ;;  %v4423_v50 = vshrl.u32 %v16382_v9, %v4417_v56 }
 0x505   :  { %v4426_v18 = vshrl.u32 %v16383_v19, %v4417_v56  ;;  %v4409_v29 = vand.u32 8388607, %v4402_v45  ;;  %v4428_v57 = vshll.u32 %v16383_v19, %v14799_v13  ;;  %v4429_v51 = vshrl.u32 %v16385_v30, %v4417_v56 }
 0x506   :  { %v15189_v39 = vsub.s32 %v4153_v5, %v4156_v40  ;;  %vm3979_vm1 = vweird.f32 %v16807_v11  ;;  %8654 = vcosq.f32 %v4284_v43  ;;  %v4419_v47 = vshll.u32 %v16381_v7, %v14799_v13 }
 0x507   :  { %v4422_v42 = vshll.u32 %v16378_v34, %v14799_v13  ;;  %v4425_v5 = vshll.u32 %v16382_v9, %v14799_v13  ;;  %8656 = vsinq.f32 %v4284_v43  ;;  %v4430_v6 = vor.u32 %v4429_v51, %v4428_v57 }
 0x508   :  { %v4159_v25 = vsub.s32 0, %v15189_v39  ;;  %v4432_v4 = vshrl.u32 %v16386_v59, %v4417_v56  ;;  %v4421_v12 = vor.u32 %v4420_v24, %v4419_v47  ;;  %v4431_v60 = vshll.u32 %v16385_v30, %v14799_v13 }
 0x509   :  { %v4424_v26 = vor.u32 %v4423_v50, %v4422_v42  ;;  %v4427_v52 = vor.u32 %v4426_v18, %v4425_v5  ;;  %v4532_v22 = vadd.f32 1.0, %v4092_v16  ;;  %v4283_v48 = vsel %vm4198_vm0, %v4282_v58, %v14998_v28 }
 0x50a   :  { %v625_v2 = vmul.f32 16.0, %v15178_v20  ;;  %v7329_v40 = vmin.u32 %v4159_v25, %v15189_v39  ;;  %v3988_v43 = vsel %vm3981_vm2, %v3984_v17, %v3987_v15  ;;  %v4410_v57 = vor.u32 8388608, %v4409_v29 }
 0x50b   :  { %v4433_v51 = vor.u32 %v4432_v4, %v4431_v60  ;;  %vm4437_vm4 = vcmp.lt.s32.totalorder %v14755_v8, 4  ;;  %vm4434_vm10 = vcmp.lt.s32.totalorder %v14755_v8, 1  ;;  %vm4436_vm15 = vcmp.lt.s32.totalorder %v14755_v8, 3 }
 0x50c   :  { %v4161_v24 = vclz %v7329_v40  ;;  %v4443_v13 = vsel %vm4437_vm4, %v4430_v6, 920167782  ;;  %v4442_v16 = vsel %vm4434_vm10, %v4421_v12, %v4424_v26  ;;  %v4446_v49 = vsel %vm4434_vm10, %v4424_v26, %v4427_v52 }
 0x50d   :  { %v4444_v28 = vsel %vm4436_vm15, %v4427_v52, %v4443_v13  ;;  %v4447_v58 = vsel %vm4437_vm4, %v4433_v51, 1326507024  ;;  %v15224_v17 = vsub.f32 %v529_v61, %v625_v2  ;;  %vm4435_vm11 = vcmp.lt.s32.totalorder %v14755_v8, 2 }
 0x50e   :  { %v7330_v15 = vadd.s32 4294967294, %v4161_v24  ;;  %v4448_v50 = vsel %vm4436_vm15, %v4430_v6, %v4447_v58  ;;  %v4285_v18 = vsel %vm15163_vm5, 0, %v4283_v48  ;;  %vm4095_vm3 = vcmp.lt.s32.totalorder %v16845_v53, 0 }
 0x50f   :  { %v4439_v29 = vsel %vm4437_vm4, %v4427_v52, 2102212464  ;;  %v4449_v47 = vsel %vm4435_vm11, %v4446_v49, %v4448_v50  ;;  %v4450_v42 = vshll.u32 %v4410_v57, 8  ;;  %v3989_v33 = vsel %vm3979_vm1, nan, %v3988_v43 }
 0x510   :  { %vm7331_vm13 = vcmp.lt.s32.totalorder %v7330_v15, 0  ;;  %v4418_v61 = vshrl.u32 %v16381_v7, %v4417_v56  ;;  %v4445_v5 = vsel %vm4435_vm11, %v4442_v16, %v4444_v28  ;;  %v8655_v25 = vpop.eup %8654  ;;  %v4149_v21 = vadd.s32 %v15095_v54, %v15086_v1 }
 0x511   :  { %v4164_v6 = vsel %vm7331_vm13, 0, %v7330_v15  ;;  %v15241_v4 = vmul.u32.u64.low %v4450_v42, %v4449_v47  ;;  %v15242_v52 = vmul.u32.u64.high %v4450_v42, %v4449_v47, %v15241_v4  ;;  %v8657_v60 = vpop.eup %8656  ;;  %v4440_v56 = vsel %vm4436_vm15, %v4424_v26, %v4439_v29 }
 0x512   :  { %v4165_v48 = vsub.s32 32, %v4164_v6  ;;  %v4169_v2 = vsub.s32 4294967266, %v4164_v6  ;;  %v4438_v11 = vsel %vm4434_vm10, %v4418_v61, %v4421_v12  ;;  %v4531_v40 = vadd.f32 1.0, %v3989_v33 }
 0x513   :  { %v4289_v43 = vand.u32 3, %v4285_v18  ;;  %v15248_v57 = vmul.u32.u64.low %v4450_v42, %v4445_v5  ;;  %v15249_v51 = vmul.u32.u64.high %v4450_v42, %v4445_v5, %v15248_v57  ;;  %v4166_v1 = vshll.u32 %v15189_v39, %v4164_v6 }
 0x514   :  { %v4167_v54 = vshrl.u32 %v4149_v21, %v4165_v48  ;;  %v4170_v24 = vadd.s32 127, %v4169_v2  ;;  %v4179_v13 = vsub.s32 4, %v15169_v23  ;;  %v4564_v16 = vmul.f32 0.5, %v4532_v22 }
 0x515   :  { %v4292_v28 = vxor.u32 2147483648, %v8657_v60  ;;  %v4295_v49 = vxor.u32 2147483648, %v8655_v25  ;;  %v4441_v12 = vsel %vm4435_vm11, %v4438_v11, %v4440_v56  ;;  %vm4288_vm9 = vweird.f32 %v16827_v31 }
 0x516   :  { %v15258_v26 = vmul.f32 0.125, %v15178_v20  ;;  %v4168_v58 = vor.u32 %v4167_v54, %v4166_v1  ;;  %v4171_v15 = vshll.u32 %v4170_v24, 23  ;;  %vm4459_vm12 = vc.u32 %v15242_v52, %v15248_v57 }
 0x517   :  { %v4563_v39 = vmul.f32 0.5, %v4531_v40  ;;  %vm4291_vm6 = vcmp.eq.s32.totalorder %v4289_v43, 0  ;;  %v753_v50 = vmul.f32 0.125, %v15224_v17  ;;  %v4460_v22 = vadd.s32 1, %v15249_v51 }
 0x518   :  { %vm4294_vm14 = vcmp.eq.s32.totalorder %v4289_v43, 2  ;;  %v4172_v18 = vor.u32 4788187, %v4171_v15  ;;  %v4180_v8 = vsel %vm4095_vm3, %v4179_v13, %v15169_v23  ;;  %v4457_v29 = vmul.u32 %v4450_v42, %v4441_v12  ;;  %v16868_v42 = vld [vmem:[#allocation118_spill] sm:$0xff] }
 0x519   :  { %v4293_v47 = vsel %vm4291_vm6, %v8655_v25, %v4292_v28  ;;  %v4296_v33 = vsel %vm4294_vm14, %v4295_v49, %v8657_v60  ;;  %v4461_v61 = vsel %vm4459_vm12, %v4460_v22, %v15249_v51  ;;  %v4314_v5 = vsub.s32 32, %v14818_v14 }
 0x51a   :  { %v16865_v21 = vand.u32 2147483647, %v16845_v53  ;;  %v4173_v4 = vand.u32 2147483647, %v4172_v18  ;;  %v4175_v48 = vcvt.s32.f32 %v4168_v58  ;;  %v4462_v2 = vadd.s32 %v4461_v61, %v4457_v29 }
 0x51b   :  { %v4596_v11 = vmul.f32 %v14976_v35, %v4564_v16  ;;  %v4595_v23 = vmul.f32 %v15153_v41, %v4563_v39  ;;  %vm4290_vm5 = vcmp.lt.s32.totalorder %v4289_v43, 2  ;;  %v4299_v25 = vand.u32 2147483647, %v16868_v42 }
 0x51c   :  { %vm15271_vm7 = vcmp.le.f32.partialorder %v16865_v21, 0.7853982  ;;  %v4297_v60 = vsel %vm4290_vm5, %v4293_v47, %v4296_v33  ;;  %v4176_v56 = vmul.f32 %v4175_v48, %v4173_v4  ;;  %v4463_v51 = vadd.s32 536870912, %v4462_v2 }
 0x51d   :  { %v4182_v40 = vsel %vm15271_vm7, 0, %v4180_v8  ;;  %v15281_v1 = vmul.f32 %v15139_v55, %v4596_v11  ;;  %v721_v54 = vfloor.f32 %v15258_v26  ;;  %v785_v24 = vfloor.f32 %v753_v50 }
 0x51e   :  { %v4317_v13 = vshrl.u32 %v16378_v34, %v4314_v5  ;;  %v15286_v35 = vmul.f32 %v15157_v36, %v4595_v23  ;;  %v4177_v41 = vxor.u32 2147483648, %v4176_v56  ;;  %v15288_v43 = vshrl.u32 %v4463_v51, 30 }
 0x51f   :  { %v4320_v16 = vshrl.u32 %v16382_v9, %v4314_v5  ;;  %v4298_v28 = vsel %vm4288_vm9, nan, %v4297_v60  ;;  %v15293_v49 = vand.u32 3, %v4182_v40  ;;  %v4306_v55 = vand.u32 8388607, %v4299_v25 }
 0x520   :  { %v4316_v12 = vshll.u32 %v16381_v7, %v14818_v14  ;;  %v4178_v36 = vsel %vm4095_vm3, %v4177_v41, %v4176_v56  ;;  %v4465_v26 = vshll.u32 %v15288_v43, 30  ;;  %v4319_v58 = vshll.u32 %v16378_v34, %v14818_v14  ;;  %v16872_v56 = vld [vmem:[#allocation52_spill] sm:$0xff] }
 0x521   :  { %v4323_v15 = vshrl.u32 %v16383_v19, %v4314_v5  ;;  %v4181_v31 = vsel %vm15271_vm7, %v16845_v53, %v4178_v36  ;;  %v4325_v50 = vshll.u32 %v16383_v19, %v14818_v14  ;;  %v4326_v22 = vshrl.u32 %v16385_v30, %v4314_v5  ;;  %v16869_v19 = vld [vmem:[#allocation74_spill] sm:$0xff] }
 0x522   :  { %v4318_v39 = vor.u32 %v4317_v13, %v4316_v12  ;;  %8658 = vcosq.f32 %v4181_v31  ;;  %v15311_v18 = vsub.s32 %v4462_v2, %v4465_v26  ;;  %v4321_v8 = vor.u32 %v4320_v16, %v4319_v58  ;;  %v6021_v2 = vld [vmem:[%s15762_s2 + $0x88] sm:$0xff] }
 0x523   :  { %v4322_v29 = vshll.u32 %v16382_v9, %v14818_v14  ;;  %8660 = vsinq.f32 %v4181_v31  ;;  %v4327_v34 = vor.u32 %v4326_v22, %v4325_v50  ;;  %v4328_v47 = vshll.u32 %v16385_v30, %v14818_v14 }
 0x524   :  { %v4329_v33 = vshrl.u32 %v16386_v59, %v4314_v5  ;;  %v5940_v61 = vmul.f32 %v16507_v63, %v15281_v1  ;;  %v15322_v21 = vadd.f32 %v14829_v38, %v16869_v19  ;;  %v4468_v6 = vsub.s32 0, %v15311_v18 }
 0x525   :  { %v4324_v4 = vor.u32 %v4323_v15, %v4322_v29  ;;  %v5939_v9 = vmul.f32 %v16511_v62, %v15286_v35  ;;  %v4534_v48 = vadd.f32 1.0, %v4298_v28  ;;  %vm15327_vm0 = vcmp.eq.f32.partialorder %v721_v54, %v785_v24 }
 0x526   :  { %vm849_vm2 = vcmp.ne.f32.partialorder %v15178_v20, %v15224_v17  ;;  %v4307_v30 = vor.u32 8388608, %v4306_v55  ;;  %v4330_v59 = vor.u32 %v4329_v33, %v4328_v47  ;;  %v7341_v14 = vmin.u32 %v4468_v6, %v15311_v18  ;;  %v6020_v17 = vld [vmem:[%s15762_s2 + $0x80] sm:$0xff] }
 0x527   :  { %v4315_v11 = vshrl.u32 %v16381_v7, %v4314_v5  ;;  %vm4331_vm8 = vcmp.lt.s32.totalorder %v14816_v32, 1  ;;  %vm4334_vm1 = vcmp.lt.s32.totalorder %v14816_v32, 4  ;;  %vm4188_vm4 = vcmp.eq.s32.totalorder %v15293_v49, 0  ;;  %vm15384_vm6 = vmand %vm15327_vm0, %vm849_vm2 }
 0x528   :  { %vm4332_vm10 = vcmp.lt.s32.totalorder %v14816_v32, 2  ;;  %vm4333_vm15 = vcmp.lt.s32.totalorder %v14816_v32, 3  ;;  %v4339_v23 = vsel %vm4331_vm8, %v4318_v39, %v4321_v8  ;;  %v4340_v60 = vsel %vm4334_vm1, %v4327_v34, 920167782 }
 0x529   :  { %vm881_vm11 = vcmp.le.f32.partialorder %v16872_v56, 4.0  ;;  %vm4187_vm3 = vcmp.lt.s32.totalorder %v15293_v49, 2  ;;  %v4470_v40 = vclz %v7341_v14  ;;  %v4336_v7 = vsel %vm4334_vm1, %v4324_v4, 2102212464  ;;  %v16875_v14 = vld [vmem:[#allocation145_spill] sm:$0xff] }
 0x52a   :  { %v4341_v5 = vsel %vm4333_vm15, %v4324_v4, %v4340_v60  ;;  %v4343_v51 = vsel %vm4331_vm8, %v4321_v8, %v4324_v4  ;;  %vm4185_vm13 = vweird.f32 %v16845_v53  ;;  %vm4191_vm9 = vcmp.eq.s32.totalorder %v15293_v49, 2  ;;  %vm945_vm7 = vmand %vm15384_vm6, %vm881_vm11  ;;  %v7459_v56 = vld [vmem:[%s15762_s2 + $0xc8] ss:$0 sm:$0xff] }
 0x52b   :  { %v4342_v54 = vsel %vm4332_vm10, %v4339_v23, %v4341_v5  ;;  %v4344_v24 = vsel %vm4334_vm1, %v4330_v59, 1326507024  ;;  %v4347_v13 = vshll.u32 %v4307_v30, 8  ;;  %v4566_v41 = vmul.f32 0.5, %v4534_v48  ;;  %v16874_v59 = vld [vmem:[#allocation144_spill] sm:$0xff] }
 0x52c   :  { %v7342_v16 = vadd.s32 4294967294, %v4470_v40  ;;  %v4335_v28 = vsel %vm4331_vm8, %v4315_v11, %v4318_v39  ;;  %v4345_v55 = vsel %vm4333_vm15, %v4327_v34, %v4344_v24  ;;  %v4337_v12 = vsel %vm4333_vm15, %v4321_v8, %v4336_v7  ;;  %v8659_v15 = vpop.eup %8658  ;;  %v16873_v8 = vld [vmem:[#allocation6_spill] sm:$0xff] }
 0x52d   :  { %v4346_v36 = vsel %vm4332_vm10, %v4343_v51, %v4345_v55  ;;  %v15360_v26 = vmul.u32.u64.low %v4347_v13, %v4342_v54  ;;  %v15361_v58 = vmul.u32.u64.high %v4347_v13, %v4342_v54, %v15360_v26  ;;  %v7958_v22 = vpack.c.bf16 %v5940_v61, %v5939_v9  ;;  %v8661_v39 = vpop.eup %8660 }
 0x52e   :  { %vm7343_vm12 = vcmp.lt.s32.totalorder %v7342_v16, 0  ;;  %v15364_v31 = vmul.u32.u64.low %v4347_v13, %v4346_v36  ;;  %v15365_v50 = vmul.u32.u64.high %v4347_v13, %v4346_v36, %v15364_v31  ;;  %v4192_v29 = vxor.u32 2147483648, %v8659_v15  ;;  %v16879_v36 = vld [vmem:[#allocation111_spill] sm:$0xff] }
 0x52f   :  { %v4458_v34 = vadd.s32 %v15248_v57, %v15242_v52  ;;  %v4473_v47 = vsel %vm7343_vm12, 0, %v7342_v16  ;;  %v5809_v33 = vadd.s32 128, %v16873_v8  ;;  %v4189_v19 = vxor.u32 2147483648, %v8661_v39  ;;  %7959 = vmatprep.subr.bf16.mxu1 %v7958_v22 }
 0x530   :  { %v4474_v6 = vsub.s32 32, %v4473_v47  ;;  %v4478_v4 = vsub.s32 4294967266, %v4473_v47  ;;  %v4338_v48 = vsel %vm4332_vm10, %v4335_v28, %v4337_v12  ;;  %v4598_v30 = vmul.f32 %v15175_v46, %v4566_v41 }
 0x531   :  { %v4193_v61 = vsel %vm4191_vm9, %v4192_v29, %v8661_v39  ;;  %v4357_v9 = vadd.s32 1, %v15361_v58  ;;  %v16876_v52 = vpack.c.bf16 %v16874_v59, %v16875_v14  ;;  %v5810_v57 = vcvt.s32.f32 %v5809_v33 }
 0x532   :  { %v4190_v46 = vsel %vm4188_vm4, %v8659_v15, %v4189_v19  ;;  %v4475_v11 = vshll.u32 %v15311_v18, %v4473_v47  ;;  %v4476_v23 = vshrl.u32 %v4458_v34, %v4474_v6  ;;  %v4479_v60 = vadd.s32 127, %v4478_v4 }
 0x533   :  { %7961 = vmatpush3.bf16.msra.mxu1 %v16876_v52  ;;  %v4194_v40 = vsel %vm4187_vm3, %v4190_v46, %v4193_v61  ;;  %v4354_v7 = vmul.u32 %v4347_v13, %v4338_v48  ;;  %vm4356_vm14 = vc.u32 %v15365_v50, %v15360_v26  ;;  %v15395_v20 = vmul.f32 0.0625, %v5810_v57  ;;  %v16882_v61 = vld [vmem:[#allocation22_spill] sm:$0xff] }
 0x534   :  { %v4195_v18 = vsel %vm4185_vm13, nan, %v4194_v40  ;;  %v4477_v5 = vor.u32 %v4476_v23, %v4475_v11  ;;  %v4480_v49 = vshll.u32 %v4479_v60, 23  ;;  %v4358_v51 = vsel %vm4356_vm14, %v4357_v9, %v15361_v58  ;;  %v16883_v9 = vld [vmem:[#allocation63_spill] sm:$0xff] }
 0x535   :  { %v4533_v54 = vadd.f32 1.0, %v4195_v18  ;;  %v4359_v24 = vadd.s32 %v4358_v51, %v4354_v7  ;;  %v5814_v13 = vfloor.f32 %v15395_v20  ;;  %v5759_v41 = vadd.f32 %v14829_v38, %v14718_v3  ;;  %v6022_v20 = vld [vmem:[%s15762_s2 + $0x90] sm:$0xff] }
 0x536   :  { %v4481_v16 = vor.u32 4788187, %v4480_v49  ;;  %v7970_v28 = vpack.c.bf16 %v6021_v2, %v6020_v17  ;;  %v15414_v53 = vmul.f32 %v15322_v21, %v4598_v30  ;;  %v7212_v58 = vsel %vm945_vm7, 1.0, %v16442_v37 }
 0x537   :  { %v4565_v55 = vmul.f32 0.5, %v4533_v54  ;;  %v4360_v12 = vadd.s32 536870912, %v4359_v24  ;;  %vm15419_vm5 = vcmp.eq.f32.partialorder %v5814_v13, %v16879_v36  ;;  %v4484_v31 = vcvt.s32.f32 %v4477_v5 }
 0x538   :  { %v4482_v15 = vand.u32 2147483647, %v4481_v16  ;;  %v8732_v22 = vmov 1.0   ;;  %7971 = vmatprep.subr.bf16.mxu0 %v7970_v28  ;;  %v5942_v39 = vmul.f32 %v16507_v63, %v15414_v53  ;;  %v500_v19 = vadd.s32 248, %v16417_v0 }
 0x539   :  { %7448 = vmatprep.mubr.msk.f32.mxu1 %vm15419_vm5, %v8732_v22  ;;  %v4597_v3 = vmul.f32 %v7212_v58, %v4565_v55  ;;  %v15427_v38 = vshrl.u32 %v4360_v12, 30  ;;  %7973 = vmatpush3.bf16.msra.mxu0 %v7970_v28  ;;  %vm4404_vm0 = vcmp.lt.s32.totalorder %v16864_v44, 0  ;;  %v16884_v59 = vpack.c.bf16 %v16882_v61, %v16883_v9 }
 0x53a   :  { %v4485_v21 = vmul.f32 %v4484_v31, %v4482_v15  ;;  %v532_v14 = vcvt.s32.f32 %v500_v19  ;;  %vm15445_vm2 = vcmp.le.f32.partialorder %v4402_v45, 0.7853982  ;;  %v499_v46 = vadd.s32 240, %v16417_v0 }
 0x53b   :  { %v15431_v29 = vmul.f32 %v5759_v41, %v4597_v3  ;;  %v4362_v34 = vshll.u32 %v15427_v38, 30  ;;  %v4355_v45 = vadd.s32 %v15360_v26, %v15365_v50  ;;  %v4488_v2 = vsub.s32 4, %v15288_v43 }
 0x53c   :  { %v4486_v8 = vxor.u32 2147483648, %v4485_v21  ;;  %v564_v23 = vmul.f32 0.0625, %v532_v14  ;;  %v531_v60 = vcvt.s32.f32 %v499_v46  ;;  %vm4301_vm1 = vcmp.lt.s32.totalorder %v16868_v42, 0 }
 0x53d   :  { %v5941_v47 = vmul.f32 %v16511_v62, %v15431_v29  ;;  %v4363_v33 = vsub.s32 %v4359_v24, %v4362_v34  ;;  %v4489_v41 = vsel %vm4404_vm0, %v4488_v2, %v15288_v43  ;;  %vm15464_vm4 = vcmp.le.f32.partialorder %v4299_v25, 0.7853982 }
 0x53e   :  { %v4487_v48 = vsel %vm4404_vm0, %v4486_v8, %v4485_v21  ;;  %v596_v18 = vfloor.f32 %v564_v23  ;;  %v563_v54 = vmul.f32 0.0625, %v531_v60  ;;  %v4491_v26 = vsel %vm15445_vm2, 0, %v4489_v41 }
 0x53f   :  { %v4365_v6 = vsub.s32 0, %v4363_v33  ;;  %v7962_v4 = vpack.c.bf16 %v5942_v39, %v5941_v47  ;;  %v4490_v32 = vsel %vm15445_vm2, %v16864_v44, %v4487_v48  ;;  %v4495_v21 = vand.u32 3, %v4491_v26 }
 0x540   :  { %8662 = vcosq.f32 %v4490_v32  ;;  %v628_v16 = vmul.f32 16.0, %v596_v18  ;;  %v595_v55 = vfloor.f32 %v563_v54  ;;  %vm4494_vm3 = vweird.f32 %v16864_v44  ;;  %v8698_v54 = vld [vmem:[%s15762_s2 + $0x58] ss:$0 sm:$0xff] }
 0x541   :  { %v7337_v30 = vmin.u32 %v4365_v6, %v4363_v33  ;;  %7963 = vmatprep.subr.bf16.mxu1 %v7962_v4  ;;  %8664 = vsinq.f32 %v4490_v32  ;;  %v4385_v4 = vsub.s32 4, %v15427_v38  ;;  %vm4497_vm10 = vcmp.eq.s32.totalorder %v4495_v21, 0 }
 0x542   :  { %7965 = vmatpush3.bf16.msra.mxu1 %v16884_v59  ;;  %v660_v31 = vsub.f32 %v532_v14, %v628_v16  ;;  %v627_v39 = vmul.f32 16.0, %v595_v55  ;;  %vm4500_vm15 = vcmp.eq.s32.totalorder %v4495_v21, 2  ;;  %vm4496_vm11 = vcmp.lt.s32.totalorder %v4495_v21, 2 }
 0x543   :  { %v4367_v57 = vclz %v7337_v30  ;;  %v4386_v25 = vsel %vm4301_vm1, %v4385_v4, %v15427_v38 }
 0x544   :  { %v756_v43 = vmul.f32 0.125, %v660_v31  ;;  %v659_v48 = vsub.f32 %v531_v60, %v627_v39  ;;  %v4388_v46 = vsel %vm15464_vm4, 0, %v4386_v25  ;;  %vm852_vm9 = vcmp.ne.f32.partialorder %v596_v18, %v660_v31  ;;  %v16891_v31 = vld [vmem:[#allocation7_spill] sm:$0xff] }
 0x545   :  { %v7338_v11 = vadd.s32 4294967294, %v4367_v57  ;;  %v691_v57 = vmul.f32 0.125, %v595_v55  ;;  %v6143_v25 = vld [vmem:[%s15762_s2 + $0xb0] sm:$0xff] }
 0x546   :  { %v788_v14 = vfloor.f32 %v756_v43  ;;  %v755_v32 = vmul.f32 0.125, %v659_v48  ;;  %vm851_vm7 = vcmp.ne.f32.partialorder %v595_v55, %v659_v48  ;;  %v16897_v43 = vld [vmem:[#allocation102_spill] sm:$0xff] }
 0x547   :  { %vm7339_vm8 = vcmp.lt.s32.totalorder %v7338_v11, 0  ;;  %v723_v23 = vfloor.f32 %v691_v57  ;;  %v6145_v57 = vld [vmem:[%s15762_s2 + $0xc0] sm:$0xff] }
 0x548   :  { %v4370_v40 = vsel %vm7339_vm8, 0, %v7338_v11  ;;  %v787_v60 = vfloor.f32 %v755_v32 }
 0x549   :  { %v4371_v7 = vsub.s32 32, %v4370_v40  ;;  %v4375_v17 = vsub.s32 4294967266, %v4370_v40  ;;  %v4372_v5 = vshll.u32 %v4363_v33, %v4370_v40  ;;  %v692_v33 = vmul.f32 0.125, %v596_v18 }
 0x54a   :  { %v8663_v12 = vpop.eup %8662  ;;  %v4392_v40 = vand.u32 3, %v4388_v46  ;;  %vm819_vm14 = vcmp.eq.f32.partialorder %v723_v23, %v787_v60  ;;  %v6236_v46 = vld [vmem:[%s15762_s2 + $0xd0] sm:$0xff]  ;;  %v7452_v60 = vld [vmem:[%s15762_s2 + $0xa0] ss:$0 sm:$0xff] }
 0x54b   :  { %v4373_v49 = vshrl.u32 %v4355_v45, %v4371_v7  ;;  %v4376_v51 = vadd.s32 127, %v4375_v17  ;;  %v8665_v15 = vpop.eup %8664  ;;  %v4501_v47 = vxor.u32 2147483648, %v8663_v12  ;;  %v724_v59 = vfloor.f32 %v692_v33  ;;  %v16889_v17 = vld [vmem:[#allocation55_spill] sm:$0xff] }
 0x54c   :  { %v4498_v34 = vxor.u32 2147483648, %v8665_v15  ;;  %vm884_vm12 = vcmp.le.f32.partialorder %v16889_v17, 4.0  ;;  %vm4397_vm0 = vcmp.eq.s32.totalorder %v4392_v40, 2  ;;  %vm4394_vm8 = vcmp.eq.s32.totalorder %v4392_v40, 0 }
 0x54d   :  { %v4374_v0 = vor.u32 %v4373_v49, %v4372_v5  ;;  %v4377_v24 = vshll.u32 %v4376_v51, 23  ;;  %v4502_v9 = vsel %vm4500_vm15, %v4501_v47, %v8665_v15  ;;  %vm820_vm13 = vcmp.eq.f32.partialorder %v724_v59, %v788_v14  ;;  %v16890_v51 = vld [vmem:[#allocation56_spill] sm:$0xff]  ;;  %v6142_v59 = vld [vmem:[%s15762_s2 + $0xa8] sm:$0xff] }
 0x54e   :  { %v4499_v61 = vsel %vm4497_vm10, %v8663_v12, %v4498_v34  ;;  %vm916_vm6 = vmand %vm820_vm13, %vm852_vm9  ;;  %vm4393_vm10 = vcmp.lt.s32.totalorder %v4392_v40, 2  ;;  %vm4391_vm15 = vweird.f32 %v16868_v42  ;;  %v16892_v47 = vld [vmem:[#allocation60_spill] sm:$0xff]  ;;  %vm15506_vm13 = vcmp.eq.f32.partialorder %v5814_v13, %v16897_v43 }
 0x54f   :  { %v4378_v28 = vor.u32 4788187, %v4377_v24  ;;  %v4381_v58 = vcvt.s32.f32 %v4374_v0  ;;  %v4503_v52 = vsel %vm4496_vm11, %v4499_v61, %v4502_v9  ;;  %vm948_vm2 = vmand %vm916_vm6, %vm884_vm12  ;;  %v5774_v0 = vadd.f32 %v8698_v54, %v14891_v27  ;;  %v6023_v13 = vld [vmem:[%s15762_s2 + $0x98] sm:$0xff] }
 0x550   :  { %v4504_v11 = vsel %vm4494_vm3, nan, %v4503_v52  ;;  %v7215_v41 = vsel %vm948_vm2, 1.0, %v16442_v37  ;;  %v7974_v19 = vpack.c.bf16 %v6023_v13, %v6022_v20  ;;  %vm16902_vm12 = vcmask 261120   ;;  %v6144_v14 = vld [vmem:[%s15762_s2 + $0xb8] sm:$0xff] }
 0x551   :  { %v4379_v50 = vand.u32 2147483647, %v4378_v28  ;;  %v4536_v45 = vadd.f32 1.0, %v4504_v11  ;;  %vm16903_vm6 = vmmov %vm16902_vm12  ;;  %v7978_v52 = vpack.c.bf16 %v6143_v25, %v6142_v59  ;;  %v7982_v32 = vpack.c.bf16 %v6145_v57, %v6144_v14  ;;  %v6237_v11 = vld [vmem:[%s15762_s2 + $0xd8] sm:$0xff]  ;;  %v8700_v25 = vld [vmem:[%s15761_s1] sm:$0xff] }
 0x552   :  { %7975 = vmatprep.subr.bf16.mxu0 %v7974_v19  ;;  %v7986_v23 = vpack.c.bf16 %v6237_v11, %v6236_v46 }
 0x553   :  { %v4382_v3 = vmul.f32 %v4381_v58, %v4379_v50  ;;  %v4568_v44 = vmul.f32 0.5, %v4536_v45  ;;  %v5769_v50 = vadd.f32 %v8698_v54, %v15040_v10  ;;  %7977 = vmatpush3.bf16.msra.mxu0 %v7974_v19 }
 0x554   :  { %7979 = vmatprep.subr.bf16.mxu0 %v7978_v52 }
 0x555   :  { %v4383_v8 = vxor.u32 2147483648, %v4382_v3  ;;  %v4600_v28 = vmul.f32 %v7215_v41, %v4568_v44 }
 0x557   :  { %v4384_v6 = vsel %vm4301_vm1, %v4383_v8, %v4382_v3  ;;  %vm883_vm1 = vcmp.le.f32.partialorder %v16890_v51, 4.0  ;;  %v15484_v12 = vmul.f32 %v5774_v0, %v4600_v28  ;;  %v5811_v3 = vmul.f32 0.0625, %v16891_v31  ;;  %v16893_v8 = vld [vmem:[#allocation65_spill] sm:$0xff] }
 0x558   :  { %v4387_v30 = vsel %vm15464_vm4, %v16868_v42, %v4384_v6  ;;  %vm915_vm4 = vmand %vm819_vm14, %vm851_vm7  ;;  %v16894_v33 = vpack.c.bf16 %v16892_v47, %v16893_v8 }
 0x559   :  { %8666 = vcosq.f32 %v4387_v30  ;;  %vm947_vm11 = vmand %vm915_vm4, %vm883_vm1  ;;  %v5944_v27 = vmul.f32 %v16507_v63, %v15484_v12  ;;  %v5813_v39 = vfloor.f32 %v5811_v3 }
 0x55a   :  { %8668 = vsinq.f32 %v4387_v30  ;;  %v7214_v58 = vsel %vm947_vm11, 1.0, %v16442_v37 }
 0x55b   :  { %vm15499_vm3 = vcmp.eq.f32.partialorder %v5813_v39, %v16879_v36  ;;  %vm15517_vm9 = vcmp.eq.f32.partialorder %v5813_v39, %v16897_v43 }
 0x563   :  { %v8667_v7 = vpop.eup %8666 }
 0x564   :  { %v8669_v38 = vpop.eup %8668  ;;  %v4398_v2 = vxor.u32 2147483648, %v8667_v7 }
 0x565   :  { %v4395_v5 = vxor.u32 2147483648, %v8669_v38 }
 0x566   :  { %v4399_v49 = vsel %vm4397_vm0, %v4398_v2, %v8669_v38  ;;  %vm16904_vm0 = vmmov %vm16903_vm6 }
 0x567   :  { %v4396_v18 = vsel %vm4394_vm8, %v8667_v7, %v4395_v5  ;;  %vm16905_vm2 = vmmov %vm16904_vm0 }
 0x568   :  { %v4400_v24 = vsel %vm4393_vm10, %v4396_v18, %v4399_v49  ;;  %vm16907_vm8 = vmmov %vm16904_vm0 }
 0x569   :  { %v4401_v16 = vsel %vm4391_vm15, nan, %v4400_v24  ;;  %vm16934_vm1 = vmmov %vm16904_vm0 }
 0x56a   :  { %v4535_v55 = vadd.f32 1.0, %v4401_v16  ;;  %vm16935_vm4 = vmmov %vm16904_vm0 }
 0x56b   :  { %vm16936_vm11 = vmmov %vm16904_vm0 }
 0x56c   :  { %v4567_v26 = vmul.f32 0.5, %v4535_v55 }
 0x56e   :  { %v4599_v15 = vmul.f32 %v7214_v58, %v4567_v26 }
 0x570   :  { %v15491_v42 = vmul.f32 %v5769_v50, %v4599_v15 }
 0x572   :  { %v5943_v21 = vmul.f32 %v16511_v62, %v15491_v42 }
 0x574   :  { %v7966_v34 = vpack.c.bf16 %v5944_v27, %v5943_v21 }
 0x576   :  { %7967 = vmatprep.subr.bf16.mxu1 %v7966_v34 }
 0x577   :  { %7969 = vmatpush3.bf16.msra.mxu1 %v16894_v33 }
 0x578   :  { %7987 = vmatprep.subr.bf16.mxu1 %v7986_v23 }
 0x57a   :  { %7449 = vmatmul.mubr.msk.f32.vlgmr.msra.gmra.mrb[32].mxu1 %vm15499_vm3, %v8732_v22 }
 0x57b   :  { %7450 = vmatprep.mubr.msk.f32.mxu1 %vm15506_vm13, %v8732_v22  ;;  %7989 = vmatpush3.bf16.msra.mxu1 %v7986_v23 }
 0x57e   :  { %7451 = vmatmul.mubr.msk.f32.gmra.mrb[34].mxu1 %vm15517_vm9, %v8732_v22 }
 0x64d   :  { %v7600_v6 = vpop.f32.mrb[32].mxu1 }
 0x64e   :  { %v7601_v4 = vpop.f32.mrb[33].mxu1 }
 0x64f   :  { %v7602_v48 = vadd.f32 %v7601_v4, %v7600_v6  ;;  %v6238_v6 = vld [vmem:[%s15762_s2 + $0xe0] sm:$0xff]  ;;  %v6239_v4 = vld [vmem:[%s15762_s2 + $0xe8] sm:$0xff] }
 0x651   :  { %v7603_v30 = vpop.f32.mrb[34].mxu1  ;;  %7827 = vmatprep.mubr.msk.f32.mxu0 %vm16902_vm12, %v7602_v48  ;;  %v7990_v48 = vpack.c.bf16 %v6239_v4, %v6238_v6  ;;  %v16923_v4 = vld [vmem:[#allocation153_spill] sm:$0xff] }
 0x652   :  { %v7604_v61 = vpop.f32.mrb[35].mxu1 }
 0x653   :  { %v7605_v9 = vadd.f32 %v7604_v61, %v7603_v30  ;;  %7991 = vmatprep.subr.bf16.mxu1 %v7990_v48  ;;  %v8699_v61 = vld [vmem:[%s15761_s1 + $0x8] sm:$0xff]  ;;  %s8734_s1 = smov 96  }
 0x654   :  { %7993 = vmatpush3.bf16.msra.mxu1 %v7990_v48 }
 0x655   :  { %7828 = vmatmul.mubr.msk.f32.vlgmr.msra.gmra.mrb[34].mxu0 %vm16903_vm6, %v7605_v9 }
 0x656   :  { %7981 = vmatpush3.bf16.msra.mxu0 %v7978_v52 }
 0x657   :  { %7983 = vmatprep.subr.bf16.mxu0 %v7982_v32 }
 0x65a   :  { %7985 = vmatpush3.bf16.msra.mxu0 %v7982_v32 }
 0x728   :  { %v7829_v40 = vpop.f32.mrb[34].mxu0 }
 0x729   :  { %v6107_v45 = vadd.f32 %v7829_v40, %v7452_v60  ;;  %v6101_v7 = vpop.f32.mrb[35].mxu0 }
 0x72a   :  { %v6102_v17 = vadd.f32 %v7452_v60, %v6101_v7  ;;  %v16908_v60 = vld [vmem:[#allocation72_spill] sm:$0xff] }
 0x72b   :  { %v6113_v38 = vand.u32 2147483647, %v6107_v45  ;;  %v6111_v21 = vmax.f32 %v6107_v45, 0.0  ;;  %v16909_v45 = vld [vmem:[#allocation71_spill] sm:$0xff] }
 0x72c   :  { %v6112_v2 = vand.u32 2147483647, %v6102_v17  ;;  %v6110_v8 = vmax.f32 %v6102_v17, 0.0  ;;  %v16910_v17 = vld [vmem:[#allocation23_spill] sm:$0xff] }
 0x72d   :  { %v6115_v5 = vsub.f32 0.0, %v6113_v38 }
 0x72e   :  { %v6114_v44 = vsub.f32 0.0, %v6112_v2  ;;  %v16911_v2 = vld [vmem:[#allocation47_spill] sm:$0xff] }
 0x72f   :  { %v6118_v49 = vmul.f32 1.442695, %v6115_v5 }
 0x730   :  { %v6116_v51 = vmul.f32 1.442695, %v6114_v44  ;;  %v16912_v44 = vld [vmem:[#allocation53_spill] sm:$0xff] }
 0x731   :  { %8670 = vpow2.f32 %v6118_v49 }
 0x732   :  { %8672 = vpow2.f32 %v6116_v51  ;;  %v16913_v51 = vld [vmem:[#allocation19_spill] sm:$0xff] }
 0x73b   :  { %v8671_v18 = vpop.eup %8670 }
 0x73c   :  { %v8673_v54 = vpop.eup %8672  ;;  %v6129_v0 = vadd.f32 1.0, %v8671_v18  ;;  %v6132_v41 = vmul.f32 -0.5, %v8671_v18  ;;  %v6135_v55 = vand.u32 2147483647, %v8671_v18 }
 0x73d   :  { %v6120_v24 = vadd.f32 1.0, %v8673_v54  ;;  %v6123_v16 = vmul.f32 -0.5, %v8673_v54  ;;  %v6126_v50 = vand.u32 2147483647, %v8673_v54 }
 0x73e   :  { %8674 = vlog2.f32 %v6129_v0  ;;  %v6133_v28 = vadd.f32 1.0, %v6132_v41  ;;  %vm6136_vm14 = vcmp.lt.f32.partialorder %v6135_v55, 0.0004427343  ;;  %v16916_v55 = vld [vmem:[#allocation139_spill] sm:$0xff] }
 0x73f   :  { %8676 = vlog2.f32 %v6120_v24  ;;  %v6124_v26 = vadd.f32 1.0, %v6123_v16  ;;  %vm6127_vm7 = vcmp.lt.f32.partialorder %v6126_v50, 0.0004427343  ;;  %v16914_v24 = vld [vmem:[#allocation75_spill] sm:$0xff]  ;;  %v16915_v16 = vld [vmem:[#allocation68_spill] sm:$0xff] }
 0x740   :  { %v6134_v27 = vmul.f32 %v8671_v18, %v6133_v28  ;;  %v16917_v50 = vld [vmem:[#allocation136_spill] sm:$0xff] }
 0x741   :  { %v6125_v34 = vmul.f32 %v8673_v54, %v6124_v26 }
 0x748   :  { %v8675_v58 = vpop.eup %8674 }
 0x749   :  { %v8677_v15 = vpop.eup %8676  ;;  %v6131_v3 = vmul.f32 0.6931472, %v8675_v58 }
 0x74a   :  { %v6122_v39 = vmul.f32 0.6931472, %v8677_v15 }
 0x74b   :  { %v6137_v47 = vsel %vm6136_vm14, %v6134_v27, %v6131_v3  ;;  %v16918_v27 = vld [vmem:[#allocation73_spill] sm:$0xff]  ;;  %vm16940_vm14 = vcmask 130048  }
 0x74c   :  { %v6139_v33 = vadd.f32 %v6137_v47, %v6111_v21  ;;  %v6128_v43 = vsel %vm6127_vm7, %v6125_v34, %v6122_v39  ;;  %v16919_v39 = vld [vmem:[#allocation69_spill] sm:$0xff]  ;;  %v16920_v47 = vld [vmem:[#allocation142_spill] sm:$0xff]  ;;  %vm16941_vm7 = vmmov %vm16940_vm14 }
 0x74d   :  { %v6138_v20 = vadd.f32 %v6128_v43, %v6110_v8 }
 0x74e   :  { %v7456_v19 = vadd.f32 -0.6931472, %v6139_v33  ;;  %v16921_v33 = vld [vmem:[#allocation146_spill] sm:$0xff] }
 0x74f   :  { %v7455_v13 = vadd.f32 -0.6931472, %v6138_v20 }
 0x751   :  { %7838 = vmatprep.mubr.msk.f32.mxu0 %vm16904_vm0, %v7455_v13 }
 0x752   :  { %7839 = vmatmul.mubr.msk.f32.vlgmr.msra.gmra.mrb[36].mxu0 %vm16905_vm2, %v7456_v19  ;;  %v16922_v19 = vld [vmem:[#allocation50_spill] sm:$0xff] }
 0x753   :  { %7462 = vmatprep.mubr.msk.f32.mxu0 %vm15419_vm5, %v8732_v22  ;;  %vm16906_vm5 = vmmov %vm16904_vm0 }
 0x825   :  { %v7840_v30 = vpop.f32.mrb[36].mxu0 }
 0x826   :  { %v6228_v9 = vadd.f32 %v8699_v61, %v7840_v30  ;;  %v6218_v59 = vpop.f32.mrb[37].mxu0 }
 0x827   :  { %v6227_v14 = vadd.f32 %v8700_v25, %v6218_v59  ;;  %v16924_v59 = vld [vmem:[#allocation133_spill] sm:$0xff] }
 0x828   :  { %v15575_v57 = vadd.f32 %v7459_v56, %v6228_v9 }
 0x829   :  { %v15573_v52 = vadd.f32 %v7459_v56, %v6227_v14  ;;  %v16925_v14 = vld [vmem:[#allocation140_spill] sm:$0xff] }
 0x82b   :  { %7849 = vmatprep.mubr.msk.f32.mxu1 %vm16906_vm5, %v15573_v52  ;;  %vm16942_vm5 = vmmov %vm16941_vm7 }
 0x82c   :  { %7850 = vmatmul.mubr.msk.f32.vlgmr.msra.gmra.mrb[36].mxu1 %vm16907_vm8, %v15575_v57  ;;  %vm16943_vm8 = vmmov %vm16934_vm1 }
 0x8ff   :  { %v7851_v32 = vpop.f32.mrb[36].mxu1 }
 0x900   :  { %6325 = vrot.lane.b32.xlu1 %v7851_v32, %s8733_s10  ;;  %v6312_v46 = vpop.f32.mrb[37].mxu1 }
 0x901   :  { %6323 = vrot.lane.b32.xlu0 %v6312_v46, %s8733_s10 }
 0x972   :  { %v15581_v11 = vpop.permute.xlu1 %6325 }
 0x973   :  { %v6324_v23 = vpop.permute.xlu0 %6323  ;;  %v6348_v40 = vmul.f32 %v15581_v11, %v16908_v60  ;;  %v6346_v7 = vmul.f32 %v15581_v11, %v16909_v45  ;;  %v6350_v49 = vmul.f32 %v15581_v11, %v16912_v44  ;;  %v6330_v18 = vmul.f32 %v15581_v11, %v16913_v51  ;;  %v16926_v45 = vld [vmem:[#allocation154_spill] sm:$0xff] }
 0x974   :  { %v6347_v38 = vmul.f32 %v6324_v23, %v16910_v17  ;;  %v6345_v5 = vmul.f32 %v6324_v23, %v16911_v2  ;;  %v6349_v41 = vmul.f32 %v6324_v23, %v16914_v24  ;;  %v6329_v28 = vmul.f32 %v6324_v23, %v16915_v16  ;;  %v16927_v17 = vld [vmem:[#allocation149_spill] sm:$0xff]  ;;  %v16928_v44 = vld [vmem:[#allocation34_spill] sm:$0xff]  ;;  %v16932_v16 = vld [vmem:[#allocation16_spill] sm:$0xff] }
 0x975   :  { %v6351_v26 = vmul.f32 %v6324_v23, %v16916_v55  ;;  %v6352_v58 = vmul.f32 %v15581_v11, %v16917_v50  ;;  %v6331_v21 = vmul.f32 %v6324_v23, %v16918_v27  ;;  %v6332_v34 = vmul.f32 %v15581_v11, %v16919_v39  ;;  %v16933_v55 = vld [vmem:[#allocation15_spill] sm:$0xff] }
 0x976   :  { %v8215_v54 = vpack.i.bf16 %v6348_v40, %v6347_v38  ;;  %v8205_v0 = vpack.i.bf16 %v6346_v7, %v6345_v5  ;;  %v8225_v15 = vpack.i.bf16 %v6350_v49, %v6349_v41  ;;  %v8210_v3 = vpack.i.bf16 %v6330_v18, %v6329_v28  ;;  %v16929_v49 = vld [vmem:[#allocation59_spill] sm:$0xff]  ;;  %v16931_v41 = vld [vmem:[#allocation58_spill] sm:$0xff] }
 0x977   :  { %v6353_v8 = vmul.f32 %v6324_v23, %v16920_v47  ;;  %v6354_v43 = vmul.f32 %v15581_v11, %v16921_v33  ;;  %v8235_v20 = vpack.i.bf16 %v6352_v58, %v6351_v26  ;;  %v8220_v13 = vpack.i.bf16 %v6332_v34, %v6331_v21  ;;  %v6564_v58 = vld [vmem:[%s15762_s2 + $0xf0] sm:$0xff] }
 0x978   :  { %8216 = vrot.lane.b32.xlu0 %v8215_v54, %s8734_s1  ;;  %8206 = vrot.lane.b32.xlu1 %v8205_v0, %s8734_s1  ;;  %v6333_v6 = vmul.f32 %v6324_v23, %v16922_v19  ;;  %v6334_v48 = vmul.f32 %v15581_v11, %v16923_v4  ;;  %v6355_v61 = vmul.f32 %v6324_v23, %v15286_v35  ;;  %v16930_v0 = vld [vmem:[#allocation5_spill] sm:$0xff] }
 0x979   :  { %v8245_v30 = vpack.i.bf16 %v6354_v43, %v6353_v8  ;;  %v6356_v56 = vmul.f32 %v15581_v11, %v15281_v1  ;;  %v6335_v25 = vmul.f32 %v6324_v23, %v16924_v59  ;;  %v6336_v32 = vmul.f32 %v15581_v11, %v16925_v14 }
 0x97a   :  { %v8230_v9 = vpack.i.bf16 %v6334_v48, %v6333_v6  ;;  %v6357_v46 = vmul.f32 %v6324_v23, %v15431_v29  ;;  %v6358_v60 = vmul.f32 %v15581_v11, %v15414_v53  ;;  %v6337_v7 = vmul.f32 %v6324_v23, %v16926_v45 }
 0x97b   :  { %v8255_v40 = vpack.i.bf16 %v6356_v56, %v6355_v61  ;;  %v8240_v35 = vpack.i.bf16 %v6336_v32, %v6335_v25  ;;  %v6338_v1 = vmul.f32 %v15581_v11, %v16927_v17  ;;  %v6359_v2 = vmul.f32 %v6324_v23, %v15491_v42 }
 0x97c   :  { %8226 = vrot.lane.b32.xlu0 %v8225_v15, %s8734_s1  ;;  %8211 = vrot.lane.b32.xlu1 %v8210_v3, %s8734_s1  ;;  %v8265_v38 = vpack.i.bf16 %v6358_v60, %v6357_v46  ;;  %v6360_v29 = vmul.f32 %v15581_v11, %v15484_v12  ;;  %v6339_v53 = vmul.f32 %v6324_v23, %v16928_v44  ;;  %v6565_v15 = vld [vmem:[%s15762_s2 + $0xf8] sm:$0xff] }
 0x97d   :  { %v8250_v5 = vpack.i.bf16 %v6338_v1, %v6337_v7  ;;  %v6340_v51 = vmul.f32 %v15581_v11, %v16929_v49  ;;  %v6341_v24 = vmul.f32 %v6324_v23, %v16930_v0  ;;  %v6342_v42 = vmul.f32 %v15581_v11, %v16931_v41 }
 0x97e   :  { %v8275_v18 = vpack.i.bf16 %v6360_v29, %v6359_v2  ;;  %v6343_v28 = vmul.f32 %v6324_v23, %v16932_v16  ;;  %v6344_v26 = vmul.f32 %v15581_v11, %v16933_v55  ;;  %v8026_v3 = vpack.c.bf16 %v6565_v15, %v6564_v58 }
 0x97f   :  { %v8260_v54 = vpack.i.bf16 %v6340_v51, %v6339_v53  ;;  %v8270_v12 = vpack.i.bf16 %v6342_v42, %v6341_v24 }
 0x980   :  { %8236 = vrot.lane.b32.xlu0 %v8235_v20, %s8734_s1  ;;  %8221 = vrot.lane.b32.xlu1 %v8220_v13, %s8734_s1  ;;  %v8280_v50 = vpack.i.bf16 %v6344_v26, %v6343_v28 }
 0x981   :  { %8027 = vmatprep.subr.bf16.mxu1 %v8026_v3 }
 0x982   :  { %8029 = vmatpush3.bf16.msra.mxu1 %v8026_v3 }
 0x984   :  { %8246 = vrot.lane.b32.xlu0 %v8245_v30, %s8734_s1  ;;  %8231 = vrot.lane.b32.xlu1 %v8230_v9, %s8734_s1 }
 0x988   :  { %8256 = vrot.lane.b32.xlu0 %v8255_v40, %s8734_s1  ;;  %8241 = vrot.lane.b32.xlu1 %v8240_v35, %s8734_s1 }
 0x98c   :  { %8266 = vrot.lane.b32.xlu0 %v8265_v38, %s8734_s1  ;;  %8251 = vrot.lane.b32.xlu1 %v8250_v5, %s8734_s1 }
 0x990   :  { %8276 = vrot.lane.b32.xlu0 %v8275_v18, %s8734_s1  ;;  %8261 = vrot.lane.b32.xlu1 %v8260_v54, %s8734_s1 }
 0x994   :  { %8271 = vrot.lane.b32.xlu1 %v8270_v12, %s8734_s1 }
 0x998   :  { %8281 = vrot.lane.b32.xlu1 %v8280_v50, %s8734_s1 }
 0x9ea   :  { %v8217_v23 = vpop.permute.xlu0 %8216  ;;  %v8207_v27 = vpop.permute.xlu1 %8206 }
 0x9eb   :  { %v8209_v21 = vunpack.i.h.bf16 %v8207_v27  ;;  %v8208_v11 = vunpack.i.l.bf16 %v8207_v27  ;;  %v8219_v34 = vunpack.i.h.bf16 %v8217_v23  ;;  %v8218_v47 = vunpack.i.l.bf16 %v8217_v23 }
 0x9ed   :  { %v7994_v39 = vpack.c.bf16 %v8209_v21, %v8208_v11  ;;  %v7998_v19 = vpack.c.bf16 %v8219_v34, %v8218_v47 }
 0x9ee   :  { %v8227_v8 = vpop.permute.xlu0 %8226  ;;  %v8212_v33 = vpop.permute.xlu1 %8211 }
 0x9ef   :  { %v8214_v43 = vunpack.i.h.bf16 %v8212_v33  ;;  %v8213_v20 = vunpack.i.l.bf16 %v8212_v33  ;;  %7995 = vmatprep.subr.bf16.mxu0 %v7994_v39  ;;  %v8229_v6 = vunpack.i.h.bf16 %v8227_v8  ;;  %v8228_v4 = vunpack.i.l.bf16 %v8227_v8 }
 0x9f1   :  { %v7996_v13 = vpack.c.bf16 %v8214_v43, %v8213_v20  ;;  %v8002_v59 = vpack.c.bf16 %v8229_v6, %v8228_v4  ;;  %v6566_v43 = vld [vmem:[%s15762_s2 + $0x100] sm:$0xff]  ;;  %v6567_v20 = vld [vmem:[%s15762_s2 + $0x108] sm:$0xff] }
 0x9f2   :  { %v8237_v48 = vpop.permute.xlu0 %8236  ;;  %v8222_v30 = vpop.permute.xlu1 %8221 }
 0x9f3   :  { %v8224_v61 = vunpack.i.h.bf16 %v8222_v30  ;;  %v8223_v9 = vunpack.i.l.bf16 %v8222_v30  ;;  %7997 = vmatpush3.bf16.msra.mxu0 %v7996_v13  ;;  %v8239_v25 = vunpack.i.h.bf16 %v8237_v48  ;;  %v8238_v14 = vunpack.i.l.bf16 %v8237_v48  ;;  %v6687_v48 = vld [vmem:[%s15762_s2 + $0x120] sm:$0xff]  ;;  %v6688_v30 = vld [vmem:[%s15762_s2 + $0x128] sm:$0xff] }
 0x9f4   :  { %7999 = vmatprep.subr.bf16.mxu0 %v7998_v19  ;;  %v8030_v13 = vpack.c.bf16 %v6567_v20, %v6566_v43 }
 0x9f5   :  { %v8000_v56 = vpack.c.bf16 %v8224_v61, %v8223_v9  ;;  %v8006_v45 = vpack.c.bf16 %v8239_v25, %v8238_v14  ;;  %v6689_v9 = vld [vmem:[%s15762_s2 + $0x130] sm:$0xff]  ;;  %v6781_v25 = vld [vmem:[%s15762_s2 + $0x148] sm:$0xff] }
 0x9f6   :  { %v8247_v32 = vpop.permute.xlu0 %8246  ;;  %v8232_v46 = vpop.permute.xlu1 %8231  ;;  %8031 = vmatprep.subr.bf16.mxu1 %v8030_v13 }
 0x9f7   :  { %v8234_v60 = vunpack.i.h.bf16 %v8232_v46  ;;  %v8233_v40 = vunpack.i.l.bf16 %v8232_v46  ;;  %8001 = vmatpush3.bf16.msra.mxu0 %v8000_v56  ;;  %v8249_v7 = vunpack.i.h.bf16 %v8247_v32  ;;  %v8248_v17 = vunpack.i.l.bf16 %v8247_v32  ;;  %8033 = vmatpush3.bf16.msra.mxu1 %v8030_v13  ;;  %v7466_v32 = vld [vmem:[%s15762_s2 + $0x110] ss:$0 sm:$0xff] }
 0x9f8   :  { %8003 = vmatprep.subr.bf16.mxu0 %v8002_v59  ;;  %v8038_v56 = vpack.c.bf16 %v6689_v9, %v6688_v30  ;;  %v6780_v59 = vld [vmem:[%s15762_s2 + $0x140] sm:$0xff] }
 0x9f9   :  { %v8004_v35 = vpack.c.bf16 %v8234_v60, %v8233_v40  ;;  %v8010_v44 = vpack.c.bf16 %v8249_v7, %v8248_v17  ;;  %v8042_v14 = vpack.c.bf16 %v6781_v25, %v6780_v59 }
 0x9fa   :  { %v8257_v1 = vpop.permute.xlu0 %8256  ;;  %v8242_v38 = vpop.permute.xlu1 %8241 }
 0x9fb   :  { %v8244_v2 = vunpack.i.h.bf16 %v8242_v38  ;;  %v8243_v5 = vunpack.i.l.bf16 %v8242_v38  ;;  %8005 = vmatpush3.bf16.msra.mxu0 %v8004_v35  ;;  %v8259_v53 = vunpack.i.h.bf16 %v8257_v1  ;;  %v8258_v49 = vunpack.i.l.bf16 %v8257_v1 }
 0x9fc   :  { %8007 = vmatprep.subr.bf16.mxu0 %v8006_v45 }
 0x9fd   :  { %v8008_v29 = vpack.c.bf16 %v8244_v2, %v8243_v5  ;;  %v8014_v41 = vpack.c.bf16 %v8259_v53, %v8258_v49 }
 0x9fe   :  { %v8267_v51 = vpop.permute.xlu0 %8266  ;;  %v8252_v18 = vpop.permute.xlu1 %8251 }
 0x9ff   :  { %v8254_v54 = vunpack.i.h.bf16 %v8252_v18  ;;  %v8253_v0 = vunpack.i.l.bf16 %v8252_v18  ;;  %8009 = vmatpush3.bf16.msra.mxu0 %v8008_v29  ;;  %v8269_v42 = vunpack.i.h.bf16 %v8267_v51  ;;  %v8268_v12 = vunpack.i.l.bf16 %v8267_v51 }
 0xa00   :  { %8011 = vmatprep.subr.bf16.mxu0 %v8010_v44 }
 0xa01   :  { %v8012_v24 = vpack.c.bf16 %v8254_v54, %v8253_v0  ;;  %v8018_v58 = vpack.c.bf16 %v8269_v42, %v8268_v12 }
 0xa02   :  { %v8262_v16 = vpop.permute.xlu1 %8261  ;;  %v8277_v28 = vpop.permute.xlu0 %8276 }
 0xa03   :  { %v8264_v55 = vunpack.i.h.bf16 %v8262_v16  ;;  %v8263_v26 = vunpack.i.l.bf16 %v8262_v16  ;;  %8013 = vmatpush3.bf16.msra.mxu0 %v8012_v24  ;;  %v8279_v15 = vunpack.i.h.bf16 %v8277_v28  ;;  %v8278_v3 = vunpack.i.l.bf16 %v8277_v28 }
 0xa04   :  { %8015 = vmatprep.subr.bf16.mxu0 %v8014_v41 }
 0xa05   :  { %v8016_v50 = vpack.c.bf16 %v8264_v55, %v8263_v26  ;;  %v8022_v39 = vpack.c.bf16 %v8279_v15, %v8278_v3 }
 0xa06   :  { %v8272_v23 = vpop.permute.xlu1 %8271 }
 0xa07   :  { %v8274_v27 = vunpack.i.h.bf16 %v8272_v23  ;;  %v8273_v21 = vunpack.i.l.bf16 %v8272_v23  ;;  %8017 = vmatpush3.bf16.msra.mxu0 %v8016_v50 }
 0xa08   :  { %8019 = vmatprep.subr.bf16.mxu0 %v8018_v58 }
 0xa09   :  { %v8020_v11 = vpack.c.bf16 %v8274_v27, %v8273_v21 }
 0xa0a   :  { %v8282_v34 = vpop.permute.xlu1 %8281 }
 0xa0b   :  { %v8284_v47 = vunpack.i.h.bf16 %v8282_v34  ;;  %v8283_v8 = vunpack.i.l.bf16 %v8282_v34  ;;  %8021 = vmatpush3.bf16.msra.mxu0 %v8020_v11  ;;  %v6782_v11 = vld [vmem:[%s15762_s2 + $0x150] sm:$0xff] }
 0xa0c   :  { %8023 = vmatprep.subr.bf16.mxu0 %v8022_v39  ;;  %v6783_v39 = vld [vmem:[%s15762_s2 + $0x158] sm:$0xff] }
 0xa0d   :  { %v8024_v33 = vpack.c.bf16 %v8284_v47, %v8283_v8  ;;  %v8046_v34 = vpack.c.bf16 %v6783_v39, %v6782_v11  ;;  %v7089_v39 = vld [vmem:[%s15762_s2 + $0x1a8] sm:$0xff] }
 0xa0f   :  { %8025 = vmatpush3.bf16.msra.mxu0 %v8024_v33  ;;  %v7473_v33 = vld [vmem:[%s15762_s2 + $0x138] ss:$0 sm:$0xff] }
 0xa12   :  { %7463 = vmatmul.mubr.msk.f32.vlgmr.msra.gmra.mrb[38].mxu0 %vm15499_vm3, %v8732_v22  ;;  %vm16937_vm3 = vmmov %vm16904_vm0 }
 0xa13   :  { %7464 = vmatprep.mubr.msk.f32.mxu0 %vm15506_vm13, %v8732_v22  ;;  %vm16938_vm13 = vmmov %vm16904_vm0 }
 0xa16   :  { %7465 = vmatmul.mubr.msk.f32.gmra.mrb[40].mxu0 %vm15517_vm9, %v8732_v22  ;;  %v6686_v22 = vld [vmem:[%s15762_s2 + $0x118] sm:$0xff]  ;;  %vm16939_vm9 = vmmov %vm16904_vm0  ;;  %vm8736_vm0 = vmmov 0  }
 0xa17   :  { %v8034_v61 = vpack.c.bf16 %v6687_v48, %v6686_v22  ;;  %7907 = vmatprep.mubr.msk.f32.mxu0 %vm8736_vm0, %v16442_v37 }
 0xa19   :  { %8035 = vmatprep.subr.bf16.mxu1 %v8034_v61 }
 0xae5   :  { %v7656_v10 = vpop.f32.mrb[38].mxu0 }
 0xae6   :  { %v7657_v19 = vpop.f32.mrb[39].mxu0 }
 0xae7   :  { %v7658_v6 = vadd.f32 %v7657_v19, %v7656_v10  ;;  %v6902_v19 = vld [vmem:[%s15762_s2 + $0x168] sm:$0xff] }
 0xae9   :  { %v7659_v63 = vpop.f32.mrb[40].mxu0  ;;  %7860 = vmatprep.mubr.msk.f32.mxu1 %vm16934_vm1, %v7658_v6  ;;  %vm7168_vm1 = vcmask 25600  }
 0xaea   :  { %v7660_v4 = vpop.f32.mrb[41].mxu0 }
 0xaeb   :  { %v7661_v62 = vadd.f32 %v7660_v4, %v7659_v63 }
 0xaed   :  { %7861 = vmatmul.mubr.msk.f32.vlgmr.msra.gmra.mrb[38].mxu1 %vm16935_vm4, %v7661_v62 }
 0xaee   :  { %8037 = vmatpush3.bf16.msra.mxu1 %v8034_v61 }
 0xaef   :  { %8039 = vmatprep.subr.bf16.mxu1 %v8038_v56 }
 0xaf2   :  { %8041 = vmatpush3.bf16.msra.mxu1 %v8038_v56 }
 0xaf3   :  { %8043 = vmatprep.subr.bf16.mxu1 %v8042_v14 }
 0xbc0   :  { %v7862_v46 = vpop.f32.mrb[38].mxu1 }
 0xbc1   :  { %v6651_v60 = vadd.f32 %v7862_v46, %v7466_v32  ;;  %v6645_v40 = vpop.f32.mrb[39].mxu1 }
 0xbc2   :  { %v6646_v35 = vadd.f32 %v7466_v32, %v6645_v40 }
 0xbc3   :  { %v6657_v45 = vand.u32 2147483647, %v6651_v60  ;;  %v6655_v28 = vmax.f32 %v6651_v60, 0.0 }
 0xbc4   :  { %v6656_v7 = vand.u32 2147483647, %v6646_v35  ;;  %v6654_v58 = vmax.f32 %v6646_v35, 0.0 }
 0xbc5   :  { %v6659_v17 = vsub.f32 0.0, %v6657_v45 }
 0xbc6   :  { %v6658_v1 = vsub.f32 0.0, %v6656_v7 }
 0xbc7   :  { %v6662_v38 = vmul.f32 1.442695, %v6659_v17 }
 0xbc8   :  { %v6660_v2 = vmul.f32 1.442695, %v6658_v1 }
 0xbc9   :  { %8678 = vpow2.f32 %v6662_v38 }
 0xbca   :  { %8680 = vpow2.f32 %v6660_v2 }
 0xbd3   :  { %v8679_v5 = vpop.eup %8678 }
 0xbd4   :  { %v8681_v29 = vpop.eup %8680  ;;  %v6673_v44 = vadd.f32 1.0, %v8679_v5  ;;  %v6676_v49 = vmul.f32 -0.5, %v8679_v5  ;;  %v6679_v54 = vand.u32 2147483647, %v8679_v5 }
 0xbd5   :  { %v6664_v53 = vadd.f32 1.0, %v8681_v29  ;;  %v6667_v51 = vmul.f32 -0.5, %v8681_v29  ;;  %v6670_v24 = vand.u32 2147483647, %v8681_v29 }
 0xbd6   :  { %8682 = vlog2.f32 %v6673_v44  ;;  %v6677_v18 = vadd.f32 1.0, %v6676_v49  ;;  %vm6680_vm10 = vcmp.lt.f32.partialorder %v6679_v54, 0.0004427343 }
 0xbd7   :  { %8684 = vlog2.f32 %v6664_v53  ;;  %v6668_v0 = vadd.f32 1.0, %v6667_v51  ;;  %vm6671_vm15 = vcmp.lt.f32.partialorder %v6670_v24, 0.0004427343 }
 0xbd8   :  { %v6678_v16 = vmul.f32 %v8679_v5, %v6677_v18 }
 0xbd9   :  { %v6669_v26 = vmul.f32 %v8681_v29, %v6668_v0 }
 0xbe0   :  { %v8683_v41 = vpop.eup %8682 }
 0xbe1   :  { %v8685_v42 = vpop.eup %8684  ;;  %v6675_v12 = vmul.f32 0.6931472, %v8683_v41 }
 0xbe2   :  { %v6666_v55 = vmul.f32 0.6931472, %v8685_v42  ;;  %v8735_v42 = vmov 0.0|0.0  }
 0xbe3   :  { %v6681_v50 = vsel %vm6680_vm10, %v6678_v16, %v6675_v12  ;;  %8057 = vmatprep.subr.bf16.mxu0 %v8735_v42  ;;  %v8737_v12 = vmov 0   ;;  %v6990_v16 = vmul.f32 0.125, %v16891_v31  ;;  %v7086_v31 = vld [vmem:[%s15762_s2 + $0x190] sm:$0xff] }
 0xbe4   :  { %v6683_v15 = vadd.f32 %v6681_v50, %v6655_v28  ;;  %v6672_v3 = vsel %vm6671_vm15, %v6669_v26, %v6666_v55  ;;  %8285 = vset.pattern.permute.xlu0 %v8737_v12  ;;  %v7479_v28 = vld [vmem:[%s15762_s2 + $0x178] ss:$0 sm:$0xff] }
 0xbe5   :  { %v6682_v23 = vadd.f32 %v6672_v3, %v6654_v58  ;;  %v6991_v55 = vfloor.f32 %v6990_v16 }
 0xbe6   :  { %v7470_v21 = vadd.f32 -0.6931472, %v6683_v15 }
 0xbe7   :  { %v7469_v27 = vadd.f32 -0.6931472, %v6682_v23  ;;  %vm6992_vm2 = vcmp.eq.f32.partialorder %v6991_v55, %v16879_v36 }
 0xbe8   :  { %v7482_v23 = vsel %vm6992_vm2, 1.0, %v16442_v37 }
 0xbe9   :  { %7871 = vmatprep.mubr.msk.f32.mxu1 %vm16936_vm11, %v7469_v27  ;;  %v7087_v27 = vld [vmem:[%s15762_s2 + $0x198] sm:$0xff] }
 0xbea   :  { %7872 = vmatmul.mubr.msk.f32.vlgmr.msra.gmra.mrb[40].mxu1 %vm16937_vm3, %v7470_v21  ;;  %v8058_v21 = vpack.c.bf16 %v7087_v27, %v7086_v31 }
 0xbeb   :  { %8045 = vmatpush3.bf16.msra.mxu1 %v8042_v14 }
 0xbec   :  { %8047 = vmatprep.subr.bf16.mxu1 %v8046_v34  ;;  %8059 = vmatpush3.bf16.msra.mxu0 %v8058_v21 }
 0xbed   :  { %8060 = vmatprep.subr.bf16.mxu0 %v8735_v42 }
 0xbef   :  { %8049 = vmatpush3.bf16.msra.mxu1 %v8046_v34 }
 0xcbd   :  { %v7873_v47 = vpop.f32.mrb[40].mxu1 }
 0xcbe   :  { %v6772_v8 = vadd.f32 %v7873_v47, %v15575_v57  ;;  %v6762_v43 = vpop.f32.mrb[41].mxu1  ;;  %v6903_v57 = vld [vmem:[%s15762_s2 + $0x170] sm:$0xff]  ;;  %v7484_v47 = vld [vmem:[%s15762_s2 + $0x180] ss:$0 sm:$0xff] }
 0xcbf   :  { %v6771_v20 = vadd.f32 %v6762_v43, %v15573_v52  ;;  %v8050_v6 = vpack.c.bf16 %v6903_v57, %v6902_v19  ;;  %v7474_v52 = vld [vmem:[%s15762_s2 + $0x160] ss:$0 sm:$0xff] }
 0xcc0   :  { %v6779_v10 = vadd.f32 %v7473_v33, %v6772_v8  ;;  %v7485_v8 = vld [vmem:[%s15762_s2 + $0x188] ss:$0 sm:$0xff] }
 0xcc1   :  { %v6778_v13 = vadd.f32 %v7473_v33, %v6771_v20  ;;  %8051 = vmatprep.subr.bf16.mxu1 %v8050_v6 }
 0xcc3   :  { %7882 = vmatprep.mubr.msk.f32.mxu1 %vm16938_vm13, %v6778_v13 }
 0xcc4   :  { %7883 = vmatmul.mubr.msk.f32.vlgmr.msra.gmra.mrb[42].mxu1 %vm16939_vm9, %v6779_v10  ;;  %v7486_v10 = vld [vmem:[%s15762_s2 + $0x1b0] ss:$0 sm:$0xff] }
 0xcc5   :  { %8053 = vmatpush3.bf16.msra.mxu1 %v8050_v6 }
 0xcc6   :  { %8054 = vmatprep.subr.bf16.mxu1 %v8735_v42 }
 0xd97   :  { %v7884_v63 = vpop.f32.mrb[42].mxu1 }
 0xd98   :  { %v6867_v4 = vadd.f32 %v7884_v63, %v7474_v52  ;;  %v6861_v62 = vpop.f32.mrb[43].mxu1 }
 0xd99   :  { %v6862_v22 = vadd.f32 %v7474_v52, %v6861_v62 }
 0xd9a   :  { %v6873_v48 = vand.u32 2147483647, %v6867_v4  ;;  %v6871_v29 = vmax.f32 %v6867_v4, 0.0 }
 0xd9b   :  { %v6872_v30 = vand.u32 2147483647, %v6862_v22  ;;  %v6870_v51 = vmax.f32 %v6862_v22, 0.0 }
 0xd9c   :  { %v6875_v61 = vsub.f32 0.0, %v6873_v48 }
 0xd9d   :  { %v6874_v9 = vsub.f32 0.0, %v6872_v30 }
 0xd9e   :  { %v6878_v56 = vmul.f32 1.442695, %v6875_v61 }
 0xd9f   :  { %v6876_v59 = vmul.f32 1.442695, %v6874_v9 }
 0xda0   :  { %8686 = vpow2.f32 %v6878_v56 }
 0xda1   :  { %8688 = vpow2.f32 %v6876_v59 }
 0xdaa   :  { %v8687_v25 = vpop.eup %8686 }
 0xdab   :  { %v8689_v14 = vpop.eup %8688  ;;  %v6889_v32 = vadd.f32 1.0, %v8687_v25  ;;  %v6892_v60 = vmul.f32 -0.5, %v8687_v25  ;;  %v6895_v45 = vand.u32 2147483647, %v8687_v25 }
 0xdac   :  { %v6880_v46 = vadd.f32 1.0, %v8689_v14  ;;  %v6883_v40 = vmul.f32 -0.5, %v8689_v14  ;;  %v6886_v17 = vand.u32 2147483647, %v8689_v14 }
 0xdad   :  { %8690 = vlog2.f32 %v6889_v32  ;;  %v6893_v35 = vadd.f32 1.0, %v6892_v60  ;;  %vm6896_vm12 = vcmp.lt.f32.partialorder %v6895_v45, 0.0004427343 }
 0xdae   :  { %8692 = vlog2.f32 %v6880_v46  ;;  %v6884_v7 = vadd.f32 1.0, %v6883_v40  ;;  %vm6887_vm6 = vcmp.lt.f32.partialorder %v6886_v17, 0.0004427343 }
 0xdaf   :  { %v6894_v5 = vmul.f32 %v8687_v25, %v6893_v35 }
 0xdb0   :  { %v6885_v53 = vmul.f32 %v8689_v14, %v6884_v7 }
 0xdb7   :  { %v8691_v1 = vpop.eup %8690 }
 0xdb8   :  { %v8693_v38 = vpop.eup %8692  ;;  %v6891_v2 = vmul.f32 0.6931472, %v8691_v1 }
 0xdb9   :  { %v6882_v44 = vmul.f32 0.6931472, %v8693_v38 }
 0xdba   :  { %v6897_v49 = vsel %vm6896_vm12, %v6894_v5, %v6891_v2 }
 0xdbb   :  { %v6899_v18 = vadd.f32 %v6897_v49, %v6871_v29  ;;  %v6888_v54 = vsel %vm6887_vm6, %v6885_v53, %v6882_v44 }
 0xdbc   :  { %v6898_v0 = vadd.f32 %v6888_v54, %v6870_v51 }
 0xdbd   :  { %v7478_v41 = vadd.f32 -0.6931472, %v6899_v18 }
 0xdbe   :  { %v7477_v24 = vadd.f32 -0.6931472, %v6898_v0 }
 0xdc0   :  { %7889 = vmatprep.mubr.msk.f32.mxu1 %vm16940_vm14, %v7477_v24 }
 0xdc1   :  { %7890 = vmatmul.mubr.msk.f32.vlgmr.msra.gmra.mrb[44].mxu1 %vm16941_vm7, %v7478_v41 }
 0xdc2   :  { %7896 = vmatprep.mubr.msk.f32.mxu1 %vm8736_vm0, %v16442_v37  ;;  %v7088_v37 = vld [vmem:[%s15762_s2 + $0x1a0] sm:$0xff] }
 0xdc3   :  { %v8061_v34 = vpack.c.bf16 %v7089_v39, %v7088_v37 }
 0xdc5   :  { %8062 = vmatpush3.bf16.msra.mxu0 %v8061_v34 }
 0xe94   :  { %v7891_v26 = vpop.f32.mrb[44].mxu1 }
 0xe95   :  { %v6987_v50 = vadd.f32 %v7891_v26, %v7479_v28  ;;  %v6981_v58 = vpop.f32.mrb[45].mxu1 }
 0xe96   :  { %v6982_v15 = vadd.f32 %v7479_v28, %v6981_v58 }
 0xe98   :  { %v8055_v3 = vpack.c.bf16 %v6987_v50, %v6982_v15 }
 0xe9a   :  { %8056 = vmatpush3.bf16.msra.mxu1 %v8055_v3 }
 0xe9d   :  { %7897 = vmatmul.mubr.msk.f32.vlgmr.msra.gmra.mrb[46].mxu1 %vm16942_vm5, %v7482_v23 }
 0xf70   :  { %v7064_v11 = vpop.f32.mrb[46].mxu1 }
 0xf71   :  { %7071 = vperm.xlu0 %8285, %v7064_v11   ;;  %v7898_v36 = vpop.f32.mrb[47].mxu1 }
 0xff0   :  { %v7072_v33 = vpop.permute.xlu0 %7071 }
 0xff1   :  { %v7078_v43 = vmul.f32 %v7484_v47, %v7072_v33 }
 0xff3   :  { %v7084_v20 = vadd.f32 %v7485_v8, %v7078_v43 }
 0xff5   :  { %v7085_v13 = vmax.f32 %v7084_v20, 0.0 }
 0xff7   :  { %7908 = vmatmul.mubr.msk.f32.vlgmr.msra.gmra.mrb[42].mxu0 %vm16943_vm8, %v7085_v13 }
0x10ca   :  { %v7164_v19 = vpop.f32.mrb[42].mxu0 }
0x10cb   :  { %v7165_v57 = vadd.f32 %v7486_v10, %v7164_v19  ;;  %v7909_v6 = vpop.f32.mrb[43].mxu0 }
0x10cd   :  { %7169 = vst.msk [vmem:[#allocation2] sm:$0x3] %vm7168_vm1, %v7165_v57 }
0x10ce   :  { %8712 = shalt.err (!%p8709_p4)
}
0x10cf   :  { %s8713_s9 = scalar_lea.hbm %s15763_s3, 32 }
0x10d0   :  { %p8714_p5 = scmp.ne.s32.totalorder %s15763_s3, %s8713_s9  ;;  %p8717_p6 = scmp.lt.u32.totalorder %s8713_s9, %s15763_s3 }
0x10d2   :  { %p8719_p7 = pnand %p8717_p6, %p8714_p5 }
0x10d4   :  { %8722 = shalt.err (!%p8719_p7)
}
0x10d5   :  { %7179 = dma.vmem_to_hbm [thread:$0]  %s7177_s5, 32, %s15763_s3, [#allocation3]  }
0x10d6   :  { %8723 = dma.done.wait [#allocation3], 32  }
0x10d7   :  { %8724 = vsyncadd [#allocation3], 4294967264 }
0x10d8   :  { %7183 = vsyncpa [#allocation3], 1 }

</bundles_post_ra>
